<compile_context>
chip_gen: v5e
topology: v5e:2x2
jax: 0.10.0
libtpu: 0.0.40
codegen_flags: <defaults>
</compile_context>

<pallas_src>
import functools

import jax
import jax.numpy as jnp
from jax.experimental import pallas as pl
from jax.experimental.pallas import tpu as pltpu


# ----------------------------------------------------------------------------
# Fused kernel: whole DownSamBlock forward for one batch element per grid step
# ----------------------------------------------------------------------------
def _fused_downsam_kernel(s_ref, x_ref, caw1_ref, caw2_ref, saw_ref, *rest,
                          ks, has_down):
    if has_down:
        down_ref = rest[0]
        rest = rest[1:]
    else:
        down_ref = None
    (rw1_ref, rb1_ref, rw2_ref, rb2_ref,
     out_ref, sa_pad_ref, cv_pad_ref) = rest
    f32 = jnp.float32

    # ---- 1. MaxPool2d(ks) on shallow path, MaxPool2d(2) on input path -------
    def pool_hw(ref, k):
        # ref: (H, W//k, k*C) -- the k W-taps of one output column sit in
        # adjacent lane groups (free reshape done in the wrapper).
        h, wo, kc = ref.shape
        c = kc // k
        v = ref[...]
        pw = v[:, :, 0:c]
        for dx in range(1, k):                               # W-direction max
            pw = jnp.maximum(pw, v[:, :, dx * c:(dx + 1) * c])
        # H direction: split the leading dim and reduce (layout-safe).
        return jnp.max(pw.reshape(h // k, k, wo, c), axis=1)  # (Ho, Wo, C)

    ps = pool_hw(s_ref, ks)                                   # shallowDownSam
    px = pool_hw(x_ref, 2)                                    # DownSam
    xcat = jnp.concatenate([ps, px], axis=-1)                 # channel concat
    ho, wo, cin = xcat.shape
    hw = ho * wo

    # ---- 2. ChannelAttention: sigmoid(fc(avg) + fc(max)) * x ----------------
    avg = jnp.mean(jnp.mean(xcat, axis=0), axis=0, keepdims=True)   # (1, Cin)
    mxv = jnp.max(jnp.max(xcat, axis=0), axis=0, keepdims=True)     # (1, Cin)

    def fc(v):
        hid = jnp.dot(v, caw1_ref[...], preferred_element_type=f32)
        hid = jnp.maximum(hid, 0.0)
        return jnp.dot(hid, caw2_ref[...], preferred_element_type=f32)

    att = jax.nn.sigmoid(fc(avg) + fc(mxv))                   # (1, Cin)
    xca = xcat * att.reshape(1, 1, cin)

    # ---- 3. SpatialAttention: sigmoid(conv7x7([mean_c, max_c])) * x ---------
    stats = jnp.concatenate(
        [jnp.mean(xca, axis=-1, keepdims=True),
         jnp.max(xca, axis=-1, keepdims=True)], axis=-1)      # (Ho, Wo, 2)
    sa_pad_ref[...] = jnp.zeros_like(sa_pad_ref)              # zero-pad tile
    sa_pad_ref[3:3 + ho, 3:3 + wo, :] = stats
    sacc = jnp.zeros((ho, wo, 1), f32)
    for ky in range(7):                                       # 49 VPU MAC taps
        for kx in range(7):
            win = sa_pad_ref[ky:ky + ho, kx:kx + wo, :]       # (Ho, Wo, 2)
            wv = saw_ref[ky * 7 + kx:ky * 7 + kx + 1, :]      # (1, 2)
            sacc = sacc + jnp.sum(win * wv, axis=-1, keepdims=True)
    xsa = xca * jax.nn.sigmoid(sacc)                          # (Ho, Wo, Cin)

    # ---- 4. optional 1x1 down conv (bias-free, no activation) ---------------
    a = xsa.reshape(hw, cin)
    if has_down:
        a = jnp.dot(a, down_ref[...], preferred_element_type=f32)
    cout = a.shape[-1]

    # ---- 5. ResBlocks: relu(conv3x3(relu(conv3x3(x)+b1)) + b2 + x) ----------
    def conv3x3(act, get_w):
        cv_pad_ref[...] = jnp.zeros_like(cv_pad_ref)          # zero-pad tile
        cv_pad_ref[1:1 + ho, 1:1 + wo, :] = act.reshape(ho, wo, cout)
        acc = jnp.zeros((hw, cout), f32)
        for ky in range(3):                                   # 9 MXU taps
            for kx in range(3):
                win = cv_pad_ref[ky:ky + ho, kx:kx + wo, :].reshape(hw, cout)
                acc = acc + jnp.dot(win, get_w(ky * 3 + kx),
                                    preferred_element_type=f32)
        return acc

    for l in range(rw1_ref.shape[0]):
        h1 = conv3x3(a, lambda t, l=l: rw1_ref[l, t]) + rb1_ref[l]
        h1 = jnp.maximum(h1, 0.0)
        a = conv3x3(h1, lambda t, l=l: rw2_ref[l, t]) + rb2_ref[l] + a
        a = jnp.maximum(a, 0.0)

    out_ref[...] = a.astype(out_ref.dtype)


# ----------------------------------------------------------------------------
# Wrapper
# ----------------------------------------------------------------------------
def _resident(arr):
    """Full-array block, same block every grid step (stays resident in VMEM)."""
    nd = arr.ndim
    return pl.BlockSpec(arr.shape, lambda i, nd=nd: (0,) * nd)


def downsam_block(params, shallow_fs, inputs, layer_num):
    """DownSamBlock.forward on NHWC inputs -> NHWC output (one pallas_call)."""
    B, Hs, Ws, Cs = shallow_fs.shape
    Bx, Hi, Wi, Ci = inputs.shape
    assert B == Bx
    ks = layer_num                                           # shallowDownSam k
    # PyTorch MaxPool2d floors odd sizes; require exact divisibility here.
    assert Hs % ks == 0 and Ws % ks == 0 and Hi % 2 == 0 and Wi % 2 == 0
    Ho, Wo = Hi // 2, Wi // 2
    assert (Hs // ks, Ws // ks) == (Ho, Wo), "pooled maps must match for concat"
    cin = Cs + Ci
    has_down = 'att_down_w' in params
    cout = params['att_down_w'].shape[1] if has_down else cin

    # Free contiguous reshapes: group the k W-pool taps of every output column
    # onto the lane (channel) axis so the kernel never needs strided loads.
    s_r = shallow_fs.reshape(B, Hs, Ws // ks, ks * Cs)
    x_r = inputs.reshape(B, Hi, Wi // 2, 2 * Ci)

    args = [s_r, x_r, params['ca_w1'], params['ca_w2'], params['sa_w']]
    in_specs = [
        pl.BlockSpec((None, Hs, Ws // ks, ks * Cs), lambda i: (i, 0, 0, 0)),
        pl.BlockSpec((None, Hi, Wi // 2, 2 * Ci), lambda i: (i, 0, 0, 0)),
        _resident(params['ca_w1']),
        _resident(params['ca_w2']),
        _resident(params['sa_w']),
    ]
    if has_down:
        args.append(params['att_down_w'])
        in_specs.append(_resident(params['att_down_w']))
    for name in ('res_w1', 'res_b1', 'res_w2', 'res_b2'):
        args.append(params[name])
        in_specs.append(_resident(params[name]))

    out = pl.pallas_call(
        functools.partial(_fused_downsam_kernel, ks=ks, has_down=has_down),
        out_shape=jax.ShapeDtypeStruct((B, Ho * Wo, cout), shallow_fs.dtype),
        grid=(B,),
        in_specs=in_specs,
        out_specs=pl.BlockSpec((None, Ho * Wo, cout), lambda i: (i, 0, 0)),
        scratch_shapes=[
            pltpu.VMEM((Ho + 6, Wo + 6, 2), jnp.float32),      # 7x7 SA pad tile
            pltpu.VMEM((Ho + 2, Wo + 2, cout), jnp.float32),   # 3x3 conv pad tile
        ],
        compiler_params=pltpu.CompilerParams(
            dimension_semantics=("parallel",)),                # 2 TCs on v7x
    )(*args)
    return out.reshape(B, Ho, Wo, cout)


# ----------------------------------------------------------------------------
# Deterministic synthetic parameters (no checkpoint loading)
# ----------------------------------------------------------------------------
def _nrm(key, shape, scale=0.1):
    return jax.random.normal(key, shape, jnp.float32) * scale


def init_params(key, in_size, out_size, layer_num, ratio=16):
    cr = max(in_size // ratio, 1)
    keys = jax.random.split(key, 4 + 4 * layer_num)
    params = {
        'ca_w1': _nrm(keys[0], (in_size, cr)),     # CA fc1 (1x1 conv, no bias)
        'ca_w2': _nrm(keys[1], (cr, in_size)),     # CA fc2 (1x1 conv, no bias)
        'sa_w': _nrm(keys[2], (49, 2)),            # SA 7x7 conv, [ky*7+kx, c]
    }
    if in_size != out_size:
        params['att_down_w'] = _nrm(keys[3], (in_size, out_size))
    w1, b1, w2, b2 = [], [], [], []
    for i in range(layer_num):
        k0, k1, k2, k3 = keys[4 + 4 * i: 8 + 4 * i]
        w1.append(_nrm(k0, (9, out_size, out_size)))   # [ky*3+kx, Cin, Cout]
        b1.append(_nrm(k1, (1, out_size)))
        w2.append(_nrm(k2, (9, out_size, out_size)))
        b2.append(_nrm(k3, (1, out_size)))
    params['res_w1'] = jnp.stack(w1)
    params['res_b1'] = jnp.stack(b1)
    params['res_w2'] = jnp.stack(w2)
    params['res_b2'] = jnp.stack(b2)
    return params


# ----------------------------------------------------------------------------
if __name__ == "__main__":
    # Module config: DownSamBlock(in_size=32, out_size=16, layer_num=2)
    in_size, out_size, layer_num = 32, 16, 2
    B, H, W = 2, 16, 16
    c_shallow, c_in = 16, 16                     # c_shallow + c_in == in_size

    key = jax.random.PRNGKey(0)
    k_s, k_x, k_p = jax.random.split(key, 3)
    # PyTorch-convention NCHW inputs
    shallow_fs_nchw = jax.random.normal(k_s, (B, c_shallow, H, W), jnp.float32)
    inputs_nchw = jax.random.normal(k_x, (B, c_in, H, W), jnp.float32)

    # NCHW -> NHWC (kernel layout)
    shallow_fs = jnp.transpose(shallow_fs_nchw, (0, 2, 3, 1))
    inputs = jnp.transpose(inputs_nchw, (0, 2, 3, 1))

    params = init_params(k_p, in_size, out_size, layer_num)

    out_nhwc = downsam_block(params, shallow_fs, inputs, layer_num)
    out_nchw = jnp.transpose(out_nhwc, (0, 3, 1, 2))          # back to NCHW
    jax.block_until_ready(out_nchw)

    assert out_nchw.shape == (B, out_size, H // 2, W // 2)
    assert bool(jnp.all(jnp.isfinite(out_nchw)))
    print("KERNEL_OK")
</pallas_src>

<mosaic_0001>
module attributes {stable_mosaic.version = 11 : i64} {
  func.func @_fused_downsam_kernel(%arg0: i32, %arg1: memref<1x16x8x32xf32, #tpu.memory_space<vmem>>, %arg2: memref<1x16x8x32xf32, #tpu.memory_space<vmem>>, %arg3: memref<32x2xf32, #tpu.memory_space<vmem>>, %arg4: memref<2x32xf32, #tpu.memory_space<vmem>>, %arg5: memref<49x2xf32, #tpu.memory_space<vmem>>, %arg6: memref<32x16xf32, #tpu.memory_space<vmem>>, %arg7: memref<2x9x16x16xf32, #tpu.memory_space<vmem>>, %arg8: memref<2x1x16xf32, #tpu.memory_space<vmem>>, %arg9: memref<2x9x16x16xf32, #tpu.memory_space<vmem>>, %arg10: memref<2x1x16xf32, #tpu.memory_space<vmem>>, %arg11: memref<1x64x16xf32, #tpu.memory_space<vmem>>, %arg12: memref<14x14x2xf32, #tpu.memory_space<vmem>>, %arg13: memref<10x10x16xf32, #tpu.memory_space<vmem>>) attributes {dimension_semantics = [#tpu.dimension_semantics<parallel>], iteration_bounds = array<i64: 2>, scalar_prefetch = 0 : i64, scratch_operands = 2 : i64, tpu.core_type = #tpu.core_type<tc>, window_params = [{transform_indices = @transform_0, window_bounds = array<i64: 1, 16, 8, 32>}, {transform_indices = @transform_1, window_bounds = array<i64: 1, 16, 8, 32>}, {pipeline_mode = #tpu.pipeline_mode<synchronous>, transform_indices = @transform_2, window_bounds = array<i64: 32, 2>}, {pipeline_mode = #tpu.pipeline_mode<synchronous>, transform_indices = @transform_3, window_bounds = array<i64: 2, 32>}, {pipeline_mode = #tpu.pipeline_mode<synchronous>, transform_indices = @transform_4, window_bounds = array<i64: 49, 2>}, {pipeline_mode = #tpu.pipeline_mode<synchronous>, transform_indices = @transform_5, window_bounds = array<i64: 32, 16>}, {pipeline_mode = #tpu.pipeline_mode<synchronous>, transform_indices = @transform_6, window_bounds = array<i64: 2, 9, 16, 16>}, {pipeline_mode = #tpu.pipeline_mode<synchronous>, transform_indices = @transform_7, window_bounds = array<i64: 2, 1, 16>}, {pipeline_mode = #tpu.pipeline_mode<synchronous>, transform_indices = @transform_8, window_bounds = array<i64: 2, 9, 16, 16>}, {pipeline_mode = #tpu.pipeline_mode<synchronous>, transform_indices = @transform_9, window_bounds = array<i64: 2, 1, 16>}, {transform_indices = @transform_10, window_bounds = array<i64: 1, 64, 16>}]} {
    %c0 = arith.constant 0 : index
    %c0_0 = arith.constant 0 : index
    %c0_1 = arith.constant 0 : index
    %c0_2 = arith.constant 0 : index
    %0 = vector.load %arg1[%c0, %c0_0, %c0_1, %c0_2] : memref<1x16x8x32xf32, #tpu.memory_space<vmem>>, vector<1x16x8x32xf32>
    %1 = vector.shape_cast %0 : vector<1x16x8x32xf32> to vector<16x8x32xf32>
    %2 = vector.extract_strided_slice %1 {offsets = [0, 0, 0], sizes = [16, 8, 16], strides = [1, 1, 1]} : vector<16x8x32xf32> to vector<16x8x16xf32>
    %3 = vector.extract_strided_slice %1 {offsets = [0, 0, 16], sizes = [16, 8, 16], strides = [1, 1, 1]} : vector<16x8x32xf32> to vector<16x8x16xf32>
    %4 = arith.maximumf %2, %3 : vector<16x8x16xf32>
    %5 = vector.shape_cast %4 : vector<16x8x16xf32> to vector<8x2x8x16xf32>
    %cst = arith.constant dense<0xFF800000> : vector<8x8x16xf32>
    %6 = vector.multi_reduction <maximumf>, %5, %cst [1] : vector<8x2x8x16xf32> to vector<8x8x16xf32>
    %c0_3 = arith.constant 0 : index
    %c0_4 = arith.constant 0 : index
    %c0_5 = arith.constant 0 : index
    %c0_6 = arith.constant 0 : index
    %7 = vector.load %arg2[%c0_3, %c0_4, %c0_5, %c0_6] : memref<1x16x8x32xf32, #tpu.memory_space<vmem>>, vector<1x16x8x32xf32>
    %8 = vector.shape_cast %7 : vector<1x16x8x32xf32> to vector<16x8x32xf32>
    %9 = vector.extract_strided_slice %8 {offsets = [0, 0, 0], sizes = [16, 8, 16], strides = [1, 1, 1]} : vector<16x8x32xf32> to vector<16x8x16xf32>
    %10 = vector.extract_strided_slice %8 {offsets = [0, 0, 16], sizes = [16, 8, 16], strides = [1, 1, 1]} : vector<16x8x32xf32> to vector<16x8x16xf32>
    %11 = arith.maximumf %9, %10 : vector<16x8x16xf32>
    %12 = vector.shape_cast %11 : vector<16x8x16xf32> to vector<8x2x8x16xf32>
    %cst_7 = arith.constant dense<0xFF800000> : vector<8x8x16xf32>
    %13 = vector.multi_reduction <maximumf>, %12, %cst_7 [1] : vector<8x2x8x16xf32> to vector<8x8x16xf32>
    %14 = tpu.concatenate %6, %13 in 2 : vector<8x8x16xf32>, vector<8x8x16xf32> -> vector<8x8x32xf32>
    %cst_8 = arith.constant dense<0.000000e+00> : vector<8x32xf32>
    %15 = vector.multi_reduction <add>, %14, %cst_8 [0] : vector<8x8x32xf32> to vector<8x32xf32>
    %cst_9 = arith.constant 8.000000e+00 : f32
    %16 = vector.broadcast %cst_9 : f32 to vector<8x32xf32>
    %17 = arith.divf %15, %16 : vector<8x32xf32>
    %cst_10 = arith.constant dense<0.000000e+00> : vector<32xf32>
    %18 = vector.multi_reduction <add>, %17, %cst_10 [0] : vector<8x32xf32> to vector<32xf32>
    %19 = vector.shape_cast %18 : vector<32xf32> to vector<1x32xf32>
    %cst_11 = arith.constant 8.000000e+00 : f32
    %20 = vector.broadcast %cst_11 : f32 to vector<1x32xf32>
    %21 = arith.divf %19, %20 : vector<1x32xf32>
    %cst_12 = arith.constant dense<0xFF800000> : vector<8x32xf32>
    %22 = vector.multi_reduction <maximumf>, %14, %cst_12 [0] : vector<8x8x32xf32> to vector<8x32xf32>
    %cst_13 = arith.constant dense<0xFF800000> : vector<32xf32>
    %23 = vector.multi_reduction <maximumf>, %22, %cst_13 [0] : vector<8x32xf32> to vector<32xf32>
    %24 = vector.shape_cast %23 : vector<32xf32> to vector<1x32xf32>
    %c0_14 = arith.constant 0 : index
    %c0_15 = arith.constant 0 : index
    %25 = vector.load %arg3[%c0_14, %c0_15] : memref<32x2xf32, #tpu.memory_space<vmem>>, vector<32x2xf32>
    %cst_16 = arith.constant dense<0.000000e+00> : vector<1x2xf32>
    %26 = tpu.matmul %21, %25, %cst_16 {dimension_numbers = #tpu.dot_dimension_numbers<[1], [0], [0], [1], [0, 0, 1, 1], [], []>} : vector<1x32xf32>, vector<32x2xf32>, vector<1x2xf32> -> vector<1x2xf32>
    %cst_17 = arith.constant 0.000000e+00 : f32
    %27 = vector.broadcast %cst_17 : f32 to vector<1x2xf32>
    %28 = arith.maximumf %26, %27 : vector<1x2xf32>
    %c0_18 = arith.constant 0 : index
    %c0_19 = arith.constant 0 : index
    %29 = vector.load %arg4[%c0_18, %c0_19] : memref<2x32xf32, #tpu.memory_space<vmem>>, vector<2x32xf32>
    %cst_20 = arith.constant dense<0.000000e+00> : vector<1x32xf32>
    %30 = tpu.matmul %28, %29, %cst_20 {dimension_numbers = #tpu.dot_dimension_numbers<[1], [0], [0], [1], [0, 0, 1, 1], [], []>} : vector<1x2xf32>, vector<2x32xf32>, vector<1x32xf32> -> vector<1x32xf32>
    %c0_21 = arith.constant 0 : index
    %c0_22 = arith.constant 0 : index
    %31 = vector.load %arg3[%c0_21, %c0_22] : memref<32x2xf32, #tpu.memory_space<vmem>>, vector<32x2xf32>
    %cst_23 = arith.constant dense<0.000000e+00> : vector<1x2xf32>
    %32 = tpu.matmul %24, %31, %cst_23 {dimension_numbers = #tpu.dot_dimension_numbers<[1], [0], [0], [1], [0, 0, 1, 1], [], []>} : vector<1x32xf32>, vector<32x2xf32>, vector<1x2xf32> -> vector<1x2xf32>
    %cst_24 = arith.constant 0.000000e+00 : f32
    %33 = vector.broadcast %cst_24 : f32 to vector<1x2xf32>
    %34 = arith.maximumf %32, %33 : vector<1x2xf32>
    %c0_25 = arith.constant 0 : index
    %c0_26 = arith.constant 0 : index
    %35 = vector.load %arg4[%c0_25, %c0_26] : memref<2x32xf32, #tpu.memory_space<vmem>>, vector<2x32xf32>
    %cst_27 = arith.constant dense<0.000000e+00> : vector<1x32xf32>
    %36 = tpu.matmul %34, %35, %cst_27 {dimension_numbers = #tpu.dot_dimension_numbers<[1], [0], [0], [1], [0, 0, 1, 1], [], []>} : vector<1x2xf32>, vector<2x32xf32>, vector<1x32xf32> -> vector<1x32xf32>
    %37 = arith.addf %30, %36 : vector<1x32xf32>
    %38 = arith.negf %37 : vector<1x32xf32>
    %39 = math.exp %38 : vector<1x32xf32>
    %cst_28 = arith.constant 1.000000e+00 : f32
    %40 = vector.broadcast %cst_28 : f32 to vector<1x32xf32>
    %41 = arith.addf %40, %39 : vector<1x32xf32>
    %42 = arith.divf %40, %41 : vector<1x32xf32>
    %43 = vector.shape_cast %42 : vector<1x32xf32> to vector<1x1x32xf32>
    %44 = vector.broadcast %43 : vector<1x1x32xf32> to vector<8x8x32xf32>
    %45 = arith.mulf %14, %44 : vector<8x8x32xf32>
    %cst_29 = arith.constant dense<0.000000e+00> : vector<8x8xf32>
    %46 = vector.multi_reduction <add>, %45, %cst_29 [2] : vector<8x8x32xf32> to vector<8x8xf32>
    %47 = vector.shape_cast %46 : vector<8x8xf32> to vector<8x8x1xf32>
    %cst_30 = arith.constant 3.200000e+01 : f32
    %48 = vector.broadcast %cst_30 : f32 to vector<8x8x1xf32>
    %49 = arith.divf %47, %48 : vector<8x8x1xf32>
    %cst_31 = arith.constant dense<0xFF800000> : vector<8x8xf32>
    %50 = vector.multi_reduction <maximumf>, %45, %cst_31 [2] : vector<8x8x32xf32> to vector<8x8xf32>
    %51 = vector.shape_cast %50 : vector<8x8xf32> to vector<8x8x1xf32>
    %52 = tpu.concatenate %49, %51 in 2 : vector<8x8x1xf32>, vector<8x8x1xf32> -> vector<8x8x2xf32>
    %cst_32 = arith.constant 0.000000e+00 : f32
    %53 = vector.broadcast %cst_32 : f32 to vector<14x14x2xf32>
    %c0_33 = arith.constant 0 : index
    %c0_34 = arith.constant 0 : index
    %c0_35 = arith.constant 0 : index
    %54 = vector.load %arg12[%c0_33, %c0_34, %c0_35] : memref<14x14x2xf32, #tpu.memory_space<vmem>>, vector<14x14x2xf32>
    tpu.vector_store %arg12[%c0_33, %c0_34, %c0_35], %53 {strides = array<i32>} : memref<14x14x2xf32, #tpu.memory_space<vmem>>, vector<14x14x2xf32>,
    %c3 = arith.constant 3 : index
    %c3_36 = arith.constant 3 : index
    %c0_37 = arith.constant 0 : index
    %55 = vector.load %arg12[%c3, %c3_36, %c0_37] : memref<14x14x2xf32, #tpu.memory_space<vmem>>, vector<8x8x2xf32>
    tpu.vector_store %arg12[%c3, %c3_36, %c0_37], %52 {strides = array<i32>} : memref<14x14x2xf32, #tpu.memory_space<vmem>>, vector<8x8x2xf32>,
    %cst_38 = arith.constant 0.000000e+00 : f32
    %56 = vector.broadcast %cst_38 : f32 to vector<8x8x1xf32>
    %c0_39 = arith.constant 0 : index
    %c0_40 = arith.constant 0 : index
    %c0_41 = arith.constant 0 : index
    %57 = vector.load %arg12[%c0_39, %c0_40, %c0_41] : memref<14x14x2xf32, #tpu.memory_space<vmem>>, vector<8x8x2xf32>
    %c0_42 = arith.constant 0 : index
    %c0_43 = arith.constant 0 : index
    %58 = vector.load %arg5[%c0_42, %c0_43] : memref<49x2xf32, #tpu.memory_space<vmem>>, vector<1x2xf32>
    %59 = vector.shape_cast %58 : vector<1x2xf32> to vector<1x1x2xf32>
    %60 = vector.broadcast %59 : vector<1x1x2xf32> to vector<8x8x2xf32>
    %61 = arith.mulf %57, %60 : vector<8x8x2xf32>
    %cst_44 = arith.constant dense<0.000000e+00> : vector<8x8xf32>
    %62 = vector.multi_reduction <add>, %61, %cst_44 [2] : vector<8x8x2xf32> to vector<8x8xf32>
    %63 = vector.shape_cast %62 : vector<8x8xf32> to vector<8x8x1xf32>
    %64 = arith.addf %56, %63 : vector<8x8x1xf32>
    %c0_45 = arith.constant 0 : index
    %c1 = arith.constant 1 : index
    %c0_46 = arith.constant 0 : index
    %65 = vector.load %arg12[%c0_45, %c1, %c0_46] : memref<14x14x2xf32, #tpu.memory_space<vmem>>, vector<8x8x2xf32>
    %c1_47 = arith.constant 1 : index
    %c0_48 = arith.constant 0 : index
    %66 = vector.load %arg5[%c1_47, %c0_48] : memref<49x2xf32, #tpu.memory_space<vmem>>, vector<1x2xf32>
    %67 = vector.shape_cast %66 : vector<1x2xf32> to vector<1x1x2xf32>
    %68 = vector.broadcast %67 : vector<1x1x2xf32> to vector<8x8x2xf32>
    %69 = arith.mulf %65, %68 : vector<8x8x2xf32>
    %cst_49 = arith.constant dense<0.000000e+00> : vector<8x8xf32>
    %70 = vector.multi_reduction <add>, %69, %cst_49 [2] : vector<8x8x2xf32> to vector<8x8xf32>
    %71 = vector.shape_cast %70 : vector<8x8xf32> to vector<8x8x1xf32>
    %72 = arith.addf %64, %71 : vector<8x8x1xf32>
    %c0_50 = arith.constant 0 : index
    %c2 = arith.constant 2 : index
    %c0_51 = arith.constant 0 : index
    %73 = vector.load %arg12[%c0_50, %c2, %c0_51] : memref<14x14x2xf32, #tpu.memory_space<vmem>>, vector<8x8x2xf32>
    %c2_52 = arith.constant 2 : index
    %c0_53 = arith.constant 0 : index
    %74 = vector.load %arg5[%c2_52, %c0_53] : memref<49x2xf32, #tpu.memory_space<vmem>>, vector<1x2xf32>
    %75 = vector.shape_cast %74 : vector<1x2xf32> to vector<1x1x2xf32>
    %76 = vector.broadcast %75 : vector<1x1x2xf32> to vector<8x8x2xf32>
    %77 = arith.mulf %73, %76 : vector<8x8x2xf32>
    %cst_54 = arith.constant dense<0.000000e+00> : vector<8x8xf32>
    %78 = vector.multi_reduction <add>, %77, %cst_54 [2] : vector<8x8x2xf32> to vector<8x8xf32>
    %79 = vector.shape_cast %78 : vector<8x8xf32> to vector<8x8x1xf32>
    %80 = arith.addf %72, %79 : vector<8x8x1xf32>
    %c0_55 = arith.constant 0 : index
    %c3_56 = arith.constant 3 : index
    %c0_57 = arith.constant 0 : index
    %81 = vector.load %arg12[%c0_55, %c3_56, %c0_57] : memref<14x14x2xf32, #tpu.memory_space<vmem>>, vector<8x8x2xf32>
    %c3_58 = arith.constant 3 : index
    %c0_59 = arith.constant 0 : index
    %82 = vector.load %arg5[%c3_58, %c0_59] : memref<49x2xf32, #tpu.memory_space<vmem>>, vector<1x2xf32>
    %83 = vector.shape_cast %82 : vector<1x2xf32> to vector<1x1x2xf32>
    %84 = vector.broadcast %83 : vector<1x1x2xf32> to vector<8x8x2xf32>
    %85 = arith.mulf %81, %84 : vector<8x8x2xf32>
    %cst_60 = arith.constant dense<0.000000e+00> : vector<8x8xf32>
    %86 = vector.multi_reduction <add>, %85, %cst_60 [2] : vector<8x8x2xf32> to vector<8x8xf32>
    %87 = vector.shape_cast %86 : vector<8x8xf32> to vector<8x8x1xf32>
    %88 = arith.addf %80, %87 : vector<8x8x1xf32>
    %c0_61 = arith.constant 0 : index
    %c4 = arith.constant 4 : index
    %c0_62 = arith.constant 0 : index
    %89 = vector.load %arg12[%c0_61, %c4, %c0_62] : memref<14x14x2xf32, #tpu.memory_space<vmem>>, vector<8x8x2xf32>
    %c4_63 = arith.constant 4 : index
    %c0_64 = arith.constant 0 : index
    %90 = vector.load %arg5[%c4_63, %c0_64] : memref<49x2xf32, #tpu.memory_space<vmem>>, vector<1x2xf32>
    %91 = vector.shape_cast %90 : vector<1x2xf32> to vector<1x1x2xf32>
    %92 = vector.broadcast %91 : vector<1x1x2xf32> to vector<8x8x2xf32>
    %93 = arith.mulf %89, %92 : vector<8x8x2xf32>
    %cst_65 = arith.constant dense<0.000000e+00> : vector<8x8xf32>
    %94 = vector.multi_reduction <add>, %93, %cst_65 [2] : vector<8x8x2xf32> to vector<8x8xf32>
    %95 = vector.shape_cast %94 : vector<8x8xf32> to vector<8x8x1xf32>
    %96 = arith.addf %88, %95 : vector<8x8x1xf32>
    %c0_66 = arith.constant 0 : index
    %c5 = arith.constant 5 : index
    %c0_67 = arith.constant 0 : index
    %97 = vector.load %arg12[%c0_66, %c5, %c0_67] : memref<14x14x2xf32, #tpu.memory_space<vmem>>, vector<8x8x2xf32>
    %c5_68 = arith.constant 5 : index
    %c0_69 = arith.constant 0 : index
    %98 = vector.load %arg5[%c5_68, %c0_69] : memref<49x2xf32, #tpu.memory_space<vmem>>, vector<1x2xf32>
    %99 = vector.shape_cast %98 : vector<1x2xf32> to vector<1x1x2xf32>
    %100 = vector.broadcast %99 : vector<1x1x2xf32> to vector<8x8x2xf32>
    %101 = arith.mulf %97, %100 : vector<8x8x2xf32>
    %cst_70 = arith.constant dense<0.000000e+00> : vector<8x8xf32>
    %102 = vector.multi_reduction <add>, %101, %cst_70 [2] : vector<8x8x2xf32> to vector<8x8xf32>
    %103 = vector.shape_cast %102 : vector<8x8xf32> to vector<8x8x1xf32>
    %104 = arith.addf %96, %103 : vector<8x8x1xf32>
    %c0_71 = arith.constant 0 : index
    %c6 = arith.constant 6 : index
    %c0_72 = arith.constant 0 : index
    %105 = vector.load %arg12[%c0_71, %c6, %c0_72] : memref<14x14x2xf32, #tpu.memory_space<vmem>>, vector<8x8x2xf32>
    %c6_73 = arith.constant 6 : index
    %c0_74 = arith.constant 0 : index
    %106 = vector.load %arg5[%c6_73, %c0_74] : memref<49x2xf32, #tpu.memory_space<vmem>>, vector<1x2xf32>
    %107 = vector.shape_cast %106 : vector<1x2xf32> to vector<1x1x2xf32>
    %108 = vector.broadcast %107 : vector<1x1x2xf32> to vector<8x8x2xf32>
    %109 = arith.mulf %105, %108 : vector<8x8x2xf32>
    %cst_75 = arith.constant dense<0.000000e+00> : vector<8x8xf32>
    %110 = vector.multi_reduction <add>, %109, %cst_75 [2] : vector<8x8x2xf32> to vector<8x8xf32>
    %111 = vector.shape_cast %110 : vector<8x8xf32> to vector<8x8x1xf32>
    %112 = arith.addf %104, %111 : vector<8x8x1xf32>
    %c1_76 = arith.constant 1 : index
    %c0_77 = arith.constant 0 : index
    %c0_78 = arith.constant 0 : index
    %113 = vector.load %arg12[%c1_76, %c0_77, %c0_78] : memref<14x14x2xf32, #tpu.memory_space<vmem>>, vector<8x8x2xf32>
    %c7 = arith.constant 7 : index
    %c0_79 = arith.constant 0 : index
    %114 = vector.load %arg5[%c7, %c0_79] : memref<49x2xf32, #tpu.memory_space<vmem>>, vector<1x2xf32>
    %115 = vector.shape_cast %114 : vector<1x2xf32> to vector<1x1x2xf32>
    %116 = vector.broadcast %115 : vector<1x1x2xf32> to vector<8x8x2xf32>
    %117 = arith.mulf %113, %116 : vector<8x8x2xf32>
    %cst_80 = arith.constant dense<0.000000e+00> : vector<8x8xf32>
    %118 = vector.multi_reduction <add>, %117, %cst_80 [2] : vector<8x8x2xf32> to vector<8x8xf32>
    %119 = vector.shape_cast %118 : vector<8x8xf32> to vector<8x8x1xf32>
    %120 = arith.addf %112, %119 : vector<8x8x1xf32>
    %c1_81 = arith.constant 1 : index
    %c1_82 = arith.constant 1 : index
    %c0_83 = arith.constant 0 : index
    %121 = vector.load %arg12[%c1_81, %c1_82, %c0_83] : memref<14x14x2xf32, #tpu.memory_space<vmem>>, vector<8x8x2xf32>
    %c8 = arith.constant 8 : index
    %c0_84 = arith.constant 0 : index
    %122 = vector.load %arg5[%c8, %c0_84] : memref<49x2xf32, #tpu.memory_space<vmem>>, vector<1x2xf32>
    %123 = vector.shape_cast %122 : vector<1x2xf32> to vector<1x1x2xf32>
    %124 = vector.broadcast %123 : vector<1x1x2xf32> to vector<8x8x2xf32>
    %125 = arith.mulf %121, %124 : vector<8x8x2xf32>
    %cst_85 = arith.constant dense<0.000000e+00> : vector<8x8xf32>
    %126 = vector.multi_reduction <add>, %125, %cst_85 [2] : vector<8x8x2xf32> to vector<8x8xf32>
    %127 = vector.shape_cast %126 : vector<8x8xf32> to vector<8x8x1xf32>
    %128 = arith.addf %120, %127 : vector<8x8x1xf32>
    %c1_86 = arith.constant 1 : index
    %c2_87 = arith.constant 2 : index
    %c0_88 = arith.constant 0 : index
    %129 = vector.load %arg12[%c1_86, %c2_87, %c0_88] : memref<14x14x2xf32, #tpu.memory_space<vmem>>, vector<8x8x2xf32>
    %c9 = arith.constant 9 : index
    %c0_89 = arith.constant 0 : index
    %130 = vector.load %arg5[%c9, %c0_89] : memref<49x2xf32, #tpu.memory_space<vmem>>, vector<1x2xf32>
    %131 = vector.shape_cast %130 : vector<1x2xf32> to vector<1x1x2xf32>
    %132 = vector.broadcast %131 : vector<1x1x2xf32> to vector<8x8x2xf32>
    %133 = arith.mulf %129, %132 : vector<8x8x2xf32>
    %cst_90 = arith.constant dense<0.000000e+00> : vector<8x8xf32>
    %134 = vector.multi_reduction <add>, %133, %cst_90 [2] : vector<8x8x2xf32> to vector<8x8xf32>
    %135 = vector.shape_cast %134 : vector<8x8xf32> to vector<8x8x1xf32>
    %136 = arith.addf %128, %135 : vector<8x8x1xf32>
    %c1_91 = arith.constant 1 : index
    %c3_92 = arith.constant 3 : index
    %c0_93 = arith.constant 0 : index
    %137 = vector.load %arg12[%c1_91, %c3_92, %c0_93] : memref<14x14x2xf32, #tpu.memory_space<vmem>>, vector<8x8x2xf32>
    %c10 = arith.constant 10 : index
    %c0_94 = arith.constant 0 : index
    %138 = vector.load %arg5[%c10, %c0_94] : memref<49x2xf32, #tpu.memory_space<vmem>>, vector<1x2xf32>
    %139 = vector.shape_cast %138 : vector<1x2xf32> to vector<1x1x2xf32>
    %140 = vector.broadcast %139 : vector<1x1x2xf32> to vector<8x8x2xf32>
    %141 = arith.mulf %137, %140 : vector<8x8x2xf32>
    %cst_95 = arith.constant dense<0.000000e+00> : vector<8x8xf32>
    %142 = vector.multi_reduction <add>, %141, %cst_95 [2] : vector<8x8x2xf32> to vector<8x8xf32>
    %143 = vector.shape_cast %142 : vector<8x8xf32> to vector<8x8x1xf32>
    %144 = arith.addf %136, %143 : vector<8x8x1xf32>
    %c1_96 = arith.constant 1 : index
    %c4_97 = arith.constant 4 : index
    %c0_98 = arith.constant 0 : index
    %145 = vector.load %arg12[%c1_96, %c4_97, %c0_98] : memref<14x14x2xf32, #tpu.memory_space<vmem>>, vector<8x8x2xf32>
    %c11 = arith.constant 11 : index
    %c0_99 = arith.constant 0 : index
    %146 = vector.load %arg5[%c11, %c0_99] : memref<49x2xf32, #tpu.memory_space<vmem>>, vector<1x2xf32>
    %147 = vector.shape_cast %146 : vector<1x2xf32> to vector<1x1x2xf32>
    %148 = vector.broadcast %147 : vector<1x1x2xf32> to vector<8x8x2xf32>
    %149 = arith.mulf %145, %148 : vector<8x8x2xf32>
    %cst_100 = arith.constant dense<0.000000e+00> : vector<8x8xf32>
    %150 = vector.multi_reduction <add>, %149, %cst_100 [2] : vector<8x8x2xf32> to vector<8x8xf32>
    %151 = vector.shape_cast %150 : vector<8x8xf32> to vector<8x8x1xf32>
    %152 = arith.addf %144, %151 : vector<8x8x1xf32>
    %c1_101 = arith.constant 1 : index
    %c5_102 = arith.constant 5 : index
    %c0_103 = arith.constant 0 : index
    %153 = vector.load %arg12[%c1_101, %c5_102, %c0_103] : memref<14x14x2xf32, #tpu.memory_space<vmem>>, vector<8x8x2xf32>
    %c12 = arith.constant 12 : index
    %c0_104 = arith.constant 0 : index
    %154 = vector.load %arg5[%c12, %c0_104] : memref<49x2xf32, #tpu.memory_space<vmem>>, vector<1x2xf32>
    %155 = vector.shape_cast %154 : vector<1x2xf32> to vector<1x1x2xf32>
    %156 = vector.broadcast %155 : vector<1x1x2xf32> to vector<8x8x2xf32>
    %157 = arith.mulf %153, %156 : vector<8x8x2xf32>
    %cst_105 = arith.constant dense<0.000000e+00> : vector<8x8xf32>
    %158 = vector.multi_reduction <add>, %157, %cst_105 [2] : vector<8x8x2xf32> to vector<8x8xf32>
    %159 = vector.shape_cast %158 : vector<8x8xf32> to vector<8x8x1xf32>
    %160 = arith.addf %152, %159 : vector<8x8x1xf32>
    %c1_106 = arith.constant 1 : index
    %c6_107 = arith.constant 6 : index
    %c0_108 = arith.constant 0 : index
    %161 = vector.load %arg12[%c1_106, %c6_107, %c0_108] : memref<14x14x2xf32, #tpu.memory_space<vmem>>, vector<8x8x2xf32>
    %c13 = arith.constant 13 : index
    %c0_109 = arith.constant 0 : index
    %162 = vector.load %arg5[%c13, %c0_109] : memref<49x2xf32, #tpu.memory_space<vmem>>, vector<1x2xf32>
    %163 = vector.shape_cast %162 : vector<1x2xf32> to vector<1x1x2xf32>
    %164 = vector.broadcast %163 : vector<1x1x2xf32> to vector<8x8x2xf32>
    %165 = arith.mulf %161, %164 : vector<8x8x2xf32>
    %cst_110 = arith.constant dense<0.000000e+00> : vector<8x8xf32>
    %166 = vector.multi_reduction <add>, %165, %cst_110 [2] : vector<8x8x2xf32> to vector<8x8xf32>
    %167 = vector.shape_cast %166 : vector<8x8xf32> to vector<8x8x1xf32>
    %168 = arith.addf %160, %167 : vector<8x8x1xf32>
    %c2_111 = arith.constant 2 : index
    %c0_112 = arith.constant 0 : index
    %c0_113 = arith.constant 0 : index
    %169 = vector.load %arg12[%c2_111, %c0_112, %c0_113] : memref<14x14x2xf32, #tpu.memory_space<vmem>>, vector<8x8x2xf32>
    %c14 = arith.constant 14 : index
    %c0_114 = arith.constant 0 : index
    %170 = vector.load %arg5[%c14, %c0_114] : memref<49x2xf32, #tpu.memory_space<vmem>>, vector<1x2xf32>
    %171 = vector.shape_cast %170 : vector<1x2xf32> to vector<1x1x2xf32>
    %172 = vector.broadcast %171 : vector<1x1x2xf32> to vector<8x8x2xf32>
    %173 = arith.mulf %169, %172 : vector<8x8x2xf32>
    %cst_115 = arith.constant dense<0.000000e+00> : vector<8x8xf32>
    %174 = vector.multi_reduction <add>, %173, %cst_115 [2] : vector<8x8x2xf32> to vector<8x8xf32>
    %175 = vector.shape_cast %174 : vector<8x8xf32> to vector<8x8x1xf32>
    %176 = arith.addf %168, %175 : vector<8x8x1xf32>
    %c2_116 = arith.constant 2 : index
    %c1_117 = arith.constant 1 : index
    %c0_118 = arith.constant 0 : index
    %177 = vector.load %arg12[%c2_116, %c1_117, %c0_118] : memref<14x14x2xf32, #tpu.memory_space<vmem>>, vector<8x8x2xf32>
    %c15 = arith.constant 15 : index
    %c0_119 = arith.constant 0 : index
    %178 = vector.load %arg5[%c15, %c0_119] : memref<49x2xf32, #tpu.memory_space<vmem>>, vector<1x2xf32>
    %179 = vector.shape_cast %178 : vector<1x2xf32> to vector<1x1x2xf32>
    %180 = vector.broadcast %179 : vector<1x1x2xf32> to vector<8x8x2xf32>
    %181 = arith.mulf %177, %180 : vector<8x8x2xf32>
    %cst_120 = arith.constant dense<0.000000e+00> : vector<8x8xf32>
    %182 = vector.multi_reduction <add>, %181, %cst_120 [2] : vector<8x8x2xf32> to vector<8x8xf32>
    %183 = vector.shape_cast %182 : vector<8x8xf32> to vector<8x8x1xf32>
    %184 = arith.addf %176, %183 : vector<8x8x1xf32>
    %c2_121 = arith.constant 2 : index
    %c2_122 = arith.constant 2 : index
    %c0_123 = arith.constant 0 : index
    %185 = vector.load %arg12[%c2_121, %c2_122, %c0_123] : memref<14x14x2xf32, #tpu.memory_space<vmem>>, vector<8x8x2xf32>
    %c16 = arith.constant 16 : index
    %c0_124 = arith.constant 0 : index
    %186 = vector.load %arg5[%c16, %c0_124] : memref<49x2xf32, #tpu.memory_space<vmem>>, vector<1x2xf32>
    %187 = vector.shape_cast %186 : vector<1x2xf32> to vector<1x1x2xf32>
    %188 = vector.broadcast %187 : vector<1x1x2xf32> to vector<8x8x2xf32>
    %189 = arith.mulf %185, %188 : vector<8x8x2xf32>
    %cst_125 = arith.constant dense<0.000000e+00> : vector<8x8xf32>
    %190 = vector.multi_reduction <add>, %189, %cst_125 [2] : vector<8x8x2xf32> to vector<8x8xf32>
    %191 = vector.shape_cast %190 : vector<8x8xf32> to vector<8x8x1xf32>
    %192 = arith.addf %184, %191 : vector<8x8x1xf32>
    %c2_126 = arith.constant 2 : index
    %c3_127 = arith.constant 3 : index
    %c0_128 = arith.constant 0 : index
    %193 = vector.load %arg12[%c2_126, %c3_127, %c0_128] : memref<14x14x2xf32, #tpu.memory_space<vmem>>, vector<8x8x2xf32>
    %c17 = arith.constant 17 : index
    %c0_129 = arith.constant 0 : index
    %194 = vector.load %arg5[%c17, %c0_129] : memref<49x2xf32, #tpu.memory_space<vmem>>, vector<1x2xf32>
    %195 = vector.shape_cast %194 : vector<1x2xf32> to vector<1x1x2xf32>
    %196 = vector.broadcast %195 : vector<1x1x2xf32> to vector<8x8x2xf32>
    %197 = arith.mulf %193, %196 : vector<8x8x2xf32>
    %cst_130 = arith.constant dense<0.000000e+00> : vector<8x8xf32>
    %198 = vector.multi_reduction <add>, %197, %cst_130 [2] : vector<8x8x2xf32> to vector<8x8xf32>
    %199 = vector.shape_cast %198 : vector<8x8xf32> to vector<8x8x1xf32>
    %200 = arith.addf %192, %199 : vector<8x8x1xf32>
    %c2_131 = arith.constant 2 : index
    %c4_132 = arith.constant 4 : index
    %c0_133 = arith.constant 0 : index
    %201 = vector.load %arg12[%c2_131, %c4_132, %c0_133] : memref<14x14x2xf32, #tpu.memory_space<vmem>>, vector<8x8x2xf32>
    %c18 = arith.constant 18 : index
    %c0_134 = arith.constant 0 : index
    %202 = vector.load %arg5[%c18, %c0_134] : memref<49x2xf32, #tpu.memory_space<vmem>>, vector<1x2xf32>
    %203 = vector.shape_cast %202 : vector<1x2xf32> to vector<1x1x2xf32>
    %204 = vector.broadcast %203 : vector<1x1x2xf32> to vector<8x8x2xf32>
    %205 = arith.mulf %201, %204 : vector<8x8x2xf32>
    %cst_135 = arith.constant dense<0.000000e+00> : vector<8x8xf32>
    %206 = vector.multi_reduction <add>, %205, %cst_135 [2] : vector<8x8x2xf32> to vector<8x8xf32>
    %207 = vector.shape_cast %206 : vector<8x8xf32> to vector<8x8x1xf32>
    %208 = arith.addf %200, %207 : vector<8x8x1xf32>
    %c2_136 = arith.constant 2 : index
    %c5_137 = arith.constant 5 : index
    %c0_138 = arith.constant 0 : index
    %209 = vector.load %arg12[%c2_136, %c5_137, %c0_138] : memref<14x14x2xf32, #tpu.memory_space<vmem>>, vector<8x8x2xf32>
    %c19 = arith.constant 19 : index
    %c0_139 = arith.constant 0 : index
    %210 = vector.load %arg5[%c19, %c0_139] : memref<49x2xf32, #tpu.memory_space<vmem>>, vector<1x2xf32>
    %211 = vector.shape_cast %210 : vector<1x2xf32> to vector<1x1x2xf32>
    %212 = vector.broadcast %211 : vector<1x1x2xf32> to vector<8x8x2xf32>
    %213 = arith.mulf %209, %212 : vector<8x8x2xf32>
    %cst_140 = arith.constant dense<0.000000e+00> : vector<8x8xf32>
    %214 = vector.multi_reduction <add>, %213, %cst_140 [2] : vector<8x8x2xf32> to vector<8x8xf32>
    %215 = vector.shape_cast %214 : vector<8x8xf32> to vector<8x8x1xf32>
    %216 = arith.addf %208, %215 : vector<8x8x1xf32>
    %c2_141 = arith.constant 2 : index
    %c6_142 = arith.constant 6 : index
    %c0_143 = arith.constant 0 : index
    %217 = vector.load %arg12[%c2_141, %c6_142, %c0_143] : memref<14x14x2xf32, #tpu.memory_space<vmem>>, vector<8x8x2xf32>
    %c20 = arith.constant 20 : index
    %c0_144 = arith.constant 0 : index
    %218 = vector.load %arg5[%c20, %c0_144] : memref<49x2xf32, #tpu.memory_space<vmem>>, vector<1x2xf32>
    %219 = vector.shape_cast %218 : vector<1x2xf32> to vector<1x1x2xf32>
    %220 = vector.broadcast %219 : vector<1x1x2xf32> to vector<8x8x2xf32>
    %221 = arith.mulf %217, %220 : vector<8x8x2xf32>
    %cst_145 = arith.constant dense<0.000000e+00> : vector<8x8xf32>
    %222 = vector.multi_reduction <add>, %221, %cst_145 [2] : vector<8x8x2xf32> to vector<8x8xf32>
    %223 = vector.shape_cast %222 : vector<8x8xf32> to vector<8x8x1xf32>
    %224 = arith.addf %216, %223 : vector<8x8x1xf32>
    %c3_146 = arith.constant 3 : index
    %c0_147 = arith.constant 0 : index
    %c0_148 = arith.constant 0 : index
    %225 = vector.load %arg12[%c3_146, %c0_147, %c0_148] : memref<14x14x2xf32, #tpu.memory_space<vmem>>, vector<8x8x2xf32>
    %c21 = arith.constant 21 : index
    %c0_149 = arith.constant 0 : index
    %226 = vector.load %arg5[%c21, %c0_149] : memref<49x2xf32, #tpu.memory_space<vmem>>, vector<1x2xf32>
    %227 = vector.shape_cast %226 : vector<1x2xf32> to vector<1x1x2xf32>
    %228 = vector.broadcast %227 : vector<1x1x2xf32> to vector<8x8x2xf32>
    %229 = arith.mulf %225, %228 : vector<8x8x2xf32>
    %cst_150 = arith.constant dense<0.000000e+00> : vector<8x8xf32>
    %230 = vector.multi_reduction <add>, %229, %cst_150 [2] : vector<8x8x2xf32> to vector<8x8xf32>
    %231 = vector.shape_cast %230 : vector<8x8xf32> to vector<8x8x1xf32>
    %232 = arith.addf %224, %231 : vector<8x8x1xf32>
    %c3_151 = arith.constant 3 : index
    %c1_152 = arith.constant 1 : index
    %c0_153 = arith.constant 0 : index
    %233 = vector.load %arg12[%c3_151, %c1_152, %c0_153] : memref<14x14x2xf32, #tpu.memory_space<vmem>>, vector<8x8x2xf32>
    %c22 = arith.constant 22 : index
    %c0_154 = arith.constant 0 : index
    %234 = vector.load %arg5[%c22, %c0_154] : memref<49x2xf32, #tpu.memory_space<vmem>>, vector<1x2xf32>
    %235 = vector.shape_cast %234 : vector<1x2xf32> to vector<1x1x2xf32>
    %236 = vector.broadcast %235 : vector<1x1x2xf32> to vector<8x8x2xf32>
    %237 = arith.mulf %233, %236 : vector<8x8x2xf32>
    %cst_155 = arith.constant dense<0.000000e+00> : vector<8x8xf32>
    %238 = vector.multi_reduction <add>, %237, %cst_155 [2] : vector<8x8x2xf32> to vector<8x8xf32>
    %239 = vector.shape_cast %238 : vector<8x8xf32> to vector<8x8x1xf32>
    %240 = arith.addf %232, %239 : vector<8x8x1xf32>
    %c3_156 = arith.constant 3 : index
    %c2_157 = arith.constant 2 : index
    %c0_158 = arith.constant 0 : index
    %241 = vector.load %arg12[%c3_156, %c2_157, %c0_158] : memref<14x14x2xf32, #tpu.memory_space<vmem>>, vector<8x8x2xf32>
    %c23 = arith.constant 23 : index
    %c0_159 = arith.constant 0 : index
    %242 = vector.load %arg5[%c23, %c0_159] : memref<49x2xf32, #tpu.memory_space<vmem>>, vector<1x2xf32>
    %243 = vector.shape_cast %242 : vector<1x2xf32> to vector<1x1x2xf32>
    %244 = vector.broadcast %243 : vector<1x1x2xf32> to vector<8x8x2xf32>
    %245 = arith.mulf %241, %244 : vector<8x8x2xf32>
    %cst_160 = arith.constant dense<0.000000e+00> : vector<8x8xf32>
    %246 = vector.multi_reduction <add>, %245, %cst_160 [2] : vector<8x8x2xf32> to vector<8x8xf32>
    %247 = vector.shape_cast %246 : vector<8x8xf32> to vector<8x8x1xf32>
    %248 = arith.addf %240, %247 : vector<8x8x1xf32>
    %c3_161 = arith.constant 3 : index
    %c3_162 = arith.constant 3 : index
    %c0_163 = arith.constant 0 : index
    %249 = vector.load %arg12[%c3_161, %c3_162, %c0_163] : memref<14x14x2xf32, #tpu.memory_space<vmem>>, vector<8x8x2xf32>
    %c24 = arith.constant 24 : index
    %c0_164 = arith.constant 0 : index
    %250 = vector.load %arg5[%c24, %c0_164] : memref<49x2xf32, #tpu.memory_space<vmem>>, vector<1x2xf32>
    %251 = vector.shape_cast %250 : vector<1x2xf32> to vector<1x1x2xf32>
    %252 = vector.broadcast %251 : vector<1x1x2xf32> to vector<8x8x2xf32>
    %253 = arith.mulf %249, %252 : vector<8x8x2xf32>
    %cst_165 = arith.constant dense<0.000000e+00> : vector<8x8xf32>
    %254 = vector.multi_reduction <add>, %253, %cst_165 [2] : vector<8x8x2xf32> to vector<8x8xf32>
    %255 = vector.shape_cast %254 : vector<8x8xf32> to vector<8x8x1xf32>
    %256 = arith.addf %248, %255 : vector<8x8x1xf32>
    %c3_166 = arith.constant 3 : index
    %c4_167 = arith.constant 4 : index
    %c0_168 = arith.constant 0 : index
    %257 = vector.load %arg12[%c3_166, %c4_167, %c0_168] : memref<14x14x2xf32, #tpu.memory_space<vmem>>, vector<8x8x2xf32>
    %c25 = arith.constant 25 : index
    %c0_169 = arith.constant 0 : index
    %258 = vector.load %arg5[%c25, %c0_169] : memref<49x2xf32, #tpu.memory_space<vmem>>, vector<1x2xf32>
    %259 = vector.shape_cast %258 : vector<1x2xf32> to vector<1x1x2xf32>
    %260 = vector.broadcast %259 : vector<1x1x2xf32> to vector<8x8x2xf32>
    %261 = arith.mulf %257, %260 : vector<8x8x2xf32>
    %cst_170 = arith.constant dense<0.000000e+00> : vector<8x8xf32>
    %262 = vector.multi_reduction <add>, %261, %cst_170 [2] : vector<8x8x2xf32> to vector<8x8xf32>
    %263 = vector.shape_cast %262 : vector<8x8xf32> to vector<8x8x1xf32>
    %264 = arith.addf %256, %263 : vector<8x8x1xf32>
    %c3_171 = arith.constant 3 : index
    %c5_172 = arith.constant 5 : index
    %c0_173 = arith.constant 0 : index
    %265 = vector.load %arg12[%c3_171, %c5_172, %c0_173] : memref<14x14x2xf32, #tpu.memory_space<vmem>>, vector<8x8x2xf32>
    %c26 = arith.constant 26 : index
    %c0_174 = arith.constant 0 : index
    %266 = vector.load %arg5[%c26, %c0_174] : memref<49x2xf32, #tpu.memory_space<vmem>>, vector<1x2xf32>
    %267 = vector.shape_cast %266 : vector<1x2xf32> to vector<1x1x2xf32>
    %268 = vector.broadcast %267 : vector<1x1x2xf32> to vector<8x8x2xf32>
    %269 = arith.mulf %265, %268 : vector<8x8x2xf32>
    %cst_175 = arith.constant dense<0.000000e+00> : vector<8x8xf32>
    %270 = vector.multi_reduction <add>, %269, %cst_175 [2] : vector<8x8x2xf32> to vector<8x8xf32>
    %271 = vector.shape_cast %270 : vector<8x8xf32> to vector<8x8x1xf32>
    %272 = arith.addf %264, %271 : vector<8x8x1xf32>
    %c3_176 = arith.constant 3 : index
    %c6_177 = arith.constant 6 : index
    %c0_178 = arith.constant 0 : index
    %273 = vector.load %arg12[%c3_176, %c6_177, %c0_178] : memref<14x14x2xf32, #tpu.memory_space<vmem>>, vector<8x8x2xf32>
    %c27 = arith.constant 27 : index
    %c0_179 = arith.constant 0 : index
    %274 = vector.load %arg5[%c27, %c0_179] : memref<49x2xf32, #tpu.memory_space<vmem>>, vector<1x2xf32>
    %275 = vector.shape_cast %274 : vector<1x2xf32> to vector<1x1x2xf32>
    %276 = vector.broadcast %275 : vector<1x1x2xf32> to vector<8x8x2xf32>
    %277 = arith.mulf %273, %276 : vector<8x8x2xf32>
    %cst_180 = arith.constant dense<0.000000e+00> : vector<8x8xf32>
    %278 = vector.multi_reduction <add>, %277, %cst_180 [2] : vector<8x8x2xf32> to vector<8x8xf32>
    %279 = vector.shape_cast %278 : vector<8x8xf32> to vector<8x8x1xf32>
    %280 = arith.addf %272, %279 : vector<8x8x1xf32>
    %c4_181 = arith.constant 4 : index
    %c0_182 = arith.constant 0 : index
    %c0_183 = arith.constant 0 : index
    %281 = vector.load %arg12[%c4_181, %c0_182, %c0_183] : memref<14x14x2xf32, #tpu.memory_space<vmem>>, vector<8x8x2xf32>
    %c28 = arith.constant 28 : index
    %c0_184 = arith.constant 0 : index
    %282 = vector.load %arg5[%c28, %c0_184] : memref<49x2xf32, #tpu.memory_space<vmem>>, vector<1x2xf32>
    %283 = vector.shape_cast %282 : vector<1x2xf32> to vector<1x1x2xf32>
    %284 = vector.broadcast %283 : vector<1x1x2xf32> to vector<8x8x2xf32>
    %285 = arith.mulf %281, %284 : vector<8x8x2xf32>
    %cst_185 = arith.constant dense<0.000000e+00> : vector<8x8xf32>
    %286 = vector.multi_reduction <add>, %285, %cst_185 [2] : vector<8x8x2xf32> to vector<8x8xf32>
    %287 = vector.shape_cast %286 : vector<8x8xf32> to vector<8x8x1xf32>
    %288 = arith.addf %280, %287 : vector<8x8x1xf32>
    %c4_186 = arith.constant 4 : index
    %c1_187 = arith.constant 1 : index
    %c0_188 = arith.constant 0 : index
    %289 = vector.load %arg12[%c4_186, %c1_187, %c0_188] : memref<14x14x2xf32, #tpu.memory_space<vmem>>, vector<8x8x2xf32>
    %c29 = arith.constant 29 : index
    %c0_189 = arith.constant 0 : index
    %290 = vector.load %arg5[%c29, %c0_189] : memref<49x2xf32, #tpu.memory_space<vmem>>, vector<1x2xf32>
    %291 = vector.shape_cast %290 : vector<1x2xf32> to vector<1x1x2xf32>
    %292 = vector.broadcast %291 : vector<1x1x2xf32> to vector<8x8x2xf32>
    %293 = arith.mulf %289, %292 : vector<8x8x2xf32>
    %cst_190 = arith.constant dense<0.000000e+00> : vector<8x8xf32>
    %294 = vector.multi_reduction <add>, %293, %cst_190 [2] : vector<8x8x2xf32> to vector<8x8xf32>
    %295 = vector.shape_cast %294 : vector<8x8xf32> to vector<8x8x1xf32>
    %296 = arith.addf %288, %295 : vector<8x8x1xf32>
    %c4_191 = arith.constant 4 : index
    %c2_192 = arith.constant 2 : index
    %c0_193 = arith.constant 0 : index
    %297 = vector.load %arg12[%c4_191, %c2_192, %c0_193] : memref<14x14x2xf32, #tpu.memory_space<vmem>>, vector<8x8x2xf32>
    %c30 = arith.constant 30 : index
    %c0_194 = arith.constant 0 : index
    %298 = vector.load %arg5[%c30, %c0_194] : memref<49x2xf32, #tpu.memory_space<vmem>>, vector<1x2xf32>
    %299 = vector.shape_cast %298 : vector<1x2xf32> to vector<1x1x2xf32>
    %300 = vector.broadcast %299 : vector<1x1x2xf32> to vector<8x8x2xf32>
    %301 = arith.mulf %297, %300 : vector<8x8x2xf32>
    %cst_195 = arith.constant dense<0.000000e+00> : vector<8x8xf32>
    %302 = vector.multi_reduction <add>, %301, %cst_195 [2] : vector<8x8x2xf32> to vector<8x8xf32>
    %303 = vector.shape_cast %302 : vector<8x8xf32> to vector<8x8x1xf32>
    %304 = arith.addf %296, %303 : vector<8x8x1xf32>
    %c4_196 = arith.constant 4 : index
    %c3_197 = arith.constant 3 : index
    %c0_198 = arith.constant 0 : index
    %305 = vector.load %arg12[%c4_196, %c3_197, %c0_198] : memref<14x14x2xf32, #tpu.memory_space<vmem>>, vector<8x8x2xf32>
    %c31 = arith.constant 31 : index
    %c0_199 = arith.constant 0 : index
    %306 = vector.load %arg5[%c31, %c0_199] : memref<49x2xf32, #tpu.memory_space<vmem>>, vector<1x2xf32>
    %307 = vector.shape_cast %306 : vector<1x2xf32> to vector<1x1x2xf32>
    %308 = vector.broadcast %307 : vector<1x1x2xf32> to vector<8x8x2xf32>
    %309 = arith.mulf %305, %308 : vector<8x8x2xf32>
    %cst_200 = arith.constant dense<0.000000e+00> : vector<8x8xf32>
    %310 = vector.multi_reduction <add>, %309, %cst_200 [2] : vector<8x8x2xf32> to vector<8x8xf32>
    %311 = vector.shape_cast %310 : vector<8x8xf32> to vector<8x8x1xf32>
    %312 = arith.addf %304, %311 : vector<8x8x1xf32>
    %c4_201 = arith.constant 4 : index
    %c4_202 = arith.constant 4 : index
    %c0_203 = arith.constant 0 : index
    %313 = vector.load %arg12[%c4_201, %c4_202, %c0_203] : memref<14x14x2xf32, #tpu.memory_space<vmem>>, vector<8x8x2xf32>
    %c32 = arith.constant 32 : index
    %c0_204 = arith.constant 0 : index
    %314 = vector.load %arg5[%c32, %c0_204] : memref<49x2xf32, #tpu.memory_space<vmem>>, vector<1x2xf32>
    %315 = vector.shape_cast %314 : vector<1x2xf32> to vector<1x1x2xf32>
    %316 = vector.broadcast %315 : vector<1x1x2xf32> to vector<8x8x2xf32>
    %317 = arith.mulf %313, %316 : vector<8x8x2xf32>
    %cst_205 = arith.constant dense<0.000000e+00> : vector<8x8xf32>
    %318 = vector.multi_reduction <add>, %317, %cst_205 [2] : vector<8x8x2xf32> to vector<8x8xf32>
    %319 = vector.shape_cast %318 : vector<8x8xf32> to vector<8x8x1xf32>
    %320 = arith.addf %312, %319 : vector<8x8x1xf32>
    %c4_206 = arith.constant 4 : index
    %c5_207 = arith.constant 5 : index
    %c0_208 = arith.constant 0 : index
    %321 = vector.load %arg12[%c4_206, %c5_207, %c0_208] : memref<14x14x2xf32, #tpu.memory_space<vmem>>, vector<8x8x2xf32>
    %c33 = arith.constant 33 : index
    %c0_209 = arith.constant 0 : index
    %322 = vector.load %arg5[%c33, %c0_209] : memref<49x2xf32, #tpu.memory_space<vmem>>, vector<1x2xf32>
    %323 = vector.shape_cast %322 : vector<1x2xf32> to vector<1x1x2xf32>
    %324 = vector.broadcast %323 : vector<1x1x2xf32> to vector<8x8x2xf32>
    %325 = arith.mulf %321, %324 : vector<8x8x2xf32>
    %cst_210 = arith.constant dense<0.000000e+00> : vector<8x8xf32>
    %326 = vector.multi_reduction <add>, %325, %cst_210 [2] : vector<8x8x2xf32> to vector<8x8xf32>
    %327 = vector.shape_cast %326 : vector<8x8xf32> to vector<8x8x1xf32>
    %328 = arith.addf %320, %327 : vector<8x8x1xf32>
    %c4_211 = arith.constant 4 : index
    %c6_212 = arith.constant 6 : index
    %c0_213 = arith.constant 0 : index
    %329 = vector.load %arg12[%c4_211, %c6_212, %c0_213] : memref<14x14x2xf32, #tpu.memory_space<vmem>>, vector<8x8x2xf32>
    %c34 = arith.constant 34 : index
    %c0_214 = arith.constant 0 : index
    %330 = vector.load %arg5[%c34, %c0_214] : memref<49x2xf32, #tpu.memory_space<vmem>>, vector<1x2xf32>
    %331 = vector.shape_cast %330 : vector<1x2xf32> to vector<1x1x2xf32>
    %332 = vector.broadcast %331 : vector<1x1x2xf32> to vector<8x8x2xf32>
    %333 = arith.mulf %329, %332 : vector<8x8x2xf32>
    %cst_215 = arith.constant dense<0.000000e+00> : vector<8x8xf32>
    %334 = vector.multi_reduction <add>, %333, %cst_215 [2] : vector<8x8x2xf32> to vector<8x8xf32>
    %335 = vector.shape_cast %334 : vector<8x8xf32> to vector<8x8x1xf32>
    %336 = arith.addf %328, %335 : vector<8x8x1xf32>
    %c5_216 = arith.constant 5 : index
    %c0_217 = arith.constant 0 : index
    %c0_218 = arith.constant 0 : index
    %337 = vector.load %arg12[%c5_216, %c0_217, %c0_218] : memref<14x14x2xf32, #tpu.memory_space<vmem>>, vector<8x8x2xf32>
    %c35 = arith.constant 35 : index
    %c0_219 = arith.constant 0 : index
    %338 = vector.load %arg5[%c35, %c0_219] : memref<49x2xf32, #tpu.memory_space<vmem>>, vector<1x2xf32>
    %339 = vector.shape_cast %338 : vector<1x2xf32> to vector<1x1x2xf32>
    %340 = vector.broadcast %339 : vector<1x1x2xf32> to vector<8x8x2xf32>
    %341 = arith.mulf %337, %340 : vector<8x8x2xf32>
    %cst_220 = arith.constant dense<0.000000e+00> : vector<8x8xf32>
    %342 = vector.multi_reduction <add>, %341, %cst_220 [2] : vector<8x8x2xf32> to vector<8x8xf32>
    %343 = vector.shape_cast %342 : vector<8x8xf32> to vector<8x8x1xf32>
    %344 = arith.addf %336, %343 : vector<8x8x1xf32>
    %c5_221 = arith.constant 5 : index
    %c1_222 = arith.constant 1 : index
    %c0_223 = arith.constant 0 : index
    %345 = vector.load %arg12[%c5_221, %c1_222, %c0_223] : memref<14x14x2xf32, #tpu.memory_space<vmem>>, vector<8x8x2xf32>
    %c36 = arith.constant 36 : index
    %c0_224 = arith.constant 0 : index
    %346 = vector.load %arg5[%c36, %c0_224] : memref<49x2xf32, #tpu.memory_space<vmem>>, vector<1x2xf32>
    %347 = vector.shape_cast %346 : vector<1x2xf32> to vector<1x1x2xf32>
    %348 = vector.broadcast %347 : vector<1x1x2xf32> to vector<8x8x2xf32>
    %349 = arith.mulf %345, %348 : vector<8x8x2xf32>
    %cst_225 = arith.constant dense<0.000000e+00> : vector<8x8xf32>
    %350 = vector.multi_reduction <add>, %349, %cst_225 [2] : vector<8x8x2xf32> to vector<8x8xf32>
    %351 = vector.shape_cast %350 : vector<8x8xf32> to vector<8x8x1xf32>
    %352 = arith.addf %344, %351 : vector<8x8x1xf32>
    %c5_226 = arith.constant 5 : index
    %c2_227 = arith.constant 2 : index
    %c0_228 = arith.constant 0 : index
    %353 = vector.load %arg12[%c5_226, %c2_227, %c0_228] : memref<14x14x2xf32, #tpu.memory_space<vmem>>, vector<8x8x2xf32>
    %c37 = arith.constant 37 : index
    %c0_229 = arith.constant 0 : index
    %354 = vector.load %arg5[%c37, %c0_229] : memref<49x2xf32, #tpu.memory_space<vmem>>, vector<1x2xf32>
    %355 = vector.shape_cast %354 : vector<1x2xf32> to vector<1x1x2xf32>
    %356 = vector.broadcast %355 : vector<1x1x2xf32> to vector<8x8x2xf32>
    %357 = arith.mulf %353, %356 : vector<8x8x2xf32>
    %cst_230 = arith.constant dense<0.000000e+00> : vector<8x8xf32>
    %358 = vector.multi_reduction <add>, %357, %cst_230 [2] : vector<8x8x2xf32> to vector<8x8xf32>
    %359 = vector.shape_cast %358 : vector<8x8xf32> to vector<8x8x1xf32>
    %360 = arith.addf %352, %359 : vector<8x8x1xf32>
    %c5_231 = arith.constant 5 : index
    %c3_232 = arith.constant 3 : index
    %c0_233 = arith.constant 0 : index
    %361 = vector.load %arg12[%c5_231, %c3_232, %c0_233] : memref<14x14x2xf32, #tpu.memory_space<vmem>>, vector<8x8x2xf32>
    %c38 = arith.constant 38 : index
    %c0_234 = arith.constant 0 : index
    %362 = vector.load %arg5[%c38, %c0_234] : memref<49x2xf32, #tpu.memory_space<vmem>>, vector<1x2xf32>
    %363 = vector.shape_cast %362 : vector<1x2xf32> to vector<1x1x2xf32>
    %364 = vector.broadcast %363 : vector<1x1x2xf32> to vector<8x8x2xf32>
    %365 = arith.mulf %361, %364 : vector<8x8x2xf32>
    %cst_235 = arith.constant dense<0.000000e+00> : vector<8x8xf32>
    %366 = vector.multi_reduction <add>, %365, %cst_235 [2] : vector<8x8x2xf32> to vector<8x8xf32>
    %367 = vector.shape_cast %366 : vector<8x8xf32> to vector<8x8x1xf32>
    %368 = arith.addf %360, %367 : vector<8x8x1xf32>
    %c5_236 = arith.constant 5 : index
    %c4_237 = arith.constant 4 : index
    %c0_238 = arith.constant 0 : index
    %369 = vector.load %arg12[%c5_236, %c4_237, %c0_238] : memref<14x14x2xf32, #tpu.memory_space<vmem>>, vector<8x8x2xf32>
    %c39 = arith.constant 39 : index
    %c0_239 = arith.constant 0 : index
    %370 = vector.load %arg5[%c39, %c0_239] : memref<49x2xf32, #tpu.memory_space<vmem>>, vector<1x2xf32>
    %371 = vector.shape_cast %370 : vector<1x2xf32> to vector<1x1x2xf32>
    %372 = vector.broadcast %371 : vector<1x1x2xf32> to vector<8x8x2xf32>
    %373 = arith.mulf %369, %372 : vector<8x8x2xf32>
    %cst_240 = arith.constant dense<0.000000e+00> : vector<8x8xf32>
    %374 = vector.multi_reduction <add>, %373, %cst_240 [2] : vector<8x8x2xf32> to vector<8x8xf32>
    %375 = vector.shape_cast %374 : vector<8x8xf32> to vector<8x8x1xf32>
    %376 = arith.addf %368, %375 : vector<8x8x1xf32>
    %c5_241 = arith.constant 5 : index
    %c5_242 = arith.constant 5 : index
    %c0_243 = arith.constant 0 : index
    %377 = vector.load %arg12[%c5_241, %c5_242, %c0_243] : memref<14x14x2xf32, #tpu.memory_space<vmem>>, vector<8x8x2xf32>
    %c40 = arith.constant 40 : index
    %c0_244 = arith.constant 0 : index
    %378 = vector.load %arg5[%c40, %c0_244] : memref<49x2xf32, #tpu.memory_space<vmem>>, vector<1x2xf32>
    %379 = vector.shape_cast %378 : vector<1x2xf32> to vector<1x1x2xf32>
    %380 = vector.broadcast %379 : vector<1x1x2xf32> to vector<8x8x2xf32>
    %381 = arith.mulf %377, %380 : vector<8x8x2xf32>
    %cst_245 = arith.constant dense<0.000000e+00> : vector<8x8xf32>
    %382 = vector.multi_reduction <add>, %381, %cst_245 [2] : vector<8x8x2xf32> to vector<8x8xf32>
    %383 = vector.shape_cast %382 : vector<8x8xf32> to vector<8x8x1xf32>
    %384 = arith.addf %376, %383 : vector<8x8x1xf32>
    %c5_246 = arith.constant 5 : index
    %c6_247 = arith.constant 6 : index
    %c0_248 = arith.constant 0 : index
    %385 = vector.load %arg12[%c5_246, %c6_247, %c0_248] : memref<14x14x2xf32, #tpu.memory_space<vmem>>, vector<8x8x2xf32>
    %c41 = arith.constant 41 : index
    %c0_249 = arith.constant 0 : index
    %386 = vector.load %arg5[%c41, %c0_249] : memref<49x2xf32, #tpu.memory_space<vmem>>, vector<1x2xf32>
    %387 = vector.shape_cast %386 : vector<1x2xf32> to vector<1x1x2xf32>
    %388 = vector.broadcast %387 : vector<1x1x2xf32> to vector<8x8x2xf32>
    %389 = arith.mulf %385, %388 : vector<8x8x2xf32>
    %cst_250 = arith.constant dense<0.000000e+00> : vector<8x8xf32>
    %390 = vector.multi_reduction <add>, %389, %cst_250 [2] : vector<8x8x2xf32> to vector<8x8xf32>
    %391 = vector.shape_cast %390 : vector<8x8xf32> to vector<8x8x1xf32>
    %392 = arith.addf %384, %391 : vector<8x8x1xf32>
    %c6_251 = arith.constant 6 : index
    %c0_252 = arith.constant 0 : index
    %c0_253 = arith.constant 0 : index
    %393 = vector.load %arg12[%c6_251, %c0_252, %c0_253] : memref<14x14x2xf32, #tpu.memory_space<vmem>>, vector<8x8x2xf32>
    %c42 = arith.constant 42 : index
    %c0_254 = arith.constant 0 : index
    %394 = vector.load %arg5[%c42, %c0_254] : memref<49x2xf32, #tpu.memory_space<vmem>>, vector<1x2xf32>
    %395 = vector.shape_cast %394 : vector<1x2xf32> to vector<1x1x2xf32>
    %396 = vector.broadcast %395 : vector<1x1x2xf32> to vector<8x8x2xf32>
    %397 = arith.mulf %393, %396 : vector<8x8x2xf32>
    %cst_255 = arith.constant dense<0.000000e+00> : vector<8x8xf32>
    %398 = vector.multi_reduction <add>, %397, %cst_255 [2] : vector<8x8x2xf32> to vector<8x8xf32>
    %399 = vector.shape_cast %398 : vector<8x8xf32> to vector<8x8x1xf32>
    %400 = arith.addf %392, %399 : vector<8x8x1xf32>
    %c6_256 = arith.constant 6 : index
    %c1_257 = arith.constant 1 : index
    %c0_258 = arith.constant 0 : index
    %401 = vector.load %arg12[%c6_256, %c1_257, %c0_258] : memref<14x14x2xf32, #tpu.memory_space<vmem>>, vector<8x8x2xf32>
    %c43 = arith.constant 43 : index
    %c0_259 = arith.constant 0 : index
    %402 = vector.load %arg5[%c43, %c0_259] : memref<49x2xf32, #tpu.memory_space<vmem>>, vector<1x2xf32>
    %403 = vector.shape_cast %402 : vector<1x2xf32> to vector<1x1x2xf32>
    %404 = vector.broadcast %403 : vector<1x1x2xf32> to vector<8x8x2xf32>
    %405 = arith.mulf %401, %404 : vector<8x8x2xf32>
    %cst_260 = arith.constant dense<0.000000e+00> : vector<8x8xf32>
    %406 = vector.multi_reduction <add>, %405, %cst_260 [2] : vector<8x8x2xf32> to vector<8x8xf32>
    %407 = vector.shape_cast %406 : vector<8x8xf32> to vector<8x8x1xf32>
    %408 = arith.addf %400, %407 : vector<8x8x1xf32>
    %c6_261 = arith.constant 6 : index
    %c2_262 = arith.constant 2 : index
    %c0_263 = arith.constant 0 : index
    %409 = vector.load %arg12[%c6_261, %c2_262, %c0_263] : memref<14x14x2xf32, #tpu.memory_space<vmem>>, vector<8x8x2xf32>
    %c44 = arith.constant 44 : index
    %c0_264 = arith.constant 0 : index
    %410 = vector.load %arg5[%c44, %c0_264] : memref<49x2xf32, #tpu.memory_space<vmem>>, vector<1x2xf32>
    %411 = vector.shape_cast %410 : vector<1x2xf32> to vector<1x1x2xf32>
    %412 = vector.broadcast %411 : vector<1x1x2xf32> to vector<8x8x2xf32>
    %413 = arith.mulf %409, %412 : vector<8x8x2xf32>
    %cst_265 = arith.constant dense<0.000000e+00> : vector<8x8xf32>
    %414 = vector.multi_reduction <add>, %413, %cst_265 [2] : vector<8x8x2xf32> to vector<8x8xf32>
    %415 = vector.shape_cast %414 : vector<8x8xf32> to vector<8x8x1xf32>
    %416 = arith.addf %408, %415 : vector<8x8x1xf32>
    %c6_266 = arith.constant 6 : index
    %c3_267 = arith.constant 3 : index
    %c0_268 = arith.constant 0 : index
    %417 = vector.load %arg12[%c6_266, %c3_267, %c0_268] : memref<14x14x2xf32, #tpu.memory_space<vmem>>, vector<8x8x2xf32>
    %c45 = arith.constant 45 : index
    %c0_269 = arith.constant 0 : index
    %418 = vector.load %arg5[%c45, %c0_269] : memref<49x2xf32, #tpu.memory_space<vmem>>, vector<1x2xf32>
    %419 = vector.shape_cast %418 : vector<1x2xf32> to vector<1x1x2xf32>
    %420 = vector.broadcast %419 : vector<1x1x2xf32> to vector<8x8x2xf32>
    %421 = arith.mulf %417, %420 : vector<8x8x2xf32>
    %cst_270 = arith.constant dense<0.000000e+00> : vector<8x8xf32>
    %422 = vector.multi_reduction <add>, %421, %cst_270 [2] : vector<8x8x2xf32> to vector<8x8xf32>
    %423 = vector.shape_cast %422 : vector<8x8xf32> to vector<8x8x1xf32>
    %424 = arith.addf %416, %423 : vector<8x8x1xf32>
    %c6_271 = arith.constant 6 : index
    %c4_272 = arith.constant 4 : index
    %c0_273 = arith.constant 0 : index
    %425 = vector.load %arg12[%c6_271, %c4_272, %c0_273] : memref<14x14x2xf32, #tpu.memory_space<vmem>>, vector<8x8x2xf32>
    %c46 = arith.constant 46 : index
    %c0_274 = arith.constant 0 : index
    %426 = vector.load %arg5[%c46, %c0_274] : memref<49x2xf32, #tpu.memory_space<vmem>>, vector<1x2xf32>
    %427 = vector.shape_cast %426 : vector<1x2xf32> to vector<1x1x2xf32>
    %428 = vector.broadcast %427 : vector<1x1x2xf32> to vector<8x8x2xf32>
    %429 = arith.mulf %425, %428 : vector<8x8x2xf32>
    %cst_275 = arith.constant dense<0.000000e+00> : vector<8x8xf32>
    %430 = vector.multi_reduction <add>, %429, %cst_275 [2] : vector<8x8x2xf32> to vector<8x8xf32>
    %431 = vector.shape_cast %430 : vector<8x8xf32> to vector<8x8x1xf32>
    %432 = arith.addf %424, %431 : vector<8x8x1xf32>
    %c6_276 = arith.constant 6 : index
    %c5_277 = arith.constant 5 : index
    %c0_278 = arith.constant 0 : index
    %433 = vector.load %arg12[%c6_276, %c5_277, %c0_278] : memref<14x14x2xf32, #tpu.memory_space<vmem>>, vector<8x8x2xf32>
    %c47 = arith.constant 47 : index
    %c0_279 = arith.constant 0 : index
    %434 = vector.load %arg5[%c47, %c0_279] : memref<49x2xf32, #tpu.memory_space<vmem>>, vector<1x2xf32>
    %435 = vector.shape_cast %434 : vector<1x2xf32> to vector<1x1x2xf32>
    %436 = vector.broadcast %435 : vector<1x1x2xf32> to vector<8x8x2xf32>
    %437 = arith.mulf %433, %436 : vector<8x8x2xf32>
    %cst_280 = arith.constant dense<0.000000e+00> : vector<8x8xf32>
    %438 = vector.multi_reduction <add>, %437, %cst_280 [2] : vector<8x8x2xf32> to vector<8x8xf32>
    %439 = vector.shape_cast %438 : vector<8x8xf32> to vector<8x8x1xf32>
    %440 = arith.addf %432, %439 : vector<8x8x1xf32>
    %c6_281 = arith.constant 6 : index
    %c6_282 = arith.constant 6 : index
    %c0_283 = arith.constant 0 : index
    %441 = vector.load %arg12[%c6_281, %c6_282, %c0_283] : memref<14x14x2xf32, #tpu.memory_space<vmem>>, vector<8x8x2xf32>
    %c48 = arith.constant 48 : index
    %c0_284 = arith.constant 0 : index
    %442 = vector.load %arg5[%c48, %c0_284] : memref<49x2xf32, #tpu.memory_space<vmem>>, vector<1x2xf32>
    %443 = vector.shape_cast %442 : vector<1x2xf32> to vector<1x1x2xf32>
    %444 = vector.broadcast %443 : vector<1x1x2xf32> to vector<8x8x2xf32>
    %445 = arith.mulf %441, %444 : vector<8x8x2xf32>
    %cst_285 = arith.constant dense<0.000000e+00> : vector<8x8xf32>
    %446 = vector.multi_reduction <add>, %445, %cst_285 [2] : vector<8x8x2xf32> to vector<8x8xf32>
    %447 = vector.shape_cast %446 : vector<8x8xf32> to vector<8x8x1xf32>
    %448 = arith.addf %440, %447 : vector<8x8x1xf32>
    %449 = arith.negf %448 : vector<8x8x1xf32>
    %450 = math.exp %449 : vector<8x8x1xf32>
    %cst_286 = arith.constant 1.000000e+00 : f32
    %451 = vector.broadcast %cst_286 : f32 to vector<8x8x1xf32>
    %452 = arith.addf %451, %450 : vector<8x8x1xf32>
    %453 = arith.divf %451, %452 : vector<8x8x1xf32>
    %454 = vector.broadcast %453 : vector<8x8x1xf32> to vector<8x8x32xf32>
    %455 = arith.mulf %45, %454 : vector<8x8x32xf32>
    %456 = vector.shape_cast %455 : vector<8x8x32xf32> to vector<64x32xf32>
    %c0_287 = arith.constant 0 : index
    %c0_288 = arith.constant 0 : index
    %457 = vector.load %arg6[%c0_287, %c0_288] : memref<32x16xf32, #tpu.memory_space<vmem>>, vector<32x16xf32>
    %cst_289 = arith.constant dense<0.000000e+00> : vector<64x16xf32>
    %458 = tpu.matmul %456, %457, %cst_289 {dimension_numbers = #tpu.dot_dimension_numbers<[1], [0], [0], [1], [0, 0, 1, 1], [], []>} : vector<64x32xf32>, vector<32x16xf32>, vector<64x16xf32> -> vector<64x16xf32>
    %cst_290 = arith.constant 0.000000e+00 : f32
    %459 = vector.broadcast %cst_290 : f32 to vector<10x10x16xf32>
    %c0_291 = arith.constant 0 : index
    %c0_292 = arith.constant 0 : index
    %c0_293 = arith.constant 0 : index
    %460 = vector.load %arg13[%c0_291, %c0_292, %c0_293] : memref<10x10x16xf32, #tpu.memory_space<vmem>>, vector<10x10x16xf32>
    tpu.vector_store %arg13[%c0_291, %c0_292, %c0_293], %459 {strides = array<i32>} : memref<10x10x16xf32, #tpu.memory_space<vmem>>, vector<10x10x16xf32>,
    %461 = vector.shape_cast %458 : vector<64x16xf32> to vector<8x8x16xf32>
    %c1_294 = arith.constant 1 : index
    %c1_295 = arith.constant 1 : index
    %c0_296 = arith.constant 0 : index
    %462 = vector.load %arg13[%c1_294, %c1_295, %c0_296] : memref<10x10x16xf32, #tpu.memory_space<vmem>>, vector<8x8x16xf32>
    tpu.vector_store %arg13[%c1_294, %c1_295, %c0_296], %461 {strides = array<i32>} : memref<10x10x16xf32, #tpu.memory_space<vmem>>, vector<8x8x16xf32>,
    %cst_297 = arith.constant 0.000000e+00 : f32
    %463 = vector.broadcast %cst_297 : f32 to vector<64x16xf32>
    %c0_298 = arith.constant 0 : index
    %c0_299 = arith.constant 0 : index
    %c0_300 = arith.constant 0 : index
    %464 = vector.load %arg13[%c0_298, %c0_299, %c0_300] : memref<10x10x16xf32, #tpu.memory_space<vmem>>, vector<8x8x16xf32>
    %465 = vector.shape_cast %464 : vector<8x8x16xf32> to vector<64x16xf32>
    %c0_301 = arith.constant 0 : index
    %c0_302 = arith.constant 0 : index
    %c0_303 = arith.constant 0 : index
    %c0_304 = arith.constant 0 : index
    %466 = vector.load %arg7[%c0_301, %c0_302, %c0_303, %c0_304] : memref<2x9x16x16xf32, #tpu.memory_space<vmem>>, vector<1x1x16x16xf32>
    %467 = vector.shape_cast %466 : vector<1x1x16x16xf32> to vector<16x16xf32>
    %cst_305 = arith.constant dense<0.000000e+00> : vector<64x16xf32>
    %468 = tpu.matmul %465, %467, %cst_305 {dimension_numbers = #tpu.dot_dimension_numbers<[1], [0], [0], [1], [0, 0, 1, 1], [], []>} : vector<64x16xf32>, vector<16x16xf32>, vector<64x16xf32> -> vector<64x16xf32>
    %469 = arith.addf %463, %468 : vector<64x16xf32>
    %c0_306 = arith.constant 0 : index
    %c1_307 = arith.constant 1 : index
    %c0_308 = arith.constant 0 : index
    %470 = vector.load %arg13[%c0_306, %c1_307, %c0_308] : memref<10x10x16xf32, #tpu.memory_space<vmem>>, vector<8x8x16xf32>
    %471 = vector.shape_cast %470 : vector<8x8x16xf32> to vector<64x16xf32>
    %c0_309 = arith.constant 0 : index
    %c1_310 = arith.constant 1 : index
    %c0_311 = arith.constant 0 : index
    %c0_312 = arith.constant 0 : index
    %472 = vector.load %arg7[%c0_309, %c1_310, %c0_311, %c0_312] : memref<2x9x16x16xf32, #tpu.memory_space<vmem>>, vector<1x1x16x16xf32>
    %473 = vector.shape_cast %472 : vector<1x1x16x16xf32> to vector<16x16xf32>
    %cst_313 = arith.constant dense<0.000000e+00> : vector<64x16xf32>
    %474 = tpu.matmul %471, %473, %cst_313 {dimension_numbers = #tpu.dot_dimension_numbers<[1], [0], [0], [1], [0, 0, 1, 1], [], []>} : vector<64x16xf32>, vector<16x16xf32>, vector<64x16xf32> -> vector<64x16xf32>
    %475 = arith.addf %469, %474 : vector<64x16xf32>
    %c0_314 = arith.constant 0 : index
    %c2_315 = arith.constant 2 : index
    %c0_316 = arith.constant 0 : index
    %476 = vector.load %arg13[%c0_314, %c2_315, %c0_316] : memref<10x10x16xf32, #tpu.memory_space<vmem>>, vector<8x8x16xf32>
    %477 = vector.shape_cast %476 : vector<8x8x16xf32> to vector<64x16xf32>
    %c0_317 = arith.constant 0 : index
    %c2_318 = arith.constant 2 : index
    %c0_319 = arith.constant 0 : index
    %c0_320 = arith.constant 0 : index
    %478 = vector.load %arg7[%c0_317, %c2_318, %c0_319, %c0_320] : memref<2x9x16x16xf32, #tpu.memory_space<vmem>>, vector<1x1x16x16xf32>
    %479 = vector.shape_cast %478 : vector<1x1x16x16xf32> to vector<16x16xf32>
    %cst_321 = arith.constant dense<0.000000e+00> : vector<64x16xf32>
    %480 = tpu.matmul %477, %479, %cst_321 {dimension_numbers = #tpu.dot_dimension_numbers<[1], [0], [0], [1], [0, 0, 1, 1], [], []>} : vector<64x16xf32>, vector<16x16xf32>, vector<64x16xf32> -> vector<64x16xf32>
    %481 = arith.addf %475, %480 : vector<64x16xf32>
    %c1_322 = arith.constant 1 : index
    %c0_323 = arith.constant 0 : index
    %c0_324 = arith.constant 0 : index
    %482 = vector.load %arg13[%c1_322, %c0_323, %c0_324] : memref<10x10x16xf32, #tpu.memory_space<vmem>>, vector<8x8x16xf32>
    %483 = vector.shape_cast %482 : vector<8x8x16xf32> to vector<64x16xf32>
    %c0_325 = arith.constant 0 : index
    %c3_326 = arith.constant 3 : index
    %c0_327 = arith.constant 0 : index
    %c0_328 = arith.constant 0 : index
    %484 = vector.load %arg7[%c0_325, %c3_326, %c0_327, %c0_328] : memref<2x9x16x16xf32, #tpu.memory_space<vmem>>, vector<1x1x16x16xf32>
    %485 = vector.shape_cast %484 : vector<1x1x16x16xf32> to vector<16x16xf32>
    %cst_329 = arith.constant dense<0.000000e+00> : vector<64x16xf32>
    %486 = tpu.matmul %483, %485, %cst_329 {dimension_numbers = #tpu.dot_dimension_numbers<[1], [0], [0], [1], [0, 0, 1, 1], [], []>} : vector<64x16xf32>, vector<16x16xf32>, vector<64x16xf32> -> vector<64x16xf32>
    %487 = arith.addf %481, %486 : vector<64x16xf32>
    %c1_330 = arith.constant 1 : index
    %c1_331 = arith.constant 1 : index
    %c0_332 = arith.constant 0 : index
    %488 = vector.load %arg13[%c1_330, %c1_331, %c0_332] : memref<10x10x16xf32, #tpu.memory_space<vmem>>, vector<8x8x16xf32>
    %489 = vector.shape_cast %488 : vector<8x8x16xf32> to vector<64x16xf32>
    %c0_333 = arith.constant 0 : index
    %c4_334 = arith.constant 4 : index
    %c0_335 = arith.constant 0 : index
    %c0_336 = arith.constant 0 : index
    %490 = vector.load %arg7[%c0_333, %c4_334, %c0_335, %c0_336] : memref<2x9x16x16xf32, #tpu.memory_space<vmem>>, vector<1x1x16x16xf32>
    %491 = vector.shape_cast %490 : vector<1x1x16x16xf32> to vector<16x16xf32>
    %cst_337 = arith.constant dense<0.000000e+00> : vector<64x16xf32>
    %492 = tpu.matmul %489, %491, %cst_337 {dimension_numbers = #tpu.dot_dimension_numbers<[1], [0], [0], [1], [0, 0, 1, 1], [], []>} : vector<64x16xf32>, vector<16x16xf32>, vector<64x16xf32> -> vector<64x16xf32>
    %493 = arith.addf %487, %492 : vector<64x16xf32>
    %c1_338 = arith.constant 1 : index
    %c2_339 = arith.constant 2 : index
    %c0_340 = arith.constant 0 : index
    %494 = vector.load %arg13[%c1_338, %c2_339, %c0_340] : memref<10x10x16xf32, #tpu.memory_space<vmem>>, vector<8x8x16xf32>
    %495 = vector.shape_cast %494 : vector<8x8x16xf32> to vector<64x16xf32>
    %c0_341 = arith.constant 0 : index
    %c5_342 = arith.constant 5 : index
    %c0_343 = arith.constant 0 : index
    %c0_344 = arith.constant 0 : index
    %496 = vector.load %arg7[%c0_341, %c5_342, %c0_343, %c0_344] : memref<2x9x16x16xf32, #tpu.memory_space<vmem>>, vector<1x1x16x16xf32>
    %497 = vector.shape_cast %496 : vector<1x1x16x16xf32> to vector<16x16xf32>
    %cst_345 = arith.constant dense<0.000000e+00> : vector<64x16xf32>
    %498 = tpu.matmul %495, %497, %cst_345 {dimension_numbers = #tpu.dot_dimension_numbers<[1], [0], [0], [1], [0, 0, 1, 1], [], []>} : vector<64x16xf32>, vector<16x16xf32>, vector<64x16xf32> -> vector<64x16xf32>
    %499 = arith.addf %493, %498 : vector<64x16xf32>
    %c2_346 = arith.constant 2 : index
    %c0_347 = arith.constant 0 : index
    %c0_348 = arith.constant 0 : index
    %500 = vector.load %arg13[%c2_346, %c0_347, %c0_348] : memref<10x10x16xf32, #tpu.memory_space<vmem>>, vector<8x8x16xf32>
    %501 = vector.shape_cast %500 : vector<8x8x16xf32> to vector<64x16xf32>
    %c0_349 = arith.constant 0 : index
    %c6_350 = arith.constant 6 : index
    %c0_351 = arith.constant 0 : index
    %c0_352 = arith.constant 0 : index
    %502 = vector.load %arg7[%c0_349, %c6_350, %c0_351, %c0_352] : memref<2x9x16x16xf32, #tpu.memory_space<vmem>>, vector<1x1x16x16xf32>
    %503 = vector.shape_cast %502 : vector<1x1x16x16xf32> to vector<16x16xf32>
    %cst_353 = arith.constant dense<0.000000e+00> : vector<64x16xf32>
    %504 = tpu.matmul %501, %503, %cst_353 {dimension_numbers = #tpu.dot_dimension_numbers<[1], [0], [0], [1], [0, 0, 1, 1], [], []>} : vector<64x16xf32>, vector<16x16xf32>, vector<64x16xf32> -> vector<64x16xf32>
    %505 = arith.addf %499, %504 : vector<64x16xf32>
    %c2_354 = arith.constant 2 : index
    %c1_355 = arith.constant 1 : index
    %c0_356 = arith.constant 0 : index
    %506 = vector.load %arg13[%c2_354, %c1_355, %c0_356] : memref<10x10x16xf32, #tpu.memory_space<vmem>>, vector<8x8x16xf32>
    %507 = vector.shape_cast %506 : vector<8x8x16xf32> to vector<64x16xf32>
    %c0_357 = arith.constant 0 : index
    %c7_358 = arith.constant 7 : index
    %c0_359 = arith.constant 0 : index
    %c0_360 = arith.constant 0 : index
    %508 = vector.load %arg7[%c0_357, %c7_358, %c0_359, %c0_360] : memref<2x9x16x16xf32, #tpu.memory_space<vmem>>, vector<1x1x16x16xf32>
    %509 = vector.shape_cast %508 : vector<1x1x16x16xf32> to vector<16x16xf32>
    %cst_361 = arith.constant dense<0.000000e+00> : vector<64x16xf32>
    %510 = tpu.matmul %507, %509, %cst_361 {dimension_numbers = #tpu.dot_dimension_numbers<[1], [0], [0], [1], [0, 0, 1, 1], [], []>} : vector<64x16xf32>, vector<16x16xf32>, vector<64x16xf32> -> vector<64x16xf32>
    %511 = arith.addf %505, %510 : vector<64x16xf32>
    %c2_362 = arith.constant 2 : index
    %c2_363 = arith.constant 2 : index
    %c0_364 = arith.constant 0 : index
    %512 = vector.load %arg13[%c2_362, %c2_363, %c0_364] : memref<10x10x16xf32, #tpu.memory_space<vmem>>, vector<8x8x16xf32>
    %513 = vector.shape_cast %512 : vector<8x8x16xf32> to vector<64x16xf32>
    %c0_365 = arith.constant 0 : index
    %c8_366 = arith.constant 8 : index
    %c0_367 = arith.constant 0 : index
    %c0_368 = arith.constant 0 : index
    %514 = vector.load %arg7[%c0_365, %c8_366, %c0_367, %c0_368] : memref<2x9x16x16xf32, #tpu.memory_space<vmem>>, vector<1x1x16x16xf32>
    %515 = vector.shape_cast %514 : vector<1x1x16x16xf32> to vector<16x16xf32>
    %cst_369 = arith.constant dense<0.000000e+00> : vector<64x16xf32>
    %516 = tpu.matmul %513, %515, %cst_369 {dimension_numbers = #tpu.dot_dimension_numbers<[1], [0], [0], [1], [0, 0, 1, 1], [], []>} : vector<64x16xf32>, vector<16x16xf32>, vector<64x16xf32> -> vector<64x16xf32>
    %517 = arith.addf %511, %516 : vector<64x16xf32>
    %c0_370 = arith.constant 0 : index
    %c0_371 = arith.constant 0 : index
    %c0_372 = arith.constant 0 : index
    %518 = vector.load %arg8[%c0_370, %c0_371, %c0_372] : memref<2x1x16xf32, #tpu.memory_space<vmem>>, vector<1x1x16xf32>
    %519 = vector.shape_cast %518 : vector<1x1x16xf32> to vector<1x16xf32>
    %520 = vector.broadcast %519 : vector<1x16xf32> to vector<64x16xf32>
    %521 = arith.addf %517, %520 : vector<64x16xf32>
    %cst_373 = arith.constant 0.000000e+00 : f32
    %522 = vector.broadcast %cst_373 : f32 to vector<64x16xf32>
    %523 = arith.maximumf %521, %522 : vector<64x16xf32>
    %cst_374 = arith.constant 0.000000e+00 : f32
    %524 = vector.broadcast %cst_374 : f32 to vector<10x10x16xf32>
    %c0_375 = arith.constant 0 : index
    %c0_376 = arith.constant 0 : index
    %c0_377 = arith.constant 0 : index
    %525 = vector.load %arg13[%c0_375, %c0_376, %c0_377] : memref<10x10x16xf32, #tpu.memory_space<vmem>>, vector<10x10x16xf32>
    tpu.vector_store %arg13[%c0_375, %c0_376, %c0_377], %524 {strides = array<i32>} : memref<10x10x16xf32, #tpu.memory_space<vmem>>, vector<10x10x16xf32>,
    %526 = vector.shape_cast %523 : vector<64x16xf32> to vector<8x8x16xf32>
    %c1_378 = arith.constant 1 : index
    %c1_379 = arith.constant 1 : index
    %c0_380 = arith.constant 0 : index
    %527 = vector.load %arg13[%c1_378, %c1_379, %c0_380] : memref<10x10x16xf32, #tpu.memory_space<vmem>>, vector<8x8x16xf32>
    tpu.vector_store %arg13[%c1_378, %c1_379, %c0_380], %526 {strides = array<i32>} : memref<10x10x16xf32, #tpu.memory_space<vmem>>, vector<8x8x16xf32>,
    %cst_381 = arith.constant 0.000000e+00 : f32
    %528 = vector.broadcast %cst_381 : f32 to vector<64x16xf32>
    %c0_382 = arith.constant 0 : index
    %c0_383 = arith.constant 0 : index
    %c0_384 = arith.constant 0 : index
    %529 = vector.load %arg13[%c0_382, %c0_383, %c0_384] : memref<10x10x16xf32, #tpu.memory_space<vmem>>, vector<8x8x16xf32>
    %530 = vector.shape_cast %529 : vector<8x8x16xf32> to vector<64x16xf32>
    %c0_385 = arith.constant 0 : index
    %c0_386 = arith.constant 0 : index
    %c0_387 = arith.constant 0 : index
    %c0_388 = arith.constant 0 : index
    %531 = vector.load %arg9[%c0_385, %c0_386, %c0_387, %c0_388] : memref<2x9x16x16xf32, #tpu.memory_space<vmem>>, vector<1x1x16x16xf32>
    %532 = vector.shape_cast %531 : vector<1x1x16x16xf32> to vector<16x16xf32>
    %cst_389 = arith.constant dense<0.000000e+00> : vector<64x16xf32>
    %533 = tpu.matmul %530, %532, %cst_389 {dimension_numbers = #tpu.dot_dimension_numbers<[1], [0], [0], [1], [0, 0, 1, 1], [], []>} : vector<64x16xf32>, vector<16x16xf32>, vector<64x16xf32> -> vector<64x16xf32>
    %534 = arith.addf %528, %533 : vector<64x16xf32>
    %c0_390 = arith.constant 0 : index
    %c1_391 = arith.constant 1 : index
    %c0_392 = arith.constant 0 : index
    %535 = vector.load %arg13[%c0_390, %c1_391, %c0_392] : memref<10x10x16xf32, #tpu.memory_space<vmem>>, vector<8x8x16xf32>
    %536 = vector.shape_cast %535 : vector<8x8x16xf32> to vector<64x16xf32>
    %c0_393 = arith.constant 0 : index
    %c1_394 = arith.constant 1 : index
    %c0_395 = arith.constant 0 : index
    %c0_396 = arith.constant 0 : index
    %537 = vector.load %arg9[%c0_393, %c1_394, %c0_395, %c0_396] : memref<2x9x16x16xf32, #tpu.memory_space<vmem>>, vector<1x1x16x16xf32>
    %538 = vector.shape_cast %537 : vector<1x1x16x16xf32> to vector<16x16xf32>
    %cst_397 = arith.constant dense<0.000000e+00> : vector<64x16xf32>
    %539 = tpu.matmul %536, %538, %cst_397 {dimension_numbers = #tpu.dot_dimension_numbers<[1], [0], [0], [1], [0, 0, 1, 1], [], []>} : vector<64x16xf32>, vector<16x16xf32>, vector<64x16xf32> -> vector<64x16xf32>
    %540 = arith.addf %534, %539 : vector<64x16xf32>
    %c0_398 = arith.constant 0 : index
    %c2_399 = arith.constant 2 : index
    %c0_400 = arith.constant 0 : index
    %541 = vector.load %arg13[%c0_398, %c2_399, %c0_400] : memref<10x10x16xf32, #tpu.memory_space<vmem>>, vector<8x8x16xf32>
    %542 = vector.shape_cast %541 : vector<8x8x16xf32> to vector<64x16xf32>
    %c0_401 = arith.constant 0 : index
    %c2_402 = arith.constant 2 : index
    %c0_403 = arith.constant 0 : index
    %c0_404 = arith.constant 0 : index
    %543 = vector.load %arg9[%c0_401, %c2_402, %c0_403, %c0_404] : memref<2x9x16x16xf32, #tpu.memory_space<vmem>>, vector<1x1x16x16xf32>
    %544 = vector.shape_cast %543 : vector<1x1x16x16xf32> to vector<16x16xf32>
    %cst_405 = arith.constant dense<0.000000e+00> : vector<64x16xf32>
    %545 = tpu.matmul %542, %544, %cst_405 {dimension_numbers = #tpu.dot_dimension_numbers<[1], [0], [0], [1], [0, 0, 1, 1], [], []>} : vector<64x16xf32>, vector<16x16xf32>, vector<64x16xf32> -> vector<64x16xf32>
    %546 = arith.addf %540, %545 : vector<64x16xf32>
    %c1_406 = arith.constant 1 : index
    %c0_407 = arith.constant 0 : index
    %c0_408 = arith.constant 0 : index
    %547 = vector.load %arg13[%c1_406, %c0_407, %c0_408] : memref<10x10x16xf32, #tpu.memory_space<vmem>>, vector<8x8x16xf32>
    %548 = vector.shape_cast %547 : vector<8x8x16xf32> to vector<64x16xf32>
    %c0_409 = arith.constant 0 : index
    %c3_410 = arith.constant 3 : index
    %c0_411 = arith.constant 0 : index
    %c0_412 = arith.constant 0 : index
    %549 = vector.load %arg9[%c0_409, %c3_410, %c0_411, %c0_412] : memref<2x9x16x16xf32, #tpu.memory_space<vmem>>, vector<1x1x16x16xf32>
    %550 = vector.shape_cast %549 : vector<1x1x16x16xf32> to vector<16x16xf32>
    %cst_413 = arith.constant dense<0.000000e+00> : vector<64x16xf32>
    %551 = tpu.matmul %548, %550, %cst_413 {dimension_numbers = #tpu.dot_dimension_numbers<[1], [0], [0], [1], [0, 0, 1, 1], [], []>} : vector<64x16xf32>, vector<16x16xf32>, vector<64x16xf32> -> vector<64x16xf32>
    %552 = arith.addf %546, %551 : vector<64x16xf32>
    %c1_414 = arith.constant 1 : index
    %c1_415 = arith.constant 1 : index
    %c0_416 = arith.constant 0 : index
    %553 = vector.load %arg13[%c1_414, %c1_415, %c0_416] : memref<10x10x16xf32, #tpu.memory_space<vmem>>, vector<8x8x16xf32>
    %554 = vector.shape_cast %553 : vector<8x8x16xf32> to vector<64x16xf32>
    %c0_417 = arith.constant 0 : index
    %c4_418 = arith.constant 4 : index
    %c0_419 = arith.constant 0 : index
    %c0_420 = arith.constant 0 : index
    %555 = vector.load %arg9[%c0_417, %c4_418, %c0_419, %c0_420] : memref<2x9x16x16xf32, #tpu.memory_space<vmem>>, vector<1x1x16x16xf32>
    %556 = vector.shape_cast %555 : vector<1x1x16x16xf32> to vector<16x16xf32>
    %cst_421 = arith.constant dense<0.000000e+00> : vector<64x16xf32>
    %557 = tpu.matmul %554, %556, %cst_421 {dimension_numbers = #tpu.dot_dimension_numbers<[1], [0], [0], [1], [0, 0, 1, 1], [], []>} : vector<64x16xf32>, vector<16x16xf32>, vector<64x16xf32> -> vector<64x16xf32>
    %558 = arith.addf %552, %557 : vector<64x16xf32>
    %c1_422 = arith.constant 1 : index
    %c2_423 = arith.constant 2 : index
    %c0_424 = arith.constant 0 : index
    %559 = vector.load %arg13[%c1_422, %c2_423, %c0_424] : memref<10x10x16xf32, #tpu.memory_space<vmem>>, vector<8x8x16xf32>
    %560 = vector.shape_cast %559 : vector<8x8x16xf32> to vector<64x16xf32>
    %c0_425 = arith.constant 0 : index
    %c5_426 = arith.constant 5 : index
    %c0_427 = arith.constant 0 : index
    %c0_428 = arith.constant 0 : index
    %561 = vector.load %arg9[%c0_425, %c5_426, %c0_427, %c0_428] : memref<2x9x16x16xf32, #tpu.memory_space<vmem>>, vector<1x1x16x16xf32>
    %562 = vector.shape_cast %561 : vector<1x1x16x16xf32> to vector<16x16xf32>
    %cst_429 = arith.constant dense<0.000000e+00> : vector<64x16xf32>
    %563 = tpu.matmul %560, %562, %cst_429 {dimension_numbers = #tpu.dot_dimension_numbers<[1], [0], [0], [1], [0, 0, 1, 1], [], []>} : vector<64x16xf32>, vector<16x16xf32>, vector<64x16xf32> -> vector<64x16xf32>
    %564 = arith.addf %558, %563 : vector<64x16xf32>
    %c2_430 = arith.constant 2 : index
    %c0_431 = arith.constant 0 : index
    %c0_432 = arith.constant 0 : index
    %565 = vector.load %arg13[%c2_430, %c0_431, %c0_432] : memref<10x10x16xf32, #tpu.memory_space<vmem>>, vector<8x8x16xf32>
    %566 = vector.shape_cast %565 : vector<8x8x16xf32> to vector<64x16xf32>
    %c0_433 = arith.constant 0 : index
    %c6_434 = arith.constant 6 : index
    %c0_435 = arith.constant 0 : index
    %c0_436 = arith.constant 0 : index
    %567 = vector.load %arg9[%c0_433, %c6_434, %c0_435, %c0_436] : memref<2x9x16x16xf32, #tpu.memory_space<vmem>>, vector<1x1x16x16xf32>
    %568 = vector.shape_cast %567 : vector<1x1x16x16xf32> to vector<16x16xf32>
    %cst_437 = arith.constant dense<0.000000e+00> : vector<64x16xf32>
    %569 = tpu.matmul %566, %568, %cst_437 {dimension_numbers = #tpu.dot_dimension_numbers<[1], [0], [0], [1], [0, 0, 1, 1], [], []>} : vector<64x16xf32>, vector<16x16xf32>, vector<64x16xf32> -> vector<64x16xf32>
    %570 = arith.addf %564, %569 : vector<64x16xf32>
    %c2_438 = arith.constant 2 : index
    %c1_439 = arith.constant 1 : index
    %c0_440 = arith.constant 0 : index
    %571 = vector.load %arg13[%c2_438, %c1_439, %c0_440] : memref<10x10x16xf32, #tpu.memory_space<vmem>>, vector<8x8x16xf32>
    %572 = vector.shape_cast %571 : vector<8x8x16xf32> to vector<64x16xf32>
    %c0_441 = arith.constant 0 : index
    %c7_442 = arith.constant 7 : index
    %c0_443 = arith.constant 0 : index
    %c0_444 = arith.constant 0 : index
    %573 = vector.load %arg9[%c0_441, %c7_442, %c0_443, %c0_444] : memref<2x9x16x16xf32, #tpu.memory_space<vmem>>, vector<1x1x16x16xf32>
    %574 = vector.shape_cast %573 : vector<1x1x16x16xf32> to vector<16x16xf32>
    %cst_445 = arith.constant dense<0.000000e+00> : vector<64x16xf32>
    %575 = tpu.matmul %572, %574, %cst_445 {dimension_numbers = #tpu.dot_dimension_numbers<[1], [0], [0], [1], [0, 0, 1, 1], [], []>} : vector<64x16xf32>, vector<16x16xf32>, vector<64x16xf32> -> vector<64x16xf32>
    %576 = arith.addf %570, %575 : vector<64x16xf32>
    %c2_446 = arith.constant 2 : index
    %c2_447 = arith.constant 2 : index
    %c0_448 = arith.constant 0 : index
    %577 = vector.load %arg13[%c2_446, %c2_447, %c0_448] : memref<10x10x16xf32, #tpu.memory_space<vmem>>, vector<8x8x16xf32>
    %578 = vector.shape_cast %577 : vector<8x8x16xf32> to vector<64x16xf32>
    %c0_449 = arith.constant 0 : index
    %c8_450 = arith.constant 8 : index
    %c0_451 = arith.constant 0 : index
    %c0_452 = arith.constant 0 : index
    %579 = vector.load %arg9[%c0_449, %c8_450, %c0_451, %c0_452] : memref<2x9x16x16xf32, #tpu.memory_space<vmem>>, vector<1x1x16x16xf32>
    %580 = vector.shape_cast %579 : vector<1x1x16x16xf32> to vector<16x16xf32>
    %cst_453 = arith.constant dense<0.000000e+00> : vector<64x16xf32>
    %581 = tpu.matmul %578, %580, %cst_453 {dimension_numbers = #tpu.dot_dimension_numbers<[1], [0], [0], [1], [0, 0, 1, 1], [], []>} : vector<64x16xf32>, vector<16x16xf32>, vector<64x16xf32> -> vector<64x16xf32>
    %582 = arith.addf %576, %581 : vector<64x16xf32>
    %c0_454 = arith.constant 0 : index
    %c0_455 = arith.constant 0 : index
    %c0_456 = arith.constant 0 : index
    %583 = vector.load %arg10[%c0_454, %c0_455, %c0_456] : memref<2x1x16xf32, #tpu.memory_space<vmem>>, vector<1x1x16xf32>
    %584 = vector.shape_cast %583 : vector<1x1x16xf32> to vector<1x16xf32>
    %585 = vector.broadcast %584 : vector<1x16xf32> to vector<64x16xf32>
    %586 = arith.addf %582, %585 : vector<64x16xf32>
    %587 = arith.addf %586, %458 : vector<64x16xf32>
    %cst_457 = arith.constant 0.000000e+00 : f32
    %588 = vector.broadcast %cst_457 : f32 to vector<64x16xf32>
    %589 = arith.maximumf %587, %588 : vector<64x16xf32>
    %cst_458 = arith.constant 0.000000e+00 : f32
    %590 = vector.broadcast %cst_458 : f32 to vector<10x10x16xf32>
    %c0_459 = arith.constant 0 : index
    %c0_460 = arith.constant 0 : index
    %c0_461 = arith.constant 0 : index
    %591 = vector.load %arg13[%c0_459, %c0_460, %c0_461] : memref<10x10x16xf32, #tpu.memory_space<vmem>>, vector<10x10x16xf32>
    tpu.vector_store %arg13[%c0_459, %c0_460, %c0_461], %590 {strides = array<i32>} : memref<10x10x16xf32, #tpu.memory_space<vmem>>, vector<10x10x16xf32>,
    %592 = vector.shape_cast %589 : vector<64x16xf32> to vector<8x8x16xf32>
    %c1_462 = arith.constant 1 : index
    %c1_463 = arith.constant 1 : index
    %c0_464 = arith.constant 0 : index
    %593 = vector.load %arg13[%c1_462, %c1_463, %c0_464] : memref<10x10x16xf32, #tpu.memory_space<vmem>>, vector<8x8x16xf32>
    tpu.vector_store %arg13[%c1_462, %c1_463, %c0_464], %592 {strides = array<i32>} : memref<10x10x16xf32, #tpu.memory_space<vmem>>, vector<8x8x16xf32>,
    %cst_465 = arith.constant 0.000000e+00 : f32
    %594 = vector.broadcast %cst_465 : f32 to vector<64x16xf32>
    %c0_466 = arith.constant 0 : index
    %c0_467 = arith.constant 0 : index
    %c0_468 = arith.constant 0 : index
    %595 = vector.load %arg13[%c0_466, %c0_467, %c0_468] : memref<10x10x16xf32, #tpu.memory_space<vmem>>, vector<8x8x16xf32>
    %596 = vector.shape_cast %595 : vector<8x8x16xf32> to vector<64x16xf32>
    %c1_469 = arith.constant 1 : index
    %c0_470 = arith.constant 0 : index
    %c0_471 = arith.constant 0 : index
    %c0_472 = arith.constant 0 : index
    %597 = vector.load %arg7[%c1_469, %c0_470, %c0_471, %c0_472] : memref<2x9x16x16xf32, #tpu.memory_space<vmem>>, vector<1x1x16x16xf32>
    %598 = vector.shape_cast %597 : vector<1x1x16x16xf32> to vector<16x16xf32>
    %cst_473 = arith.constant dense<0.000000e+00> : vector<64x16xf32>
    %599 = tpu.matmul %596, %598, %cst_473 {dimension_numbers = #tpu.dot_dimension_numbers<[1], [0], [0], [1], [0, 0, 1, 1], [], []>} : vector<64x16xf32>, vector<16x16xf32>, vector<64x16xf32> -> vector<64x16xf32>
    %600 = arith.addf %594, %599 : vector<64x16xf32>
    %c0_474 = arith.constant 0 : index
    %c1_475 = arith.constant 1 : index
    %c0_476 = arith.constant 0 : index
    %601 = vector.load %arg13[%c0_474, %c1_475, %c0_476] : memref<10x10x16xf32, #tpu.memory_space<vmem>>, vector<8x8x16xf32>
    %602 = vector.shape_cast %601 : vector<8x8x16xf32> to vector<64x16xf32>
    %c1_477 = arith.constant 1 : index
    %c1_478 = arith.constant 1 : index
    %c0_479 = arith.constant 0 : index
    %c0_480 = arith.constant 0 : index
    %603 = vector.load %arg7[%c1_477, %c1_478, %c0_479, %c0_480] : memref<2x9x16x16xf32, #tpu.memory_space<vmem>>, vector<1x1x16x16xf32>
    %604 = vector.shape_cast %603 : vector<1x1x16x16xf32> to vector<16x16xf32>
    %cst_481 = arith.constant dense<0.000000e+00> : vector<64x16xf32>
    %605 = tpu.matmul %602, %604, %cst_481 {dimension_numbers = #tpu.dot_dimension_numbers<[1], [0], [0], [1], [0, 0, 1, 1], [], []>} : vector<64x16xf32>, vector<16x16xf32>, vector<64x16xf32> -> vector<64x16xf32>
    %606 = arith.addf %600, %605 : vector<64x16xf32>
    %c0_482 = arith.constant 0 : index
    %c2_483 = arith.constant 2 : index
    %c0_484 = arith.constant 0 : index
    %607 = vector.load %arg13[%c0_482, %c2_483, %c0_484] : memref<10x10x16xf32, #tpu.memory_space<vmem>>, vector<8x8x16xf32>
    %608 = vector.shape_cast %607 : vector<8x8x16xf32> to vector<64x16xf32>
    %c1_485 = arith.constant 1 : index
    %c2_486 = arith.constant 2 : index
    %c0_487 = arith.constant 0 : index
    %c0_488 = arith.constant 0 : index
    %609 = vector.load %arg7[%c1_485, %c2_486, %c0_487, %c0_488] : memref<2x9x16x16xf32, #tpu.memory_space<vmem>>, vector<1x1x16x16xf32>
    %610 = vector.shape_cast %609 : vector<1x1x16x16xf32> to vector<16x16xf32>
    %cst_489 = arith.constant dense<0.000000e+00> : vector<64x16xf32>
    %611 = tpu.matmul %608, %610, %cst_489 {dimension_numbers = #tpu.dot_dimension_numbers<[1], [0], [0], [1], [0, 0, 1, 1], [], []>} : vector<64x16xf32>, vector<16x16xf32>, vector<64x16xf32> -> vector<64x16xf32>
    %612 = arith.addf %606, %611 : vector<64x16xf32>
    %c1_490 = arith.constant 1 : index
    %c0_491 = arith.constant 0 : index
    %c0_492 = arith.constant 0 : index
    %613 = vector.load %arg13[%c1_490, %c0_491, %c0_492] : memref<10x10x16xf32, #tpu.memory_space<vmem>>, vector<8x8x16xf32>
    %614 = vector.shape_cast %613 : vector<8x8x16xf32> to vector<64x16xf32>
    %c1_493 = arith.constant 1 : index
    %c3_494 = arith.constant 3 : index
    %c0_495 = arith.constant 0 : index
    %c0_496 = arith.constant 0 : index
    %615 = vector.load %arg7[%c1_493, %c3_494, %c0_495, %c0_496] : memref<2x9x16x16xf32, #tpu.memory_space<vmem>>, vector<1x1x16x16xf32>
    %616 = vector.shape_cast %615 : vector<1x1x16x16xf32> to vector<16x16xf32>
    %cst_497 = arith.constant dense<0.000000e+00> : vector<64x16xf32>
    %617 = tpu.matmul %614, %616, %cst_497 {dimension_numbers = #tpu.dot_dimension_numbers<[1], [0], [0], [1], [0, 0, 1, 1], [], []>} : vector<64x16xf32>, vector<16x16xf32>, vector<64x16xf32> -> vector<64x16xf32>
    %618 = arith.addf %612, %617 : vector<64x16xf32>
    %c1_498 = arith.constant 1 : index
    %c1_499 = arith.constant 1 : index
    %c0_500 = arith.constant 0 : index
    %619 = vector.load %arg13[%c1_498, %c1_499, %c0_500] : memref<10x10x16xf32, #tpu.memory_space<vmem>>, vector<8x8x16xf32>
    %620 = vector.shape_cast %619 : vector<8x8x16xf32> to vector<64x16xf32>
    %c1_501 = arith.constant 1 : index
    %c4_502 = arith.constant 4 : index
    %c0_503 = arith.constant 0 : index
    %c0_504 = arith.constant 0 : index
    %621 = vector.load %arg7[%c1_501, %c4_502, %c0_503, %c0_504] : memref<2x9x16x16xf32, #tpu.memory_space<vmem>>, vector<1x1x16x16xf32>
    %622 = vector.shape_cast %621 : vector<1x1x16x16xf32> to vector<16x16xf32>
    %cst_505 = arith.constant dense<0.000000e+00> : vector<64x16xf32>
    %623 = tpu.matmul %620, %622, %cst_505 {dimension_numbers = #tpu.dot_dimension_numbers<[1], [0], [0], [1], [0, 0, 1, 1], [], []>} : vector<64x16xf32>, vector<16x16xf32>, vector<64x16xf32> -> vector<64x16xf32>
    %624 = arith.addf %618, %623 : vector<64x16xf32>
    %c1_506 = arith.constant 1 : index
    %c2_507 = arith.constant 2 : index
    %c0_508 = arith.constant 0 : index
    %625 = vector.load %arg13[%c1_506, %c2_507, %c0_508] : memref<10x10x16xf32, #tpu.memory_space<vmem>>, vector<8x8x16xf32>
    %626 = vector.shape_cast %625 : vector<8x8x16xf32> to vector<64x16xf32>
    %c1_509 = arith.constant 1 : index
    %c5_510 = arith.constant 5 : index
    %c0_511 = arith.constant 0 : index
    %c0_512 = arith.constant 0 : index
    %627 = vector.load %arg7[%c1_509, %c5_510, %c0_511, %c0_512] : memref<2x9x16x16xf32, #tpu.memory_space<vmem>>, vector<1x1x16x16xf32>
    %628 = vector.shape_cast %627 : vector<1x1x16x16xf32> to vector<16x16xf32>
    %cst_513 = arith.constant dense<0.000000e+00> : vector<64x16xf32>
    %629 = tpu.matmul %626, %628, %cst_513 {dimension_numbers = #tpu.dot_dimension_numbers<[1], [0], [0], [1], [0, 0, 1, 1], [], []>} : vector<64x16xf32>, vector<16x16xf32>, vector<64x16xf32> -> vector<64x16xf32>
    %630 = arith.addf %624, %629 : vector<64x16xf32>
    %c2_514 = arith.constant 2 : index
    %c0_515 = arith.constant 0 : index
    %c0_516 = arith.constant 0 : index
    %631 = vector.load %arg13[%c2_514, %c0_515, %c0_516] : memref<10x10x16xf32, #tpu.memory_space<vmem>>, vector<8x8x16xf32>
    %632 = vector.shape_cast %631 : vector<8x8x16xf32> to vector<64x16xf32>
    %c1_517 = arith.constant 1 : index
    %c6_518 = arith.constant 6 : index
    %c0_519 = arith.constant 0 : index
    %c0_520 = arith.constant 0 : index
    %633 = vector.load %arg7[%c1_517, %c6_518, %c0_519, %c0_520] : memref<2x9x16x16xf32, #tpu.memory_space<vmem>>, vector<1x1x16x16xf32>
    %634 = vector.shape_cast %633 : vector<1x1x16x16xf32> to vector<16x16xf32>
    %cst_521 = arith.constant dense<0.000000e+00> : vector<64x16xf32>
    %635 = tpu.matmul %632, %634, %cst_521 {dimension_numbers = #tpu.dot_dimension_numbers<[1], [0], [0], [1], [0, 0, 1, 1], [], []>} : vector<64x16xf32>, vector<16x16xf32>, vector<64x16xf32> -> vector<64x16xf32>
    %636 = arith.addf %630, %635 : vector<64x16xf32>
    %c2_522 = arith.constant 2 : index
    %c1_523 = arith.constant 1 : index
    %c0_524 = arith.constant 0 : index
    %637 = vector.load %arg13[%c2_522, %c1_523, %c0_524] : memref<10x10x16xf32, #tpu.memory_space<vmem>>, vector<8x8x16xf32>
    %638 = vector.shape_cast %637 : vector<8x8x16xf32> to vector<64x16xf32>
    %c1_525 = arith.constant 1 : index
    %c7_526 = arith.constant 7 : index
    %c0_527 = arith.constant 0 : index
    %c0_528 = arith.constant 0 : index
    %639 = vector.load %arg7[%c1_525, %c7_526, %c0_527, %c0_528] : memref<2x9x16x16xf32, #tpu.memory_space<vmem>>, vector<1x1x16x16xf32>
    %640 = vector.shape_cast %639 : vector<1x1x16x16xf32> to vector<16x16xf32>
    %cst_529 = arith.constant dense<0.000000e+00> : vector<64x16xf32>
    %641 = tpu.matmul %638, %640, %cst_529 {dimension_numbers = #tpu.dot_dimension_numbers<[1], [0], [0], [1], [0, 0, 1, 1], [], []>} : vector<64x16xf32>, vector<16x16xf32>, vector<64x16xf32> -> vector<64x16xf32>
    %642 = arith.addf %636, %641 : vector<64x16xf32>
    %c2_530 = arith.constant 2 : index
    %c2_531 = arith.constant 2 : index
    %c0_532 = arith.constant 0 : index
    %643 = vector.load %arg13[%c2_530, %c2_531, %c0_532] : memref<10x10x16xf32, #tpu.memory_space<vmem>>, vector<8x8x16xf32>
    %644 = vector.shape_cast %643 : vector<8x8x16xf32> to vector<64x16xf32>
    %c1_533 = arith.constant 1 : index
    %c8_534 = arith.constant 8 : index
    %c0_535 = arith.constant 0 : index
    %c0_536 = arith.constant 0 : index
    %645 = vector.load %arg7[%c1_533, %c8_534, %c0_535, %c0_536] : memref<2x9x16x16xf32, #tpu.memory_space<vmem>>, vector<1x1x16x16xf32>
    %646 = vector.shape_cast %645 : vector<1x1x16x16xf32> to vector<16x16xf32>
    %cst_537 = arith.constant dense<0.000000e+00> : vector<64x16xf32>
    %647 = tpu.matmul %644, %646, %cst_537 {dimension_numbers = #tpu.dot_dimension_numbers<[1], [0], [0], [1], [0, 0, 1, 1], [], []>} : vector<64x16xf32>, vector<16x16xf32>, vector<64x16xf32> -> vector<64x16xf32>
    %648 = arith.addf %642, %647 : vector<64x16xf32>
    %c1_538 = arith.constant 1 : index
    %c0_539 = arith.constant 0 : index
    %c0_540 = arith.constant 0 : index
    %649 = vector.load %arg8[%c1_538, %c0_539, %c0_540] : memref<2x1x16xf32, #tpu.memory_space<vmem>>, vector<1x1x16xf32>
    %650 = vector.shape_cast %649 : vector<1x1x16xf32> to vector<1x16xf32>
    %651 = vector.broadcast %650 : vector<1x16xf32> to vector<64x16xf32>
    %652 = arith.addf %648, %651 : vector<64x16xf32>
    %cst_541 = arith.constant 0.000000e+00 : f32
    %653 = vector.broadcast %cst_541 : f32 to vector<64x16xf32>
    %654 = arith.maximumf %652, %653 : vector<64x16xf32>
    %cst_542 = arith.constant 0.000000e+00 : f32
    %655 = vector.broadcast %cst_542 : f32 to vector<10x10x16xf32>
    %c0_543 = arith.constant 0 : index
    %c0_544 = arith.constant 0 : index
    %c0_545 = arith.constant 0 : index
    %656 = vector.load %arg13[%c0_543, %c0_544, %c0_545] : memref<10x10x16xf32, #tpu.memory_space<vmem>>, vector<10x10x16xf32>
    tpu.vector_store %arg13[%c0_543, %c0_544, %c0_545], %655 {strides = array<i32>} : memref<10x10x16xf32, #tpu.memory_space<vmem>>, vector<10x10x16xf32>,
    %657 = vector.shape_cast %654 : vector<64x16xf32> to vector<8x8x16xf32>
    %c1_546 = arith.constant 1 : index
    %c1_547 = arith.constant 1 : index
    %c0_548 = arith.constant 0 : index
    %658 = vector.load %arg13[%c1_546, %c1_547, %c0_548] : memref<10x10x16xf32, #tpu.memory_space<vmem>>, vector<8x8x16xf32>
    tpu.vector_store %arg13[%c1_546, %c1_547, %c0_548], %657 {strides = array<i32>} : memref<10x10x16xf32, #tpu.memory_space<vmem>>, vector<8x8x16xf32>,
    %cst_549 = arith.constant 0.000000e+00 : f32
    %659 = vector.broadcast %cst_549 : f32 to vector<64x16xf32>
    %c0_550 = arith.constant 0 : index
    %c0_551 = arith.constant 0 : index
    %c0_552 = arith.constant 0 : index
    %660 = vector.load %arg13[%c0_550, %c0_551, %c0_552] : memref<10x10x16xf32, #tpu.memory_space<vmem>>, vector<8x8x16xf32>
    %661 = vector.shape_cast %660 : vector<8x8x16xf32> to vector<64x16xf32>
    %c1_553 = arith.constant 1 : index
    %c0_554 = arith.constant 0 : index
    %c0_555 = arith.constant 0 : index
    %c0_556 = arith.constant 0 : index
    %662 = vector.load %arg9[%c1_553, %c0_554, %c0_555, %c0_556] : memref<2x9x16x16xf32, #tpu.memory_space<vmem>>, vector<1x1x16x16xf32>
    %663 = vector.shape_cast %662 : vector<1x1x16x16xf32> to vector<16x16xf32>
    %cst_557 = arith.constant dense<0.000000e+00> : vector<64x16xf32>
    %664 = tpu.matmul %661, %663, %cst_557 {dimension_numbers = #tpu.dot_dimension_numbers<[1], [0], [0], [1], [0, 0, 1, 1], [], []>} : vector<64x16xf32>, vector<16x16xf32>, vector<64x16xf32> -> vector<64x16xf32>
    %665 = arith.addf %659, %664 : vector<64x16xf32>
    %c0_558 = arith.constant 0 : index
    %c1_559 = arith.constant 1 : index
    %c0_560 = arith.constant 0 : index
    %666 = vector.load %arg13[%c0_558, %c1_559, %c0_560] : memref<10x10x16xf32, #tpu.memory_space<vmem>>, vector<8x8x16xf32>
    %667 = vector.shape_cast %666 : vector<8x8x16xf32> to vector<64x16xf32>
    %c1_561 = arith.constant 1 : index
    %c1_562 = arith.constant 1 : index
    %c0_563 = arith.constant 0 : index
    %c0_564 = arith.constant 0 : index
    %668 = vector.load %arg9[%c1_561, %c1_562, %c0_563, %c0_564] : memref<2x9x16x16xf32, #tpu.memory_space<vmem>>, vector<1x1x16x16xf32>
    %669 = vector.shape_cast %668 : vector<1x1x16x16xf32> to vector<16x16xf32>
    %cst_565 = arith.constant dense<0.000000e+00> : vector<64x16xf32>
    %670 = tpu.matmul %667, %669, %cst_565 {dimension_numbers = #tpu.dot_dimension_numbers<[1], [0], [0], [1], [0, 0, 1, 1], [], []>} : vector<64x16xf32>, vector<16x16xf32>, vector<64x16xf32> -> vector<64x16xf32>
    %671 = arith.addf %665, %670 : vector<64x16xf32>
    %c0_566 = arith.constant 0 : index
    %c2_567 = arith.constant 2 : index
    %c0_568 = arith.constant 0 : index
    %672 = vector.load %arg13[%c0_566, %c2_567, %c0_568] : memref<10x10x16xf32, #tpu.memory_space<vmem>>, vector<8x8x16xf32>
    %673 = vector.shape_cast %672 : vector<8x8x16xf32> to vector<64x16xf32>
    %c1_569 = arith.constant 1 : index
    %c2_570 = arith.constant 2 : index
    %c0_571 = arith.constant 0 : index
    %c0_572 = arith.constant 0 : index
    %674 = vector.load %arg9[%c1_569, %c2_570, %c0_571, %c0_572] : memref<2x9x16x16xf32, #tpu.memory_space<vmem>>, vector<1x1x16x16xf32>
    %675 = vector.shape_cast %674 : vector<1x1x16x16xf32> to vector<16x16xf32>
    %cst_573 = arith.constant dense<0.000000e+00> : vector<64x16xf32>
    %676 = tpu.matmul %673, %675, %cst_573 {dimension_numbers = #tpu.dot_dimension_numbers<[1], [0], [0], [1], [0, 0, 1, 1], [], []>} : vector<64x16xf32>, vector<16x16xf32>, vector<64x16xf32> -> vector<64x16xf32>
    %677 = arith.addf %671, %676 : vector<64x16xf32>
    %c1_574 = arith.constant 1 : index
    %c0_575 = arith.constant 0 : index
    %c0_576 = arith.constant 0 : index
    %678 = vector.load %arg13[%c1_574, %c0_575, %c0_576] : memref<10x10x16xf32, #tpu.memory_space<vmem>>, vector<8x8x16xf32>
    %679 = vector.shape_cast %678 : vector<8x8x16xf32> to vector<64x16xf32>
    %c1_577 = arith.constant 1 : index
    %c3_578 = arith.constant 3 : index
    %c0_579 = arith.constant 0 : index
    %c0_580 = arith.constant 0 : index
    %680 = vector.load %arg9[%c1_577, %c3_578, %c0_579, %c0_580] : memref<2x9x16x16xf32, #tpu.memory_space<vmem>>, vector<1x1x16x16xf32>
    %681 = vector.shape_cast %680 : vector<1x1x16x16xf32> to vector<16x16xf32>
    %cst_581 = arith.constant dense<0.000000e+00> : vector<64x16xf32>
    %682 = tpu.matmul %679, %681, %cst_581 {dimension_numbers = #tpu.dot_dimension_numbers<[1], [0], [0], [1], [0, 0, 1, 1], [], []>} : vector<64x16xf32>, vector<16x16xf32>, vector<64x16xf32> -> vector<64x16xf32>
    %683 = arith.addf %677, %682 : vector<64x16xf32>
    %c1_582 = arith.constant 1 : index
    %c1_583 = arith.constant 1 : index
    %c0_584 = arith.constant 0 : index
    %684 = vector.load %arg13[%c1_582, %c1_583, %c0_584] : memref<10x10x16xf32, #tpu.memory_space<vmem>>, vector<8x8x16xf32>
    %685 = vector.shape_cast %684 : vector<8x8x16xf32> to vector<64x16xf32>
    %c1_585 = arith.constant 1 : index
    %c4_586 = arith.constant 4 : index
    %c0_587 = arith.constant 0 : index
    %c0_588 = arith.constant 0 : index
    %686 = vector.load %arg9[%c1_585, %c4_586, %c0_587, %c0_588] : memref<2x9x16x16xf32, #tpu.memory_space<vmem>>, vector<1x1x16x16xf32>
    %687 = vector.shape_cast %686 : vector<1x1x16x16xf32> to vector<16x16xf32>
    %cst_589 = arith.constant dense<0.000000e+00> : vector<64x16xf32>
    %688 = tpu.matmul %685, %687, %cst_589 {dimension_numbers = #tpu.dot_dimension_numbers<[1], [0], [0], [1], [0, 0, 1, 1], [], []>} : vector<64x16xf32>, vector<16x16xf32>, vector<64x16xf32> -> vector<64x16xf32>
    %689 = arith.addf %683, %688 : vector<64x16xf32>
    %c1_590 = arith.constant 1 : index
    %c2_591 = arith.constant 2 : index
    %c0_592 = arith.constant 0 : index
    %690 = vector.load %arg13[%c1_590, %c2_591, %c0_592] : memref<10x10x16xf32, #tpu.memory_space<vmem>>, vector<8x8x16xf32>
    %691 = vector.shape_cast %690 : vector<8x8x16xf32> to vector<64x16xf32>
    %c1_593 = arith.constant 1 : index
    %c5_594 = arith.constant 5 : index
    %c0_595 = arith.constant 0 : index
    %c0_596 = arith.constant 0 : index
    %692 = vector.load %arg9[%c1_593, %c5_594, %c0_595, %c0_596] : memref<2x9x16x16xf32, #tpu.memory_space<vmem>>, vector<1x1x16x16xf32>
    %693 = vector.shape_cast %692 : vector<1x1x16x16xf32> to vector<16x16xf32>
    %cst_597 = arith.constant dense<0.000000e+00> : vector<64x16xf32>
    %694 = tpu.matmul %691, %693, %cst_597 {dimension_numbers = #tpu.dot_dimension_numbers<[1], [0], [0], [1], [0, 0, 1, 1], [], []>} : vector<64x16xf32>, vector<16x16xf32>, vector<64x16xf32> -> vector<64x16xf32>
    %695 = arith.addf %689, %694 : vector<64x16xf32>
    %c2_598 = arith.constant 2 : index
    %c0_599 = arith.constant 0 : index
    %c0_600 = arith.constant 0 : index
    %696 = vector.load %arg13[%c2_598, %c0_599, %c0_600] : memref<10x10x16xf32, #tpu.memory_space<vmem>>, vector<8x8x16xf32>
    %697 = vector.shape_cast %696 : vector<8x8x16xf32> to vector<64x16xf32>
    %c1_601 = arith.constant 1 : index
    %c6_602 = arith.constant 6 : index
    %c0_603 = arith.constant 0 : index
    %c0_604 = arith.constant 0 : index
    %698 = vector.load %arg9[%c1_601, %c6_602, %c0_603, %c0_604] : memref<2x9x16x16xf32, #tpu.memory_space<vmem>>, vector<1x1x16x16xf32>
    %699 = vector.shape_cast %698 : vector<1x1x16x16xf32> to vector<16x16xf32>
    %cst_605 = arith.constant dense<0.000000e+00> : vector<64x16xf32>
    %700 = tpu.matmul %697, %699, %cst_605 {dimension_numbers = #tpu.dot_dimension_numbers<[1], [0], [0], [1], [0, 0, 1, 1], [], []>} : vector<64x16xf32>, vector<16x16xf32>, vector<64x16xf32> -> vector<64x16xf32>
    %701 = arith.addf %695, %700 : vector<64x16xf32>
    %c2_606 = arith.constant 2 : index
    %c1_607 = arith.constant 1 : index
    %c0_608 = arith.constant 0 : index
    %702 = vector.load %arg13[%c2_606, %c1_607, %c0_608] : memref<10x10x16xf32, #tpu.memory_space<vmem>>, vector<8x8x16xf32>
    %703 = vector.shape_cast %702 : vector<8x8x16xf32> to vector<64x16xf32>
    %c1_609 = arith.constant 1 : index
    %c7_610 = arith.constant 7 : index
    %c0_611 = arith.constant 0 : index
    %c0_612 = arith.constant 0 : index
    %704 = vector.load %arg9[%c1_609, %c7_610, %c0_611, %c0_612] : memref<2x9x16x16xf32, #tpu.memory_space<vmem>>, vector<1x1x16x16xf32>
    %705 = vector.shape_cast %704 : vector<1x1x16x16xf32> to vector<16x16xf32>
    %cst_613 = arith.constant dense<0.000000e+00> : vector<64x16xf32>
    %706 = tpu.matmul %703, %705, %cst_613 {dimension_numbers = #tpu.dot_dimension_numbers<[1], [0], [0], [1], [0, 0, 1, 1], [], []>} : vector<64x16xf32>, vector<16x16xf32>, vector<64x16xf32> -> vector<64x16xf32>
    %707 = arith.addf %701, %706 : vector<64x16xf32>
    %c2_614 = arith.constant 2 : index
    %c2_615 = arith.constant 2 : index
    %c0_616 = arith.constant 0 : index
    %708 = vector.load %arg13[%c2_614, %c2_615, %c0_616] : memref<10x10x16xf32, #tpu.memory_space<vmem>>, vector<8x8x16xf32>
    %709 = vector.shape_cast %708 : vector<8x8x16xf32> to vector<64x16xf32>
    %c1_617 = arith.constant 1 : index
    %c8_618 = arith.constant 8 : index
    %c0_619 = arith.constant 0 : index
    %c0_620 = arith.constant 0 : index
    %710 = vector.load %arg9[%c1_617, %c8_618, %c0_619, %c0_620] : memref<2x9x16x16xf32, #tpu.memory_space<vmem>>, vector<1x1x16x16xf32>
    %711 = vector.shape_cast %710 : vector<1x1x16x16xf32> to vector<16x16xf32>
    %cst_621 = arith.constant dense<0.000000e+00> : vector<64x16xf32>
    %712 = tpu.matmul %709, %711, %cst_621 {dimension_numbers = #tpu.dot_dimension_numbers<[1], [0], [0], [1], [0, 0, 1, 1], [], []>} : vector<64x16xf32>, vector<16x16xf32>, vector<64x16xf32> -> vector<64x16xf32>
    %713 = arith.addf %707, %712 : vector<64x16xf32>
    %c1_622 = arith.constant 1 : index
    %c0_623 = arith.constant 0 : index
    %c0_624 = arith.constant 0 : index
    %714 = vector.load %arg10[%c1_622, %c0_623, %c0_624] : memref<2x1x16xf32, #tpu.memory_space<vmem>>, vector<1x1x16xf32>
    %715 = vector.shape_cast %714 : vector<1x1x16xf32> to vector<1x16xf32>
    %716 = vector.broadcast %715 : vector<1x16xf32> to vector<64x16xf32>
    %717 = arith.addf %713, %716 : vector<64x16xf32>
    %718 = arith.addf %717, %589 : vector<64x16xf32>
    %cst_625 = arith.constant 0.000000e+00 : f32
    %719 = vector.broadcast %cst_625 : f32 to vector<64x16xf32>
    %720 = arith.maximumf %718, %719 : vector<64x16xf32>
    %c0_626 = arith.constant 0 : index
    %c0_627 = arith.constant 0 : index
    %c0_628 = arith.constant 0 : index
    %721 = vector.load %arg11[%c0_626, %c0_627, %c0_628] : memref<1x64x16xf32, #tpu.memory_space<vmem>>, vector<1x64x16xf32>
    %722 = vector.shape_cast %721 : vector<1x64x16xf32> to vector<64x16xf32>
    %723 = vector.shape_cast %720 : vector<64x16xf32> to vector<1x64x16xf32>
    tpu.vector_store %arg11[%c0_626, %c0_627, %c0_628], %723 {strides = array<i32>} : memref<1x64x16xf32, #tpu.memory_space<vmem>>, vector<1x64x16xf32>,
    return
  }
  func.func @transform_0(%arg0: i32) -> (i32, i32, i32, i32) {
    %c0_i32 = arith.constant 0 : i32
    %c0_i32_0 = arith.constant 0 : i32
    %c0_i32_1 = arith.constant 0 : i32
    %c0_i32_2 = arith.constant 0 : i32
    return %arg0, %c0_i32, %c0_i32_0, %c0_i32_1 : i32, i32, i32, i32
  }
  func.func @transform_1(%arg0: i32) -> (i32, i32, i32, i32) {
    %c0_i32 = arith.constant 0 : i32
    %c0_i32_0 = arith.constant 0 : i32
    %c0_i32_1 = arith.constant 0 : i32
    %c0_i32_2 = arith.constant 0 : i32
    return %arg0, %c0_i32, %c0_i32_0, %c0_i32_1 : i32, i32, i32, i32
  }
  func.func @transform_2(%arg0: i32) -> (i32, i32) {
    %c0_i32 = arith.constant 0 : i32
    %c0_i32_0 = arith.constant 0 : i32
    %c0_i32_1 = arith.constant 0 : i32
    return %c0_i32, %c0_i32_0 : i32, i32
  }
  func.func @transform_3(%arg0: i32) -> (i32, i32) {
    %c0_i32 = arith.constant 0 : i32
    %c0_i32_0 = arith.constant 0 : i32
    %c0_i32_1 = arith.constant 0 : i32
    return %c0_i32, %c0_i32_0 : i32, i32
  }
  func.func @transform_4(%arg0: i32) -> (i32, i32) {
    %c0_i32 = arith.constant 0 : i32
    %c0_i32_0 = arith.constant 0 : i32
    %c0_i32_1 = arith.constant 0 : i32
    return %c0_i32, %c0_i32_0 : i32, i32
  }
  func.func @transform_5(%arg0: i32) -> (i32, i32) {
    %c0_i32 = arith.constant 0 : i32
    %c0_i32_0 = arith.constant 0 : i32
    %c0_i32_1 = arith.constant 0 : i32
    return %c0_i32, %c0_i32_0 : i32, i32
  }
  func.func @transform_6(%arg0: i32) -> (i32, i32, i32, i32) {
    %c0_i32 = arith.constant 0 : i32
    %c0_i32_0 = arith.constant 0 : i32
    %c0_i32_1 = arith.constant 0 : i32
    %c0_i32_2 = arith.constant 0 : i32
    %c0_i32_3 = arith.constant 0 : i32
    return %c0_i32, %c0_i32_0, %c0_i32_1, %c0_i32_2 : i32, i32, i32, i32
  }
  func.func @transform_7(%arg0: i32) -> (i32, i32, i32) {
    %c0_i32 = arith.constant 0 : i32
    %c0_i32_0 = arith.constant 0 : i32
    %c0_i32_1 = arith.constant 0 : i32
    %c0_i32_2 = arith.constant 0 : i32
    return %c0_i32, %c0_i32_0, %c0_i32_1 : i32, i32, i32
  }
  func.func @transform_8(%arg0: i32) -> (i32, i32, i32, i32) {
    %c0_i32 = arith.constant 0 : i32
    %c0_i32_0 = arith.constant 0 : i32
    %c0_i32_1 = arith.constant 0 : i32
    %c0_i32_2 = arith.constant 0 : i32
    %c0_i32_3 = arith.constant 0 : i32
    return %c0_i32, %c0_i32_0, %c0_i32_1, %c0_i32_2 : i32, i32, i32, i32
  }
  func.func @transform_9(%arg0: i32) -> (i32, i32, i32) {
    %c0_i32 = arith.constant 0 : i32
    %c0_i32_0 = arith.constant 0 : i32
    %c0_i32_1 = arith.constant 0 : i32
    %c0_i32_2 = arith.constant 0 : i32
    return %c0_i32, %c0_i32_0, %c0_i32_1 : i32, i32, i32
  }
  func.func @transform_10(%arg0: i32) -> (i32, i32, i32) {
    %c0_i32 = arith.constant 0 : i32
    %c0_i32_0 = arith.constant 0 : i32
    %c0_i32_1 = arith.constant 0 : i32
    return %arg0, %c0_i32, %c0_i32_0 : i32, i32, i32
  }
}

</mosaic_0001>

<bundles_post_ra>
// kernel: tpu_custom_call.1
= control target key start
LH: loop header
LB: loop body
LE: loop exit
PB: predicated region body
PF: predicated region fallthrough
CT: control target
= control target key end

     0   :  { %s12655_s0 = inlined_call_operand.hbm [shape: f32[2,16,8,32], index: 0, kind: input, shape index: {}]   ;;  %s12656_s1 = inlined_call_operand.hbm [shape: f32[2,16,8,32], index: 1, kind: input, shape index: {}]   ;;  %s12657_s2 = inlined_call_operand.vmem [shape: f32[32,2], index: 2, kind: input, shape index: {}]   ;;  %s12658_s3 = inlined_call_operand.vmem [shape: f32[2,32], index: 3, kind: input, shape index: {}]   ;;  %s12659_s4 = inlined_call_operand.vmem [shape: f32[49,2], index: 4, kind: input, shape index: {}]   ;;  %s12660_s5 = inlined_call_operand.vmem [shape: f32[32,16], index: 5, kind: input, shape index: {}]   ;;  %s12661_s6 = inlined_call_operand.hbm [shape: f32[2,9,16,16], index: 6, kind: input, shape index: {}]   ;;  %s12662_s7 = inlined_call_operand.vmem [shape: f32[2,1,16], index: 7, kind: input, shape index: {}]   ;;  %s12663_s8 = inlined_call_operand.hbm [shape: f32[2,9,16,16], index: 8, kind: input, shape index: {}]   ;;  %s12664_s9 = inlined_call_operand.vmem [shape: f32[2,1,16], index: 9, kind: input, shape index: {}]   ;;  %s12665_s10 = inlined_call_operand.vmem [shape: f32[2,64,16], index: 10, kind: output, shape index: {}]  }
   0x1   :  { %12699 = sst [smem:[#allocation232_spill]] %s12655_s0 }
   0x2   :  { %12700 = sst [smem:[#allocation233_spill]] %s12661_s6 }
   0x3   :  { %12701 = sst [smem:[#allocation234_spill]] %s12663_s8 }
   0x4   :  { %15 = vsyncpa [#allocation5], 0 }
   0x5   :  { %17 = vsyncpa [#allocation5 + $0x1], 0 }
   0x6   :  { %18 = vsyncpa [#allocation7], 0 }
   0x7   :  { %20 = vsyncpa [#allocation7 + $0x1], 0 }
   0x8   :  { %21 = vsyncpa [#allocation10], 0  ;;  %s7851_s13 = smov 0   ;;  %s7853_s14 = smov 0  }
   0x9   :  { %s7855_s15 = smov 0   ;;  %s7857_s16 = smov 0  }
   0xa LB: > { %12702 = sst [smem:[#allocation15_spill]] %s7781_s15  ;;  %s7870_s17 = sadd.s32 4294967295, %s7785_s16   ;;  %s7785_s16 = sphi %s7857_s16, %s13173_s16   ;;  %s7781_s15 = sphi %s7855_s15, %s13170_s15   ;;  %s7777_s14 = sphi %s7853_s14, %s13172_s14   ;;  %s7773_s13 = sphi %s7851_s13, %s13171_s13  }
   0xb   : > { %p47_p0 = scmp.ne.s32.totalorder %s7777_s14, %s7773_s13  ;;  %p48_p1 = scmp.eq.s32.totalorder %s7870_s17, 0 }
   0xc   : > { %p7007_p2 = scmp.ge.s32.totalorder %s7785_s16, 1  ;;  %p278_p3 = scmp.lt.s32.totalorder %s7785_s16, 3 }
   0xd   : > { %p7878_p4 = por %p48_p1, %p47_p0  ;;  %s12704_s6 = sld [smem:[#allocation233_spill]] }
   0xe   : > { %p7885_p5 = pnand %p7007_p2, %p278_p3  ;;  %s7787_s23 = smov [#allocation8]  }
   0xf   : > { %s303_s24 = sshll.u32 %s7787_s23, 4  ;;  %s12706_s8 = sld [smem:[#allocation234_spill]]  ;;  %s304_s24 = int_to_ptr.vmem [resolvable:$true] %s303_s24 }
  0x10   : > { %p7362_p6 = pneg %p7885_p5  ;;  %s12666_s28 = smov 128  }
  0x11   : > { %s12668_s29 = smov 8   ;;  %s7790_s30 = smov [#allocation9]  }
  0x12   : > { %p7363_p7 = pnand %p7362_p6, %p48_p1  ;;  %s320_s11 = sshll.u32 %s7790_s30, 4  ;;  %s321_s11 = int_to_ptr.vmem [resolvable:$true] %s320_s11 }
  0x13   : > { %s301_s21 = sshll.u32 %s12704_s6, 4  ;;  %s7903_s12 = sadd.s32 1, %s7785_s16   ;;  %s302_s21 = int_to_ptr.hbm [resolvable:$true] %s301_s21 }
  0x14   : > { %7365 = dma.hbm_to_vmem [thread:$0]  (!%p7363_p7), %s302_s21, 4608, %s304_s24, [#allocation7], %s12666_s28, %s12666_s28, %s12668_s29  }
  0x15   : > { %s318_s27 = sshll.u32 %s12706_s8, 4  ;;  %s34_s13 = sadd.s32 1, %s7781_s15  ;;  %s319_s27 = int_to_ptr.hbm [resolvable:$true] %s318_s27 }
  0x16   : > { %7368 = dma.hbm_to_vmem [thread:$0]  (!%p7363_p7), %s319_s27, 4608, %s321_s11, [#allocation10], %s12666_s28, %s12666_s28, %s12668_s29  }
  0x17   : > { %s31_s19 = ssub.s32 %s7785_s16, %s7903_s12  ;;  %p41_p8 = scmp.ne.s32.totalorder %s7781_s15, %s7777_s14 }
  0x18   : > { %p32_p9 = scmp.eq.s32.totalorder %s31_s19, 0  ;;  %p42_p10 = scmp.eq.s32.totalorder %s7785_s16, 0 }
  0x19   : > { %p7378_p11 = scmp.lt.s32.totalorder %s7785_s16, 2  ;;  %s337_s20 = sand.u32 1, %s7781_s15  }
  0x1a   : > { %s7914_s23 = scalar_select %p32_p9, %s7781_s15, %s34_s13  }
  0x1b   : > { %p43_p12 = por %p42_p10, %p41_p8  ;;  %s7011_s21 = sshll.u32 %s337_s20, 7 }
  0x1c   : > { %12707 = sst [smem:[#allocation16_spill]] %s7914_s23  ;;  %s7339_s24 = sshll.u32 %s7785_s16, 7 }
  0x1d   : > { %s12708_s0 = sld [smem:[#allocation232_spill]]  ;;  %s341_s11 = scalar_lea.vmem [#allocation4], %s7011_s21 }
  0x1e   : > { %s349_s28 = sshll.u32 %s341_s11, 4  ;;  %p7920_p13 = pnand %p7378_p11, %p43_p12  ;;  %s350_s28 = int_to_ptr.vmem [resolvable:$true] %s349_s28 }
  0x1f   : > { %s368_s13 = scalar_lea.hbm %s12656_s1, %s7339_s24  ;;  %s363_s8 = scalar_lea.vmem [#allocation6], %s7011_s21 }
  0x20   : > { %s7927_s23 = sshll.u32 %s363_s8, 4  ;;  %s369_s25 = sshll.u32 %s368_s13, 4  ;;  %s370_s25 = int_to_ptr.hbm [resolvable:$true] %s369_s25  ;;  %s372_s23 = int_to_ptr.vmem [resolvable:$true] %s7927_s23 }
  0x21   : > { %s338_s26 = scalar_lea.sflag [#allocation5], %s337_s20  ;;  %p7683_p2 = pneg %p7920_p13 }
  0x23   : > { %s346_s30 = scalar_lea.hbm %s12708_s0, %s7339_s24  ;;  %s7686_s19 = scalar_lea.hbm %s12708_s0, 256 }
  0x24   : > { %s347_s27 = sshll.u32 %s346_s30, 4  ;;  %s348_s27 = int_to_ptr.hbm [resolvable:$true] %s347_s27 }
  0x25   : > { %s7679_s30 = sshra.s32 %s348_s27, 4  ;;  %s7680_s30 = int_to_ptr.hbm [resolvable:$true] %s7679_s30 }
  0x26   : > { %s7681_s11 = scalar_lea.hbm %s7680_s30, 128  ;;  %p7687_p7 = scmp.lt.s32.totalorder %s7680_s30, %s12708_s0 }
  0x27   : > { %p7682_p0 = scmp.ne.s32.totalorder %s7680_s30, %s7681_s11  ;;  %p7688_p8 = scmp.lt.s32.totalorder %s7686_s19, %s7681_s11 }
  0x29   : > { %p7684_p3 = pnand %p7683_p2, %p7682_p0  ;;  %p7689_p9 = por %p7688_p8, %p7687_p7 }
  0x2b   : > { %p7685_p6 = pneg %p7684_p3 }
  0x2d   : > { %p7690_p10 = pnand %p7689_p9, %p7685_p6 }
  0x2f   : > { %7693 = shalt.err (!%p7690_p10)
}
  0x30   : > { %s12710_s8 = smov 8   ;;  %s12711_s20 = smov 128  }
  0x31   : > { %7372 = dma.hbm_to_vmem [thread:$0]  (!%p7920_p13), %s348_s27, 2048, %s350_s28, %s338_s26, %s12711_s20, %s12711_s20, %s12710_s8  }
  0x32   : > { %s359_s15 = sand.u32 1, %s7785_s16   ;;  %s7709_s6 = sshra.s32 %s370_s25, 4  ;;  %s7710_s6 = int_to_ptr.hbm [resolvable:$true] %s7709_s6 }
  0x33   : > { %s360_s13 = scalar_lea.sflag [#allocation7], %s359_s15  ;;  %s7711_s30 = scalar_lea.hbm %s7710_s6, 128 }
  0x34   : > { %p7712_p11 = scmp.ne.s32.totalorder %s7710_s6, %s7711_s30  ;;  %s7716_s24 = scalar_lea.hbm %s12656_s1, 256 }
  0x35   : > { %p7717_p3 = scmp.lt.s32.totalorder %s7710_s6, %s12656_s1  ;;  %p7718_p6 = scmp.lt.s32.totalorder %s7716_s24, %s7711_s30 }
  0x36   : > { %p7714_p12 = pnand %p7712_p11, %p7683_p2 }
  0x37   : > { %p7719_p7 = por %p7718_p6, %p7717_p3 }
  0x38   : > { %p7715_p0 = pneg %p7714_p12 }
  0x3a   : > { %p7720_p8 = pnand %p7719_p7, %p7715_p0 }
  0x3c   : > { %7723 = shalt.err (!%p7720_p8)
}
  0x3d   : > { %7375 = dma.hbm_to_vmem [thread:$0]  (!%p7920_p13), %s370_s25, 2048, %s372_s23, %s360_s13, %s12711_s20, %s12711_s20, %s12710_s8  }
  0x3e   : > { %383 = sbr.rel (%p7885_p5) target bundleno = 3037 (0xbdd), region = 60 }
  0x43   : > { %s385_s16 = sand.u32 1, %s7777_s14  }
  0x44   : > { %s7018_s28 = sshll.u32 %s385_s16, 7  ;;  %s386_s27 = scalar_lea.sflag [#allocation5], %s385_s16 }
  0x45   : > { %s7964_s0 = scalar_lea.vmem [#allocation4], %s7018_s28 }
  0x46   : > { %7756 = dma.done.wait (%p7878_p4), %s386_s27, 2048  }
  0x47   : > { %7758 = vsyncadd (%p7878_p4), %s386_s27, 4294965248  ;;  %s395_s29 = sand.u32 1, %s7870_s17   ;;  %s7971_s23 = scalar_lea.vmem [#allocation6], %s7018_s28 }
  0x48   : > { %s396_s26 = scalar_lea.sflag [#allocation7], %s395_s29 }
  0x49   : > { %7760 = dma.done.wait (%p7878_p4), %s396_s26, 2048  }
  0x4a   : > { %7762 = vsyncadd (%p7878_p4), %s396_s26, 4294965248 }
  0x4b   : > { %7764 = dma.done.wait (%p48_p1), [#allocation7], 4608  }
  0x4c   : > { %7766 = vsyncadd (%p48_p1), [#allocation7], 4294962688 }
  0x4d   : > { %7768 = dma.done.wait (%p48_p1), [#allocation10], 4608  }
  0x4e   : > { %7770 = vsyncadd (%p48_p1), [#allocation10], 4294962688  ;;  %v7986_v0 = vld [vmem:[%s7971_s23 + $0x20] sm:$0xff]  ;;  %v7989_v1 = vld [vmem:[%s7971_s23 + $0x10] sm:$0xff]  ;;  %s7791_s18 = smov 112   ;;  %vm845_vm0 = vcmask 15360  }
  0x4f   : > { %v7992_v2 = vld [vmem:[%s7971_s23] sm:$0xff]  ;;  %618 = vrot.lane.b32.xlu2 %v7986_v0, %s7791_s18  ;;  %614 = vrot.lane.b32.xlu1 %v7989_v1, %s7791_s18  ;;  %v8001_v3 = vld [vmem:[%s7971_s23 + $0x28] sm:$0xff]  ;;  %vm997_vm1 = vcmask 13312   ;;  %v12671_v27 = vmov 0.0   ;;  %vm553_vm2 = vcmask 130048   ;;  %s7793_s16 = smov 16  }
  0x50   : > { %610 = vrot.lane.b32.xlu0 %v7992_v2, %s7791_s18  ;;  %v8004_v4 = vld [vmem:[%s7971_s23 + $0x18] sm:$0xff]  ;;  %v8007_v5 = vld [vmem:[%s7971_s23 + $0x8] sm:$0xff]  ;;  %v8016_v6 = vld [vmem:[%s7971_s23 + $0x40] sm:$0xff]  ;;  %996 = vst.msk [vmem:[#allocation2] sm:$0xff] %vm845_vm0, %v12671_v27  ;;  %vm738_vm3 = vcmask 261120   ;;  %vm849_vm5 = vcmask 1041408  }
  0x51   : > { %v8019_v7 = vld [vmem:[%s7971_s23 + $0x38] sm:$0xff]  ;;  %v8022_v8 = vld [vmem:[%s7971_s23 + $0x30] sm:$0xff]  ;;  %v8037_v11 = vld [vmem:[%s7971_s23 + $0x48] sm:$0xff]  ;;  %998 = vst.msk [vmem:[#allocation2 + $0x8] sm:$0x3f] %vm997_vm1, %v12671_v27  ;;  %vm987_vm11 = vcmask 7168  }
  0x52   : > { %v8031_v9 = vld [vmem:[%s7971_s23 + $0x58] sm:$0xff]  ;;  %v8034_v10 = vld [vmem:[%s7971_s23 + $0x50] sm:$0xff]  ;;  %v8049_v13 = vld [vmem:[%s7971_s23 + $0x68] sm:$0xff]  ;;  %1010 = vst.msk [vmem:[#allocation2 + $0x68] sm:$0x3f] %vm997_vm1, %v12671_v27  ;;  %p452_p1 = scmp.lt.s32.totalorder %s7870_s17, 1 }
  0x53   : > { %v8046_v12 = vld [vmem:[%s7971_s23 + $0x70] sm:$0xff]  ;;  %v8052_v14 = vld [vmem:[%s7971_s23 + $0x60] sm:$0xff]  ;;  %v8061_v15 = vld [vmem:[%s7964_s0 + $0x8] sm:$0xff]  ;;  %1012 = vst.msk [vmem:[#allocation2 + $0x78] sm:$0x3f] %vm997_vm1, %v12671_v27 }
  0x54   : > { %v8064_v16 = vld [vmem:[%s7964_s0] sm:$0xff]  ;;  %v8067_v17 = vld [vmem:[%s7971_s23 + $0x78] sm:$0xff]  ;;  %v8082_v20 = vld [vmem:[%s7964_s0 + $0x10] sm:$0xff]  ;;  %999 = vst.msk [vmem:[#allocation2 + $0x10] sm:$0xff] %vm845_vm0, %v12671_v27  ;;  %s13175_s17 = smov (!%p452_p1, %s7870_s17), 1 }
  0x55   : > { %v8076_v18 = vld [vmem:[%s7964_s0 + $0x20] sm:$0xff]  ;;  %v8079_v19 = vld [vmem:[%s7964_s0 + $0x18] sm:$0xff]  ;;  %v8094_v22 = vld [vmem:[%s7964_s0 + $0x30] sm:$0xff]  ;;  %1000 = vst.msk [vmem:[#allocation2 + $0x18] sm:$0x3f] %vm997_vm1, %v12671_v27  ;;  %s7341_s20 = sshll.u32 %s13175_s17, 6 }
  0x56   : > { %v8091_v21 = vld [vmem:[%s7964_s0 + $0x38] sm:$0xff]  ;;  %v8097_v23 = vld [vmem:[%s7964_s0 + $0x28] sm:$0xff]  ;;  %v8106_v24 = vld [vmem:[%s7964_s0 + $0x50] sm:$0xff]  ;;  %1001 = vst.msk [vmem:[#allocation2 + $0x20] sm:$0xff] %vm845_vm0, %v12671_v27  ;;  %s12582_s6 = scalar_lea.vmem %s12665_s10, %s7341_s20 }
  0x57   : > { %620 = vrot.lane.b32.xlu2 %v8001_v3, %s7791_s18  ;;  %616 = vrot.lane.b32.xlu1 %v8004_v4, %s7791_s18  ;;  %v8109_v25 = vld [vmem:[%s7964_s0 + $0x48] sm:$0xff]  ;;  %v8112_v26 = vld [vmem:[%s7964_s0 + $0x40] sm:$0xff]  ;;  %1002 = vst.msk [vmem:[#allocation2 + $0x28] sm:$0x3f] %vm997_vm1, %v12671_v27 }
  0x58   : > { %612 = vrot.lane.b32.xlu0 %v8007_v5, %s7791_s18  ;;  %v8135_v28 = vld [vmem:[%s7964_s0 + $0x68] sm:$0xff]  ;;  %v8138_v29 = vld [vmem:[%s7964_s0 + $0x60] sm:$0xff]  ;;  %v8143_v30 = vld [vmem:[%s7964_s0 + $0x58] sm:$0xff]  ;;  %1003 = vst.msk [vmem:[#allocation2 + $0x30] sm:$0xff] %vm845_vm0, %v12671_v27 }
  0x59   : > { %1004 = vst.msk [vmem:[#allocation2 + $0x38] sm:$0x3f] %vm997_vm1, %v12671_v27  ;;  %v8166_v31 = vld [vmem:[%s7964_s0 + $0x78] sm:$0xff]  ;;  %v8171_v32 = vld [vmem:[%s7964_s0 + $0x70] sm:$0xff]  ;;  %v8224_v33 = vld [vmem:[%s12659_s4 + $0x4] ss:$0 sm:$0xff] }
  0x5a   : > { %1005 = vst.msk [vmem:[#allocation2 + $0x40] sm:$0xff] %vm845_vm0, %v12671_v27  ;;  %v1234_v34 = vld [vmem:[#allocation2 + $0x4] sm:$0xff]  ;;  %v8236_v39 = vld [vmem:[%s12659_s4 + $0x1] ss:$0 sm:$0xff]  ;;  %v8241_v40 = vld [vmem:[%s12659_s4] ss:$0 sm:$0xff] }
  0x5b   : > { %1006 = vst.msk [vmem:[#allocation2 + $0x48] sm:$0x3f] %vm997_vm1, %v12671_v27  ;;  %v1244_v35 = vmul.f32 %v8224_v33, %v1234_v34  ;;  %v8231_v37 = vld [vmem:[%s12659_s4 + $0x5] ss:$0 sm:$0xff]  ;;  %v8251_v50 = vld [vmem:[%s12659_s4 + $0x3] ss:$0 sm:$0xff] }
  0x5c   : > { %1007 = vst.msk [vmem:[#allocation2 + $0x50] sm:$0xff] %vm845_vm0, %v12671_v27  ;;  %v1284_v38 = vld [vmem:[#allocation2 + $0x5] sm:$0xff]  ;;  %v8257_v52 = vld [vmem:[%s12659_s4 + $0x2] ss:$0 sm:$0xff]  ;;  %v8263_v62 = vld [vmem:[#allocation2 + $0x11] sm:$0xff] }
  0x5d   : > { %1008 = vst.msk [vmem:[#allocation2 + $0x58] sm:$0x3f] %vm997_vm1, %v12671_v27  ;;  %v1252_v36 = vsel %vm845_vm0, %v1244_v35, 0.0  ;;  %v1084_v41 = vld [vmem:[#allocation2 + $0x1] sm:$0xff]  ;;  %v1294_v44 = vmul.f32 %v8231_v37, %v1284_v38  ;;  %v8265_v63 = vld [vmem:[#allocation2 + $0x10] sm:$0xff] }
  0x5e   : > { %1009 = vst.msk [vmem:[#allocation2 + $0x60] sm:$0xff] %vm845_vm0, %v12671_v27  ;;  %v1034_v42 = vld [vmem:[#allocation2] sm:$0xff]  ;;  %v1094_v46 = vmul.f32 %v8236_v39, %v1084_v41  ;;  %v1045_v38 = vmul.f32 %v8241_v40, %v8265_v63 }
  0x5f   : > { %626 = vrot.lane.b32.xlu2 %v8016_v6, %s7791_s18  ;;  %624 = vrot.lane.b32.xlu1 %v8019_v7, %s7791_s18  ;;  %1011 = vst.msk [vmem:[#allocation2 + $0x70] sm:$0xff] %vm845_vm0, %v12671_v27  ;;  %v1044_v47 = vmul.f32 %v8241_v40, %v1034_v42  ;;  %v1302_v48 = vsel %vm845_vm0, %v1294_v44, 0.0  ;;  %v1184_v53 = vld [vmem:[#allocation2 + $0x3] sm:$0xff] }
  0x60   : > { %622 = vrot.lane.b32.xlu0 %v8022_v8, %s7791_s18  ;;  %1013 = vst.msk [vmem:[#allocation2 + $0x80] sm:$0xff] %vm845_vm0, %v12671_v27  ;;  %v1102_v49 = vsel %vm845_vm0, %v1094_v46, 0.0  ;;  %v1134_v54 = vld [vmem:[#allocation2 + $0x2] sm:$0xff]  ;;  %v1194_v57 = vmul.f32 %v8251_v50, %v1184_v53  ;;  %v1055_v44 = vsel %vm845_vm0, %v1045_v38, 0.0 }
  0x61   : > { %1014 = vst.msk [vmem:[#allocation2 + $0x88] sm:$0x3f] %vm997_vm1, %v12671_v27  ;;  %v1052_v51 = vsel %vm845_vm0, %v1044_v47, 0.0  ;;  %v1144_v58 = vmul.f32 %v8257_v52, %v1134_v54 }
  0x62   : > { %1015 = vst.msk [vmem:[#allocation2 + $0x90] sm:$0xff] %vm845_vm0, %v12671_v27  ;;  %v1202_v60 = vsel %vm845_vm0, %v1194_v57, 0.0 }
  0x63   : > { %1016 = vst.msk [vmem:[#allocation2 + $0x98] sm:$0x3f] %vm997_vm1, %v12671_v27  ;;  %v1152_v61 = vsel %vm845_vm0, %v1144_v58, 0.0 }
  0x64   : > { %1017 = vst.msk [vmem:[#allocation2 + $0xa0] sm:$0xff] %vm845_vm0, %v12671_v27 }
  0x65   : > { %1018 = vst.msk [vmem:[#allocation2 + $0xa8] sm:$0x3f] %vm997_vm1, %v12671_v27 }
  0x66   : > { %1019 = vst.msk [vmem:[#allocation2 + $0xb0] sm:$0xff] %vm845_vm0, %v12671_v27 }
  0x67   : > { %632 = vrot.lane.b32.xlu2 %v8031_v9, %s7791_s18  ;;  %630 = vrot.lane.b32.xlu1 %v8034_v10, %s7791_s18  ;;  %1020 = vst.msk [vmem:[#allocation2 + $0xb8] sm:$0x3f] %vm997_vm1, %v12671_v27 }
  0x68   : > { %628 = vrot.lane.b32.xlu0 %v8037_v11, %s7791_s18  ;;  %1021 = vst.msk [vmem:[#allocation2 + $0xc0] sm:$0xff] %vm845_vm0, %v12671_v27 }
  0x69   : > { %1022 = vst.msk [vmem:[#allocation2 + $0xc8] sm:$0x3f] %vm997_vm1, %v12671_v27 }
  0x6a   : > { %1023 = vst.msk [vmem:[#allocation2 + $0xd0] sm:$0xff] %vm845_vm0, %v12671_v27 }
  0x6b   : > { %1024 = vst.msk [vmem:[#allocation2 + $0xd8] sm:$0x3f] %vm997_vm1, %v12671_v27 }
  0x6c   : > { %3718 = vst.msk [vmem:[#allocation3] sm:$0xff] %vm553_vm2, %v12671_v27 }
  0x6d   : > { %3721 = vst.msk [vmem:[#allocation3 + $0x10] sm:$0xff] %vm553_vm2, %v12671_v27 }
  0x6e   : > { %3723 = vst.msk [vmem:[#allocation3 + $0x20] sm:$0xff] %vm553_vm2, %v12671_v27 }
  0x6f   : > { %638 = vrot.lane.b32.xlu2 %v8046_v12, %s7791_s18  ;;  %636 = vrot.lane.b32.xlu1 %v8049_v13, %s7791_s18  ;;  %3725 = vst.msk [vmem:[#allocation3 + $0x30] sm:$0xff] %vm553_vm2, %v12671_v27 }
  0x70   : > { %634 = vrot.lane.b32.xlu0 %v8052_v14, %s7791_s18  ;;  %3727 = vst.msk [vmem:[#allocation3 + $0x40] sm:$0xff] %vm553_vm2, %v12671_v27 }
  0x71   : > { %3729 = vst.msk [vmem:[#allocation3 + $0x50] sm:$0xff] %vm553_vm2, %v12671_v27 }
  0x72   : > { %3731 = vst.msk [vmem:[#allocation3 + $0x60] sm:$0xff] %vm553_vm2, %v12671_v27 }
  0x73   : > { %3733 = vst.msk [vmem:[#allocation3 + $0x70] sm:$0xff] %vm553_vm2, %v12671_v27 }
  0x74   : > { %3735 = vst.msk [vmem:[#allocation3 + $0x80] sm:$0xff] %vm553_vm2, %v12671_v27 }
  0x75   : > { %3737 = vst.msk [vmem:[#allocation3 + $0x90] sm:$0xff] %vm553_vm2, %v12671_v27 }
  0x77   : > { %491 = vrot.lane.b32.xlu2 %v8061_v15, %s7791_s18  ;;  %489 = vrot.lane.b32.xlu1 %v8064_v16, %s7791_s18 }
  0x78   : > { %640 = vrot.lane.b32.xlu0 %v8067_v17, %s7791_s18 }
  0x7f   : > { %497 = vrot.lane.b32.xlu2 %v8076_v18, %s7791_s18  ;;  %495 = vrot.lane.b32.xlu1 %v8079_v19, %s7791_s18 }
  0x80   : > { %493 = vrot.lane.b32.xlu0 %v8082_v20, %s7791_s18 }
  0x87   : > { %503 = vrot.lane.b32.xlu2 %v8091_v21, %s7791_s18  ;;  %501 = vrot.lane.b32.xlu1 %v8094_v22, %s7791_s18 }
  0x88   : > { %499 = vrot.lane.b32.xlu0 %v8097_v23, %s7791_s18 }
  0x8f   : > { %509 = vrot.lane.b32.xlu2 %v8106_v24, %s7791_s18  ;;  %507 = vrot.lane.b32.xlu1 %v8109_v25, %s7791_s18 }
  0x90   : > { %505 = vrot.lane.b32.xlu0 %v8112_v26, %s7791_s18 }
  0x97   : > { %515 = vrot.lane.b32.xlu2 %v8135_v28, %s7791_s18  ;;  %513 = vrot.lane.b32.xlu1 %v8138_v29, %s7791_s18 }
  0x98   : > { %511 = vrot.lane.b32.xlu0 %v8143_v30, %s7791_s18 }
  0x9f   : > { %519 = vrot.lane.b32.xlu1 %v8166_v31, %s7791_s18 }
  0xa0   : > { %517 = vrot.lane.b32.xlu0 %v8171_v32, %s7791_s18 }
  0xa9   : > { %v619_v59 = vpop.permute.xlu2 %618 }
  0xb1   : > { %v621_v46 = vpop.permute.xlu2 %620 }
  0xc0   : > { %1253 = vadd.xlane.f32.xlu2 %v1252_v36  ;;  %v1095_v36 = vmul.f32 %v8236_v39, %v8263_v62 }
  0xc1   : > { %v615_v43 = vpop.permute.xlu1 %614 }
  0xc2   : > { %v611_v45 = vpop.permute.xlu0 %610  ;;  %v1105_v41 = vsel %vm845_vm0, %v1095_v36, 0.0  ;;  %v660_v38 = vmax.f32 %v7989_v1, %v615_v43 }
  0xc3   : > { %v658_v47 = vmax.f32 %v7992_v2, %v611_v45 }
  0xc5   : > { %v674_v53 = vsel %vm553_vm2, %v658_v47, -inf }
  0xc8   : > { %1303 = vadd.xlane.f32.xlu2 %v1302_v48 }
  0xc9   : > { %v617_v55 = vpop.permute.xlu1 %616  ;;  %1103 = vadd.xlane.f32.xlu1 %v1102_v49 }
  0xca   : > { %v613_v56 = vpop.permute.xlu0 %612  ;;  %1053 = vadd.xlane.f32.xlu0 %v1052_v51 }
  0xcb   : > { %v659_v42 = vmax.f32 %v8007_v5, %v613_v56 }
  0xcd   : > { %v675_v51 = vsel %vm553_vm2, %v659_v42, -inf }
  0xce   : > { %v676_v54 = vmax.f32 %v674_v53, %v675_v51 }
  0xd1   : > { %v625_v34 = vpop.permute.xlu1 %624  ;;  %1203 = vadd.xlane.f32.xlu1 %v1202_v60  ;;  %v627_v60 = vpop.permute.xlu2 %626 }
  0xd2   : > { %v623_v35 = vpop.permute.xlu0 %622  ;;  %1153 = vadd.xlane.f32.xlu0 %v1152_v61  ;;  %v665_v57 = vmax.f32 %v8019_v7, %v625_v34  ;;  %v661_v61 = vmax.f32 %v8004_v4, %v617_v55  ;;  %v663_v34 = vmax.f32 %v8001_v3, %v621_v46  ;;  %v666_v3 = vmax.f32 %v8016_v6, %v627_v60 }
  0xd3   : > { %v664_v58 = vmax.f32 %v8022_v8, %v623_v35  ;;  %v662_v8 = vmax.f32 %v7986_v0, %v619_v59 }
  0xd4   : > { %v684_v5 = vsel %vm553_vm2, %v665_v57, -inf  ;;  %v678_v35 = vsel %vm553_vm2, %v661_v61, -inf }
  0xd5   : > { %v683_v2 = vsel %vm553_vm2, %v664_v58, -inf }
  0xd6   : > { %v685_v36 = vmax.f32 %v683_v2, %v684_v5 }
  0xd9   : > { %1106 = vadd.xlane.f32.xlu1 %v1105_v41  ;;  %v631_v48 = vpop.permute.xlu1 %630  ;;  %v633_v42 = vpop.permute.xlu2 %632 }
  0xda   : > { %v629_v49 = vpop.permute.xlu0 %628  ;;  %1056 = vadd.xlane.f32.xlu0 %v1055_v44  ;;  %v677_v44 = vsel %vm553_vm2, %v660_v38, -inf  ;;  %v668_v46 = vmax.f32 %v8034_v10, %v631_v48  ;;  %v669_v51 = vmax.f32 %v8031_v9, %v633_v42 }
  0xdb   : > { %v679_v1 = vmax.f32 %v677_v44, %v678_v35  ;;  %v667_v43 = vmax.f32 %v8037_v11, %v629_v49  ;;  %v8336_v44 = vld [vmem:[#allocation2 + $0x20] sm:$0xff] }
  0xdc   : > { %v689_v57 = vsel %vm553_vm2, %v668_v46, -inf  ;;  %v690_v6 = vsel %vm553_vm2, %v669_v51, -inf  ;;  %v8357_v46 = vld [vmem:[%s12659_s4 + $0x6] ss:$0 sm:$0xff] }
  0xdd   : > { %v687_v47 = vsel %vm553_vm2, %v667_v43, -inf  ;;  %v691_v48 = vmax.f32 %v689_v57, %v690_v6  ;;  %v1334_v51 = vld [vmem:[#allocation2 + $0x6] sm:$0xff] }
  0xe0   : > { %706 = vrot.lane.b32.xlu2 %v676_v54, %s7793_s16  ;;  %v686_v54 = vsel %vm553_vm2, %v666_v3, -inf }
  0xe1   : > { %v637_v45 = vpop.permute.xlu1 %636  ;;  %v639_v11 = vpop.permute.xlu2 %638  ;;  %v688_v49 = vmax.f32 %v686_v54, %v687_v47 }
  0xe2   : > { %v635_v56 = vpop.permute.xlu0 %634  ;;  %v671_v41 = vmax.f32 %v8049_v13, %v637_v45  ;;  %v680_v13 = vsel %vm553_vm2, %v662_v8, -inf  ;;  %v672_v10 = vmax.f32 %v8046_v12, %v639_v11  ;;  %v1135_v45 = vld [vmem:[#allocation2 + $0x12] sm:$0xff]  ;;  %v1344_v11 = vmul.f32 %v8357_v46, %v1334_v51 }
  0xe3   : > { %v670_v7 = vmax.f32 %v8052_v14, %v635_v56  ;;  %v681_v14 = vsel %vm553_vm2, %v663_v34, -inf }
  0xe4   : > { %v693_v4 = vsel %vm553_vm2, %v671_v41, -inf  ;;  %v682_v59 = vmax.f32 %v680_v13, %v681_v14  ;;  %v695_v60 = vsel %vm553_vm2, %v672_v10, -inf  ;;  %v8345_v14 = vld [vmem:[#allocation2 + $0x22] sm:$0xff] }
  0xe5   : > { %v692_v55 = vsel %vm553_vm2, %v670_v7, -inf  ;;  %v8327_v7 = vld [vmem:[#allocation2 + $0x21] sm:$0xff] }
  0xe6   : > { %v694_v0 = vmax.f32 %v692_v55, %v693_v4  ;;  %v1096_v34 = vmul.f32 %v8236_v39, %v8327_v7  ;;  %v8338_v4 = vld [vmem:[#allocation2 + $0x23] sm:$0xff] }
  0xe7   : > { %v1196_v43 = vmul.f32 %v8251_v50, %v8338_v4 }
  0xe8   : > { %712 = vrot.lane.b32.xlu2 %v685_v36, %s7793_s16  ;;  %v8321_v36 = vld [vmem:[#allocation2 + $0x13] sm:$0xff]  ;;  %v1108_v55 = vsel %vm845_vm0, %v1096_v34, 0.0 }
  0xe9   : > { %v8313_v2 = vpop.permute.xlu1 %489  ;;  %v8315_v56 = vpop.permute.xlu2 %491  ;;  %v1195_v41 = vmul.f32 %v8251_v50, %v8321_v36  ;;  %v1208_v47 = vsel %vm845_vm0, %v1196_v43, 0.0  ;;  %v8363_v50 = vld [vmem:[%s12659_s4 + $0x9] ss:$0 sm:$0xff]  ;;  %v1235_v43 = vld [vmem:[#allocation2 + $0x14] sm:$0xff] }
  0xea   : > { %v641_v53 = vpop.permute.xlu0 %640  ;;  %v1495_v57 = vmul.f32 %v8363_v50, %v1135_v45 }
  0xeb   : > { %v673_v58 = vmax.f32 %v8067_v17, %v641_v53  ;;  %v1145_v17 = vmul.f32 %v8257_v52, %v1135_v45  ;;  %v1205_v42 = vsel %vm845_vm0, %v1195_v41, 0.0 }
  0xed   : > { %v696_v9 = vsel %vm553_vm2, %v673_v58, -inf  ;;  %v1155_v12 = vsel %vm845_vm0, %v1145_v17, 0.0  ;;  %v1352_v58 = vsel %vm845_vm0, %v1344_v11, 0.0 }
  0xee   : > { %708 = vrot.lane.b32.xlu0 %v679_v1, %s7793_s16  ;;  %v697_v5 = vmax.f32 %v695_v60, %v696_v9  ;;  %v1046_v1 = vmul.f32 %v8241_v40, %v8336_v44  ;;  %v1503_v9 = vsel %vm845_vm0, %v1495_v57, 0.0 }
  0xf0   : > { %718 = vrot.lane.b32.xlu2 %v694_v0, %s7793_s16  ;;  %v1058_v3 = vsel %vm845_vm0, %v1046_v1, 0.0 }
  0xf1   : > { %v8323_v38 = vpop.permute.xlu1 %495  ;;  %v8329_v8 = vpop.permute.xlu2 %497 }
  0xf2   : > { %710 = vrot.lane.b32.xlu1 %v682_v59, %s7793_s16  ;;  %v8318_v61 = vpop.permute.xlu0 %493  ;;  %v1146_v59 = vmul.f32 %v8257_v52, %v8345_v14 }
  0xf4   : > { %v1158_v54 = vsel %vm845_vm0, %v1146_v59, 0.0 }
  0xf6   : > { %714 = vrot.lane.b32.xlu0 %v688_v49, %s7793_s16  ;;  %v8372_v49 = vld [vmem:[%s12659_s4 + $0x8] ss:$0 sm:$0xff] }
  0xf7   : > { %v1445_v10 = vmul.f32 %v8372_v49, %v8263_v62  ;;  %v8395_v62 = vld [vmem:[#allocation2 + $0x15] sm:$0xff] }
  0xf9   : > { %v8343_v13 = vpop.permute.xlu1 %501  ;;  %v8349_v0 = vpop.permute.xlu2 %503  ;;  %v1453_v45 = vsel %vm845_vm0, %v1445_v10, 0.0  ;;  %v8426_v10 = vld [vmem:[#allocation2 + $0x24] sm:$0xff] }
  0xfa   : > { %716 = vrot.lane.b32.xlu1 %v691_v48, %s7793_s16  ;;  %v8333_v35 = vpop.permute.xlu0 %499  ;;  %v8383_v48 = vld [vmem:[%s12659_s4 + $0x7] ss:$0 sm:$0xff] }
  0xfb   : > { %v1395_v17 = vmul.f32 %v8383_v48, %v8265_v63  ;;  %v8408_v63 = vld [vmem:[%s12659_s4 + $0xb] ss:$0 sm:$0xff] }
  0xfc   : > { %v1595_v51 = vmul.f32 %v8408_v63, %v1235_v43 }
  0xfd   : > { %v1403_v34 = vsel %vm845_vm0, %v1395_v17, 0.0 }
  0xfe   : > { %720 = vrot.lane.b32.xlu0 %v697_v5, %s7793_s16  ;;  %v8388_v5 = vld [vmem:[#allocation2 + $0x25] sm:$0xff] }
  0xff   : > { %v1296_v41 = vmul.f32 %v8231_v37, %v8388_v5 }
 0x101   : > { %v8375_v6 = vpop.permute.xlu1 %507  ;;  %v8386_v60 = vpop.permute.xlu2 %509  ;;  %v1308_v1 = vsel %vm845_vm0, %v1296_v41, 0.0  ;;  %v1246_v41 = vmul.f32 %v8224_v33, %v8426_v10 }
 0x102   : > { %v8365_v53 = vpop.permute.xlu0 %505 }
 0x119   : > { %1156 = vadd.xlane.f32.xlu2 %v1155_v12  ;;  %v8393_v12 = vpop.permute.xlu0 %511 }
 0x121   : > { %1206 = vadd.xlane.f32.xlu2 %v1205_v42  ;;  %v1295_v42 = vmul.f32 %v8231_v37, %v8395_v62  ;;  %v8417_v37 = vld [vmem:[%s12659_s4 + $0xa] ss:$0 sm:$0xff] }
 0x122   : > { %v1545_v57 = vmul.f32 %v8417_v37, %v8321_v36  ;;  %v1258_v36 = vsel %vm845_vm0, %v1246_v41, 0.0 }
 0x123   : > { %v1305_v59 = vsel %vm845_vm0, %v1295_v42, 0.0 }
 0x124   : > { %1109 = vadd.xlane.f32.xlu1 %v1108_v55  ;;  %v8402_v55 = vpop.permute.xlu1 %513  ;;  %v1553_v17 = vsel %vm845_vm0, %v1545_v57, 0.0 }
 0x128   : > { %1059 = vadd.xlane.f32.xlu0 %v1058_v3  ;;  %v8410_v3 = vpop.permute.xlu2 %515 }
 0x129   : > { %1209 = vadd.xlane.f32.xlu2 %v1208_v47  ;;  %v1245_v47 = vmul.f32 %v8224_v33, %v1235_v43  ;;  %v1335_v43 = vld [vmem:[#allocation2 + $0x16] sm:$0xff] }
 0x12a   : > { %v1345_v33 = vmul.f32 %v8357_v46, %v1335_v43 }
 0x12b   : > { %v1255_v11 = vsel %vm845_vm0, %v1245_v47, 0.0 }
 0x12c   : > { %1159 = vadd.xlane.f32.xlu1 %v1158_v54  ;;  %v8420_v54 = vpop.permute.xlu0 %517 }
 0x130   : > { %1353 = vadd.xlane.f32.xlu0 %v1352_v58  ;;  %v1603_v58 = vsel %vm845_vm0, %v1595_v51, 0.0 }
 0x131   : > { %1504 = vadd.xlane.f32.xlu2 %v1503_v9  ;;  %v8428_v9 = vpop.permute.xlu1 %519 }
 0x134   : > { %1454 = vadd.xlane.f32.xlu1 %v1453_v45  ;;  %v8430_v45 = vpop.xlane.xlu2 %1253 }
 0x135   : > { %12712 = vst [vmem:[#allocation17_spill] sm:$0xff] %v8430_v45 }
 0x138   : > { %1404 = vadd.xlane.f32.xlu0 %v1403_v34  ;;  %v1446_v34 = vmul.f32 %v8372_v49, %v8327_v7 }
 0x139   : > { %1309 = vadd.xlane.f32.xlu2 %v1308_v1  ;;  %v1396_v1 = vmul.f32 %v8383_v48, %v8336_v44 }
 0x13b   : > { %v1406_v51 = vsel %vm845_vm0, %v1396_v1, 0.0 }
 0x13c   : > { %1306 = vadd.xlane.f32.xlu1 %v1305_v59  ;;  %v1456_v59 = vsel %vm845_vm0, %v1446_v34, 0.0  ;;  %v8443_v47 = vpop.xlane.xlu1 %1103  ;;  %v8452_v57 = vpop.xlane.xlu2 %1303  ;;  %v8458_v34 = vld [vmem:[#allocation2 + $0x26] sm:$0xff] }
 0x13d   : > { %v8437_v42 = vpop.xlane.xlu0 %1053  ;;  %12713 = vst [vmem:[#allocation18_spill] sm:$0xff] %v8452_v57  ;;  %v1346_v1 = vmul.f32 %v8357_v46, %v8458_v34  ;;  %v537_v57 = vmax.f32 %v8064_v16, %v8313_v2  ;;  %v8497_v16 = vld [vmem:[%s12659_s4 + $0xf] ss:$0 sm:$0xff]  ;;  %v543_v2 = vmax.f32 %v8094_v22, %v8343_v13 }
 0x140   : > { %1256 = vadd.xlane.f32.xlu0 %v1255_v11  ;;  %v8450_v11 = vld [vmem:[%s12659_s4 + $0xd] ss:$0 sm:$0xff] }
 0x141   : > { %1604 = vadd.xlane.f32.xlu2 %v1603_v58  ;;  %v1355_v58 = vsel %vm845_vm0, %v1345_v33, 0.0 }
 0x144   : > { %1554 = vadd.xlane.f32.xlu1 %v1553_v17  ;;  %v1695_v17 = vmul.f32 %v8450_v11, %v1335_v43  ;;  %v707_v33 = vpop.permute.xlu2 %706  ;;  %v1358_v43 = vsel %vm845_vm0, %v1346_v1, 0.0  ;;  %v540_v1 = vmax.f32 %v8079_v19, %v8323_v38  ;;  %v7794_v19 = vmov 8.0  }
 0x145   : > { %v8456_v41 = vpop.xlane.xlu0 %1153  ;;  %7475 = vrcp.f32 %v7794_v19 }
 0x146   : > { %v558_v38 = vsel %vm553_vm2, %v540_v1, -inf  ;;  %v550_v1 = vmax.f32 %v8135_v28, %v8410_v3  ;;  %v1496_v3 = vmul.f32 %v8363_v50, %v8345_v14 }
 0x148   : > { %1259 = vadd.xlane.f32.xlu0 %v1258_v36  ;;  %v1703_v36 = vsel %vm845_vm0, %v1695_v17, 0.0  ;;  %v538_v17 = vmax.f32 %v8061_v15, %v8315_v56  ;;  %v554_v56 = vsel %vm553_vm2, %v537_v57, -inf  ;;  %v563_v57 = vsel %vm553_vm2, %v543_v2, -inf }
 0x149   : > { %1457 = vadd.xlane.f32.xlu2 %v1456_v59  ;;  %v8466_v59 = vld [vmem:[%s12659_s4 + $0xe] ss:$0 sm:$0xff] }
 0x14a   : > { %v1746_v27 = vmul.f32 %v8466_v59, %v8336_v44  ;;  %v795_v44 = vld [vmem:[%s12657_s2 + $0x18] sm:$0xff] }
 0x14b   : > { %836 = vmatpush.msra.mxu1 %v795_v44  ;;  %811 = vmatpush.msra.mxu0 %v795_v44 }
 0x14c   : > { %1407 = vadd.xlane.f32.xlu1 %v1406_v51  ;;  %v8468_v51 = vpop.xlane.xlu1 %1203 }
 0x14d   : > { %12714 = vst [vmem:[#allocation19_spill] sm:$0xff] %v8468_v51  ;;  %v8486_v45 = vpop.xlane.xlu0 %1056  ;;  %v1754_v51 = vsel %vm845_vm0, %v1746_v27, 0.0  ;;  %v544_v27 = vmax.f32 %v8091_v21, %v8349_v0  ;;  %v1796_v21 = vmul.f32 %v8497_v16, %v8327_v7  ;;  %v1696_v7 = vmul.f32 %v8450_v11, %v8458_v34 }
 0x150   : > { %1356 = vadd.xlane.f32.xlu0 %v1355_v58  ;;  %v8476_v58 = vld [vmem:[%s12659_s4 + $0xc] ss:$0 sm:$0xff] }
 0x151   : > { %v1645_v15 = vmul.f32 %v8476_v58, %v8395_v62  ;;  %v542_v62 = vmax.f32 %v8097_v23, %v8333_v35  ;;  %v713_v35 = vpop.permute.xlu2 %712 }
 0x153   : > { %v1653_v22 = vsel %vm845_vm0, %v1645_v15, 0.0  ;;  %v561_v23 = vsel %vm553_vm2, %v542_v62, -inf }
 0x154   : > { %1704 = vadd.xlane.f32.xlu1 %v1703_v36  ;;  %v539_v36 = vmax.f32 %v8082_v20, %v8318_v61  ;;  %v555_v20 = vsel %vm553_vm2, %v538_v17, -inf  ;;  %v8511_v44 = vpop.xlane.xlu1 %1106  ;;  %v564_v17 = vsel %vm553_vm2, %v544_v27, -inf }
 0x155   : > { %v556_v13 = vmax.f32 %v554_v56, %v555_v20  ;;  %v565_v2 = vmax.f32 %v563_v57, %v564_v17  ;;  %v792_v56 = vld [vmem:[%s12657_s2] sm:$0xff] }
 0x156   : > { %v557_v61 = vsel %vm553_vm2, %v539_v36, -inf  ;;  %v8518_v36 = vpop.eup %7475 }
 0x157   : > { %v559_v0 = vmax.f32 %v557_v61, %v558_v38  ;;  %v8531_v15 = vsel %vm553_vm2, %v556_v13, %v707_v33  ;;  %v1706_v33 = vsel %vm845_vm0, %v1696_v7, 0.0  ;;  %v755_v61 = vmul.f32 8.0, %v8518_v36 }
 0x158   : > { %1359 = vadd.xlane.f32.xlu0 %v1358_v43  ;;  %v541_v43 = vmax.f32 %v8076_v18, %v8329_v8  ;;  %v545_v18 = vmax.f32 %v8112_v26, %v8365_v53  ;;  %v546_v8 = vmax.f32 %v8109_v25, %v8375_v6  ;;  %v8536_v26 = vld [vmem:[%s12659_s4 + $0x10] ss:$0 sm:$0xff]  ;;  %v793_v53 = vld [vmem:[%s12657_s2 + $0x8] sm:$0xff]  ;;  %v1804_v6 = vsel %vm845_vm0, %v1796_v21, 0.0  ;;  %1707 = vadd.xlane.f32.xlu2 %v1706_v33 }
 0x159   : > { %v794_v25 = vld [vmem:[%s12657_s2 + $0x10] sm:$0xff]  ;;  %v551_v21 = vmax.f32 %v8171_v32, %v8420_v54  ;;  %v552_v13 = vmax.f32 %v8166_v31, %v8428_v9  ;;  %v1846_v17 = vmul.f32 %v8536_v26, %v8345_v14  ;;  %v1506_v32 = vsel %vm845_vm0, %v1496_v3, 0.0 }
 0x15a   : > { %837 = vmatpush.msra.mxu1 %v794_v25  ;;  %812 = vmatpush.msra.mxu0 %v794_v25  ;;  %v566_v38 = vsel %vm553_vm2, %v545_v18, -inf  ;;  %v567_v62 = vsel %vm553_vm2, %v546_v8, -inf  ;;  %v547_v31 = vmax.f32 %v8106_v24, %v8386_v60  ;;  %v756_v54 = vsub.f32 1.0, %v755_v61  ;;  %v719_v60 = vpop.permute.xlu2 %718 }
 0x15b   : > { %v568_v9 = vmax.f32 %v566_v38, %v567_v62  ;;  %v576_v7 = vsel %vm553_vm2, %v552_v13, -inf  ;;  %v770_v13 = vsel %vm738_vm3, %v8531_v15, -inf  ;;  %vm759_vm4 = vweird.f32 %v8518_v36 }
 0x15c   : > { %1755 = vadd.xlane.f32.xlu1 %v1754_v51  ;;  %v560_v51 = vsel %vm553_vm2, %v541_v43, -inf  ;;  %v548_v43 = vmax.f32 %v8143_v30, %v8393_v12  ;;  %838 = vmatpush.msra.mxu1 %v793_v53  ;;  %v8572_v30 = vsel %vm553_vm2, %v565_v2, %v713_v35  ;;  %v575_v35 = vsel %vm553_vm2, %v551_v21, -inf }
 0x15d   : > { %v562_v20 = vmax.f32 %v560_v51, %v561_v23  ;;  %813 = vmatpush.msra.mxu0 %v793_v53  ;;  %v573_v23 = vsel %vm553_vm2, %v550_v1, -inf  ;;  %v744_v51 = vsel %vm738_vm3, %v8572_v30, 0.0  ;;  %v1854_v53 = vsel %vm845_vm0, %v1846_v17, 0.0 }
 0x15e   : > { %839 = vmatpush.msra.mxu1 %v792_v56  ;;  %v570_v8 = vsel %vm553_vm2, %v548_v43, -inf  ;;  %v1546_v1 = vmul.f32 %v8417_v37, %v8338_v4  ;;  %v569_v3 = vsel %vm553_vm2, %v547_v31, -inf  ;;  %v757_v2 = vmul.f32 %v8518_v36, %v756_v54 }
 0x15f   : > { %814 = vmatpush.msra.mxu0 %v792_v56  ;;  %v577_v56 = vmax.f32 %v575_v35, %v576_v7 }
 0x160   : > { %1654 = vadd.xlane.f32.xlu0 %v1653_v22  ;;  %v709_v19 = vpop.permute.xlu0 %708  ;;  %v549_v22 = vmax.f32 %v8138_v29, %v8402_v55  ;;  %v758_v17 = vadd.f32 %v8518_v36, %v757_v2 }
 0x161   : > { %v8545_v28 = vsel %vm553_vm2, %v559_v0, %v709_v19  ;;  %v739_v0 = vsel %vm738_vm3, %v8531_v15, 0.0 }
 0x162   : > { %v740_v27 = vsel %vm738_vm3, %v8545_v28, 0.0  ;;  %v572_v14 = vsel %vm553_vm2, %v549_v22, -inf  ;;  %v1556_v22 = vsel %vm845_vm0, %v1546_v1, 0.0 }
 0x163   : > { %v741_v29 = vadd.f32 %v740_v27, %v739_v0  ;;  %v574_v33 = vmax.f32 %v572_v14, %v573_v23  ;;  %v571_v27 = vmax.f32 %v569_v3, %v570_v8  ;;  %v1596_v23 = vmul.f32 %v8408_v63, %v8426_v10 }
 0x164   : > { %1805 = vadd.xlane.f32.xlu1 %v1804_v6  ;;  %v711_v57 = vpop.permute.xlu1 %710  ;;  %v8598_v6 = vld [vmem:[%s12659_s4 + $0x12] ss:$0 sm:$0xff] }
 0x165   : > { %v8575_v12 = vsel %vm553_vm2, %v562_v20, %v711_v57  ;;  %v8605_v61 = vsel %vm553_vm2, %v574_v33, %v719_v60  ;;  %v1946_v21 = vmul.f32 %v8598_v6, %v8426_v10 }
 0x166   : > { %v742_v55 = vsel %vm738_vm3, %v8575_v12, 0.0  ;;  %v772_v54 = vsel %vm738_vm3, %v8575_v12, -inf }
 0x167   : > { %v743_v18 = vadd.f32 %v742_v55, %v741_v29  ;;  %v773_v29 = vsel %vm738_vm3, %v8572_v30, -inf  ;;  %v771_v55 = vsel %vm738_vm3, %v8545_v28, -inf  ;;  %v1954_v7 = vsel %vm845_vm0, %v1946_v21, 0.0 }
 0x168   : > { %1507 = vadd.xlane.f32.xlu0 %v1506_v32  ;;  %v715_v24 = vpop.permute.xlu0 %714  ;;  %v750_v32 = vsel %vm738_vm3, %v8605_v61, 0.0 }
 0x169   : > { %v8590_v19 = vsel %vm553_vm2, %v568_v9, %v715_v24  ;;  %v745_v25 = vadd.f32 %v744_v51, %v743_v18  ;;  %v8640_v51 = vld [vmem:[%s12659_s4 + $0x13] ss:$0 sm:$0xff]  ;;  %v778_v24 = vsel %vm738_vm3, %v8605_v61, -inf }
 0x16a   : > { %v746_v20 = vsel %vm738_vm3, %v8590_v19, 0.0  ;;  %v774_v9 = vsel %vm738_vm3, %v8590_v19, -inf }
 0x16b   : > { %v747_v62 = vadd.f32 %v746_v20, %v745_v25  ;;  %v760_v25 = vsel %vm759_vm4, %v8518_v36, %v758_v17  ;;  %v775_v1 = vmax.f32 %v770_v13, %v774_v9  ;;  %v1606_v20 = vsel %vm845_vm0, %v1596_v23, 0.0 }
 0x16c   : > { %1855 = vadd.xlane.f32.xlu1 %v1854_v53  ;;  %v717_v38 = vpop.permute.xlu1 %716  ;;  %v779_v53 = vmax.f32 %v772_v54, %v778_v24  ;;  %v1646_v36 = vmul.f32 %v8476_v58, %v8388_v5 }
 0x16d   : > { %v8608_v43 = vsel %vm553_vm2, %v571_v27, %v717_v38 }
 0x16e   : > { %v748_v0 = vsel %vm738_vm3, %v8608_v43, 0.0  ;;  %v776_v57 = vsel %vm738_vm3, %v8608_v43, -inf }
 0x16f   : > { %v749_v31 = vadd.f32 %v748_v0, %v747_v62  ;;  %v777_v18 = vmax.f32 %v771_v55, %v776_v57  ;;  %v8660_v57 = vld [vmem:[%s12659_s4 + $0x14] ss:$0 sm:$0xff]  ;;  %v1656_v55 = vsel %vm845_vm0, %v1646_v36, 0.0 }
 0x170   : > { %1557 = vadd.xlane.f32.xlu0 %v1556_v22  ;;  %v721_v14 = vpop.permute.xlu0 %720  ;;  %v2046_v54 = vmul.f32 %v8660_v57, %v8458_v34  ;;  %v820_v34 = vld [vmem:[%s12658_s3] sm:$0x3] }
 0x171   : > { %v8634_v8 = vsel %vm553_vm2, %v577_v56, %v721_v14  ;;  %v751_v35 = vadd.f32 %v750_v32, %v749_v31  ;;  %v782_v2 = vmax.f32 %v775_v1, %v777_v18  ;;  %v1996_v56 = vmul.f32 %v8640_v51, %v8388_v5  ;;  %v8666_v5 = vld [vmem:[%s12659_s4 + $0x11] ss:$0 sm:$0xff]  ;;  %7026 = vmatpush.msk.msrb.mxu1 %vm849_vm5, %v820_v34 }
 0x172   : > { %v752_v60 = vsel %vm738_vm3, %v8634_v8, 0.0  ;;  %v780_v10 = vsel %vm738_vm3, %v8634_v8, -inf }
 0x173   : > { %v753_v3 = vadd.f32 %v752_v60, %v751_v35  ;;  %v781_v33 = vmax.f32 %v773_v29, %v780_v10  ;;  %v2004_v13 = vsel %vm845_vm0, %v1996_v56, 0.0  ;;  %v1896_v35 = vmul.f32 %v8666_v5, %v8338_v4 }
 0x174   : > { %1955 = vadd.xlane.f32.xlu1 %v1954_v7  ;;  %v2054_v7 = vsel %vm845_vm0, %v2046_v54, 0.0 }
 0x175   : > { %v783_v27 = vmax.f32 %v779_v53, %v781_v33  ;;  %v761_v38 = vmul.f32 %v760_v25, %v753_v3  ;;  %v1904_v1 = vsel %vm845_vm0, %v1896_v35, 0.0 }
 0x177   : > { %v784_v62 = vmax.f32 %v782_v2, %v783_v27  ;;  %v762_v22 = vsel %vm738_vm3, %v761_v38, 0.0 }
 0x178   : > { %1607 = vadd.xlane.f32.xlu0 %v1606_v20  ;;  %v763_v21 = vrot.slane %v762_v22, 4 }
 0x179   : > { %v785_v0 = vsel %vm738_vm3, %v784_v62, -inf }
 0x17a   : > { %v786_v17 = vrot.slane %v785_v0, 4  ;;  %v764_v29 = vadd.f32 %v763_v21, %v762_v22 }
 0x17c   : > { %2005 = vadd.xlane.f32.xlu1 %v2004_v13  ;;  %v787_v32 = vmax.f32 %v785_v0, %v786_v17  ;;  %v765_v31 = vrot.slane %v764_v29, 2 }
 0x17e   : > { %v788_v9 = vrot.slane %v787_v32, 2  ;;  %v766_v14 = vadd.f32 %v765_v31, %v764_v29 }
 0x180   : > { %1657 = vadd.xlane.f32.xlu0 %v1656_v55  ;;  %v789_v23 = vmax.f32 %v787_v32, %v788_v9  ;;  %v767_v18 = vrot.slane %v766_v14, 1 }
 0x182   : > { %v790_v24 = vrot.slane %v789_v23, 1  ;;  %v768_v60 = vadd.f32 %v767_v18, %v766_v14 }
 0x184   : > { %v791_v10 = vmax.f32 %v789_v23, %v790_v24  ;;  %v769_v53 = vmul.f32 %v768_v60, %v760_v25  ;;  %2055 = vadd.xlane.f32.xlu1 %v2054_v7 }
 0x186   : > { %7025 = vmatmul.msk.f32.vlgmr.msra.gmra.mxu1 %vm738_vm3, %v791_v10  ;;  %7024 = vmatmul.msk.f32.vlgmr.msra.gmra.mxu0 %vm738_vm3, %v769_v53 }
 0x187   : > { %7028 = vmatpush.msk.msra.mxu1 %vm849_vm5, %v820_v34 }
 0x188   : > { %1905 = vadd.xlane.f32.xlu0 %v1904_v1 }
 0x197   : > { %v8681_v29 = vpop.xlane.xlu1 %1109 }
 0x19b   : > { %v8683_v32 = vpop.xlane.xlu0 %1059 }
 0x19f   : > { %v8697_v60 = vpop.xlane.xlu1 %1159 }
 0x1a3   : > { %v8699_v10 = vpop.xlane.xlu0 %1353 }
 0x203   : > { %v841_v4 = vpop.f32.mrf.mxu1  ;;  %v816_v25 = vpop.f32.mrf.mxu0 }
 0x204   : > { %v844_v3 = vmax.f32 %v841_v4, 0.0  ;;  %v819_v33 = vmax.f32 %v816_v25, 0.0  ;;  %v8713_v4 = vpop.xlane.xlu1 %1454 }
 0x205   : > { %12719 = vst [vmem:[#allocation24_spill] sm:$0xff] %v8713_v4 }
 0x206   : > { %7027 = vmatmul.msk.f32.vlgmr.msrb.gmra.mxu1 %vm845_vm0, %v844_v3  ;;  %v8715_v3 = vpop.xlane.xlu0 %1404 }
 0x207   : > { %12720 = vst [vmem:[#allocation25_spill] sm:$0xff] %v8715_v3 }
 0x20e   : > { %7029 = vmatmul.msk.f32.vlgmr.msra.gmra.mxu1 %vm845_vm0, %v819_v33  ;;  %v8724_v33 = vpop.xlane.xlu1 %1306 }
 0x283   : > { %v870_v20 = vpop.f32.mrf.mxu1 }
 0x28b   : > { %v893_v2 = vpop.f32.mrf.mxu1 }
 0x28c   : > { %v894_v27 = vadd.f32 %v893_v2, %v870_v20  ;;  %v8726_v20 = vpop.xlane.xlu0 %1256 }
 0x28e   : > { %v7030_v56 = vmul.f32 -1.442695, %v894_v27 }
 0x290   : > { %7477 = vpow2.f32 %v7030_v56 }
 0x296   : > { %v7478_v38 = vpop.eup %7477 }
 0x297   : > { %v899_v62 = vadd.f32 1.0, %v7478_v38  ;;  %v8735_v38 = vpop.xlane.xlu1 %1554 }
 0x298   : > { %12723 = vst [vmem:[#allocation28_spill] sm:$0xff] %v8735_v38 }
 0x299   : > { %7479 = vrcp.f32 %v899_v62  ;;  %v911_v13 = vand.u32 2147483648, %v899_v62  ;;  %v909_v17 = vand.u32 2147483647, %v899_v62  ;;  %vm905_vm7 = vweird.f32 %v899_v62 }
 0x29b   : > { %v912_v55 = vor.u32 1.1754944e-38, %v911_v13  ;;  %vm910_vm9 = vcmp.eq.f32.partialorder %v909_v17, 8.507059e+37 }
 0x29f   : > { %v7480_v22 = vpop.eup %7479 }
 0x2a0   : > { %v901_v21 = vmul.f32 %v7480_v22, %v899_v62  ;;  %vm906_vm6 = vweird.f32 %v7480_v22  ;;  %v8737_v62 = vpop.xlane.xlu0 %1259 }
 0x2a1   : > { %vm907_vm8 = vmor %vm905_vm7, %vm906_vm6  ;;  %12724 = vst [vmem:[#allocation29_spill] sm:$0xff] %v8737_v62 }
 0x2a2   : > { %v902_v36 = vsub.f32 1.0, %v901_v21 }
 0x2a4   : > { %v903_v0 = vmul.f32 %v7480_v22, %v902_v36  ;;  %v8747_v36 = vpop.xlane.xlu2 %1156 }
 0x2a6   : > { %v904_v31 = vadd.f32 %v7480_v22, %v903_v0 }
 0x2a8   : > { %v908_v54 = vsel %vm907_vm8, %v7480_v22, %v904_v31  ;;  %v8743_v22 = vpop.xlane.xlu1 %1407  ;;  %v8745_v21 = vpop.xlane.xlu0 %1356 }
 0x2a9   : > { %v913_v9 = vsel %vm910_vm9, %v912_v55, %v908_v54  ;;  %12725 = vst [vmem:[#allocation30_spill] sm:$0xff] %v8743_v22 }
 0x2aa   : > { %v915_v14 = vperm.slane %v913_v9, 0 }
 0x2ac   : > { %v8686_v23 = vmul.f32 %v915_v14, %v8545_v28  ;;  %v8689_v18 = vmul.f32 %v915_v14, %v8531_v15  ;;  %v8702_v28 = vmul.f32 %v915_v14, %v8572_v30  ;;  %v8705_v15 = vmul.f32 %v915_v14, %v8575_v12  ;;  %v8758_v55 = vpop.xlane.xlu2 %1206 }
 0x2ad   : > { %v8722_v25 = vmul.f32 %v915_v14, %v8590_v19  ;;  %v8729_v2 = vmul.f32 %v915_v14, %v8608_v43  ;;  %v8750_v13 = vmul.f32 %v915_v14, %v8605_v61  ;;  %v8763_v9 = vmul.f32 %v915_v14, %v8634_v8 }
 0x2ae   : > { %12715 = vst [vmem:[#allocation20_spill] sm:$0xff] %v8686_v23  ;;  %v927_v35 = vsel %vm738_vm3, %v8686_v23, 0.0  ;;  %v963_v7 = vsel %vm738_vm3, %v8689_v18, -inf  ;;  %v924_v24 = vsel %vm738_vm3, %v8689_v18, 0.0  ;;  %v933_v53 = vsel %vm738_vm3, %v8702_v28, 0.0 }
 0x2af   : > { %12716 = vst [vmem:[#allocation21_spill] sm:$0xff] %v8689_v18  ;;  %928 = vadd.xlane.f32.xlu0 %v927_v35  ;;  %964 = vmax.xlane.f32.xlu2 %v963_v7  ;;  %v966_v1 = vsel %vm738_vm3, %v8686_v23, -inf  ;;  %v930_v34 = vsel %vm738_vm3, %v8705_v15, 0.0  ;;  %v969_v30 = vsel %vm738_vm3, %v8705_v15, -inf  ;;  %v972_v12 = vsel %vm738_vm3, %v8702_v28, -inf }
 0x2b0   : > { %925 = vadd.xlane.f32.xlu1 %v924_v24  ;;  %12717 = vst [vmem:[#allocation22_spill] sm:$0xff] %v8702_v28  ;;  %v936_v27 = vsel %vm738_vm3, %v8722_v25, 0.0  ;;  %v939_v56 = vsel %vm738_vm3, %v8729_v2, 0.0  ;;  %v975_v19 = vsel %vm738_vm3, %v8722_v25, -inf  ;;  %v978_v43 = vsel %vm738_vm3, %v8729_v2, -inf  ;;  %v8754_v17 = vpop.xlane.xlu1 %1704  ;;  %v8756_v31 = vpop.xlane.xlu0 %1359 }
 0x2b1   : > { %12718 = vst [vmem:[#allocation23_spill] sm:$0xff] %v8705_v15  ;;  %v942_v0 = vsel %vm738_vm3, %v8750_v13, 0.0  ;;  %v981_v54 = vsel %vm738_vm3, %v8750_v13, -inf  ;;  %v945_v24 = vsel %vm738_vm3, %v8763_v9, 0.0  ;;  %v984_v8 = vsel %vm738_vm3, %v8763_v9, -inf }
 0x2b2   : > { %12721 = vst [vmem:[#allocation26_spill] sm:$0xff] %v8722_v25 }
 0x2b3   : > { %12722 = vst [vmem:[#allocation27_spill] sm:$0xff] %v8729_v2 }
 0x2b4   : > { %12726 = vst [vmem:[#allocation31_spill] sm:$0xff] %v8750_v13  ;;  %v8769_v7 = vpop.xlane.xlu2 %1209 }
 0x2b5   : > { %12727 = vst [vmem:[#allocation32_spill] sm:$0xff] %v8754_v17 }
 0x2b6   : > { %12728 = vst [vmem:[#allocation33_spill] sm:$0xff] %v8756_v31 }
 0x2b7   : > { %934 = vadd.xlane.f32.xlu0 %v933_v53  ;;  %967 = vmax.xlane.f32.xlu2 %v966_v1  ;;  %12729 = vst [vmem:[#allocation34_spill] sm:$0xff] %v8763_v9 }
 0x2b8   : > { %931 = vadd.xlane.f32.xlu1 %v930_v34  ;;  %v8765_v35 = vpop.xlane.xlu1 %1755  ;;  %v8767_v61 = vpop.xlane.xlu0 %1654  ;;  %12732 = vst [vmem:[#allocation37_spill] sm:$0xff] %v8769_v7 }
 0x2b9   : > { %12730 = vst [vmem:[#allocation35_spill] sm:$0xff] %v8765_v35 }
 0x2ba   : > { %12731 = vst [vmem:[#allocation36_spill] sm:$0xff] %v8767_v61 }
 0x2bc   : > { %v8777_v34 = vpop.xlane.xlu2 %1504 }
 0x2bd   : > { %12735 = vst [vmem:[#allocation40_spill] sm:$0xff] %v8777_v34 }
 0x2bf   : > { %970 = vmax.xlane.f32.xlu2 %v969_v30 }
 0x2c0   : > { %973 = vmax.xlane.f32.xlu1 %v972_v12  ;;  %v8773_v53 = vpop.xlane.xlu1 %1805  ;;  %v8775_v1 = vpop.xlane.xlu0 %1507 }
 0x2c1   : > { %12733 = vst [vmem:[#allocation38_spill] sm:$0xff] %v8773_v53 }
 0x2c2   : > { %12734 = vst [vmem:[#allocation39_spill] sm:$0xff] %v8775_v1 }
 0x2c4   : > { %v8785_v12 = vpop.xlane.xlu2 %1309 }
 0x2c5   : > { %12738 = vst [vmem:[#allocation43_spill] sm:$0xff] %v8785_v12 }
 0x2c7   : > { %937 = vadd.xlane.f32.xlu2 %v936_v27 }
 0x2c8   : > { %940 = vadd.xlane.f32.xlu1 %v939_v56  ;;  %v8781_v14 = vpop.xlane.xlu1 %1855  ;;  %v8783_v30 = vpop.xlane.xlu0 %1557  ;;  %v7795_v56 = vmov 32.0  }
 0x2c9   : > { %12736 = vst [vmem:[#allocation41_spill] sm:$0xff] %v8781_v14  ;;  %7481 = vrcp.f32 %v7795_v56 }
 0x2ca   : > { %12737 = vst [vmem:[#allocation42_spill] sm:$0xff] %v8783_v30 }
 0x2cf   : > { %976 = vmax.xlane.f32.xlu2 %v975_v19 }
 0x2d0   : > { %v8787_v27 = vpop.xlane.xlu1 %1955  ;;  %v8789_v19 = vpop.xlane.xlu0 %1607 }
 0x2d1   : > { %12739 = vst [vmem:[#allocation44_spill] sm:$0xff] %v8787_v27 }
 0x2d2   : > { %12740 = vst [vmem:[#allocation45_spill] sm:$0xff] %v8789_v19 }
 0x2d7   : > { %979 = vmax.xlane.f32.xlu2 %v978_v43  ;;  %v8791_v43 = vpop.xlane.xlu2 %1604 }
 0x2d8   : > { %12741 = vst [vmem:[#allocation46_spill] sm:$0xff] %v8791_v43 }
 0x2df   : > { %943 = vadd.xlane.f32.xlu2 %v942_v0  ;;  %v7482_v0 = vpop.eup %7481  ;;  %v8795_v9 = vpop.xlane.xlu2 %1457 }
 0x2e0   : > { %12743 = vst [vmem:[#allocation48_spill] sm:$0xff] %v8795_v9  ;;  %vm953_vm10 = vweird.f32 %v7482_v0 }
 0x2e7   : > { %982 = vmax.xlane.f32.xlu2 %v981_v54  ;;  %v8793_v54 = vpop.xlane.xlu1 %2005  ;;  %v8799_v25 = vpop.xlane.xlu2 %1707 }
 0x2e8   : > { %12742 = vst [vmem:[#allocation47_spill] sm:$0xff] %v8793_v54 }
 0x2e9   : > { %12745 = vst [vmem:[#allocation50_spill] sm:$0xff] %v8799_v25 }
 0x2ef   : > { %946 = vadd.xlane.f32.xlu2 %v945_v24  ;;  %v949_v24 = vmul.f32 32.0, %v7482_v0  ;;  %v8801_v28 = vpop.xlane.xlu1 %2055 }
 0x2f0   : > { %12746 = vst [vmem:[#allocation51_spill] sm:$0xff] %v8801_v28 }
 0x2f1   : > { %v950_v13 = vsub.f32 1.0, %v949_v24 }
 0x2f3   : > { %v951_v2 = vmul.f32 %v7482_v0, %v950_v13 }
 0x2f5   : > { %v952_v56 = vadd.f32 %v7482_v0, %v951_v2 }
 0x2f7   : > { %985 = vmax.xlane.f32.xlu2 %v984_v8  ;;  %v8797_v8 = vpop.xlane.xlu0 %1657  ;;  %v8805_v23 = vsel %vm953_vm10, %v7482_v0, %v952_v56 }
 0x2f8   : > { %12744 = vst [vmem:[#allocation49_spill] sm:$0xff] %v8797_v8 }
 0x2ff   : > { %v8803_v15 = vpop.xlane.xlu0 %1905 }
 0x300   : > { %12747 = vst [vmem:[#allocation52_spill] sm:$0xff] %v8803_v15 }
 0x322   : > { %v965_v18 = vpop.xlane.xlu2 %964  ;;  %v929_v14 = vpop.xlane.xlu0 %928 }
 0x323   : > { %v926_v54 = vpop.xlane.xlu1 %925  ;;  %v956_v13 = vmul.f32 %v8805_v23, %v929_v14 }
 0x324   : > { %v955_v27 = vmul.f32 %v8805_v23, %v926_v54 }
 0x326   : > { %v988_v53 = vsel %vm987_vm11, %v955_v27, %v965_v18 }
 0x327   : > { %1026 = vst.msk [vmem:[#allocation2 + $0x33] sm:$0xff] %vm845_vm0, %v988_v53 }
 0x32a   : > { %v968_v24 = vpop.xlane.xlu2 %967  ;;  %v935_v54 = vpop.xlane.xlu0 %934 }
 0x32b   : > { %v989_v28 = vsel %vm987_vm11, %v956_v13, %v968_v24  ;;  %v932_v15 = vpop.xlane.xlu1 %931  ;;  %v958_v35 = vmul.f32 %v8805_v23, %v935_v54 }
 0x32c   : > { %1027 = vst.msk [vmem:[#allocation2 + $0x43] sm:$0xff] %vm845_vm0, %v989_v28  ;;  %v957_v27 = vmul.f32 %v8805_v23, %v932_v15 }
 0x32e   : > { %v8813_v2 = vld [vmem:[#allocation2 + $0x32] sm:$0xff] }
 0x32f   : > { %v8815_v0 = vld [vmem:[#allocation2 + $0x31] sm:$0xff]  ;;  %v1147_v18 = vmul.f32 %v8257_v52, %v8813_v2 }
 0x330   : > { %v8817_v56 = vld [vmem:[#allocation2 + $0x30] sm:$0xff]  ;;  %v1097_v53 = vmul.f32 %v8236_v39, %v8815_v0  ;;  %v1447_v15 = vmul.f32 %v8372_v49, %v8815_v0 }
 0x331   : > { %v1047_v14 = vmul.f32 %v8241_v40, %v8817_v56  ;;  %v1161_v28 = vsel %vm845_vm0, %v1147_v18, 0.0  ;;  %v8831_v25 = vld [vmem:[#allocation2 + $0x33] sm:$0xff]  ;;  %v1397_v54 = vmul.f32 %v8383_v48, %v8817_v56  ;;  %v8843_v18 = vld [vmem:[%s12659_s4 + $0x3] ss:$0 sm:$0xff] }
 0x332   : > { %v1111_v13 = vsel %vm845_vm0, %v1097_v53, 0.0  ;;  %1162 = vadd.xlane.f32.xlu2 %v1161_v28  ;;  %v971_v17 = vpop.xlane.xlu2 %970  ;;  %v1459_v53 = vsel %vm845_vm0, %v1447_v15, 0.0  ;;  %v8881_v8 = vld [vmem:[#allocation2 + $0x35] sm:$0xff] }
 0x333   : > { %v1061_v24 = vsel %vm845_vm0, %v1047_v14, 0.0  ;;  %1112 = vadd.xlane.f32.xlu1 %v1111_v13  ;;  %v990_v52 = vsel %vm987_vm11, %v957_v27, %v971_v17  ;;  %v974_v39 = vpop.xlane.xlu1 %973  ;;  %v1197_v17 = vmul.f32 %v8843_v18, %v8831_v25  ;;  %v8850_v28 = vld [vmem:[#allocation2 + $0x40] sm:$0xff]  ;;  %v8852_v13 = vld [vmem:[#allocation2 + $0x34] sm:$0xff] }
 0x334   : > { %1062 = vadd.xlane.f32.xlu0 %v1061_v24  ;;  %1028 = vst.msk [vmem:[#allocation2 + $0x53] sm:$0xff] %vm845_vm0, %v990_v52  ;;  %v991_v40 = vsel %vm987_vm11, %v958_v35, %v974_v39  ;;  %v1409_v35 = vsel %vm845_vm0, %v1397_v54, 0.0  ;;  %v8854_v24 = vld [vmem:[#allocation2 + $0x41] sm:$0xff]  ;;  %v8859_v52 = vld [vmem:[%s12659_s4] ss:$0 sm:$0xff]  ;;  %v8907_v30 = vld [vmem:[#allocation2 + $0x36] sm:$0xff] }
 0x335   : > { %1029 = vst.msk [vmem:[#allocation2 + $0x63] sm:$0xff] %vm845_vm0, %v991_v40  ;;  %v1211_v14 = vsel %vm845_vm0, %v1197_v17, 0.0  ;;  %v1048_v39 = vmul.f32 %v8859_v52, %v8850_v28  ;;  %v8866_v40 = vld [vmem:[%s12659_s4 + $0x4] ss:$0 sm:$0xff]  ;;  %v8873_v54 = vld [vmem:[%s12659_s4 + $0x1] ss:$0 sm:$0xff]  ;;  %v1697_v22 = vmul.f32 %v8450_v11, %v8907_v30 }
 0x336   : > { %v1247_v15 = vmul.f32 %v8866_v40, %v8852_v13  ;;  %v1098_v17 = vmul.f32 %v8873_v54, %v8854_v24  ;;  %v8884_v19 = vld [vmem:[#allocation2 + $0x42] sm:$0xff] }
 0x337   : > { %v8910_v34 = vld [vmem:[#allocation2 + $0x43] sm:$0xff] }
 0x338   : > { %v1114_v61 = vsel %vm845_vm0, %v1098_v17, 0.0  ;;  %v8935_v9 = vld [vmem:[#allocation2 + $0x45] sm:$0xff] }
 0x339   : > { %v8962_v4 = vld [vmem:[#allocation2 + $0x46] sm:$0xff] }
 0x33a   : > { %1460 = vadd.xlane.f32.xlu2 %v1459_v53  ;;  %v938_v27 = vpop.xlane.xlu2 %937 }
 0x33b   : > { %1410 = vadd.xlane.f32.xlu1 %v1409_v35  ;;  %v959_v53 = vmul.f32 %v8805_v23, %v938_v27  ;;  %v1064_v35 = vsel %vm845_vm0, %v1048_v39, 0.0  ;;  %v1497_v27 = vmul.f32 %v8363_v50, %v8813_v2  ;;  %v8892_v39 = vld [vmem:[%s12659_s4 + $0x5] ss:$0 sm:$0xff]  ;;  %v941_v17 = vpop.xlane.xlu1 %940 }
 0x33c   : > { %1212 = vadd.xlane.f32.xlu0 %v1211_v14  ;;  %v1261_v14 = vsel %vm845_vm0, %v1247_v15, 0.0  ;;  %v1297_v15 = vmul.f32 %v8892_v39, %v8881_v8 }
 0x342   : > { %1065 = vadd.xlane.f32.xlu2 %v1064_v35  ;;  %v977_v43 = vpop.xlane.xlu2 %976  ;;  %v1311_v35 = vsel %vm845_vm0, %v1297_v15, 0.0  ;;  %v1198_v15 = vmul.f32 %v8843_v18, %v8910_v34 }
 0x343   : > { %1262 = vadd.xlane.f32.xlu1 %v1261_v14  ;;  %v992_v31 = vsel %vm987_vm11, %v959_v53, %v977_v43  ;;  %v960_v43 = vmul.f32 %v8805_v23, %v941_v17  ;;  %v1509_v53 = vsel %vm845_vm0, %v1497_v27, 0.0  ;;  %v1547_v17 = vmul.f32 %v8417_v37, %v8831_v25 }
 0x344   : > { %1115 = vadd.xlane.f32.xlu0 %v1114_v61  ;;  %1030 = vst.msk [vmem:[#allocation2 + $0x73] sm:$0xff] %vm845_vm0, %v992_v31  ;;  %v8899_v61 = vld [vmem:[%s12659_s4 + $0x2] ss:$0 sm:$0xff]  ;;  %v1347_v27 = vmul.f32 %v8357_v46, %v8907_v30 }
 0x345   : > { %v1148_v31 = vmul.f32 %v8899_v61, %v8884_v19 }
 0x347   : > { %v1164_v14 = vsel %vm845_vm0, %v1148_v31, 0.0  ;;  %v1559_v31 = vsel %vm845_vm0, %v1547_v17, 0.0 }
 0x34a   : > { %1510 = vadd.xlane.f32.xlu2 %v1509_v53  ;;  %v980_v38 = vpop.xlane.xlu2 %979  ;;  %v1361_v53 = vsel %vm845_vm0, %v1347_v27, 0.0 }
 0x34b   : > { %1312 = vadd.xlane.f32.xlu1 %v1311_v35  ;;  %v993_v12 = vsel %vm987_vm11, %v960_v43, %v980_v38  ;;  %v1214_v38 = vsel %vm845_vm0, %v1198_v15, 0.0  ;;  %v1398_v35 = vmul.f32 %v8383_v48, %v8850_v28 }
 0x34c   : > { %1165 = vadd.xlane.f32.xlu0 %v1164_v14  ;;  %1031 = vst.msk [vmem:[#allocation2 + $0x83] sm:$0xff] %vm845_vm0, %v993_v12  ;;  %v1597_v12 = vmul.f32 %v8408_v63, %v8852_v13  ;;  %v1448_v14 = vmul.f32 %v8372_v49, %v8854_v24 }
 0x34d   : > { %v1412_v27 = vsel %vm845_vm0, %v1398_v35, 0.0 }
 0x34e   : > { %v1609_v17 = vsel %vm845_vm0, %v1597_v12, 0.0  ;;  %v1462_v15 = vsel %vm845_vm0, %v1448_v14, 0.0  ;;  %v1298_v12 = vmul.f32 %v8892_v39, %v8935_v9 }
 0x352   : > { %1560 = vadd.xlane.f32.xlu2 %v1559_v31  ;;  %v944_v43 = vpop.xlane.xlu2 %943 }
 0x353   : > { %1362 = vadd.xlane.f32.xlu1 %v1361_v53  ;;  %v961_v1 = vmul.f32 %v8805_v23, %v944_v43  ;;  %v8932_v53 = vld [vmem:[#allocation2 + $0x44] sm:$0xff]  ;;  %v1647_v43 = vmul.f32 %v8476_v58, %v8881_v8 }
 0x354   : > { %1215 = vadd.xlane.f32.xlu0 %v1214_v38  ;;  %v1248_v49 = vmul.f32 %v8866_v40, %v8932_v53 }
 0x355   : > { %v1659_v14 = vsel %vm845_vm0, %v1647_v43, 0.0 }
 0x356   : > { %v1264_v35 = vsel %vm845_vm0, %v1248_v49, 0.0  ;;  %v1747_v49 = vmul.f32 %v8466_v59, %v8817_v56 }
 0x35a   : > { %1610 = vadd.xlane.f32.xlu2 %v1609_v17  ;;  %v983_v31 = vpop.xlane.xlu2 %982 }
 0x35b   : > { %1413 = vadd.xlane.f32.xlu1 %v1412_v27  ;;  %v994_v38 = vsel %vm987_vm11, %v961_v1, %v983_v31  ;;  %v1314_v1 = vsel %vm845_vm0, %v1298_v12, 0.0  ;;  %v8947_v27 = vld [vmem:[#allocation2 + $0x51] sm:$0xff] }
 0x35c   : > { %1463 = vadd.xlane.f32.xlu0 %v1462_v15  ;;  %1032 = vst.msk [vmem:[#allocation2 + $0x93] sm:$0xff] %vm845_vm0, %v994_v38  ;;  %v8949_v15 = vld [vmem:[#allocation2 + $0x50] sm:$0xff]  ;;  %v1099_v31 = vmul.f32 %v8873_v54, %v8947_v27 }
 0x35d   : > { %v1049_v38 = vmul.f32 %v8859_v52, %v8949_v15 }
 0x35f   : > { %v1067_v12 = vsel %vm845_vm0, %v1049_v38, 0.0 }
 0x362   : > { %1265 = vadd.xlane.f32.xlu2 %v1264_v35  ;;  %v947_v17 = vpop.xlane.xlu2 %946  ;;  %v1117_v35 = vsel %vm845_vm0, %v1099_v31, 0.0  ;;  %v1709_v31 = vsel %vm845_vm0, %v1697_v22, 0.0 }
 0x363   : > { %1660 = vadd.xlane.f32.xlu1 %v1659_v14  ;;  %v962_v43 = vmul.f32 %v8805_v23, %v947_v17  ;;  %v1757_v14 = vsel %vm845_vm0, %v1747_v49, 0.0  ;;  %v1498_v23 = vmul.f32 %v8363_v50, %v8884_v19  ;;  %v1348_v17 = vmul.f32 %v8357_v46, %v8962_v4 }
 0x364   : > { %1315 = vadd.xlane.f32.xlu0 %v1314_v1  ;;  %v1548_v50 = vmul.f32 %v8417_v37, %v8910_v34  ;;  %v1797_v46 = vmul.f32 %v8497_v16, %v8815_v0  ;;  %v1399_v37 = vmul.f32 %v8383_v48, %v8949_v15  ;;  %v1847_v48 = vmul.f32 %v8536_v26, %v8813_v2 }
 0x365   : > { %v1512_v38 = vsel %vm845_vm0, %v1498_v23, 0.0  ;;  %v1364_v49 = vsel %vm845_vm0, %v1348_v17, 0.0 }
 0x36a   : > { %1118 = vadd.xlane.f32.xlu2 %v1117_v35  ;;  %v986_v1 = vpop.xlane.xlu2 %985  ;;  %v1562_v35 = vsel %vm845_vm0, %v1548_v50, 0.0  ;;  %v9007_v50 = vld [vmem:[%s12659_s4 + $0x15] ss:$0 sm:$0xff] }
 0x36b   : > { %1068 = vadd.xlane.f32.xlu1 %v1067_v12  ;;  %v995_v62 = vsel %vm987_vm11, %v962_v43, %v986_v1  ;;  %v8974_v43 = vld [vmem:[#allocation2 + $0x52] sm:$0xff]  ;;  %v1807_v12 = vsel %vm845_vm0, %v1797_v46, 0.0  ;;  %v1598_v1 = vmul.f32 %v8408_v63, %v8932_v53  ;;  %v1648_v63 = vmul.f32 %v8476_v58, %v8935_v9 }
 0x36c   : > { %1758 = vadd.xlane.f32.xlu0 %v1757_v14  ;;  %1033 = vst.msk [vmem:[#allocation2 + $0xa3] sm:$0xff] %vm845_vm0, %v995_v62  ;;  %v1149_v62 = vmul.f32 %v8899_v61, %v8974_v43  ;;  %v1748_v14 = vmul.f32 %v8466_v59, %v8850_v28  ;;  %v1857_v46 = vsel %vm845_vm0, %v1847_v48, 0.0  ;;  %v1798_v58 = vmul.f32 %v8497_v16, %v8854_v24  ;;  %v9024_v16 = vld [vmem:[#allocation2 + $0x54] sm:$0xff] }
 0x36d   : > { %v1612_v17 = vsel %vm845_vm0, %v1598_v1, 0.0  ;;  %vm3719_vm11 = vcmask 123904  }
 0x36e   : > { %v1167_v22 = vsel %vm845_vm0, %v1149_v62, 0.0  ;;  %v1760_v23 = vsel %vm845_vm0, %v1748_v14, 0.0  ;;  %v1662_v62 = vsel %vm845_vm0, %v1648_v63, 0.0  ;;  %v1810_v14 = vsel %vm845_vm0, %v1798_v58, 0.0 }
 0x372   : > { %1710 = vadd.xlane.f32.xlu2 %v1709_v31  ;;  %v1415_v31 = vsel %vm845_vm0, %v1399_v37, 0.0 }
 0x373   : > { %1513 = vadd.xlane.f32.xlu1 %v1512_v38  ;;  %v8994_v38 = vld [vmem:[#allocation2 + $0x53] sm:$0xff] }
 0x374   : > { %1365 = vadd.xlane.f32.xlu0 %v1364_v49  ;;  %v1199_v59 = vmul.f32 %v8843_v18, %v8994_v38 }
 0x376   : > { %v1217_v49 = vsel %vm845_vm0, %v1199_v59, 0.0 }
 0x37a   : > { %1168 = vadd.xlane.f32.xlu2 %v1167_v22  ;;  %v2096_v22 = vmul.f32 %v9007_v50, %v8817_v56  ;;  %v1249_v56 = vmul.f32 %v8866_v40, %v9024_v16 }
 0x37b   : > { %1563 = vadd.xlane.f32.xlu1 %v1562_v35  ;;  %v9017_v35 = vld [vmem:[%s12659_s4 + $0x8] ss:$0 sm:$0xff] }
 0x37c   : > { %1808 = vadd.xlane.f32.xlu0 %v1807_v12  ;;  %v1449_v12 = vmul.f32 %v9017_v35, %v8947_v27  ;;  %v2104_v1 = vsel %vm845_vm0, %v2096_v22, 0.0  ;;  %v1267_v59 = vsel %vm845_vm0, %v1249_v56, 0.0 }
 0x37e   : > { %v1465_v37 = vsel %vm845_vm0, %v1449_v12, 0.0  ;;  %v9050_v12 = vld [vmem:[%s12659_s4 + $0x16] ss:$0 sm:$0xff] }
 0x382   : > { %1761 = vadd.xlane.f32.xlu2 %v1760_v23  ;;  %v9026_v23 = vld [vmem:[#allocation2 + $0x61] sm:$0xff] }
 0x383   : > { %1613 = vadd.xlane.f32.xlu1 %v1612_v17  ;;  %v1100_v17 = vmul.f32 %v8873_v54, %v9026_v23  ;;  %v1698_v54 = vmul.f32 %v8450_v11, %v8962_v4 }
 0x384   : > { %1416 = vadd.xlane.f32.xlu0 %v1415_v31  ;;  %v1897_v31 = vmul.f32 %v8666_v5, %v8831_v25 }
 0x385   : > { %v1120_v63 = vsel %vm845_vm0, %v1100_v17, 0.0  ;;  %v1712_v22 = vsel %vm845_vm0, %v1698_v54, 0.0  ;;  %v9068_v17 = vld [vmem:[%s12659_s4 + $0x9] ss:$0 sm:$0xff] }
 0x386   : > { %v1907_v48 = vsel %vm845_vm0, %v1897_v31, 0.0  ;;  %v1499_v31 = vmul.f32 %v9068_v17, %v8974_v43 }
 0x38a   : > { %1218 = vadd.xlane.f32.xlu2 %v1217_v49  ;;  %v9037_v49 = vld [vmem:[#allocation2 + $0x60] sm:$0xff] }
 0x38b   : > { %1663 = vadd.xlane.f32.xlu1 %v1662_v62  ;;  %v1848_v62 = vmul.f32 %v8536_v26, %v8884_v19  ;;  %v9053_v26 = vld [vmem:[#allocation2 + $0x55] sm:$0xff] }
 0x38c   : > { %1858 = vadd.xlane.f32.xlu0 %v1857_v46  ;;  %v1050_v46 = vmul.f32 %v8859_v52, %v9037_v49  ;;  %v1299_v52 = vmul.f32 %v8892_v39, %v9053_v26 }
 0x38d   : > { %v1860_v58 = vsel %vm845_vm0, %v1848_v62, 0.0  ;;  %v9075_v62 = vld [vmem:[#allocation2 + $0x56] sm:$0xff] }
 0x392   : > { %1811 = vadd.xlane.f32.xlu2 %v1810_v14  ;;  %v1070_v14 = vsel %vm845_vm0, %v1050_v46, 0.0  ;;  %v1898_v46 = vmul.f32 %v8666_v5, %v8910_v34 }
 0x393   : > { %2105 = vadd.xlane.f32.xlu1 %v2104_v1 }
 0x394   : > { %1466 = vadd.xlane.f32.xlu0 %v1465_v37  ;;  %v2146_v37 = vmul.f32 %v9050_v12, %v8815_v0 }
 0x39a   : > { %1268 = vadd.xlane.f32.xlu2 %v1267_v59  ;;  %v1317_v59 = vsel %vm845_vm0, %v1299_v52, 0.0  ;;  %v1947_v52 = vmul.f32 %v8598_v6, %v8852_v13 }
 0x39b   : > { %1121 = vadd.xlane.f32.xlu1 %v1120_v63  ;;  %v2154_v63 = vsel %vm845_vm0, %v2146_v37, 0.0  ;;  %v1910_v37 = vsel %vm845_vm0, %v1898_v46, 0.0 }
 0x39c   : > { %1908 = vadd.xlane.f32.xlu0 %v1907_v48  ;;  %v1515_v48 = vsel %vm845_vm0, %v1499_v31, 0.0 }
 0x3a2   : > { %1861 = vadd.xlane.f32.xlu2 %v1860_v58  ;;  %v9086_v58 = vld [vmem:[%s12659_s4 + $0x6] ss:$0 sm:$0xff] }
 0x3a3   : > { %1713 = vadd.xlane.f32.xlu1 %v1712_v22  ;;  %v1349_v22 = vmul.f32 %v9086_v58, %v9075_v62 }
 0x3a4   : > { %1071 = vadd.xlane.f32.xlu0 %v1070_v14 }
 0x3a5   : > { %v9055_v11 = vpop.xlane.xlu2 %1162  ;;  %v1367_v31 = vsel %vm845_vm0, %v1349_v22, 0.0  ;;  %v1948_v22 = vmul.f32 %v8598_v6, %v8932_v53  ;;  %v1997_v6 = vmul.f32 %v8640_v51, %v8881_v8 }
 0x3a6   : > { %12748 = vst [vmem:[#allocation53_spill] sm:$0xff] %v9055_v11  ;;  %v9057_v1 = vpop.xlane.xlu1 %1112 }
 0x3a7   : > { %12749 = vst [vmem:[#allocation54_spill] sm:$0xff] %v9057_v1  ;;  %v9063_v56 = vpop.xlane.xlu0 %1062 }
 0x3a8   : > { %12750 = vst [vmem:[#allocation55_spill] sm:$0xff] %v9063_v56  ;;  %v2048_v56 = vmul.f32 %v8660_v57, %v8962_v4 }
 0x3aa   : > { %1318 = vadd.xlane.f32.xlu2 %v1317_v59  ;;  %v1957_v59 = vsel %vm845_vm0, %v1947_v52, 0.0 }
 0x3ab   : > { %2155 = vadd.xlane.f32.xlu1 %v2154_v63  ;;  %v9097_v63 = vld [vmem:[#allocation2 + $0x62] sm:$0xff] }
 0x3ac   : > { %1516 = vadd.xlane.f32.xlu0 %v1515_v48  ;;  %v1150_v52 = vmul.f32 %v8899_v61, %v9097_v63 }
 0x3ad   : > { %v9077_v0 = vpop.xlane.xlu2 %1460 }
 0x3ae   : > { %12751 = vst [vmem:[#allocation56_spill] sm:$0xff] %v9077_v0  ;;  %v9079_v54 = vpop.xlane.xlu1 %1410 }
 0x3af   : > { %12752 = vst [vmem:[#allocation57_spill] sm:$0xff] %v9079_v54  ;;  %v9090_v14 = vpop.xlane.xlu0 %1212  ;;  %v9106_v54 = vld [vmem:[%s12659_s4 + $0xa] ss:$0 sm:$0xff] }
 0x3b0   : > { %12753 = vst [vmem:[#allocation58_spill] sm:$0xff] %v9090_v14  ;;  %v1549_v46 = vmul.f32 %v9106_v54, %v8994_v38  ;;  %v9119_v14 = vld [vmem:[#allocation2 + $0x63] sm:$0xff] }
 0x3b1   : > { %v1200_v61 = vmul.f32 %v8843_v18, %v9119_v14  ;;  %v9144_v18 = vld [vmem:[%s12659_s4 + $0x17] ss:$0 sm:$0xff] }
 0x3b2   : > { %1911 = vadd.xlane.f32.xlu2 %v1910_v37 }
 0x3b3   : > { %1368 = vadd.xlane.f32.xlu1 %v1367_v31  ;;  %v1565_v31 = vsel %vm845_vm0, %v1549_v46, 0.0 }
 0x3b4   : > { %1958 = vadd.xlane.f32.xlu0 %v1957_v59  ;;  %v1960_v59 = vsel %vm845_vm0, %v1948_v22, 0.0  ;;  %v9134_v22 = vld [vmem:[%s12659_s4 + $0xe] ss:$0 sm:$0xff] }
 0x3b5   : > { %v9099_v48 = vpop.xlane.xlu2 %1065 }
 0x3b6   : > { %12754 = vst [vmem:[#allocation59_spill] sm:$0xff] %v9099_v48  ;;  %v9101_v0 = vpop.xlane.xlu1 %1262 }
 0x3b7   : > { %12755 = vst [vmem:[#allocation60_spill] sm:$0xff] %v9101_v0  ;;  %v9112_v37 = vpop.xlane.xlu0 %1115  ;;  %v1170_v0 = vsel %vm845_vm0, %v1150_v52, 0.0  ;;  %v2007_v52 = vsel %vm845_vm0, %v1997_v6, 0.0  ;;  %v9153_v6 = vld [vmem:[%s12659_s4 + $0x7] ss:$0 sm:$0xff] }
 0x3b8   : > { %12756 = vst [vmem:[#allocation61_spill] sm:$0xff] %v9112_v37 }
 0x3ba   : > { %1566 = vadd.xlane.f32.xlu2 %v1565_v31  ;;  %v1220_v31 = vsel %vm845_vm0, %v1200_v61, 0.0  ;;  %v1400_v61 = vmul.f32 %v9153_v6, %v9037_v49 }
 0x3bb   : > { %1961 = vadd.xlane.f32.xlu1 %v1960_v59 }
 0x3bc   : > { %1171 = vadd.xlane.f32.xlu0 %v1170_v0  ;;  %v1749_v0 = vmul.f32 %v9134_v22, %v8949_v15 }
 0x3bd   : > { %v9121_v11 = vpop.xlane.xlu2 %1510 }
 0x3be   : > { %12757 = vst [vmem:[#allocation62_spill] sm:$0xff] %v9121_v11  ;;  %v9123_v48 = vpop.xlane.xlu1 %1312  ;;  %v1763_v59 = vsel %vm845_vm0, %v1749_v0, 0.0  ;;  %v9160_v0 = vld [vmem:[%s12659_s4 + $0xf] ss:$0 sm:$0xff] }
 0x3bf   : > { %12758 = vst [vmem:[#allocation63_spill] sm:$0xff] %v9123_v48  ;;  %v9129_v46 = vpop.xlane.xlu0 %1165 }
 0x3c0   : > { %12759 = vst [vmem:[#allocation64_spill] sm:$0xff] %v9129_v46  ;;  %v9173_v46 = vld [vmem:[%s12659_s4 + $0x18] ss:$0 sm:$0xff] }
 0x3c2   : > { %2008 = vadd.xlane.f32.xlu2 %v2007_v52  ;;  %v1799_v52 = vmul.f32 %v9160_v0, %v8947_v27 }
 0x3c3   : > { %1221 = vadd.xlane.f32.xlu1 %v1220_v31 }
 0x3c4   : > { %1764 = vadd.xlane.f32.xlu0 %v1763_v59  ;;  %v2196_v59 = vmul.f32 %v9144_v18, %v8813_v2  ;;  %v1998_v2 = vmul.f32 %v8640_v51, %v8935_v9 }
 0x3c5   : > { %v9146_v11 = vpop.xlane.xlu2 %1560 }
 0x3c6   : > { %12760 = vst [vmem:[#allocation65_spill] sm:$0xff] %v9146_v11  ;;  %v9148_v48 = vpop.xlane.xlu1 %1362  ;;  %v1418_v11 = vsel %vm845_vm0, %v1400_v61, 0.0  ;;  %v2204_v37 = vsel %vm845_vm0, %v2196_v59, 0.0  ;;  %v2246_v61 = vmul.f32 %v9173_v46, %v8831_v25 }
 0x3c7   : > { %12761 = vst [vmem:[#allocation66_spill] sm:$0xff] %v9148_v48  ;;  %v9164_v31 = vpop.xlane.xlu0 %1215  ;;  %v1813_v48 = vsel %vm845_vm0, %v1799_v52, 0.0 }
 0x3c8   : > { %12762 = vst [vmem:[#allocation67_spill] sm:$0xff] %v9164_v31  ;;  %v2254_v59 = vsel %vm845_vm0, %v2246_v61, 0.0 }
 0x3ca   : > { %1419 = vadd.xlane.f32.xlu2 %v1418_v11  ;;  %v9189_v11 = vld [vmem:[%s12659_s4 + $0xb] ss:$0 sm:$0xff] }
 0x3cb   : > { %1814 = vadd.xlane.f32.xlu1 %v1813_v48  ;;  %v1599_v48 = vmul.f32 %v9189_v11, %v9024_v16 }
 0x3cc   : > { %2205 = vadd.xlane.f32.xlu0 %v2204_v37  ;;  %v2010_v37 = vsel %vm845_vm0, %v1998_v2, 0.0  ;;  %v9207_v2 = vld [vmem:[%s12659_s4 + $0xc] ss:$0 sm:$0xff] }
 0x3cd   : > { %v9176_v3 = vpop.xlane.xlu2 %1610  ;;  %v1615_v51 = vsel %vm845_vm0, %v1599_v48, 0.0  ;;  %v1649_v61 = vmul.f32 %v9207_v2, %v9053_v26  ;;  %v2047_v48 = vmul.f32 %v8660_v57, %v8907_v30 }
 0x3ce   : > { %12763 = vst [vmem:[#allocation68_spill] sm:$0xff] %v9176_v3  ;;  %v9178_v31 = vpop.xlane.xlu1 %1413  ;;  %v9196_v3 = vld [vmem:[#allocation2 + $0x64] sm:$0xff] }
 0x3cf   : > { %12764 = vst [vmem:[#allocation69_spill] sm:$0xff] %v9178_v31  ;;  %v9184_v52 = vpop.xlane.xlu0 %1463  ;;  %v1250_v31 = vmul.f32 %v8866_v40, %v9196_v3  ;;  %v2057_v40 = vsel %vm845_vm0, %v2047_v48, 0.0  ;;  %v1450_v48 = vmul.f32 %v9017_v35, %v9026_v23 }
 0x3d0   : > { %12765 = vst [vmem:[#allocation70_spill] sm:$0xff] %v9184_v52 }
 0x3d2   : > { %2011 = vadd.xlane.f32.xlu2 %v2010_v37 }
 0x3d3   : > { %2255 = vadd.xlane.f32.xlu1 %v2254_v59  ;;  %v1270_v59 = vsel %vm845_vm0, %v1250_v31, 0.0  ;;  %v2097_v31 = vmul.f32 %v9007_v50, %v8850_v28 }
 0x3d4   : > { %1616 = vadd.xlane.f32.xlu0 %v1615_v51  ;;  %v1665_v51 = vsel %vm845_vm0, %v1649_v61, 0.0 }
 0x3d5   : > { %v9198_v25 = vpop.xlane.xlu2 %1265 }
 0x3d6   : > { %12766 = vst [vmem:[#allocation71_spill] sm:$0xff] %v9198_v25  ;;  %v9200_v52 = vpop.xlane.xlu1 %1660 }
 0x3d7   : > { %12767 = vst [vmem:[#allocation72_spill] sm:$0xff] %v9200_v52  ;;  %v9211_v37 = vpop.xlane.xlu0 %1315 }
 0x3d8   : > { %12768 = vst [vmem:[#allocation73_spill] sm:$0xff] %v9211_v37  ;;  %v9225_v37 = vld [vmem:[%s12659_s4 + $0x10] ss:$0 sm:$0xff] }
 0x3d9   : > { %v1849_v7 = vmul.f32 %v9225_v37, %v8974_v43 }
 0x3da   : > { %1271 = vadd.xlane.f32.xlu2 %v1270_v59 }
 0x3db   : > { %1666 = vadd.xlane.f32.xlu1 %v1665_v51  ;;  %v1863_v59 = vsel %vm845_vm0, %v1849_v7, 0.0  ;;  %v2107_v51 = vsel %vm845_vm0, %v2097_v31, 0.0  ;;  %v1500_v7 = vmul.f32 %v9068_v17, %v9097_v63 }
 0x3dc   : > { %2058 = vadd.xlane.f32.xlu0 %v2057_v40  ;;  %v9240_v40 = vld [vmem:[%s12659_s4 + $0x19] ss:$0 sm:$0xff] }
 0x3dd   : > { %v9218_v52 = vpop.xlane.xlu2 %1118  ;;  %v2296_v1 = vmul.f32 %v9240_v40, %v8852_v13 }
 0x3de   : > { %12769 = vst [vmem:[#allocation74_spill] sm:$0xff] %v9218_v52  ;;  %v9220_v25 = vpop.xlane.xlu1 %1068  ;;  %v1468_v52 = vsel %vm845_vm0, %v1450_v48, 0.0  ;;  %v1518_v48 = vsel %vm845_vm0, %v1500_v7, 0.0 }
 0x3df   : > { %12770 = vst [vmem:[#allocation75_spill] sm:$0xff] %v9220_v25  ;;  %v9231_v61 = vpop.xlane.xlu0 %1758 }
 0x3e0   : > { %12771 = vst [vmem:[#allocation76_spill] sm:$0xff] %v9231_v61 }
 0x3e2   : > { %1864 = vadd.xlane.f32.xlu2 %v1863_v59  ;;  %v2304_v59 = vsel %vm845_vm0, %v2296_v1, 0.0  ;;  %v2098_v1 = vmul.f32 %v9007_v50, %v8949_v15  ;;  %v2147_v15 = vmul.f32 %v9050_v12, %v8854_v24  ;;  %v9300_v24 = vld [vmem:[%s12659_s4 + $0x1a] ss:$0 sm:$0xff] }
 0x3e3   : > { %2108 = vadd.xlane.f32.xlu1 %v2107_v51  ;;  %v9258_v51 = vld [vmem:[#allocation2 + $0x65] sm:$0xff] }
 0x3e4   : > { %1469 = vadd.xlane.f32.xlu0 %v1468_v52  ;;  %v2060_v52 = vsel %vm845_vm0, %v2048_v56, 0.0  ;;  %v1300_v56 = vmul.f32 %v8892_v39, %v9258_v51 }
 0x3e5   : > { %v9243_v25 = vpop.xlane.xlu2 %1710 }
 0x3e6   : > { %12772 = vst [vmem:[#allocation77_spill] sm:$0xff] %v9243_v25  ;;  %v9245_v61 = vpop.xlane.xlu1 %1513 }
 0x3e7   : > { %12773 = vst [vmem:[#allocation78_spill] sm:$0xff] %v9245_v61  ;;  %v9251_v31 = vpop.xlane.xlu0 %1365  ;;  %v9267_v61 = vld [vmem:[%s12659_s4 + $0xd] ss:$0 sm:$0xff] }
 0x3e8   : > { %12774 = vst [vmem:[#allocation79_spill] sm:$0xff] %v9251_v31  ;;  %v1699_v57 = vmul.f32 %v9267_v61, %v9075_v62 }
 0x3ea   : > { %2305 = vadd.xlane.f32.xlu2 %v2304_v59  ;;  %v1715_v59 = vsel %vm845_vm0, %v1699_v57, 0.0 }
 0x3eb   : > { %1519 = vadd.xlane.f32.xlu1 %v1518_v48  ;;  %v2110_v48 = vsel %vm845_vm0, %v2098_v1, 0.0  ;;  %v1899_v1 = vmul.f32 %v8666_v5, %v8994_v38  ;;  %v1550_v5 = vmul.f32 %v9106_v54, %v9119_v14 }
 0x3ec   : > { %2061 = vadd.xlane.f32.xlu0 %v2060_v52  ;;  %v1320_v52 = vsel %vm845_vm0, %v1300_v56, 0.0  ;;  %v2157_v56 = vsel %vm845_vm0, %v2147_v15, 0.0  ;;  %v9311_v15 = vld [vmem:[%s12659_s4 + $0x12] ss:$0 sm:$0xff] }
 0x3ed   : > { %v9260_v13 = vpop.xlane.xlu2 %1168 }
 0x3ee   : > { %12775 = vst [vmem:[#allocation80_spill] sm:$0xff] %v9260_v13  ;;  %v9262_v25 = vpop.xlane.xlu1 %1563  ;;  %v9280_v13 = vld [vmem:[#allocation2 + $0x66] sm:$0xff] }
 0x3ef   : > { %12776 = vst [vmem:[#allocation81_spill] sm:$0xff] %v9262_v25  ;;  %v9273_v7 = vpop.xlane.xlu0 %1808  ;;  %v1350_v39 = vmul.f32 %v9086_v58, %v9280_v13 }
 0x3f0   : > { %12777 = vst [vmem:[#allocation82_spill] sm:$0xff] %v9273_v7  ;;  %v2198_v7 = vmul.f32 %v9144_v18, %v8974_v43  ;;  %v2248_v43 = vmul.f32 %v9173_v46, %v8994_v38  ;;  %v2297_v38 = vmul.f32 %v9240_v40, %v8932_v53 }
 0x3f2   : > { %1716 = vadd.xlane.f32.xlu2 %v1715_v59  ;;  %v1370_v59 = vsel %vm845_vm0, %v1350_v39, 0.0  ;;  %v1949_v39 = vmul.f32 %v9311_v15, %v9024_v16 }
 0x3f3   : > { %2111 = vadd.xlane.f32.xlu1 %v2110_v48  ;;  %v1913_v48 = vsel %vm845_vm0, %v1899_v1, 0.0 }
 0x3f4   : > { %1321 = vadd.xlane.f32.xlu0 %v1320_v52 }
 0x3f5   : > { %v9282_v25 = vpop.xlane.xlu2 %1761 }
 0x3f6   : > { %12778 = vst [vmem:[#allocation83_spill] sm:$0xff] %v9282_v25  ;;  %v9284_v31 = vpop.xlane.xlu1 %1613  ;;  %v9324_v25 = vld [vmem:[%s12659_s4 + $0x1b] ss:$0 sm:$0xff] }
 0x3f7   : > { %12779 = vst [vmem:[#allocation84_spill] sm:$0xff] %v9284_v31  ;;  %v9290_v57 = vpop.xlane.xlu0 %1416  ;;  %v1750_v31 = vmul.f32 %v9134_v22, %v9037_v49 }
 0x3fa   : > { %2158 = vadd.xlane.f32.xlu2 %v2157_v56  ;;  %v2346_v56 = vmul.f32 %v9300_v24, %v8881_v8  ;;  %v2148_v8 = vmul.f32 %v9050_v12, %v8947_v27 }
 0x3fb   : > { %1371 = vadd.xlane.f32.xlu1 %v1370_v59  ;;  %v1568_v59 = vsel %vm845_vm0, %v1550_v5, 0.0  ;;  %v2396_v5 = vmul.f32 %v9324_v25, %v8907_v30 }
 0x3fc   : > { %1914 = vadd.xlane.f32.xlu0 %v1913_v48  ;;  %v1963_v48 = vsel %vm845_vm0, %v1949_v39, 0.0 }
 0x3fd   : > { %v9302_v58 = vpop.xlane.xlu2 %1218 }
 0x3fe   : > { %12780 = vst [vmem:[#allocation85_spill] sm:$0xff] %v9302_v58  ;;  %v9304_v52 = vpop.xlane.xlu1 %1663 }
 0x3ff   : > { %12781 = vst [vmem:[#allocation86_spill] sm:$0xff] %v9304_v52  ;;  %v9315_v1 = vpop.xlane.xlu0 %1858  ;;  %v2354_v52 = vsel %vm845_vm0, %v2346_v56, 0.0  ;;  %v2404_v56 = vsel %vm845_vm0, %v2396_v5, 0.0  ;;  %v2197_v5 = vmul.f32 %v9144_v18, %v8884_v19 }
 0x400   : > { %12782 = vst [vmem:[#allocation87_spill] sm:$0xff] %v9315_v1 }
 0x402   : > { %1569 = vadd.xlane.f32.xlu2 %v1568_v59  ;;  %v2160_v59 = vsel %vm845_vm0, %v2148_v8, 0.0 }
 0x403   : > { %1964 = vadd.xlane.f32.xlu1 %v1963_v48  ;;  %v9342_v48 = vld [vmem:[#allocation2 + $0x70] sm:$0xff] }
 0x404   : > { %2355 = vadd.xlane.f32.xlu0 %v2354_v52  ;;  %v1766_v52 = vsel %vm845_vm0, %v1750_v31, 0.0  ;;  %v1401_v30 = vmul.f32 %v9153_v6, %v9342_v48 }
 0x405   : > { %v9327_v58 = vpop.xlane.xlu2 %1811 }
 0x406   : > { %12783 = vst [vmem:[#allocation88_spill] sm:$0xff] %v9327_v58  ;;  %v9329_v1 = vpop.xlane.xlu1 %2105  ;;  %v1800_v58 = vmul.f32 %v9160_v0, %v9026_v23  ;;  %v1421_v31 = vsel %vm845_vm0, %v1401_v30, 0.0 }
 0x407   : > { %12784 = vst [vmem:[#allocation89_spill] sm:$0xff] %v9329_v1  ;;  %v9335_v39 = vpop.xlane.xlu0 %1466 }
 0x40a   : > { %2161 = vadd.xlane.f32.xlu2 %v2160_v59  ;;  %v1816_v59 = vsel %vm845_vm0, %v1800_v58, 0.0  ;;  %v2247_v58 = vmul.f32 %v9173_v46, %v8910_v34 }
 0x40b   : > { %2405 = vadd.xlane.f32.xlu1 %v2404_v56  ;;  %v2207_v56 = vsel %vm845_vm0, %v2197_v5, 0.0  ;;  %v1600_v5 = vmul.f32 %v9189_v11, %v9196_v3 }
 0x40c   : > { %1767 = vadd.xlane.f32.xlu0 %v1766_v52 }
 0x40d   : > { %v9344_v27 = vpop.xlane.xlu2 %1268 }
 0x40e   : > { %12785 = vst [vmem:[#allocation90_spill] sm:$0xff] %v9344_v27  ;;  %v9346_v1 = vpop.xlane.xlu1 %1121  ;;  %v9366_v27 = vld [vmem:[%s12659_s4 + $0x13] ss:$0 sm:$0xff] }
 0x40f   : > { %12786 = vst [vmem:[#allocation91_spill] sm:$0xff] %v9346_v1  ;;  %v9352_v8 = vpop.xlane.xlu0 %1908  ;;  %v1999_v19 = vmul.f32 %v9366_v27, %v9053_v26 }
 0x410   : > { %12787 = vst [vmem:[#allocation92_spill] sm:$0xff] %v9352_v8 }
 0x412   : > { %1422 = vadd.xlane.f32.xlu2 %v1421_v31  ;;  %v2013_v31 = vsel %vm845_vm0, %v1999_v19, 0.0  ;;  %v1650_v19 = vmul.f32 %v9207_v2, %v9258_v51 }
 0x413   : > { %1817 = vadd.xlane.f32.xlu1 %v1816_v59  ;;  %v2257_v59 = vsel %vm845_vm0, %v2247_v58, 0.0 }
 0x414   : > { %2208 = vadd.xlane.f32.xlu0 %v2207_v56  ;;  %v9381_v56 = vld [vmem:[%s12659_s4 + $0x1c] ss:$0 sm:$0xff] }
 0x415   : > { %v9359_v52 = vpop.xlane.xlu2 %1861  ;;  %v2447_v8 = vmul.f32 %v9381_v56, %v8850_v28 }
 0x416   : > { %12788 = vst [vmem:[#allocation93_spill] sm:$0xff] %v9359_v52  ;;  %v9361_v6 = vpop.xlane.xlu1 %1713  ;;  %v1618_v52 = vsel %vm845_vm0, %v1600_v5, 0.0  ;;  %v1668_v5 = vsel %vm845_vm0, %v1650_v19, 0.0 }
 0x417   : > { %12789 = vst [vmem:[#allocation94_spill] sm:$0xff] %v9361_v6  ;;  %v9372_v30 = vpop.xlane.xlu0 %1071 }
 0x41a   : > { %2014 = vadd.xlane.f32.xlu2 %v2013_v31  ;;  %v2455_v31 = vsel %vm845_vm0, %v2447_v8, 0.0 }
 0x41b   : > { %2258 = vadd.xlane.f32.xlu1 %v2257_v59  ;;  %v9399_v59 = vld [vmem:[#allocation2 + $0x71] sm:$0xff] }
 0x41c   : > { %1619 = vadd.xlane.f32.xlu0 %v1618_v52  ;;  %v2210_v52 = vsel %vm845_vm0, %v2198_v7, 0.0  ;;  %v1451_v19 = vmul.f32 %v9017_v35, %v9399_v59 }
 0x41d   : > { %v9384_v34 = vpop.xlane.xlu2 %1318 }
 0x41e   : > { %12790 = vst [vmem:[#allocation95_spill] sm:$0xff] %v9384_v34  ;;  %v9386_v6 = vpop.xlane.xlu1 %2155  ;;  %v1850_v34 = vmul.f32 %v9225_v37, %v9097_v63 }
 0x41f   : > { %12791 = vst [vmem:[#allocation96_spill] sm:$0xff] %v9386_v6  ;;  %v9392_v58 = vpop.xlane.xlu0 %1516 }
 0x420   : > { %12792 = vst [vmem:[#allocation97_spill] sm:$0xff] %v9392_v58  ;;  %v1866_v7 = vsel %vm845_vm0, %v1850_v34, 0.0  ;;  %v1950_v58 = vmul.f32 %v9311_v15, %v9196_v3 }
 0x422   : > { %2456 = vadd.xlane.f32.xlu2 %v2455_v31  ;;  %v2260_v31 = vsel %vm845_vm0, %v2248_v43, 0.0  ;;  %v9431_v43 = vld [vmem:[%s12659_s4 + $0x14] ss:$0 sm:$0xff] }
 0x423   : > { %1669 = vadd.xlane.f32.xlu1 %v1668_v5  ;;  %v1471_v5 = vsel %vm845_vm0, %v1451_v19, 0.0  ;;  %v2049_v19 = vmul.f32 %v9431_v43, %v9075_v62 }
 0x424   : > { %2211 = vadd.xlane.f32.xlu0 %v2210_v52  ;;  %v9416_v52 = vld [vmem:[#allocation2 + $0x72] sm:$0xff] }
 0x425   : > { %v9401_v28 = vpop.xlane.xlu2 %1911  ;;  %v1501_v35 = vmul.f32 %v9068_v17, %v9416_v52  ;;  %v2063_v53 = vsel %vm845_vm0, %v2049_v19, 0.0  ;;  %v9441_v17 = vld [vmem:[%s12659_s4 + $0x1d] ss:$0 sm:$0xff] }
 0x426   : > { %12793 = vst [vmem:[#allocation98_spill] sm:$0xff] %v9401_v28  ;;  %v9403_v6 = vpop.xlane.xlu1 %1368 }
 0x427   : > { %12794 = vst [vmem:[#allocation99_spill] sm:$0xff] %v9403_v6  ;;  %v9409_v8 = vpop.xlane.xlu0 %1958 }
 0x428   : > { %12795 = vst [vmem:[#allocation100_spill] sm:$0xff] %v9409_v8 }
 0x42a   : > { %1867 = vadd.xlane.f32.xlu2 %v1866_v7  ;;  %v2307_v7 = vsel %vm845_vm0, %v2297_v38, 0.0  ;;  %v1700_v38 = vmul.f32 %v9267_v61, %v9280_v13 }
 0x42b   : > { %2261 = vadd.xlane.f32.xlu1 %v2260_v31  ;;  %v1521_v31 = vsel %vm845_vm0, %v1501_v35, 0.0  ;;  %v2099_v35 = vmul.f32 %v9007_v50, %v9037_v49 }
 0x42c   : > { %1472 = vadd.xlane.f32.xlu0 %v1471_v5  ;;  %v2487_v5 = vld [vmem:[#allocation2 + $0x41] sm:$0xff] }
 0x42d   : > { %v9418_v28 = vpop.xlane.xlu2 %1566  ;;  %v2497_v19 = vmul.f32 %v9441_v17, %v2487_v5  ;;  %v2298_v5 = vmul.f32 %v9240_v40, %v9024_v16 }
 0x42e   : > { %12796 = vst [vmem:[#allocation101_spill] sm:$0xff] %v9418_v28  ;;  %v9420_v6 = vpop.xlane.xlu1 %1961 }
 0x42f   : > { %12797 = vst [vmem:[#allocation102_spill] sm:$0xff] %v9420_v6  ;;  %v9426_v34 = vpop.xlane.xlu0 %1171 }
 0x430   : > { %12798 = vst [vmem:[#allocation103_spill] sm:$0xff] %v9426_v34  ;;  %v2113_v34 = vsel %vm845_vm0, %v2099_v35, 0.0 }
 0x432   : > { %2308 = vadd.xlane.f32.xlu2 %v2307_v7 }
 0x433   : > { %1522 = vadd.xlane.f32.xlu1 %v1521_v31  ;;  %v1718_v31 = vsel %vm845_vm0, %v1700_v38, 0.0 }
 0x434   : > { %2064 = vadd.xlane.f32.xlu0 %v2063_v53  ;;  %v9459_v53 = vld [vmem:[%s12659_s4 + $0x1e] ss:$0 sm:$0xff] }
 0x435   : > { %v9443_v6 = vpop.xlane.xlu2 %2008 }
 0x436   : > { %12799 = vst [vmem:[#allocation104_spill] sm:$0xff] %v9443_v6  ;;  %v9445_v8 = vpop.xlane.xlu1 %1221  ;;  %v2505_v6 = vsel %vm845_vm0, %v2497_v19, 0.0 }
 0x437   : > { %12800 = vst [vmem:[#allocation105_spill] sm:$0xff] %v9445_v8  ;;  %v9451_v7 = vpop.xlane.xlu0 %1764  ;;  %v2537_v8 = vld [vmem:[#allocation2 + $0x42] sm:$0xff] }
 0x438   : > { %12801 = vst [vmem:[#allocation106_spill] sm:$0xff] %v9451_v7  ;;  %v2547_v38 = vmul.f32 %v9459_v53, %v2537_v8 }
 0x43a   : > { %1719 = vadd.xlane.f32.xlu2 %v1718_v31  ;;  %v9474_v31 = vld [vmem:[%s12659_s4 + $0x11] ss:$0 sm:$0xff]  ;;  %v2555_v19 = vsel %vm845_vm0, %v2547_v38, 0.0  ;;  %v2347_v38 = vmul.f32 %v9300_v24, %v8935_v9 }
 0x43b   : > { %2114 = vadd.xlane.f32.xlu1 %v2113_v34  ;;  %v1900_v34 = vmul.f32 %v9474_v31, %v9119_v14 }
 0x43c   : > { %2506 = vadd.xlane.f32.xlu0 %v2505_v6  ;;  %v2310_v6 = vsel %vm845_vm0, %v2298_v5, 0.0 }
 0x43d   : > { %v9462_v28 = vpop.xlane.xlu2 %1419  ;;  %v1916_v16 = vsel %vm845_vm0, %v1900_v34, 0.0 }
 0x43e   : > { %12802 = vst [vmem:[#allocation107_spill] sm:$0xff] %v9462_v28  ;;  %v9464_v7 = vpop.xlane.xlu1 %1814  ;;  %v9481_v28 = vld [vmem:[#allocation2 + $0x73] sm:$0xff] }
 0x43f   : > { %12803 = vst [vmem:[#allocation108_spill] sm:$0xff] %v9464_v7  ;;  %v9469_v35 = vpop.xlane.xlu0 %2205  ;;  %v1551_v7 = vmul.f32 %v9106_v54, %v9481_v28 }
 0x440   : > { %12804 = vst [vmem:[#allocation109_spill] sm:$0xff] %v9469_v35 }
 0x441   : > { %v1571_v34 = vsel %vm845_vm0, %v1551_v7, 0.0 }
 0x442   : > { %2311 = vadd.xlane.f32.xlu2 %v2310_v6  ;;  %v1966_v6 = vsel %vm845_vm0, %v1950_v58, 0.0  ;;  %v1751_v58 = vmul.f32 %v9134_v22, %v9342_v48 }
 0x443   : > { %2556 = vadd.xlane.f32.xlu1 %v2555_v19  ;;  %v2357_v19 = vsel %vm845_vm0, %v2347_v38, 0.0 }
 0x444   : > { %1917 = vadd.xlane.f32.xlu0 %v1916_v16 }
 0x445   : > { %v9483_v8 = vpop.xlane.xlu2 %2011 }
 0x446   : > { %12805 = vst [vmem:[#allocation110_spill] sm:$0xff] %v9483_v8  ;;  %v9485_v35 = vpop.xlane.xlu1 %2255  ;;  %v2397_v8 = vmul.f32 %v9324_v25, %v8962_v4 }
 0x447   : > { %12806 = vst [vmem:[#allocation111_spill] sm:$0xff] %v9485_v35  ;;  %v9491_v5 = vpop.xlane.xlu0 %1616  ;;  %v2149_v35 = vmul.f32 %v9050_v12, %v9026_v23  ;;  %v1769_v23 = vsel %vm845_vm0, %v1751_v58, 0.0 }
 0x448   : > { %12807 = vst [vmem:[#allocation112_spill] sm:$0xff] %v9491_v5  ;;  %v2407_v38 = vsel %vm845_vm0, %v2397_v8, 0.0 }
 0x449   : > { %v2163_v7 = vsel %vm845_vm0, %v2149_v35, 0.0  ;;  %v1801_v35 = vmul.f32 %v9160_v0, %v9399_v59 }
 0x44a   : > { %1572 = vadd.xlane.f32.xlu2 %v1571_v34  ;;  %v9515_v34 = vld [vmem:[%s12659_s4 + $0x1f] ss:$0 sm:$0xff] }
 0x44b   : > { %1967 = vadd.xlane.f32.xlu1 %v1966_v6  ;;  %v2587_v6 = vld [vmem:[#allocation2 + $0x43] sm:$0xff]  ;;  %v1819_v58 = vsel %vm845_vm0, %v1801_v35, 0.0 }
 0x44c   : > { %2358 = vadd.xlane.f32.xlu0 %v2357_v19 }
 0x44d   : > { %v9498_v16 = vpop.xlane.xlu2 %1271 }
 0x44e   : > { %12808 = vst [vmem:[#allocation113_spill] sm:$0xff] %v9498_v16  ;;  %v9500_v54 = vpop.xlane.xlu1 %1666 }
 0x44f   : > { %12809 = vst [vmem:[#allocation114_spill] sm:$0xff] %v9500_v54  ;;  %v9506_v9 = vpop.xlane.xlu0 %2058  ;;  %v2348_v54 = vmul.f32 %v9300_v24, %v9053_v26  ;;  %v2398_v26 = vmul.f32 %v9324_v25, %v9075_v62 }
 0x450   : > { %12810 = vst [vmem:[#allocation115_spill] sm:$0xff] %v9506_v9  ;;  %v2597_v9 = vmul.f32 %v9515_v34, %v2587_v6 }
 0x452   : > { %2164 = vadd.xlane.f32.xlu2 %v2163_v7  ;;  %v2605_v7 = vsel %vm845_vm0, %v2597_v9, 0.0 }
 0x453   : > { %2408 = vadd.xlane.f32.xlu1 %v2407_v38  ;;  %v2360_v38 = vsel %vm845_vm0, %v2348_v54, 0.0 }
 0x454   : > { %1770 = vadd.xlane.f32.xlu0 %v1769_v23  ;;  %v9532_v23 = vld [vmem:[#allocation2 + $0x74] sm:$0xff] }
 0x455   : > { %v9518_v4 = vpop.xlane.xlu2 %1864  ;;  %v1601_v35 = vmul.f32 %v9189_v11, %v9532_v23 }
 0x456   : > { %12811 = vst [vmem:[#allocation116_spill] sm:$0xff] %v9518_v4  ;;  %v9520_v19 = vpop.xlane.xlu1 %2108 }
 0x457   : > { %12812 = vst [vmem:[#allocation117_spill] sm:$0xff] %v9520_v19  ;;  %v9525_v8 = vpop.xlane.xlu0 %1469 }
 0x458   : > { %12813 = vst [vmem:[#allocation118_spill] sm:$0xff] %v9525_v8  ;;  %v2000_v8 = vmul.f32 %v9366_v27, %v9258_v51 }
 0x45a   : > { %2606 = vadd.xlane.f32.xlu2 %v2605_v7  ;;  %v2016_v54 = vsel %vm845_vm0, %v2000_v8, 0.0  ;;  %v2410_v7 = vsel %vm845_vm0, %v2398_v26, 0.0 }
 0x45b   : > { %1820 = vadd.xlane.f32.xlu1 %v1819_v58  ;;  %v1621_v58 = vsel %vm845_vm0, %v1601_v35, 0.0  ;;  %v2199_v35 = vmul.f32 %v9144_v18, %v9097_v63  ;;  %v1851_v63 = vmul.f32 %v9225_v37, %v9416_v52 }
 0x45c   : > { %2361 = vadd.xlane.f32.xlu0 %v2360_v38  ;;  %v9549_v38 = vld [vmem:[#allocation2 + $0x50] sm:$0xff] }
 0x45d   : > { %v9534_v6 = vpop.xlane.xlu2 %2305  ;;  %v2448_v11 = vmul.f32 %v9381_v56, %v9549_v38 }
 0x45e   : > { %12814 = vst [vmem:[#allocation119_spill] sm:$0xff] %v9534_v6  ;;  %v9536_v19 = vpop.xlane.xlu1 %1519  ;;  %v9551_v6 = vld [vmem:[#allocation2 + $0x75] sm:$0xff] }
 0x45f   : > { %12815 = vst [vmem:[#allocation120_spill] sm:$0xff] %v9536_v19  ;;  %v9542_v9 = vpop.xlane.xlu0 %2061  ;;  %v1651_v8 = vmul.f32 %v9207_v2, %v9551_v6  ;;  %v2637_v2 = vld [vmem:[#allocation2 + $0x44] sm:$0xff] }
 0x460   : > { %12816 = vst [vmem:[#allocation121_spill] sm:$0xff] %v9542_v9 }
 0x462   : > { %2017 = vadd.xlane.f32.xlu2 %v2016_v54  ;;  %v2458_v54 = vsel %vm845_vm0, %v2448_v11, 0.0  ;;  %v2249_v11 = vmul.f32 %v9173_v46, %v9119_v14 }
 0x463   : > { %2411 = vadd.xlane.f32.xlu1 %v2410_v7  ;;  %v1671_v7 = vsel %vm845_vm0, %v1651_v8, 0.0 }
 0x464   : > { %1622 = vadd.xlane.f32.xlu0 %v1621_v58  ;;  %v2213_v58 = vsel %vm845_vm0, %v2199_v35, 0.0 }
 0x465   : > { %v9553_v19 = vpop.xlane.xlu2 %1716 }
 0x466   : > { %12817 = vst [vmem:[#allocation122_spill] sm:$0xff] %v9553_v19  ;;  %v9555_v62 = vpop.xlane.xlu1 %2111 }
 0x467   : > { %12818 = vst [vmem:[#allocation123_spill] sm:$0xff] %v9555_v62  ;;  %v9561_v26 = vpop.xlane.xlu0 %1321  ;;  %v9571_v62 = vld [vmem:[%s12659_s4 + $0x20] ss:$0 sm:$0xff] }
 0x468   : > { %12819 = vst [vmem:[#allocation124_spill] sm:$0xff] %v9561_v26  ;;  %v2647_v35 = vmul.f32 %v9571_v62, %v2637_v2  ;;  %v2449_v2 = vmul.f32 %v9381_v56, %v9037_v49  ;;  %v2050_v26 = vmul.f32 %v9431_v43, %v9280_v13 }
 0x46a   : > { %2459 = vadd.xlane.f32.xlu2 %v2458_v54  ;;  %v1869_v54 = vsel %vm845_vm0, %v1851_v63, 0.0 }
 0x46b   : > { %1672 = vadd.xlane.f32.xlu1 %v1671_v7  ;;  %v2263_v7 = vsel %vm845_vm0, %v2249_v11, 0.0 }
 0x46c   : > { %2214 = vadd.xlane.f32.xlu0 %v2213_v58  ;;  %v9589_v58 = vld [vmem:[%s12659_s4 + $0x21] ss:$0 sm:$0xff] }
 0x46d   : > { %v9573_v9 = vpop.xlane.xlu2 %2158 }
 0x46e   : > { %12820 = vst [vmem:[#allocation125_spill] sm:$0xff] %v9573_v9  ;;  %v9575_v4 = vpop.xlane.xlu1 %1371  ;;  %v2655_v9 = vsel %vm845_vm0, %v2647_v35, 0.0 }
 0x46f   : > { %12821 = vst [vmem:[#allocation126_spill] sm:$0xff] %v9575_v4  ;;  %v9581_v8 = vpop.xlane.xlu0 %1914  ;;  %v2687_v4 = vld [vmem:[#allocation2 + $0x45] sm:$0xff] }
 0x470   : > { %12822 = vst [vmem:[#allocation127_spill] sm:$0xff] %v9581_v8  ;;  %v2697_v63 = vmul.f32 %v9589_v58, %v2687_v4 }
 0x472   : > { %1870 = vadd.xlane.f32.xlu2 %v1869_v54  ;;  %v2461_v54 = vsel %vm845_vm0, %v2449_v2, 0.0  ;;  %v2705_v35 = vsel %vm845_vm0, %v2697_v63, 0.0  ;;  %v2100_v2 = vmul.f32 %v9007_v50, %v9342_v48  ;;  %v2299_v50 = vmul.f32 %v9240_v40, %v9196_v3 }
 0x473   : > { %2264 = vadd.xlane.f32.xlu1 %v2263_v7  ;;  %v9606_v7 = vld [vmem:[#allocation2 + $0x76] sm:$0xff] }
 0x474   : > { %2656 = vadd.xlane.f32.xlu0 %v2655_v9  ;;  %v2066_v9 = vsel %vm845_vm0, %v2050_v26, 0.0 }
 0x475   : > { %v9592_v14 = vpop.xlane.xlu2 %1569 }
 0x476   : > { %12823 = vst [vmem:[#allocation128_spill] sm:$0xff] %v9592_v14  ;;  %v9594_v8 = vpop.xlane.xlu1 %1964  ;;  %v9608_v14 = vld [vmem:[#allocation2 + $0x51] sm:$0xff] }
 0x477   : > { %12824 = vst [vmem:[#allocation129_spill] sm:$0xff] %v9594_v8  ;;  %v9599_v11 = vpop.xlane.xlu0 %2355  ;;  %v2498_v26 = vmul.f32 %v9441_v17, %v9608_v14 }
 0x478   : > { %12825 = vst [vmem:[#allocation130_spill] sm:$0xff] %v9599_v11  ;;  %v1701_v11 = vmul.f32 %v9267_v61, %v9606_v7 }
 0x47a   : > { %2462 = vadd.xlane.f32.xlu2 %v2461_v54  ;;  %v1721_v54 = vsel %vm845_vm0, %v1701_v11, 0.0 }
 0x47b   : > { %2706 = vadd.xlane.f32.xlu1 %v2705_v35  ;;  %v2116_v35 = vsel %vm845_vm0, %v2100_v2, 0.0  ;;  %v1901_v2 = vmul.f32 %v9474_v31, %v9481_v28 }
 0x47c   : > { %2067 = vadd.xlane.f32.xlu0 %v2066_v9  ;;  %v2508_v9 = vsel %vm845_vm0, %v2498_v26, 0.0  ;;  %v2313_v26 = vsel %vm845_vm0, %v2299_v50, 0.0 }
 0x47d   : > { %v9610_v49 = vpop.xlane.xlu2 %2161  ;;  %v1919_v3 = vsel %vm845_vm0, %v1901_v2, 0.0 }
 0x47e   : > { %12826 = vst [vmem:[#allocation131_spill] sm:$0xff] %v9610_v49  ;;  %v9612_v4 = vpop.xlane.xlu1 %2405 }
 0x47f   : > { %12827 = vst [vmem:[#allocation132_spill] sm:$0xff] %v9612_v4  ;;  %v9618_v63 = vpop.xlane.xlu0 %1767  ;;  %v9625_v4 = vld [vmem:[#allocation2 + $0x52] sm:$0xff] }
 0x480   : > { %12828 = vst [vmem:[#allocation133_spill] sm:$0xff] %v9618_v63  ;;  %v2548_v8 = vmul.f32 %v9459_v53, %v9625_v4 }
 0x482   : > { %1722 = vadd.xlane.f32.xlu2 %v1721_v54  ;;  %v2558_v54 = vsel %vm845_vm0, %v2548_v8, 0.0  ;;  %v1951_v8 = vmul.f32 %v9311_v15, %v9532_v23 }
 0x483   : > { %2117 = vadd.xlane.f32.xlu1 %v2116_v35  ;;  %v9644_v35 = vld [vmem:[%s12659_s4 + $0x22] ss:$0 sm:$0xff] }
 0x484   : > { %2509 = vadd.xlane.f32.xlu0 %v2508_v9  ;;  %v2737_v9 = vld [vmem:[#allocation2 + $0x46] sm:$0xff] }
 0x485   : > { %v9627_v61 = vpop.xlane.xlu2 %1422  ;;  %v2747_v50 = vmul.f32 %v9644_v35, %v2737_v9  ;;  %v9665_v9 = vld [vmem:[#allocation2 + $0x80] sm:$0xff] }
 0x486   : > { %12829 = vst [vmem:[#allocation134_spill] sm:$0xff] %v9627_v61  ;;  %v9629_v49 = vpop.xlane.xlu1 %1817 }
 0x487   : > { %12830 = vst [vmem:[#allocation135_spill] sm:$0xff] %v9629_v49  ;;  %v9635_v11 = vpop.xlane.xlu0 %2208  ;;  %v9647_v49 = vld [vmem:[#allocation2 + $0x61] sm:$0xff]  ;;  %v2755_v2 = vsel %vm845_vm0, %v2747_v50, 0.0 }
 0x488   : > { %12831 = vst [vmem:[#allocation136_spill] sm:$0xff] %v9635_v11 }
 0x48a   : > { %2314 = vadd.xlane.f32.xlu2 %v2313_v26  ;;  %v2499_v26 = vmul.f32 %v9441_v17, %v9647_v49 }
 0x48b   : > { %2559 = vadd.xlane.f32.xlu1 %v2558_v54  ;;  %v1969_v54 = vsel %vm845_vm0, %v1951_v8, 0.0 }
 0x48c   : > { %1920 = vadd.xlane.f32.xlu0 %v1919_v3  ;;  %v2511_v3 = vsel %vm845_vm0, %v2499_v26, 0.0  ;;  %v1752_v26 = vmul.f32 %v9134_v22, %v9665_v9 }
 0x48d   : > { %v9649_v11 = vpop.xlane.xlu2 %2014 }
 0x48e   : > { %12832 = vst [vmem:[#allocation137_spill] sm:$0xff] %v9649_v11  ;;  %v9651_v61 = vpop.xlane.xlu1 %2258  ;;  %v9663_v11 = vld [vmem:[#allocation2 + $0x62] sm:$0xff] }
 0x48f   : > { %12833 = vst [vmem:[#allocation138_spill] sm:$0xff] %v9651_v61  ;;  %v9656_v63 = vpop.xlane.xlu0 %1619  ;;  %v2549_v50 = vmul.f32 %v9459_v53, %v9663_v11 }
 0x490   : > { %12834 = vst [vmem:[#allocation139_spill] sm:$0xff] %v9656_v63  ;;  %v2150_v63 = vmul.f32 %v9050_v12, %v9399_v59 }
 0x492   : > { %2756 = vadd.xlane.f32.xlu2 %v2755_v2  ;;  %v2166_v2 = vsel %vm845_vm0, %v2150_v63, 0.0 }
 0x493   : > { %1970 = vadd.xlane.f32.xlu1 %v1969_v54  ;;  %v2561_v54 = vsel %vm845_vm0, %v2549_v50, 0.0 }
 0x494   : > { %2512 = vadd.xlane.f32.xlu0 %v2511_v3  ;;  %v1772_v3 = vsel %vm845_vm0, %v1752_v26, 0.0  ;;  %v2349_v26 = vmul.f32 %v9300_v24, %v9258_v51  ;;  %v2001_v51 = vmul.f32 %v9366_v27, %v9551_v6 }
 0x495   : > { %v9667_v61 = vpop.xlane.xlu2 %2456 }
 0x496   : > { %12835 = vst [vmem:[#allocation140_spill] sm:$0xff] %v9667_v61  ;;  %v9669_v19 = vpop.xlane.xlu1 %1669  ;;  %v9682_v61 = vld [vmem:[#allocation2 + $0x53] sm:$0xff] }
 0x497   : > { %12836 = vst [vmem:[#allocation141_spill] sm:$0xff] %v9669_v19  ;;  %v9675_v8 = vpop.xlane.xlu0 %2211  ;;  %v9684_v19 = vld [vmem:[#allocation2 + $0x81] sm:$0xff]  ;;  %v2598_v22 = vmul.f32 %v9515_v34, %v9682_v61 }
 0x498   : > { %12837 = vst [vmem:[#allocation142_spill] sm:$0xff] %v9675_v8  ;;  %v1802_v63 = vmul.f32 %v9160_v0, %v9684_v19 }
 0x49a   : > { %2167 = vadd.xlane.f32.xlu2 %v2166_v2  ;;  %v2608_v2 = vsel %vm845_vm0, %v2598_v22, 0.0  ;;  %v2399_v22 = vmul.f32 %v9324_v25, %v9280_v13 }
 0x49b   : > { %2562 = vadd.xlane.f32.xlu1 %v2561_v54  ;;  %v1822_v54 = vsel %vm845_vm0, %v1802_v63, 0.0 }
 0x49c   : > { %1773 = vadd.xlane.f32.xlu0 %v1772_v3  ;;  %v2363_v3 = vsel %vm845_vm0, %v2349_v26, 0.0 }
 0x49d   : > { %v9686_v12 = vpop.xlane.xlu2 %1867 }
 0x49e   : > { %12838 = vst [vmem:[#allocation143_spill] sm:$0xff] %v9686_v12  ;;  %v9688_v16 = vpop.xlane.xlu1 %2261 }
 0x49f   : > { %12839 = vst [vmem:[#allocation144_spill] sm:$0xff] %v9688_v16  ;;  %v9694_v50 = vpop.xlane.xlu0 %1472  ;;  %v9704_v16 = vld [vmem:[%s12659_s4 + $0x23] ss:$0 sm:$0xff] }
 0x4a0   : > { %12840 = vst [vmem:[#allocation145_spill] sm:$0xff] %v9694_v50  ;;  %v2798_v26 = vmul.f32 %v9704_v16, %v9549_v38 }
 0x4a2   : > { %2609 = vadd.xlane.f32.xlu2 %v2608_v2  ;;  %v2019_v2 = vsel %vm845_vm0, %v2001_v51, 0.0 }
 0x4a3   : > { %1823 = vadd.xlane.f32.xlu1 %v1822_v54  ;;  %v2413_v54 = vsel %vm845_vm0, %v2399_v22, 0.0 }
 0x4a4   : > { %2364 = vadd.xlane.f32.xlu0 %v2363_v3  ;;  %v9723_v3 = vld [vmem:[%s12659_s4 + $0x24] ss:$0 sm:$0xff] }
 0x4a5   : > { %v9706_v0 = vpop.xlane.xlu2 %2308  ;;  %v2848_v51 = vmul.f32 %v9723_v3, %v9608_v14 }
 0x4a6   : > { %12841 = vst [vmem:[#allocation146_spill] sm:$0xff] %v9706_v0  ;;  %v9708_v8 = vpop.xlane.xlu1 %1522  ;;  %v2806_v0 = vsel %vm845_vm0, %v2798_v26, 0.0 }
 0x4a7   : > { %12842 = vst [vmem:[#allocation147_spill] sm:$0xff] %v9708_v8  ;;  %v9714_v63 = vpop.xlane.xlu0 %2064  ;;  %v9726_v8 = vld [vmem:[#allocation2 + $0x63] sm:$0xff] }
 0x4a8   : > { %12843 = vst [vmem:[#allocation148_spill] sm:$0xff] %v9714_v63  ;;  %v2599_v38 = vmul.f32 %v9515_v34, %v9726_v8 }
 0x4aa   : > { %2020 = vadd.xlane.f32.xlu2 %v2019_v2  ;;  %v2200_v2 = vmul.f32 %v9144_v18, %v9416_v52  ;;  %v2611_v26 = vsel %vm845_vm0, %v2599_v38, 0.0  ;;  %v2250_v38 = vmul.f32 %v9173_v46, %v9481_v28  ;;  %v2450_v46 = vmul.f32 %v9381_v56, %v9342_v48 }
 0x4ab   : > { %2414 = vadd.xlane.f32.xlu1 %v2413_v54  ;;  %v2856_v54 = vsel %vm845_vm0, %v2848_v51, 0.0 }
 0x4ac   : > { %2807 = vadd.xlane.f32.xlu0 %v2806_v0  ;;  %v2216_v0 = vsel %vm845_vm0, %v2200_v2, 0.0 }
 0x4ad   : > { %v9728_v13 = vpop.xlane.xlu2 %1719 }
 0x4ae   : > { %12844 = vst [vmem:[#allocation149_spill] sm:$0xff] %v9728_v13  ;;  %v9730_v63 = vpop.xlane.xlu1 %2114  ;;  %v9743_v13 = vld [vmem:[#allocation2 + $0x82] sm:$0xff] }
 0x4af   : > { %12845 = vst [vmem:[#allocation150_spill] sm:$0xff] %v9730_v63  ;;  %v9736_v22 = vpop.xlane.xlu0 %2506  ;;  %v9745_v63 = vld [vmem:[#allocation2 + $0x54] sm:$0xff]  ;;  %v1852_v18 = vmul.f32 %v9225_v37, %v9743_v13 }
 0x4b0   : > { %12846 = vst [vmem:[#allocation151_spill] sm:$0xff] %v9736_v22  ;;  %v2648_v2 = vmul.f32 %v9571_v62, %v9745_v63 }
 0x4b2   : > { %2612 = vadd.xlane.f32.xlu2 %v2611_v26  ;;  %v1872_v26 = vsel %vm845_vm0, %v1852_v18, 0.0 }
 0x4b3   : > { %2857 = vadd.xlane.f32.xlu1 %v2856_v54  ;;  %v2266_v54 = vsel %vm845_vm0, %v2250_v38, 0.0  ;;  %v2051_v38 = vmul.f32 %v9431_v43, %v9606_v7 }
 0x4b4   : > { %2217 = vadd.xlane.f32.xlu0 %v2216_v0  ;;  %v2658_v0 = vsel %vm845_vm0, %v2648_v2, 0.0  ;;  %v2464_v2 = vsel %vm845_vm0, %v2450_v46, 0.0 }
 0x4b5   : > { %v9747_v50 = vpop.xlane.xlu2 %2311  ;;  %v2069_v48 = vsel %vm845_vm0, %v2051_v38, 0.0 }
 0x4b6   : > { %12847 = vst [vmem:[#allocation152_spill] sm:$0xff] %v9747_v50  ;;  %v9749_v14 = vpop.xlane.xlu1 %2556 }
 0x4b7   : > { %12848 = vst [vmem:[#allocation153_spill] sm:$0xff] %v9749_v14  ;;  %v9755_v51 = vpop.xlane.xlu0 %1917  ;;  %v9762_v14 = vld [vmem:[#allocation2 + $0x55] sm:$0xff] }
 0x4b8   : > { %12849 = vst [vmem:[#allocation154_spill] sm:$0xff] %v9755_v51  ;;  %v2698_v50 = vmul.f32 %v9589_v58, %v9762_v14 }
 0x4ba   : > { %1873 = vadd.xlane.f32.xlu2 %v1872_v26  ;;  %v2708_v26 = vsel %vm845_vm0, %v2698_v50, 0.0  ;;  %v9795_v50 = vld [vmem:[%s12659_s4 + $0x15] ss:$0 sm:$0xff] }
 0x4bb   : > { %2267 = vadd.xlane.f32.xlu1 %v2266_v54  ;;  %v9781_v54 = vld [vmem:[%s12659_s4 + $0x25] ss:$0 sm:$0xff] }
 0x4bc   : > { %2659 = vadd.xlane.f32.xlu0 %v2658_v0  ;;  %v9784_v0 = vld [vmem:[#allocation2 + $0x64] sm:$0xff]  ;;  %v2898_v46 = vmul.f32 %v9781_v54, %v9625_v4 }
 0x4bd   : > { %v9764_v37 = vpop.xlane.xlu2 %1572 }
 0x4be   : > { %12850 = vst [vmem:[#allocation155_spill] sm:$0xff] %v9764_v37  ;;  %v9766_v22 = vpop.xlane.xlu1 %1967  ;;  %v9808_v37 = vld [vmem:[#allocation2 + $0x83] sm:$0xff] }
 0x4bf   : > { %12851 = vst [vmem:[#allocation156_spill] sm:$0xff] %v9766_v22  ;;  %v9772_v18 = vpop.xlane.xlu0 %2358 }
 0x4c0   : > { %12852 = vst [vmem:[#allocation157_spill] sm:$0xff] %v9772_v18 }
 0x4c2   : > { %2465 = vadd.xlane.f32.xlu2 %v2464_v2  ;;  %v2101_v2 = vmul.f32 %v9795_v50, %v9665_v9 }
 0x4c3   : > { %2709 = vadd.xlane.f32.xlu1 %v2708_v26  ;;  %v2649_v26 = vmul.f32 %v9571_v62, %v9784_v0 }
 0x4c4   : > { %2070 = vadd.xlane.f32.xlu0 %v2069_v48  ;;  %v2906_v48 = vsel %vm845_vm0, %v2898_v46, 0.0 }
 0x4c5   : > { %v9786_v18 = vpop.xlane.xlu2 %2164  ;;  %v2661_v4 = vsel %vm845_vm0, %v2649_v26, 0.0 }
 0x4c6   : > { %12853 = vst [vmem:[#allocation158_spill] sm:$0xff] %v9786_v18  ;;  %v9788_v22 = vpop.xlane.xlu1 %2408  ;;  %v9806_v18 = vld [vmem:[#allocation2 + $0x65] sm:$0xff] }
 0x4c7   : > { %12854 = vst [vmem:[#allocation159_spill] sm:$0xff] %v9788_v22  ;;  %v9799_v38 = vpop.xlane.xlu0 %1770  ;;  %v2119_v22 = vsel %vm845_vm0, %v2101_v2, 0.0  ;;  %v2699_v46 = vmul.f32 %v9589_v58, %v9806_v18 }
 0x4c8   : > { %12855 = vst [vmem:[#allocation160_spill] sm:$0xff] %v9799_v38  ;;  %v2300_v38 = vmul.f32 %v9240_v40, %v9532_v23 }
 0x4ca   : > { %2907 = vadd.xlane.f32.xlu2 %v2906_v48  ;;  %v2316_v26 = vsel %vm845_vm0, %v2300_v38, 0.0  ;;  %v2711_v48 = vsel %vm845_vm0, %v2699_v46, 0.0 }
 0x4cb   : > { %2120 = vadd.xlane.f32.xlu1 %v2119_v22  ;;  %v1902_v22 = vmul.f32 %v9474_v31, %v9808_v37 }
 0x4cc   : > { %2662 = vadd.xlane.f32.xlu0 %v2661_v4 }
 0x4cd   : > { %v9810_v51 = vpop.xlane.xlu2 %2606  ;;  %v1922_v4 = vsel %vm845_vm0, %v1902_v22, 0.0  ;;  %v2500_v22 = vmul.f32 %v9441_v17, %v9399_v59  ;;  %v9856_v59 = vld [vmem:[%s12659_s4 + $0x16] ss:$0 sm:$0xff] }
 0x4ce   : > { %12856 = vst [vmem:[#allocation161_spill] sm:$0xff] %v9810_v51  ;;  %v9812_v12 = vpop.xlane.xlu1 %1820  ;;  %v9825_v51 = vld [vmem:[#allocation2 + $0x56] sm:$0xff] }
 0x4cf   : > { %12857 = vst [vmem:[#allocation162_spill] sm:$0xff] %v9812_v12  ;;  %v9818_v2 = vpop.xlane.xlu0 %2361  ;;  %v9827_v12 = vld [vmem:[#allocation2 + $0x84] sm:$0xff]  ;;  %v2748_v31 = vmul.f32 %v9644_v35, %v9825_v51 }
 0x4d0   : > { %12858 = vst [vmem:[#allocation163_spill] sm:$0xff] %v9818_v2  ;;  %v1952_v38 = vmul.f32 %v9311_v15, %v9827_v12 }
 0x4d2   : > { %2317 = vadd.xlane.f32.xlu2 %v2316_v26  ;;  %v2758_v26 = vsel %vm845_vm0, %v2748_v31, 0.0  ;;  %v2151_v31 = vmul.f32 %v9856_v59, %v9684_v19 }
 0x4d3   : > { %2712 = vadd.xlane.f32.xlu1 %v2711_v48  ;;  %v1972_v48 = vsel %vm845_vm0, %v1952_v38, 0.0  ;;  %v2550_v38 = vmul.f32 %v9459_v53, %v9416_v52 }
 0x4d4   : > { %1923 = vadd.xlane.f32.xlu0 %v1922_v4  ;;  %v2514_v4 = vsel %vm845_vm0, %v2500_v22, 0.0 }
 0x4d5   : > { %v9829_v40 = vpop.xlane.xlu2 %2017 }
 0x4d6   : > { %12859 = vst [vmem:[#allocation164_spill] sm:$0xff] %v9829_v40  ;;  %v9831_v5 = vpop.xlane.xlu1 %2411 }
 0x4d7   : > { %12860 = vst [vmem:[#allocation165_spill] sm:$0xff] %v9831_v5  ;;  %v9837_v46 = vpop.xlane.xlu0 %1622  ;;  %v9847_v5 = vld [vmem:[%s12659_s4 + $0x26] ss:$0 sm:$0xff] }
 0x4d8   : > { %12861 = vst [vmem:[#allocation166_spill] sm:$0xff] %v9837_v46  ;;  %v9874_v46 = vld [vmem:[#allocation2 + $0x66] sm:$0xff] }
 0x4da   : > { %2759 = vadd.xlane.f32.xlu2 %v2758_v26  ;;  %v2948_v26 = vmul.f32 %v9847_v5, %v9682_v61  ;;  %v2749_v61 = vmul.f32 %v9644_v35, %v9874_v46 }
 0x4db   : > { %1973 = vadd.xlane.f32.xlu1 %v1972_v48  ;;  %v2169_v48 = vsel %vm845_vm0, %v2151_v31, 0.0 }
 0x4dc   : > { %2515 = vadd.xlane.f32.xlu0 %v2514_v4  ;;  %v2564_v4 = vsel %vm845_vm0, %v2550_v38, 0.0 }
 0x4dd   : > { %v9849_v15 = vpop.xlane.xlu2 %2459 }
 0x4de   : > { %12862 = vst [vmem:[#allocation167_spill] sm:$0xff] %v9849_v15  ;;  %v9851_v2 = vpop.xlane.xlu1 %1672  ;;  %v9871_v15 = vld [vmem:[%s12659_s4 + $0x27] ss:$0 sm:$0xff] }
 0x4df   : > { %12863 = vst [vmem:[#allocation168_spill] sm:$0xff] %v9851_v2  ;;  %v9862_v22 = vpop.xlane.xlu0 %2214  ;;  %v2956_v2 = vsel %vm845_vm0, %v2948_v26, 0.0  ;;  %v2998_v31 = vmul.f32 %v9871_v15, %v9745_v63  ;;  %v2761_v26 = vsel %vm845_vm0, %v2749_v61, 0.0  ;;  %v2400_v61 = vmul.f32 %v9324_v25, %v9606_v7 }
 0x4e0   : > { %12864 = vst [vmem:[#allocation169_spill] sm:$0xff] %v9862_v22  ;;  %v2600_v25 = vmul.f32 %v9515_v34, %v9481_v28  ;;  %v9932_v28 = vld [vmem:[%s12659_s4 + $0x28] ss:$0 sm:$0xff] }
 0x4e2   : > { %2170 = vadd.xlane.f32.xlu2 %v2169_v48  ;;  %v2350_v48 = vmul.f32 %v9300_v24, %v9551_v6 }
 0x4e3   : > { %2565 = vadd.xlane.f32.xlu1 %v2564_v4  ;;  %v3006_v4 = vsel %vm845_vm0, %v2998_v31, 0.0 }
 0x4e4   : > { %2957 = vadd.xlane.f32.xlu0 %v2956_v2  ;;  %v2366_v2 = vsel %vm845_vm0, %v2350_v48, 0.0 }
 0x4e5   : > { %v9876_v52 = vpop.xlane.xlu2 %1870 }
 0x4e6   : > { %12865 = vst [vmem:[#allocation170_spill] sm:$0xff] %v9876_v52  ;;  %v9878_v22 = vpop.xlane.xlu1 %2264  ;;  %v9891_v52 = vld [vmem:[#allocation2 + $0x85] sm:$0xff] }
 0x4e7   : > { %12866 = vst [vmem:[#allocation171_spill] sm:$0xff] %v9878_v22  ;;  %v9884_v38 = vpop.xlane.xlu0 %2656  ;;  %v9893_v22 = vld [vmem:[#allocation2 + $0x60] sm:$0xff]  ;;  %v2002_v24 = vmul.f32 %v9366_v27, %v9891_v52 }
 0x4e8   : > { %12867 = vst [vmem:[#allocation172_spill] sm:$0xff] %v9884_v38  ;;  %v2799_v48 = vmul.f32 %v9704_v16, %v9893_v22  ;;  %v2849_v38 = vmul.f32 %v9723_v3, %v9647_v49 }
 0x4ea   : > { %2762 = vadd.xlane.f32.xlu2 %v2761_v26  ;;  %v2022_v26 = vsel %vm845_vm0, %v2002_v24, 0.0  ;;  %v9923_v24 = vld [vmem:[%s12659_s4 + $0x17] ss:$0 sm:$0xff] }
 0x4eb   : > { %3007 = vadd.xlane.f32.xlu1 %v3006_v4  ;;  %v2416_v4 = vsel %vm845_vm0, %v2400_v61, 0.0  ;;  %v2201_v61 = vmul.f32 %v9923_v24, %v9743_v13 }
 0x4ec   : > { %2367 = vadd.xlane.f32.xlu0 %v2366_v2  ;;  %v2809_v2 = vsel %vm845_vm0, %v2799_v48, 0.0  ;;  %v2614_v48 = vsel %vm845_vm0, %v2600_v25, 0.0  ;;  %v3048_v25 = vmul.f32 %v9932_v28, %v9762_v14 }
 0x4ed   : > { %v9895_v40 = vpop.xlane.xlu2 %2462 }
 0x4ee   : > { %12868 = vst [vmem:[#allocation173_spill] sm:$0xff] %v9895_v40  ;;  %v9897_v63 = vpop.xlane.xlu1 %2706 }
 0x4ef   : > { %12869 = vst [vmem:[#allocation174_spill] sm:$0xff] %v9897_v63  ;;  %v9903_v31 = vpop.xlane.xlu0 %2067 }
 0x4f0   : > { %12870 = vst [vmem:[#allocation175_spill] sm:$0xff] %v9903_v31 }
 0x4f2   : > { %2023 = vadd.xlane.f32.xlu2 %v2022_v26  ;;  %v2859_v26 = vsel %vm845_vm0, %v2849_v38, 0.0  ;;  %v9946_v38 = vld [vmem:[%s12659_s4 + $0x18] ss:$0 sm:$0xff] }
 0x4f3   : > { %2417 = vadd.xlane.f32.xlu1 %v2416_v4  ;;  %v2219_v4 = vsel %vm845_vm0, %v2201_v61, 0.0 }
 0x4f4   : > { %2810 = vadd.xlane.f32.xlu0 %v2809_v2  ;;  %v9935_v2 = vld [vmem:[#allocation2 + $0x70] sm:$0xff] }
 0x4f5   : > { %v9910_v63 = vpop.xlane.xlu2 %1722 }
 0x4f6   : > { %12871 = vst [vmem:[#allocation176_spill] sm:$0xff] %v9910_v63  ;;  %v9912_v27 = vpop.xlane.xlu1 %2117  ;;  %v9959_v63 = vld [vmem:[#allocation2 + $0x86] sm:$0xff] }
 0x4f7   : > { %12872 = vst [vmem:[#allocation177_spill] sm:$0xff] %v9912_v27  ;;  %v9918_v40 = vpop.xlane.xlu0 %2509 }
 0x4f8   : > { %12873 = vst [vmem:[#allocation178_spill] sm:$0xff] %v9918_v40 }
 0x4fa   : > { %2615 = vadd.xlane.f32.xlu2 %v2614_v48  ;;  %v2251_v48 = vmul.f32 %v9946_v38, %v9808_v37 }
 0x4fb   : > { %2860 = vadd.xlane.f32.xlu1 %v2859_v26  ;;  %v2800_v26 = vmul.f32 %v9704_v16, %v9935_v2 }
 0x4fc   : > { %2220 = vadd.xlane.f32.xlu0 %v2219_v4  ;;  %v3056_v4 = vsel %vm845_vm0, %v3048_v25, 0.0 }
 0x4fd   : > { %v9937_v40 = vpop.xlane.xlu2 %2314  ;;  %v2812_v14 = vsel %vm845_vm0, %v2800_v26, 0.0 }
 0x4fe   : > { %12874 = vst [vmem:[#allocation179_spill] sm:$0xff] %v9937_v40  ;;  %v9939_v27 = vpop.xlane.xlu1 %2559  ;;  %v9957_v40 = vld [vmem:[#allocation2 + $0x71] sm:$0xff] }
 0x4ff   : > { %12875 = vst [vmem:[#allocation180_spill] sm:$0xff] %v9939_v27  ;;  %v9950_v61 = vpop.xlane.xlu0 %1920  ;;  %v2269_v27 = vsel %vm845_vm0, %v2251_v48, 0.0  ;;  %v2850_v25 = vmul.f32 %v9723_v3, %v9957_v40 }
 0x500   : > { %12876 = vst [vmem:[#allocation181_spill] sm:$0xff] %v9950_v61  ;;  %v2451_v61 = vmul.f32 %v9381_v56, %v9665_v9 }
 0x502   : > { %3057 = vadd.xlane.f32.xlu2 %v3056_v4  ;;  %v2467_v26 = vsel %vm845_vm0, %v2451_v61, 0.0  ;;  %v2862_v4 = vsel %vm845_vm0, %v2850_v25, 0.0  ;;  %v2650_v25 = vmul.f32 %v9571_v62, %v9532_v23  ;;  %v10005_v23 = vld [vmem:[%s12659_s4 + $0x19] ss:$0 sm:$0xff] }
 0x503   : > { %2270 = vadd.xlane.f32.xlu1 %v2269_v27  ;;  %v2052_v27 = vmul.f32 %v9431_v43, %v9959_v63 }
 0x504   : > { %2813 = vadd.xlane.f32.xlu0 %v2812_v14 }
 0x505   : > { %v9961_v31 = vpop.xlane.xlu2 %2756  ;;  %v2072_v14 = vsel %vm845_vm0, %v2052_v27, 0.0 }
 0x506   : > { %12877 = vst [vmem:[#allocation182_spill] sm:$0xff] %v9961_v31  ;;  %v9963_v1 = vpop.xlane.xlu1 %1970  ;;  %v9976_v31 = vld [vmem:[#allocation2 + $0x90] sm:$0xff] }
 0x507   : > { %12878 = vst [vmem:[#allocation183_spill] sm:$0xff] %v9963_v1  ;;  %v9969_v48 = vpop.xlane.xlu0 %2512  ;;  %v2102_v43 = vmul.f32 %v9795_v50, %v9976_v31 }
 0x508   : > { %12879 = vst [vmem:[#allocation184_spill] sm:$0xff] %v9969_v48  ;;  %v2899_v48 = vmul.f32 %v9781_v54, %v9663_v11 }
 0x50a   : > { %2468 = vadd.xlane.f32.xlu2 %v2467_v26  ;;  %v2909_v27 = vsel %vm845_vm0, %v2899_v48, 0.0  ;;  %v2122_v26 = vsel %vm845_vm0, %v2102_v43, 0.0  ;;  %v2301_v48 = vmul.f32 %v10005_v23, %v9827_v12  ;;  %v2700_v43 = vmul.f32 %v9589_v58, %v9551_v6 }
 0x50b   : > { %2863 = vadd.xlane.f32.xlu1 %v2862_v4  ;;  %v2664_v4 = vsel %vm845_vm0, %v2650_v25, 0.0 }
 0x50c   : > { %2073 = vadd.xlane.f32.xlu0 %v2072_v14  ;;  %v9996_v14 = vld [vmem:[%s12659_s4 + $0x29] ss:$0 sm:$0xff] }
 0x50d   : > { %v9978_v56 = vpop.xlane.xlu2 %2167 }
 0x50e   : > { %12880 = vst [vmem:[#allocation185_spill] sm:$0xff] %v9978_v56  ;;  %v9980_v1 = vpop.xlane.xlu1 %2562 }
 0x50f   : > { %12881 = vst [vmem:[#allocation186_spill] sm:$0xff] %v9980_v1  ;;  %v9986_v61 = vpop.xlane.xlu0 %1773 }
 0x510   : > { %12882 = vst [vmem:[#allocation187_spill] sm:$0xff] %v9986_v61  ;;  %v10023_v61 = vld [vmem:[#allocation2 + $0x72] sm:$0xff] }
 0x512   : > { %2910 = vadd.xlane.f32.xlu2 %v2909_v27  ;;  %v3098_v27 = vmul.f32 %v9996_v14, %v9825_v51  ;;  %v2900_v51 = vmul.f32 %v9781_v54, %v10023_v61 }
 0x513   : > { %2123 = vadd.xlane.f32.xlu1 %v2122_v26  ;;  %v2319_v26 = vsel %vm845_vm0, %v2301_v48, 0.0 }
 0x514   : > { %2665 = vadd.xlane.f32.xlu0 %v2664_v4  ;;  %v2714_v4 = vsel %vm845_vm0, %v2700_v43, 0.0 }
 0x515   : > { %v9998_v50 = vpop.xlane.xlu2 %2609 }
 0x516   : > { %12883 = vst [vmem:[#allocation188_spill] sm:$0xff] %v9998_v50  ;;  %v10000_v1 = vpop.xlane.xlu1 %1823  ;;  %v10020_v50 = vld [vmem:[%s12659_s4 + $0x2a] ss:$0 sm:$0xff] }
 0x517   : > { %12884 = vst [vmem:[#allocation189_spill] sm:$0xff] %v10000_v1  ;;  %v10011_v25 = vpop.xlane.xlu0 %2364  ;;  %v3106_v1 = vsel %vm845_vm0, %v3098_v27, 0.0  ;;  %v3149_v48 = vmul.f32 %v10020_v50, %v9893_v22  ;;  %v2912_v27 = vsel %vm845_vm0, %v2900_v51, 0.0 }
 0x518   : > { %12885 = vst [vmem:[#allocation190_spill] sm:$0xff] %v10011_v25 }
 0x51a   : > { %2320 = vadd.xlane.f32.xlu2 %v2319_v26  ;;  %v2501_v26 = vmul.f32 %v9441_v17, %v9684_v19  ;;  %v2551_v17 = vmul.f32 %v9459_v53, %v9743_v13  ;;  %v2750_v53 = vmul.f32 %v9644_v35, %v9606_v7  ;;  %v10079_v7 = vld [vmem:[%s12659_s4 + $0x2b] ss:$0 sm:$0xff] }
 0x51b   : > { %2715 = vadd.xlane.f32.xlu1 %v2714_v4  ;;  %v3157_v4 = vsel %vm845_vm0, %v3149_v48, 0.0  ;;  %v2949_v48 = vmul.f32 %v9847_v5, %v9726_v8 }
 0x51c   : > { %3107 = vadd.xlane.f32.xlu0 %v3106_v1  ;;  %v2517_v1 = vsel %vm845_vm0, %v2501_v26, 0.0 }
 0x51d   : > { %v10025_v6 = vpop.xlane.xlu2 %2020 }
 0x51e   : > { %12886 = vst [vmem:[#allocation191_spill] sm:$0xff] %v10025_v6  ;;  %v10027_v25 = vpop.xlane.xlu1 %2414  ;;  %v10040_v6 = vld [vmem:[#allocation2 + $0x91] sm:$0xff] }
 0x51f   : > { %12887 = vst [vmem:[#allocation192_spill] sm:$0xff] %v10027_v25  ;;  %v10033_v43 = vpop.xlane.xlu0 %2807  ;;  %v2152_v22 = vmul.f32 %v9856_v59, %v10040_v6 }
 0x520   : > { %12888 = vst [vmem:[#allocation193_spill] sm:$0xff] %v10033_v43 }
 0x521   : > { %v2172_v26 = vsel %vm845_vm0, %v2152_v22, 0.0  ;;  %v10070_v22 = vld [vmem:[%s12659_s4 + $0x1a] ss:$0 sm:$0xff] }
 0x522   : > { %2913 = vadd.xlane.f32.xlu2 %v2912_v27  ;;  %v2567_v27 = vsel %vm845_vm0, %v2551_v17, 0.0  ;;  %v2351_v17 = vmul.f32 %v10070_v22, %v9891_v52 }
 0x523   : > { %3158 = vadd.xlane.f32.xlu1 %v3157_v4  ;;  %v2959_v4 = vsel %vm845_vm0, %v2949_v48, 0.0  ;;  %v2764_v48 = vsel %vm845_vm0, %v2750_v53, 0.0  ;;  %v3199_v53 = vmul.f32 %v10079_v7, %v9647_v49 }
 0x524   : > { %2518 = vadd.xlane.f32.xlu0 %v2517_v1 }
 0x525   : > { %v10042_v25 = vpop.xlane.xlu2 %2612 }
 0x526   : > { %12889 = vst [vmem:[#allocation194_spill] sm:$0xff] %v10042_v25  ;;  %v10044_v56 = vpop.xlane.xlu1 %2857 }
 0x527   : > { %12890 = vst [vmem:[#allocation195_spill] sm:$0xff] %v10044_v56  ;;  %v10050_v51 = vpop.xlane.xlu0 %2217  ;;  %v2999_v56 = vmul.f32 %v9871_v15, %v9784_v0 }
 0x528   : > { %12891 = vst [vmem:[#allocation196_spill] sm:$0xff] %v10050_v51 }
 0x52a   : > { %2173 = vadd.xlane.f32.xlu2 %v2172_v26  ;;  %v3009_v26 = vsel %vm845_vm0, %v2999_v56, 0.0  ;;  %v10093_v56 = vld [vmem:[%s12659_s4 + $0x1b] ss:$0 sm:$0xff] }
 0x52b   : > { %2568 = vadd.xlane.f32.xlu1 %v2567_v27  ;;  %v2369_v27 = vsel %vm845_vm0, %v2351_v17, 0.0 }
 0x52c   : > { %2960 = vadd.xlane.f32.xlu0 %v2959_v4  ;;  %v10082_v4 = vld [vmem:[#allocation2 + $0x73] sm:$0xff] }
 0x52d   : > { %v10057_v1 = vpop.xlane.xlu2 %1873 }
 0x52e   : > { %12892 = vst [vmem:[#allocation197_spill] sm:$0xff] %v10057_v1  ;;  %v10059_v59 = vpop.xlane.xlu1 %2267 }
 0x52f   : > { %12893 = vst [vmem:[#allocation198_spill] sm:$0xff] %v10059_v59  ;;  %v10065_v43 = vpop.xlane.xlu0 %2659  ;;  %v10106_v59 = vld [vmem:[#allocation2 + $0x92] sm:$0xff] }
 0x530   : > { %12894 = vst [vmem:[#allocation199_spill] sm:$0xff] %v10065_v43 }
 0x531   : > { %12898 = vst [vmem:[#allocation203_spill] sm:$0xff] %v10106_v59 }
 0x532   : > { %2765 = vadd.xlane.f32.xlu2 %v2764_v48  ;;  %v2401_v48 = vmul.f32 %v10093_v56, %v9959_v63 }
 0x533   : > { %3010 = vadd.xlane.f32.xlu1 %v3009_v26  ;;  %v2950_v26 = vmul.f32 %v9847_v5, %v10082_v4 }
 0x534   : > { %2370 = vadd.xlane.f32.xlu0 %v2369_v27  ;;  %v3207_v27 = vsel %vm845_vm0, %v3199_v53, 0.0 }
 0x535   : > { %v10084_v25 = vpop.xlane.xlu2 %2465  ;;  %v2962_v49 = vsel %vm845_vm0, %v2950_v26, 0.0 }
 0x536   : > { %12895 = vst [vmem:[#allocation200_spill] sm:$0xff] %v10084_v25  ;;  %v10086_v43 = vpop.xlane.xlu1 %2709  ;;  %v10104_v25 = vld [vmem:[#allocation2 + $0x74] sm:$0xff] }
 0x537   : > { %12896 = vst [vmem:[#allocation201_spill] sm:$0xff] %v10086_v43  ;;  %v10097_v17 = vpop.xlane.xlu0 %2070  ;;  %v2419_v43 = vsel %vm845_vm0, %v2401_v48, 0.0  ;;  %v3000_v53 = vmul.f32 %v9871_v15, %v10104_v25 }
 0x538   : > { %12897 = vst [vmem:[#allocation202_spill] sm:$0xff] %v10097_v17  ;;  %v2601_v17 = vmul.f32 %v9515_v34, %v9808_v37 }
 0x53a   : > { %3208 = vadd.xlane.f32.xlu2 %v3207_v27  ;;  %v2617_v26 = vsel %vm845_vm0, %v2601_v17, 0.0  ;;  %v3012_v27 = vsel %vm845_vm0, %v3000_v53, 0.0  ;;  %v2801_v53 = vmul.f32 %v9704_v16, %v9665_v9  ;;  %v10152_v9 = vld [vmem:[%s12659_s4 + $0x1c] ss:$0 sm:$0xff] }
 0x53b   : > { %2420 = vadd.xlane.f32.xlu1 %v2419_v43  ;;  %v2202_v43 = vmul.f32 %v9923_v24, %v10106_v59 }
 0x53c   : > { %2963 = vadd.xlane.f32.xlu0 %v2962_v49 }
 0x53d   : > { %v10108_v1 = vpop.xlane.xlu2 %2907  ;;  %v2222_v49 = vsel %vm845_vm0, %v2202_v43, 0.0 }
 0x53e   : > { %12899 = vst [vmem:[#allocation204_spill] sm:$0xff] %v10108_v1  ;;  %v10110_v51 = vpop.xlane.xlu1 %2120  ;;  %v10123_v1 = vld [vmem:[#allocation2 + $0x93] sm:$0xff] }
 0x53f   : > { %12900 = vst [vmem:[#allocation205_spill] sm:$0xff] %v10110_v51  ;;  %v10116_v48 = vpop.xlane.xlu0 %2662  ;;  %v2252_v24 = vmul.f32 %v9946_v38, %v10123_v1 }
 0x540   : > { %12901 = vst [vmem:[#allocation206_spill] sm:$0xff] %v10116_v48  ;;  %v3049_v48 = vmul.f32 %v9932_v28, %v9806_v18 }
 0x542   : > { %2618 = vadd.xlane.f32.xlu2 %v2617_v26  ;;  %v3059_v43 = vsel %vm845_vm0, %v3049_v48, 0.0  ;;  %v2272_v26 = vsel %vm845_vm0, %v2252_v24, 0.0  ;;  %v2452_v48 = vmul.f32 %v10152_v9, %v9976_v31  ;;  %v2851_v24 = vmul.f32 %v9723_v3, %v9684_v19 }
 0x543   : > { %3013 = vadd.xlane.f32.xlu1 %v3012_v27  ;;  %v2815_v27 = vsel %vm845_vm0, %v2801_v53, 0.0 }
 0x544   : > { %2223 = vadd.xlane.f32.xlu0 %v2222_v49  ;;  %v10143_v49 = vld [vmem:[%s12659_s4 + $0x2c] ss:$0 sm:$0xff] }
 0x545   : > { %v10125_v34 = vpop.xlane.xlu2 %2317  ;;  %12905 = vst [vmem:[#allocation210_spill] sm:$0xff] %v10143_v49 }
 0x546   : > { %12902 = vst [vmem:[#allocation207_spill] sm:$0xff] %v10125_v34  ;;  %v10127_v51 = vpop.xlane.xlu1 %2712 }
 0x547   : > { %12903 = vst [vmem:[#allocation208_spill] sm:$0xff] %v10127_v51  ;;  %v10133_v17 = vpop.xlane.xlu0 %1923 }
 0x548   : > { %12904 = vst [vmem:[#allocation209_spill] sm:$0xff] %v10133_v17  ;;  %v10170_v17 = vld [vmem:[#allocation2 + $0x75] sm:$0xff] }
 0x54a   : > { %3060 = vadd.xlane.f32.xlu2 %v3059_v43  ;;  %v3249_v43 = vmul.f32 %v10143_v49, %v9663_v11  ;;  %v3050_v11 = vmul.f32 %v9932_v28, %v10170_v17 }
 0x54b   : > { %2273 = vadd.xlane.f32.xlu1 %v2272_v26  ;;  %v2470_v26 = vsel %vm845_vm0, %v2452_v48, 0.0 }
 0x54c   : > { %2816 = vadd.xlane.f32.xlu0 %v2815_v27  ;;  %v2865_v27 = vsel %vm845_vm0, %v2851_v24, 0.0 }
 0x54d   : > { %v10145_v38 = vpop.xlane.xlu2 %2759 }
 0x54e   : > { %12906 = vst [vmem:[#allocation211_spill] sm:$0xff] %v10145_v38  ;;  %v10147_v51 = vpop.xlane.xlu1 %1973  ;;  %v10167_v38 = vld [vmem:[%s12659_s4 + $0x2d] ss:$0 sm:$0xff] }
 0x54f   : > { %12907 = vst [vmem:[#allocation212_spill] sm:$0xff] %v10147_v51  ;;  %v10158_v53 = vpop.xlane.xlu0 %2515  ;;  %v3257_v51 = vsel %vm845_vm0, %v3249_v43, 0.0  ;;  %v3299_v48 = vmul.f32 %v10167_v38, %v9726_v8  ;;  %v3062_v43 = vsel %vm845_vm0, %v3050_v11, 0.0 }
 0x550   : > { %12908 = vst [vmem:[#allocation213_spill] sm:$0xff] %v10158_v53 }
 0x551   : > { %12909 = vst [vmem:[#allocation214_spill] sm:$0xff] %v10167_v38 }
 0x552   : > { %2471 = vadd.xlane.f32.xlu2 %v2470_v26  ;;  %v2651_v26 = vmul.f32 %v9571_v62, %v9827_v12  ;;  %v2701_v62 = vmul.f32 %v9589_v58, %v9891_v52  ;;  %v2901_v58 = vmul.f32 %v9781_v54, %v9743_v13  ;;  %v10226_v13 = vld [vmem:[%s12659_s4 + $0x2e] ss:$0 sm:$0xff] }
 0x553   : > { %2866 = vadd.xlane.f32.xlu1 %v2865_v27  ;;  %v3307_v27 = vsel %vm845_vm0, %v3299_v48, 0.0  ;;  %v3099_v48 = vmul.f32 %v9996_v14, %v9874_v46 }
 0x554   : > { %3258 = vadd.xlane.f32.xlu0 %v3257_v51  ;;  %v2667_v51 = vsel %vm845_vm0, %v2651_v26, 0.0 }
 0x555   : > { %v10172_v19 = vpop.xlane.xlu2 %2170 }
 0x556   : > { %12910 = vst [vmem:[#allocation215_spill] sm:$0xff] %v10172_v19  ;;  %v10174_v53 = vpop.xlane.xlu1 %2565  ;;  %v10187_v19 = vld [vmem:[#allocation2 + $0x94] sm:$0xff] }
 0x557   : > { %12911 = vst [vmem:[#allocation216_spill] sm:$0xff] %v10174_v53  ;;  %v10180_v24 = vpop.xlane.xlu0 %2957  ;;  %v2302_v8 = vmul.f32 %v10005_v23, %v10187_v19 }
 0x558   : > { %12912 = vst [vmem:[#allocation217_spill] sm:$0xff] %v10180_v24 }
 0x559   : > { %v2322_v26 = vsel %vm845_vm0, %v2302_v8, 0.0  ;;  %v10217_v8 = vld [vmem:[%s12659_s4 + $0x1d] ss:$0 sm:$0xff] }
 0x55a   : > { %3063 = vadd.xlane.f32.xlu2 %v3062_v43  ;;  %v2717_v43 = vsel %vm845_vm0, %v2701_v62, 0.0  ;;  %v2502_v62 = vmul.f32 %v10217_v8, %v10040_v6 }
 0x55b   : > { %3308 = vadd.xlane.f32.xlu1 %v3307_v27  ;;  %v3109_v27 = vsel %vm845_vm0, %v3099_v48, 0.0  ;;  %v2915_v48 = vsel %vm845_vm0, %v2901_v58, 0.0  ;;  %v3349_v58 = vmul.f32 %v10226_v13, %v9784_v0 }
 0x55c   : > { %2668 = vadd.xlane.f32.xlu0 %v2667_v51 }
 0x55d   : > { %v10189_v53 = vpop.xlane.xlu2 %2762 }
 0x55e   : > { %12913 = vst [vmem:[#allocation218_spill] sm:$0xff] %v10189_v53  ;;  %v10191_v34 = vpop.xlane.xlu1 %3007 }
 0x55f   : > { %12914 = vst [vmem:[#allocation219_spill] sm:$0xff] %v10191_v34  ;;  %v10197_v11 = vpop.xlane.xlu0 %2367  ;;  %v3150_v34 = vmul.f32 %v10020_v50, %v9935_v2  ;;  %v2520_v2 = vsel %vm845_vm0, %v2502_v62, 0.0 }
 0x562   : > { %2323 = vadd.xlane.f32.xlu2 %v2322_v26  ;;  %v3160_v26 = vsel %vm845_vm0, %v3150_v34, 0.0  ;;  %v10240_v34 = vld [vmem:[%s12659_s4 + $0x1e] ss:$0 sm:$0xff] }
 0x563   : > { %2718 = vadd.xlane.f32.xlu1 %v2717_v43  ;;  %v10229_v43 = vld [vmem:[#allocation2 + $0x76] sm:$0xff] }
 0x564   : > { %3110 = vadd.xlane.f32.xlu0 %v3109_v27  ;;  %12918 = vst [vmem:[#allocation223_spill] sm:$0xff] %v10229_v43 }
 0x565   : > { %v10204_v51 = vpop.xlane.xlu2 %2023 }
 0x566   : > { %12915 = vst [vmem:[#allocation220_spill] sm:$0xff] %v10204_v51  ;;  %v10206_v23 = vpop.xlane.xlu1 %2417 }
 0x567   : > { %12916 = vst [vmem:[#allocation221_spill] sm:$0xff] %v10206_v23  ;;  %v10212_v24 = vpop.xlane.xlu0 %2810 }
 0x568   : > { %12917 = vst [vmem:[#allocation222_spill] sm:$0xff] %v10212_v24  ;;  %v10251_v24 = vld [vmem:[#allocation2 + $0x95] sm:$0xff] }
 0x569   : > { %12922 = vst [vmem:[#allocation227_spill] sm:$0xff] %v10251_v24 }
 0x56a   : > { %2916 = vadd.xlane.f32.xlu2 %v2915_v48  ;;  %v2552_v48 = vmul.f32 %v10240_v34, %v10106_v59 }
 0x56b   : > { %3161 = vadd.xlane.f32.xlu1 %v3160_v26  ;;  %v3100_v26 = vmul.f32 %v9996_v14, %v10229_v43 }
 0x56c   : > { %2521 = vadd.xlane.f32.xlu0 %v2520_v2  ;;  %v3357_v2 = vsel %vm845_vm0, %v3349_v58, 0.0 }
 0x56d   : > { %v10231_v27 = vpop.xlane.xlu2 %2615  ;;  %v3112_v0 = vsel %vm845_vm0, %v3100_v26, 0.0 }
 0x56e   : > { %12919 = vst [vmem:[#allocation224_spill] sm:$0xff] %v10231_v27  ;;  %v10233_v53 = vpop.xlane.xlu1 %2860  ;;  %v3141_v27 = vld [vmem:[#allocation2 + $0x80] sm:$0xff] }
 0x56f   : > { %12920 = vst [vmem:[#allocation225_spill] sm:$0xff] %v10233_v53  ;;  %v10244_v62 = vpop.xlane.xlu0 %2220  ;;  %v2570_v53 = vsel %vm845_vm0, %v2552_v48, 0.0  ;;  %v3151_v43 = vmul.f32 %v10020_v50, %v3141_v27  ;;  %v2352_v48 = vmul.f32 %v10070_v22, %v10251_v24  ;;  %v3200_v27 = vmul.f32 %v10079_v7, %v9957_v40  ;;  %v10289_v40 = vld [vmem:[%s12659_s4 + $0x2f] ss:$0 sm:$0xff] }
 0x570   : > { %12921 = vst [vmem:[#allocation226_spill] sm:$0xff] %v10244_v62  ;;  %v2751_v62 = vmul.f32 %v9644_v35, %v9959_v63 }
 0x571   : > { %v3163_v26 = vsel %vm845_vm0, %v3151_v43, 0.0  ;;  %v2951_v43 = vmul.f32 %v9847_v5, %v9808_v37  ;;  %v1127_v37 = vadd.f32 %v8511_v44, %v8486_v45  ;;  %v3399_v45 = vmul.f32 %v10289_v40, %v9806_v18  ;;  %v12926_v44 = vld [vmem:[#allocation19_spill] sm:$0xff]  ;;  %v3191_v18 = vld [vmem:[#allocation2 + $0x81] sm:$0xff] }
 0x572   : > { %3358 = vadd.xlane.f32.xlu2 %v3357_v2  ;;  %v2372_v2 = vsel %vm845_vm0, %v2352_v48, 0.0  ;;  %v1126_v48 = vadd.f32 %v8443_v47, %v8437_v42 }
 0x573   : > { %2571 = vadd.xlane.f32.xlu1 %v2570_v53  ;;  %v2767_v53 = vsel %vm845_vm0, %v2751_v62, 0.0 }
 0x574   : > { %3113 = vadd.xlane.f32.xlu0 %v3112_v0  ;;  %v10267_v0 = vld [vmem:[#allocation2 + $0x96] sm:$0xff] }
 0x575   : > { %v10253_v23 = vpop.xlane.xlu2 %3057  ;;  %v2402_v22 = vmul.f32 %v10093_v56, %v10267_v0  ;;  %v1176_v56 = vadd.f32 %v8456_v41, %v1126_v48  ;;  %v1177_v41 = vadd.f32 %v8747_v36, %v1127_v37 }
 0x576   : > { %12923 = vst [vmem:[#allocation228_spill] sm:$0xff] %v10253_v23  ;;  %v10255_v51 = vpop.xlane.xlu1 %2270 }
 0x577   : > { %v10260_v58 = vpop.xlane.xlu0 %2813 }
 0x578   : > { %12924 = vst [vmem:[#allocation229_spill] sm:$0xff] %v10260_v58  ;;  %v10319_v58 = vld [vmem:[%s12659_s4 + $0x30] ss:$0 sm:$0xff] }
 0x57a   : > { %2768 = vadd.xlane.f32.xlu2 %v2767_v53  ;;  %v3210_v53 = vsel %vm845_vm0, %v3200_v27, 0.0  ;;  %v10301_v27 = vld [vmem:[%s12659_s4 + $0x1f] ss:$0 sm:$0xff] }
 0x57b   : > { %3164 = vadd.xlane.f32.xlu1 %v3163_v26  ;;  %v2422_v26 = vsel %vm845_vm0, %v2402_v22, 0.0  ;;  %v2602_v22 = vmul.f32 %v10301_v27, %v10123_v1 }
 0x57c   : > { %2373 = vadd.xlane.f32.xlu0 %v2372_v2  ;;  %v2965_v2 = vsel %vm845_vm0, %v2951_v43, 0.0  ;;  %v3001_v43 = vmul.f32 %v9871_v15, %v9827_v12  ;;  %v3407_v12 = vsel %vm845_vm0, %v3399_v45, 0.0  ;;  %v12927_v15 = vld [vmem:[#allocation17_spill] sm:$0xff] }
 0x57d   : > { %v10269_v23 = vpop.xlane.xlu2 %2468 }
 0x57e   : > { %v10271_v35 = vpop.xlane.xlu1 %2863 }
 0x57f   : > { %12925 = vst [vmem:[#allocation230_spill] sm:$0xff] %v10271_v35  ;;  %v10277_v62 = vpop.xlane.xlu0 %2073  ;;  %v3015_v35 = vsel %vm845_vm0, %v3001_v43, 0.0  ;;  %v3201_v43 = vmul.f32 %v10079_v7, %v3191_v18 }
 0x582   : > { %3211 = vadd.xlane.f32.xlu2 %v3210_v53  ;;  %v1226_v53 = vadd.f32 %v12926_v44, %v1176_v56  ;;  %v12931_v44 = vld [vmem:[#allocation18_spill] sm:$0xff] }
 0x583   : > { %2423 = vadd.xlane.f32.xlu1 %v2422_v26  ;;  %v1227_v26 = vadd.f32 %v8758_v55, %v1177_v41  ;;  %v1128_v55 = vadd.f32 %v8681_v29, %v8683_v32 }
 0x584   : > { %2966 = vadd.xlane.f32.xlu0 %v2965_v2  ;;  %v2620_v2 = vsel %vm845_vm0, %v2602_v22, 0.0  ;;  %v1276_v56 = vadd.f32 %v12927_v15, %v1226_v53  ;;  %v12934_v15 = vld [vmem:[#allocation37_spill] sm:$0xff] }
 0x585   : > { %v10294_v42 = vpop.xlane.xlu2 %2910  ;;  %v1277_v36 = vadd.f32 %v8726_v20, %v1227_v26  ;;  %v3449_v20 = vmul.f32 %v10319_v58, %v9874_v46  ;;  %v1178_v29 = vadd.f32 %v8697_v60, %v1128_v55  ;;  %v3213_v46 = vsel %vm845_vm0, %v3201_v43, 0.0  ;;  %v12935_v60 = vld [vmem:[#allocation25_spill] sm:$0xff] }
 0x586   : > { %v10296_v47 = vpop.xlane.xlu1 %2123  ;;  %v1326_v53 = vadd.f32 %v12931_v44, %v1276_v56  ;;  %v12938_v44 = vld [vmem:[#allocation61_spill] sm:$0xff] }
 0x587   : > { %v10308_v48 = vpop.xlane.xlu0 %2665  ;;  %v1327_v41 = vadd.f32 %v8724_v33, %v1277_v36  ;;  %v3457_v33 = vsel %vm845_vm0, %v3449_v20, 0.0  ;;  %v1228_v56 = vadd.f32 %v12934_v15, %v1178_v29  ;;  %v2852_v29 = vmul.f32 %v9723_v3, %v10040_v6 }
 0x588   : > { %v1376_v26 = vadd.f32 %v8699_v10, %v1326_v53 }
 0x589   : > { %v1377_v32 = vadd.f32 %v8745_v21, %v1327_v41  ;;  %v12936_v21 = vld [vmem:[#allocation30_spill] sm:$0xff]  ;;  %v12937_v41 = vld [vmem:[#allocation59_spill] sm:$0xff] }
 0x58a   : > { %2621 = vadd.xlane.f32.xlu2 %v2620_v2  ;;  %v12932_v2 = vld [vmem:[#allocation55_spill] sm:$0xff]  ;;  %v1427_v55 = vadd.f32 %v12935_v60, %v1376_v26  ;;  %v1130_v53 = vadd.f32 %v12938_v44, %v12937_v41  ;;  %v12946_v44 = vld [vmem:[#allocation48_spill] sm:$0xff] }
 0x58b   : > { %3016 = vadd.xlane.f32.xlu1 %v3015_v35  ;;  %v2802_v35 = vmul.f32 %v9704_v16, %v9976_v31  ;;  %v10347_v16 = vld [vmem:[#allocation2 + $0xa0] sm:$0xff]  ;;  %v1428_v10 = vadd.f32 %v12936_v21, %v1377_v32  ;;  %v3250_v32 = vmul.f32 %v10143_v49, %v10023_v61  ;;  %v12945_v21 = vld [vmem:[#allocation58_spill] sm:$0xff] }
 0x58c   : > { %3408 = vadd.xlane.f32.xlu0 %v3407_v12  ;;  %v12933_v12 = vld [vmem:[#allocation54_spill] sm:$0xff] }
 0x58d   : > { %v10326_v37 = vpop.xlane.xlu2 %2320  ;;  %v1129_v18 = vadd.f32 %v12933_v12, %v12932_v2  ;;  %v2818_v36 = vsel %vm845_vm0, %v2802_v35, 0.0  ;;  %v12939_v2 = vld [vmem:[#allocation53_spill] sm:$0xff]  ;;  %v2453_v35 = vmul.f32 %v10152_v9, %v10347_v16 }
 0x58e   : > { %12928 = vst [vmem:[#allocation19_spill] sm:$0xff] %v10326_v37  ;;  %v10328_v22 = vpop.xlane.xlu1 %2715 }
 0x58f   : > { %12929 = vst [vmem:[#allocation17_spill] sm:$0xff] %v10328_v22  ;;  %v10334_v45 = vpop.xlane.xlu0 %3107  ;;  %v1179_v43 = vadd.f32 %v12939_v2, %v1129_v18  ;;  %v12944_v18 = vld [vmem:[#allocation29_spill] sm:$0xff]  ;;  %v1478_v2 = vadd.f32 %v12946_v44, %v1428_v10  ;;  %v2473_v3 = vsel %vm845_vm0, %v2453_v35, 0.0  ;;  %v12950_v22 = vld [vmem:[#allocation71_spill] sm:$0xff]  ;;  %v12955_v35 = vld [vmem:[#allocation28_spill] sm:$0xff] }
 0x590   : > { %12930 = vst [vmem:[#allocation231_spill] sm:$0xff] %v10334_v45  ;;  %v1278_v60 = vadd.f32 %v12944_v18, %v1228_v56  ;;  %v12948_v45 = vld [vmem:[#allocation60_spill] sm:$0xff]  ;;  %v12953_v18 = vld [vmem:[#allocation63_spill] sm:$0xff] }
 0x591   : > { %v1229_v41 = vadd.f32 %v12945_v21, %v1179_v43  ;;  %v12951_v56 = vld [vmem:[#allocation40_spill] sm:$0xff] }
 0x592   : > { %3214 = vadd.xlane.f32.xlu2 %v3213_v46  ;;  %v12942_v46 = vld [vmem:[#allocation64_spill] sm:$0xff] }
 0x593   : > { %3458 = vadd.xlane.f32.xlu1 %v3457_v33  ;;  %v1180_v26 = vadd.f32 %v12942_v46, %v1130_v53  ;;  %v2868_v53 = vsel %vm845_vm0, %v2852_v29, 0.0  ;;  %v12949_v46 = vld [vmem:[#allocation39_spill] sm:$0xff]  ;;  %v12956_v29 = vld [vmem:[#allocation66_spill] sm:$0xff] }
 0x594   : > { %2819 = vadd.xlane.f32.xlu0 %v2818_v36  ;;  %v12943_v36 = vld [vmem:[#allocation24_spill] sm:$0xff]  ;;  %v1528_v37 = vadd.f32 %v12949_v46, %v1478_v2  ;;  %v12959_v46 = vld [vmem:[#allocation33_spill] sm:$0xff] }
 0x595   : > { %v10355_v12 = vpop.xlane.xlu2 %2913  ;;  %v1477_v15 = vadd.f32 %v12943_v36, %v1427_v55  ;;  %v3260_v55 = vsel %vm845_vm0, %v3250_v32, 0.0  ;;  %v12952_v36 = vld [vmem:[#allocation43_spill] sm:$0xff]  ;;  %v3051_v32 = vmul.f32 %v9932_v28, %v9891_v52  ;;  %v12960_v52 = vld [vmem:[#allocation69_spill] sm:$0xff] }
 0x596   : > { %12940 = vst [vmem:[#allocation18_spill] sm:$0xff] %v10355_v12  ;;  %v10357_v20 = vpop.xlane.xlu1 %3158  ;;  %v1279_v12 = vadd.f32 %v12948_v45, %v1229_v41  ;;  %v1328_v10 = vadd.f32 %v12952_v36, %v1278_v60  ;;  %v12954_v45 = vld [vmem:[#allocation42_spill] sm:$0xff]  ;;  %v12957_v60 = vld [vmem:[#allocation45_spill] sm:$0xff] }
 0x597   : > { %12941 = vst [vmem:[#allocation55_spill] sm:$0xff] %v10357_v20  ;;  %v10364_v33 = vpop.xlane.xlu0 %2518  ;;  %v12947_v20 = vld [vmem:[#allocation67_spill] sm:$0xff]  ;;  %v1527_v43 = vadd.f32 %v12951_v56, %v1477_v15  ;;  %v3300_v15 = vmul.f32 %v10167_v38, %v10082_v4  ;;  %v12961_v56 = vld [vmem:[#allocation49_spill] sm:$0xff] }
 0x598   : > { %v1230_v9 = vadd.f32 %v12947_v20, %v1180_v26  ;;  %v1329_v20 = vadd.f32 %v12953_v18, %v1279_v12  ;;  %v1578_v26 = vadd.f32 %v12954_v45, %v1528_v37  ;;  %v12958_v12 = vld [vmem:[#allocation73_spill] sm:$0xff]  ;;  %v12963_v18 = vld [vmem:[#allocation46_spill] sm:$0xff] }
 0x599   : > { %v1577_v21 = vadd.f32 %v12955_v35, %v1527_v43  ;;  %v10400_v37 = vld [vmem:[%s12659_s4 + $0x20] ss:$0 sm:$0xff]  ;;  %v12962_v43 = vld [vmem:[#allocation79_spill] sm:$0xff]  ;;  %v3310_v35 = vsel %vm845_vm0, %v3300_v15, 0.0  ;;  %v2902_v15 = vmul.f32 %v9781_v54, %v10106_v59 }
 0x59a   : > { %v1280_v61 = vadd.f32 %v12950_v22, %v1230_v9  ;;  %2474 = vadd.xlane.f32.xlu2 %v2473_v3  ;;  %v1379_v41 = vadd.f32 %v12956_v29, %v1329_v20  ;;  %v1628_v2 = vadd.f32 %v12957_v60, %v1578_v26  ;;  %v12964_v20 = vld [vmem:[#allocation57_spill] sm:$0xff]  ;;  %v3065_v26 = vsel %vm845_vm0, %v3051_v32, 0.0 }
 0x59b   : > { %2869 = vadd.xlane.f32.xlu1 %v2868_v53  ;;  %v2652_v53 = vmul.f32 %v10400_v37, %v10187_v19 }
 0x59c   : > { %3261 = vadd.xlane.f32.xlu0 %v3260_v55  ;;  %v1330_v9 = vadd.f32 %v12958_v12, %v1280_v61  ;;  %v1378_v55 = vadd.f32 %v12959_v46, %v1328_v10  ;;  %v1430_v28 = vadd.f32 %v12960_v52, %v1379_v41  ;;  %v1678_v4 = vadd.f32 %v12961_v56, %v1628_v2  ;;  %v10414_v10 = vld [vmem:[#allocation2 + $0xa1] sm:$0xff]  ;;  %v12966_v41 = vld [vmem:[#allocation36_spill] sm:$0xff] }
 0x59d   : > { %v10385_v44 = vpop.xlane.xlu2 %2173  ;;  %v1627_v61 = vadd.f32 %v12963_v18, %v1577_v21  ;;  %v2670_v60 = vsel %vm845_vm0, %v2652_v53, 0.0  ;;  %12965 = vst [vmem:[#allocation54_spill] sm:$0xff] %v10414_v10  ;;  %v12967_v12 = vld [vmem:[#allocation70_spill] sm:$0xff]  ;;  %v12971_v18 = vld [vmem:[#allocation76_spill] sm:$0xff] }
 0x59e   : > { %v10387_v22 = vpop.xlane.xlu1 %2568  ;;  %v1380_v36 = vadd.f32 %v12962_v43, %v1330_v9  ;;  %v1429_v45 = vadd.f32 %v12964_v20, %v1378_v55  ;;  %v1480_v9 = vadd.f32 %v12967_v12, %v1430_v28  ;;  %v3241_v21 = vld [vmem:[#allocation2 + $0x82] sm:$0xff]  ;;  %v2503_v28 = vmul.f32 %v10217_v8, %v10414_v10  ;;  %v12976_v12 = vld [vmem:[#allocation75_spill] sm:$0xff] }
 0x59f   : > { %v10395_v3 = vpop.xlane.xlu0 %2960  ;;  %v1677_v2 = vadd.f32 %v12966_v41, %v1627_v61  ;;  %v12968_v46 = vld [vmem:[#allocation50_spill] sm:$0xff]  ;;  %v3251_v54 = vmul.f32 %v10143_v49, %v3241_v21  ;;  %v12983_v21 = vld [vmem:[#allocation80_spill] sm:$0xff] }
 0x5a0   : > { %v1431_v29 = vadd.f32 %v9290_v57, %v1380_v36  ;;  %v1728_v55 = vadd.f32 %v12968_v46, %v1678_v4  ;;  %v12969_v57 = vld [vmem:[#allocation56_spill] sm:$0xff]  ;;  %v12970_v56 = vld [vmem:[#allocation78_spill] sm:$0xff]  ;;  %v12972_v4 = vld [vmem:[#allocation91_spill] sm:$0xff] }
 0x5a1   : > { %v1479_v52 = vadd.f32 %v12969_v57, %v1429_v45  ;;  %v1530_v53 = vadd.f32 %v12970_v56, %v1480_v9  ;;  %v1132_v20 = vadd.f32 %v12972_v4, %v9372_v30  ;;  %v12974_v45 = vld [vmem:[#allocation32_spill] sm:$0xff]  ;;  %v12977_v9 = vld [vmem:[#allocation74_spill] sm:$0xff]  ;;  %v12978_v57 = vld [vmem:[#allocation81_spill] sm:$0xff] }
 0x5a2   : > { %3066 = vadd.xlane.f32.xlu2 %v3065_v26  ;;  %v1481_v32 = vadd.f32 %v9335_v39, %v1431_v29  ;;  %v1779_v61 = vadd.f32 %v12971_v18, %v1728_v55  ;;  %v12973_v39 = vld [vmem:[#allocation97_spill] sm:$0xff]  ;;  %v1727_v29 = vadd.f32 %v12974_v45, %v1677_v2  ;;  %v1131_v46 = vadd.f32 %v12977_v9, %v12976_v12  ;;  %v12979_v56 = vld [vmem:[#allocation82_spill] sm:$0xff]  ;;  %v12981_v30 = vld [vmem:[#allocation103_spill] sm:$0xff] }
 0x5a3   : > { %3311 = vadd.xlane.f32.xlu1 %v3310_v35  ;;  %v1580_v8 = vadd.f32 %v12978_v57, %v1530_v53  ;;  %v12980_v18 = vld [vmem:[#allocation101_spill] sm:$0xff]  ;;  %v1182_v4 = vadd.f32 %v12981_v30, %v1132_v20  ;;  %v12984_v2 = vld [vmem:[#allocation84_spill] sm:$0xff]  ;;  %v12988_v20 = vld [vmem:[#allocation35_spill] sm:$0xff] }
 0x5a4   : > { %2671 = vadd.xlane.f32.xlu0 %v2670_v60  ;;  %v1531_v26 = vadd.f32 %v12973_v39, %v1481_v32  ;;  %v12975_v60 = vld [vmem:[#allocation62_spill] sm:$0xff]  ;;  %v1829_v55 = vadd.f32 %v12979_v56, %v1779_v61  ;;  %v2918_v32 = vsel %vm845_vm0, %v2902_v15, 0.0  ;;  %v12982_v39 = vld [vmem:[#allocation65_spill] sm:$0xff]  ;;  %v1181_v49 = vadd.f32 %v12983_v21, %v1131_v46  ;;  %v12987_v57 = vld [vmem:[#allocation112_spill] sm:$0xff] }
 0x5a5   : > { %v10424_v43 = vpop.xlane.xlu2 %2765  ;;  %v1529_v41 = vadd.f32 %v12975_v60, %v1479_v52  ;;  %v1630_v45 = vadd.f32 %v12984_v2, %v1580_v8  ;;  %v2523_v52 = vsel %vm845_vm0, %v2503_v28, 0.0  ;;  %v12985_v60 = vld [vmem:[#allocation87_spill] sm:$0xff]  ;;  %v12986_v9 = vld [vmem:[#allocation105_spill] sm:$0xff]  ;;  %v1778_v15 = vadd.f32 %v12988_v20, %v1727_v29  ;;  %v12989_v56 = vld [vmem:[#allocation68_spill] sm:$0xff] }
 0x5a6   : > { %v10426_v36 = vpop.xlane.xlu1 %3010  ;;  %v1581_v59 = vadd.f32 %v12980_v18, %v1531_v26  ;;  %v1879_v12 = vadd.f32 %v12985_v60, %v1829_v55  ;;  %v1232_v53 = vadd.f32 %v12986_v9, %v1182_v4  ;;  %v3263_v26 = vsel %vm845_vm0, %v3251_v54, 0.0  ;;  %v12990_v18 = vld [vmem:[#allocation85_spill] sm:$0xff]  ;;  %v12991_v30 = vld [vmem:[#allocation86_spill] sm:$0xff]  ;;  %v12992_v28 = vld [vmem:[#allocation92_spill] sm:$0xff] }
 0x5a7   : > { %v10434_v35 = vpop.xlane.xlu0 %2370  ;;  %v1579_v10 = vadd.f32 %v12982_v39, %v1529_v41  ;;  %v1231_v46 = vadd.f32 %v12990_v18, %v1181_v49  ;;  %v1680_v8 = vadd.f32 %v12991_v30, %v1630_v45  ;;  %v12993_v55 = vld [vmem:[#allocation113_spill] sm:$0xff]  ;;  %v12994_v4 = vld [vmem:[#allocation114_spill] sm:$0xff]  ;;  %v12995_v54 = vld [vmem:[#allocation72_spill] sm:$0xff]  ;;  %v3350_v45 = vmul.f32 %v10226_v13, %v10104_v25 }
 0x5a8   : > { %v1631_v61 = vadd.f32 %v12987_v57, %v1581_v59  ;;  %v1929_v39 = vadd.f32 %v12992_v28, %v1879_v12  ;;  %v1282_v21 = vadd.f32 %v12993_v55, %v1232_v53  ;;  %v3101_v59 = vmul.f32 %v9996_v14, %v9959_v63  ;;  %v12997_v60 = vld [vmem:[#allocation94_spill] sm:$0xff]  ;;  %v12999_v12 = vld [vmem:[#allocation100_spill] sm:$0xff]  ;;  %v10480_v14 = vld [vmem:[%s12659_s4 + $0x21] ss:$0 sm:$0xff] }
 0x5a9   : > { %v1629_v41 = vadd.f32 %v12989_v56, %v1579_v10  ;;  %v1730_v10 = vadd.f32 %v12997_v60, %v1680_v8  ;;  %v13000_v57 = vld [vmem:[#allocation122_spill] sm:$0xff]  ;;  %v2702_v56 = vmul.f32 %v10480_v14, %v10251_v24  ;;  %v13004_v30 = vld [vmem:[#allocation95_spill] sm:$0xff]  ;;  %v13006_v55 = vld [vmem:[#allocation104_spill] sm:$0xff] }
 0x5aa   : > { %2524 = vadd.xlane.f32.xlu2 %v2523_v52  ;;  %v1681_v2 = vadd.f32 %v12994_v4, %v1631_v61  ;;  %v12996_v52 = vld [vmem:[#allocation90_spill] sm:$0xff]  ;;  %v1979_v53 = vadd.f32 %v12999_v12, %v1929_v39  ;;  %v3115_v60 = vsel %vm845_vm0, %v3101_v59, 0.0  ;;  %v13009_v12 = vld [vmem:[#allocation83_spill] sm:$0xff]  ;;  %v13011_v24 = vld [vmem:[#allocation108_spill] sm:$0xff] }
 0x5ab   : > { %2919 = vadd.xlane.f32.xlu1 %v2918_v32  ;;  %v1679_v32 = vadd.f32 %v12995_v54, %v1629_v41  ;;  %v1281_v29 = vadd.f32 %v12996_v52, %v1231_v46  ;;  %v13002_v41 = vld [vmem:[#allocation38_spill] sm:$0xff]  ;;  %v13003_v46 = vld [vmem:[#allocation77_spill] sm:$0xff] }
 0x5ac   : > { %3264 = vadd.xlane.f32.xlu0 %v3263_v26  ;;  %v1731_v61 = vadd.f32 %v13000_v57, %v1681_v2  ;;  %v13001_v26 = vld [vmem:[#allocation124_spill] sm:$0xff]  ;;  %v1828_v18 = vadd.f32 %v13002_v41, %v1778_v15  ;;  %v13005_v28 = vld [vmem:[#allocation106_spill] sm:$0xff]  ;;  %v13008_v54 = vld [vmem:[#allocation133_spill] sm:$0xff] }
 0x5ad   : > { %v10466_v9 = vpop.xlane.xlu2 %3208  ;;  %v1332_v20 = vadd.f32 %v13001_v26, %v1282_v21  ;;  %v1729_v25 = vadd.f32 %v13003_v46, %v1679_v32  ;;  %v1331_v8 = vadd.f32 %v13004_v30, %v1281_v29  ;;  %v1781_v39 = vadd.f32 %v13005_v28, %v1730_v10  ;;  %v13007_v4 = vld [vmem:[#allocation126_spill] sm:$0xff]  ;;  %v13010_v26 = vld [vmem:[#allocation99_spill] sm:$0xff]  ;;  %v13015_v59 = vld [vmem:[#allocation41_spill] sm:$0xff] }
 0x5ae   : > { %12998 = vst [vmem:[#allocation37_spill] sm:$0xff] %v10466_v9  ;;  %v10468_v49 = vpop.xlane.xlu1 %2420  ;;  %v2029_v21 = vadd.f32 %v13006_v55, %v1979_v53  ;;  %v1782_v52 = vadd.f32 %v13008_v54, %v1731_v61  ;;  %v3360_v32 = vsel %vm845_vm0, %v3350_v45, 0.0  ;;  %v13012_v41 = vld [vmem:[#allocation115_spill] sm:$0xff]  ;;  %v13013_v46 = vld [vmem:[#allocation134_spill] sm:$0xff]  ;;  %v13016_v28 = vld [vmem:[#allocation88_spill] sm:$0xff] }
 0x5af   : > { %v10475_v63 = vpop.xlane.xlu0 %2963  ;;  %v1382_v2 = vadd.f32 %v13007_v4, %v1332_v20  ;;  %v1780_v57 = vadd.f32 %v13009_v12, %v1729_v25  ;;  %v1381_v9 = vadd.f32 %v13010_v26, %v1331_v8  ;;  %v1831_v15 = vadd.f32 %v13011_v24, %v1781_v39  ;;  %v13014_v30 = vld [vmem:[#allocation135_spill] sm:$0xff]  ;;  %v10500_v61 = vld [vmem:[#allocation2 + $0xa2] sm:$0xff]  ;;  %v13018_v39 = vld [vmem:[#allocation116_spill] sm:$0xff] }
 0x5b0   : > { %v2079_v29 = vadd.f32 %v13012_v41, %v2029_v21  ;;  %v1832_v53 = vadd.f32 %v13014_v30, %v1782_v52  ;;  %v2720_v20 = vsel %vm845_vm0, %v2702_v56, 0.0  ;;  %v1878_v25 = vadd.f32 %v13015_v59, %v1828_v18  ;;  %v13017_v55 = vld [vmem:[#allocation107_spill] sm:$0xff]  ;;  %v10506_v21 = vld [vmem:[#allocation2 + $0x83] sm:$0xff] }
 0x5b1   : > { %v1433_v10 = vadd.f32 %v13013_v46, %v1382_v2  ;;  %v1830_v8 = vadd.f32 %v13016_v28, %v1780_v57  ;;  %v1432_v24 = vadd.f32 %v13017_v55, %v1381_v9  ;;  %v1881_v45 = vadd.f32 %v13018_v39, %v1831_v15  ;;  %13019 = vst [vmem:[#allocation25_spill] sm:$0xff] %v10506_v21  ;;  %v13020_v4 = vld [vmem:[#allocation117_spill] sm:$0xff]  ;;  %v13021_v54 = vld [vmem:[#allocation143_spill] sm:$0xff]  ;;  %v13028_v59 = vld [vmem:[#allocation154_spill] sm:$0xff] }
 0x5b2   : > { %3116 = vadd.xlane.f32.xlu2 %v3115_v60  ;;  %v2129_v2 = vadd.f32 %v13020_v4, %v2079_v29  ;;  %v1882_v52 = vadd.f32 %v13021_v54, %v1832_v53  ;;  %v13022_v60 = vld [vmem:[#allocation145_spill] sm:$0xff]  ;;  %v2952_v12 = vmul.f32 %v9847_v5, %v10123_v1  ;;  %v13025_v41 = vld [vmem:[#allocation127_spill] sm:$0xff]  ;;  %v2553_v29 = vmul.f32 %v10240_v34, %v10500_v61  ;;  %v13033_v34 = vld [vmem:[#allocation136_spill] sm:$0xff] }
 0x5b3   : > { %3361 = vadd.xlane.f32.xlu1 %v3360_v32  ;;  %v1483_v56 = vadd.f32 %v13022_v60, %v1433_v10  ;;  %v13023_v26 = vld [vmem:[#allocation93_spill] sm:$0xff]  ;;  %v13024_v32 = vld [vmem:[#allocation118_spill] sm:$0xff]  ;;  %v1931_v9 = vadd.f32 %v13025_v41, %v1881_v45  ;;  %v3301_v1 = vmul.f32 %v10167_v38, %v10506_v21  ;;  %v13031_v45 = vld [vmem:[#allocation120_spill] sm:$0xff] }
 0x5b4   : > { %2721 = vadd.xlane.f32.xlu0 %v2720_v20  ;;  %v1880_v18 = vadd.f32 %v13023_v26, %v1830_v8  ;;  %v1482_v57 = vadd.f32 %v13024_v32, %v1432_v24  ;;  %v13026_v30 = vld [vmem:[#allocation125_spill] sm:$0xff]  ;;  %v13027_v20 = vld [vmem:[#allocation147_spill] sm:$0xff]  ;;  %v1932_v28 = vadd.f32 %v13028_v59, %v1882_v52  ;;  %v13029_v8 = vld [vmem:[#allocation52_spill] sm:$0xff]  ;;  %v2968_v52 = vsel %vm845_vm0, %v2952_v12, 0.0 }
 0x5b5   : > { %v10516_v46 = vpop.xlane.xlu2 %2618  ;;  %v2179_v53 = vadd.f32 %v13026_v30, %v2129_v2  ;;  %v1533_v10 = vadd.f32 %v13027_v20, %v1483_v56  ;;  %v1928_v55 = vadd.f32 %v13029_v8, %v1878_v25  ;;  %v13030_v24 = vld [vmem:[#allocation98_spill] sm:$0xff]  ;;  %v13032_v54 = vld [vmem:[#allocation129_spill] sm:$0xff]  ;;  %v13034_v2 = vld [vmem:[#allocation155_spill] sm:$0xff] }
 0x5b6   : > { %v10518_v15 = vpop.xlane.xlu1 %3013  ;;  %v1930_v39 = vadd.f32 %v13030_v24, %v1880_v18  ;;  %v1532_v4 = vadd.f32 %v13031_v45, %v1482_v57  ;;  %v1981_v60 = vadd.f32 %v13032_v54, %v1931_v9  ;;  %v13035_v56 = vld [vmem:[#allocation156_spill] sm:$0xff]  ;;  %v13036_v30 = vld [vmem:[#allocation102_spill] sm:$0xff]  ;;  %v13038_v38 = vld [vmem:[#allocation137_spill] sm:$0xff]  ;;  %v2573_v18 = vsel %vm845_vm0, %v2553_v29, 0.0 }
 0x5b7   : > { %v10525_v5 = vpop.xlane.xlu0 %2223  ;;  %v2229_v26 = vadd.f32 %v13033_v34, %v2179_v53  ;;  %v1583_v32 = vadd.f32 %v13034_v2, %v1533_v10  ;;  %v1982_v41 = vadd.f32 %v13035_v56, %v1932_v28  ;;  %v13037_v59 = vld [vmem:[#allocation128_spill] sm:$0xff]  ;;  %v13039_v8 = vld [vmem:[#allocation138_spill] sm:$0xff]  ;;  %v3313_v10 = vsel %vm845_vm0, %v3301_v1, 0.0  ;;  %v13044_v34 = vld [vmem:[#allocation139_spill] sm:$0xff] }
 0x5b8   : > { %v1980_v20 = vadd.f32 %v13036_v30, %v1930_v39  ;;  %v1582_v21 = vadd.f32 %v13037_v59, %v1532_v4  ;;  %v2031_v25 = vadd.f32 %v13038_v38, %v1981_v60  ;;  %v13040_v24 = vld [vmem:[#allocation164_spill] sm:$0xff]  ;;  %v13041_v45 = vld [vmem:[#allocation166_spill] sm:$0xff]  ;;  %v13049_v1 = vld [vmem:[#allocation121_spill] sm:$0xff] }
 0x5b9   : > { %v2279_v57 = vadd.f32 %v13039_v8, %v2229_v26  ;;  %v2032_v9 = vadd.f32 %v13040_v24, %v1982_v41  ;;  %v1633_v53 = vadd.f32 %v13041_v45, %v1583_v32  ;;  %v13042_v28 = vld [vmem:[#allocation44_spill] sm:$0xff]  ;;  %v13043_v54 = vld [vmem:[#allocation110_spill] sm:$0xff]  ;;  %v13048_v41 = vld [vmem:[#allocation175_spill] sm:$0xff]  ;;  %v3152_v32 = vmul.f32 %v10020_v50, %v9976_v31 }
 0x5ba   : > { %2574 = vadd.xlane.f32.xlu2 %v2573_v18  ;;  %v1978_v12 = vadd.f32 %v13042_v28, %v1928_v55  ;;  %v2030_v39 = vadd.f32 %v13043_v54, %v1980_v20  ;;  %v1632_v4 = vadd.f32 %v13044_v34, %v1582_v21  ;;  %v13045_v2 = vld [vmem:[#allocation148_spill] sm:$0xff]  ;;  %v13046_v29 = vld [vmem:[#allocation146_spill] sm:$0xff]  ;;  %v13050_v59 = vld [vmem:[#allocation141_spill] sm:$0xff] }
 0x5bb   : > { %2969 = vadd.xlane.f32.xlu1 %v2968_v52  ;;  %v2081_v38 = vadd.f32 %v13045_v2, %v2031_v25  ;;  %v2329_v60 = vadd.f32 %v13046_v29, %v2279_v57  ;;  %v13047_v26 = vld [vmem:[#allocation168_spill] sm:$0xff]  ;;  %v2082_v30 = vadd.f32 %v13048_v41, %v2032_v9  ;;  %v13051_v18 = vld [vmem:[#allocation150_spill] sm:$0xff]  ;;  %v3400_v25 = vmul.f32 %v10289_v40, %v10170_v17  ;;  %v13052_v57 = vld [vmem:[#allocation157_spill] sm:$0xff] }
 0x5bc   : > { %3314 = vadd.xlane.f32.xlu0 %v3313_v10  ;;  %v1683_v56 = vadd.f32 %v13047_v26, %v1633_v53  ;;  %v2080_v52 = vadd.f32 %v13049_v1, %v2030_v39  ;;  %v1682_v55 = vadd.f32 %v13050_v59, %v1632_v4  ;;  %v13053_v45 = vld [vmem:[#allocation176_spill] sm:$0xff]  ;;  %v13054_v53 = vld [vmem:[#allocation177_spill] sm:$0xff]  ;;  %v13056_v54 = vld [vmem:[#allocation47_spill] sm:$0xff]  ;;  %v3166_v59 = vsel %vm845_vm0, %v3152_v32, 0.0 }
 0x5bd   : > { %v2131_v20 = vadd.f32 %v13051_v18, %v2081_v38  ;;  %v10557_v8 = vpop.xlane.xlu2 %3060  ;;  %v2379_v24 = vadd.f32 %v13052_v57, %v2329_v60  ;;  %v2132_v10 = vadd.f32 %v13054_v53, %v2082_v30  ;;  %v10571_v50 = vld [vmem:[%s12659_s4 + $0x22] ss:$0 sm:$0xff]  ;;  %v2028_v39 = vadd.f32 %v13056_v54, %v1978_v12  ;;  %v13057_v34 = vld [vmem:[#allocation123_spill] sm:$0xff]  ;;  %v13059_v38 = vld [vmem:[#allocation158_spill] sm:$0xff] }
 0x5be   : > { %v10559_v21 = vpop.xlane.xlu1 %2273  ;;  %v1733_v9 = vadd.f32 %v13053_v45, %v1683_v56  ;;  %13055 = vst [vmem:[#allocation30_spill] sm:$0xff] %v10571_v50  ;;  %v2752_v28 = vmul.f32 %v10571_v50, %v10267_v0  ;;  %v2130_v17 = vadd.f32 %v13057_v34, %v2080_v52  ;;  %v13058_v4 = vld [vmem:[#allocation149_spill] sm:$0xff]  ;;  %v13060_v60 = vld [vmem:[#allocation159_spill] sm:$0xff]  ;;  %v13064_v45 = vld [vmem:[#allocation160_spill] sm:$0xff]  ;;  %v3410_v52 = vsel %vm845_vm0, %v3400_v25, 0.0 }
 0x5bf   : > { %v10566_v31 = vpop.xlane.xlu0 %2816  ;;  %v1732_v2 = vadd.f32 %v13058_v4, %v1682_v55  ;;  %v2181_v29 = vadd.f32 %v13059_v38, %v2131_v20  ;;  %v2429_v26 = vadd.f32 %v13060_v60, %v2379_v24  ;;  %v13061_v56 = vld [vmem:[#allocation185_spill] sm:$0xff]  ;;  %v13062_v30 = vld [vmem:[#allocation187_spill] sm:$0xff]  ;;  %v13068_v4 = vld [vmem:[#allocation196_spill] sm:$0xff] }
 0x5c0   : > { %v2182_v41 = vadd.f32 %v13061_v56, %v2132_v10  ;;  %v1784_v1 = vadd.f32 %v13062_v30, %v1733_v9  ;;  %v13063_v18 = vld [vmem:[#allocation131_spill] sm:$0xff]  ;;  %v13065_v50 = vld [vmem:[#allocation169_spill] sm:$0xff]  ;;  %v2770_v10 = vsel %vm845_vm0, %v2752_v28, 0.0  ;;  %v13073_v56 = vld [vmem:[#allocation178_spill] sm:$0xff] }
 0x5c1   : > { %v2180_v57 = vadd.f32 %v13063_v18, %v2130_v17  ;;  %v1783_v53 = vadd.f32 %v13064_v45, %v1732_v2  ;;  %v2231_v12 = vadd.f32 %v13065_v50, %v2181_v29  ;;  %v13066_v54 = vld [vmem:[#allocation167_spill] sm:$0xff]  ;;  %v13067_v34 = vld [vmem:[#allocation189_spill] sm:$0xff]  ;;  %v13070_v2 = vld [vmem:[#allocation142_spill] sm:$0xff] }
 0x5c2   : > { %v2480_v55 = vadd.f32 %v13066_v54, %v2429_v26  ;;  %v1834_v20 = vadd.f32 %v13067_v34, %v1784_v1  ;;  %v2232_v24 = vadd.f32 %v13068_v4, %v2182_v41  ;;  %3167 = vadd.xlane.f32.xlu2 %v3166_v59  ;;  %v10591_v9 = vld [vmem:[#allocation2 + $0xa3] sm:$0xff]  ;;  %v13069_v32 = vld [vmem:[#allocation51_spill] sm:$0xff]  ;;  %v13079_v4 = vld [vmem:[#allocation180_spill] sm:$0xff] }
 0x5c3   : > { %3411 = vadd.xlane.f32.xlu1 %v3410_v52  ;;  %v10594_v17 = vadd.f32 %v13069_v32, %v2028_v39  ;;  %v2230_v38 = vadd.f32 %v13070_v2, %v2180_v57  ;;  %v13071_v50 = vld [vmem:[#allocation162_spill] sm:$0xff]  ;;  %v13072_v25 = vld [vmem:[#allocation171_spill] sm:$0xff]  ;;  %v13074_v30 = vld [vmem:[#allocation197_spill] sm:$0xff] }
 0x5c4   : > { %v1833_v29 = vadd.f32 %v13071_v50, %v1783_v53  ;;  %v2281_v60 = vadd.f32 %v13072_v25, %v2231_v12  ;;  %2771 = vadd.xlane.f32.xlu0 %v2770_v10  ;;  %v10599_v26 = vld [vmem:[#allocation2 + $0x84] sm:$0xff]  ;;  %v2530_v41 = vadd.f32 %v13073_v56, %v2480_v55  ;;  %v1884_v1 = vadd.f32 %v13074_v30, %v1834_v20  ;;  %v13076_v57 = vld [vmem:[#allocation144_spill] sm:$0xff]  ;;  %v13078_v52 = vld [vmem:[#allocation179_spill] sm:$0xff] }
 0x5c5   : > { %v13075_v28 = vld [vmem:[#allocation198_spill] sm:$0xff]  ;;  %v10607_v39 = vld [vmem:[%s12659_s4 + $0x27] ss:$0 sm:$0xff]  ;;  %v2280_v45 = vadd.f32 %v13076_v57, %v2230_v38  ;;  %v10614_v34 = vpop.xlane.xlu2 %2471  ;;  %v2603_v20 = vmul.f32 %v10301_v27, %v10591_v9  ;;  %v13080_v10 = vld [vmem:[#allocation207_spill] sm:$0xff]  ;;  %v3351_v38 = vmul.f32 %v10226_v13, %v10599_v26  ;;  %v3202_v27 = vmul.f32 %v10079_v7, %v10040_v6 }
 0x5c6   : > { %v2282_v59 = vadd.f32 %v13075_v28, %v2232_v24  ;;  %v3002_v18 = vmul.f32 %v10607_v39, %v10187_v19  ;;  %v13077_v53 = vld [vmem:[#allocation170_spill] sm:$0xff]  ;;  %v2331_v54 = vadd.f32 %v13078_v52, %v2281_v60  ;;  %v10616_v55 = vpop.xlane.xlu1 %2866  ;;  %v2580_v24 = vadd.f32 %v13079_v4, %v2530_v41  ;;  %v13081_v2 = vld [vmem:[#allocation209_spill] sm:$0xff]  ;;  %v13085_v57 = vld [vmem:[#allocation188_spill] sm:$0xff] }
 0x5c7   : > { %v1883_v12 = vadd.f32 %v13077_v53, %v1833_v29  ;;  %v1934_v50 = vadd.f32 %v13081_v2, %v1884_v1  ;;  %v10623_v19 = vpop.xlane.xlu0 %3258  ;;  %v13082_v29 = vld [vmem:[#allocation152_spill] sm:$0xff]  ;;  %v13083_v60 = vld [vmem:[#allocation181_spill] sm:$0xff]  ;;  %v13084_v30 = vld [vmem:[#allocation190_spill] sm:$0xff] }
 0x5c8   : > { %v2332_v32 = vadd.f32 %v13080_v10, %v2282_v59  ;;  %v2330_v25 = vadd.f32 %v13082_v29, %v2280_v45  ;;  %v2381_v28 = vadd.f32 %v13084_v30, %v2331_v54  ;;  %v2630_v41 = vadd.f32 %v13085_v57, %v2580_v24  ;;  %v13086_v53 = vld [vmem:[#allocation212_spill] sm:$0xff]  ;;  %v13087_v4 = vld [vmem:[#allocation163_spill] sm:$0xff]  ;;  %v13092_v7 = vld [vmem:[#allocation221_spill] sm:$0xff] }
 0x5c9   : > { %v1933_v56 = vadd.f32 %v13083_v60, %v1883_v12  ;;  %v1984_v59 = vadd.f32 %v13086_v53, %v1934_v50  ;;  %v3018_v52 = vsel %vm845_vm0, %v3002_v18, 0.0  ;;  %v13088_v13 = vld [vmem:[#allocation183_spill] sm:$0xff]  ;;  %v13089_v45 = vld [vmem:[#allocation192_spill] sm:$0xff]  ;;  %v2623_v12 = vsel %vm845_vm0, %v2603_v20, 0.0  ;;  %v13097_v53 = vld [vmem:[#allocation201_spill] sm:$0xff] }
 0x5ca   : > { %v2382_v1 = vadd.f32 %v10197_v11, %v2332_v32  ;;  %v2380_v10 = vadd.f32 %v13087_v4, %v2330_v25  ;;  %v2431_v29 = vadd.f32 %v13089_v45, %v2381_v28  ;;  %v13090_v54 = vld [vmem:[#allocation199_spill] sm:$0xff]  ;;  %v13091_v30 = vld [vmem:[#allocation220_spill] sm:$0xff]  ;;  %2624 = vadd.xlane.f32.xlu2 %v2623_v12  ;;  %v3363_v50 = vsel %vm845_vm0, %v3351_v38, 0.0  ;;  %v13093_v11 = vld [vmem:[#allocation165_spill] sm:$0xff] }
 0x5cb   : > { %v1983_v2 = vadd.f32 %v13088_v13, %v1933_v56  ;;  %v2680_v60 = vadd.f32 %v13090_v54, %v2630_v41  ;;  %v2034_v6 = vadd.f32 %v13091_v30, %v1984_v59  ;;  %3019 = vadd.xlane.f32.xlu1 %v3018_v52  ;;  %v13094_v32 = vld [vmem:[#allocation191_spill] sm:$0xff]  ;;  %v13095_v57 = vld [vmem:[#allocation200_spill] sm:$0xff]  ;;  %v7551_v38 = vld [vmem:[%s12659_s4] ss:$0 sm:$0xff] }
 0x5cc   : > { %v2432_v24 = vadd.f32 %v13092_v7, %v2382_v1  ;;  %v2430_v18 = vadd.f32 %v13093_v11, %v2380_v10  ;;  %v2482_v56 = vadd.f32 %v13095_v57, %v2431_v29  ;;  %3364 = vadd.xlane.f32.xlu0 %v3363_v50  ;;  %v13096_v28 = vld [vmem:[#allocation223_spill] sm:$0xff]  ;;  %v13098_v10 = vld [vmem:[#allocation173_spill] sm:$0xff] }
 0x5cd   : > { %v2033_v25 = vadd.f32 %v13094_v32, %v1983_v2  ;;  %v3450_v20 = vmul.f32 %v10319_v58, %v13096_v28  ;;  %v2730_v41 = vadd.f32 %v13097_v53, %v2680_v60  ;;  %v2084_v1 = vadd.f32 %v10277_v62, %v2034_v6  ;;  %v7552_v52 = vld [vmem:[#allocation2 + $0x70] sm:$0xff]  ;;  %v13099_v2 = vld [vmem:[#allocation202_spill] sm:$0xff]  ;;  %v13100_v29 = vld [vmem:[#allocation213_spill] sm:$0xff]  ;;  %v10658_v54 = vpop.xlane.xlu2 %3063 }
 0x5ce   : > { %v2483_v59 = vadd.f32 %v10269_v23, %v2432_v24  ;;  %v1051_v4 = vmul.f32 %v7552_v52, %v7551_v38  ;;  %v2481_v13 = vadd.f32 %v13098_v10, %v2430_v18  ;;  %v2532_v12 = vadd.f32 %v13100_v29, %v2482_v56  ;;  %v10660_v30 = vpop.xlane.xlu1 %3308  ;;  %v13101_v60 = vld [vmem:[#allocation211_spill] sm:$0xff]  ;;  %v10669_v50 = vld [vmem:[%s12659_s4 + $0x23] ss:$0 sm:$0xff]  ;;  %v13105_v28 = vld [vmem:[#allocation216_spill] sm:$0xff] }
 0x5cf   : > { %v2083_v45 = vadd.f32 %v13099_v2, %v2033_v25  ;;  %v3216_v23 = vsel %vm845_vm0, %v3202_v27, 0.0  ;;  %v2780_v62 = vadd.f32 %v13101_v60, %v2730_v41  ;;  %v2134_v6 = vadd.f32 %v10296_v47, %v2084_v1  ;;  %v2669_v24 = vpop.xlane.xlu0 %2668  ;;  %v13102_v18 = vld [vmem:[#allocation89_spill] sm:$0xff]  ;;  %v13103_v25 = vld [vmem:[#allocation184_spill] sm:$0xff]  ;;  %v13106_v53 = vld [vmem:[#allocation222_spill] sm:$0xff] }
 0x5d0   : > { %v2533_v7 = vadd.f32 %v10364_v33, %v2483_v59  ;;  %v2803_v11 = vmul.f32 %v10669_v50, %v10347_v16  ;;  %v2128_v32 = vadd.f32 %v13102_v18, %v10594_v17  ;;  %v2531_v27 = vadd.f32 %v13103_v25, %v2481_v13  ;;  %v13104_v57 = vld [vmem:[#allocation205_spill] sm:$0xff]  ;;  %v13107_v52 = vld [vmem:[#allocation96_spill] sm:$0xff]  ;;  %v13108_v2 = vld [vmem:[#allocation186_spill] sm:$0xff] }
 0x5d1   : > { %v2133_v56 = vadd.f32 %v13104_v57, %v2083_v45  ;;  %v2582_v47 = vadd.f32 %v13105_v28, %v2532_v12  ;;  %v2831_v33 = vadd.f32 %v13106_v53, %v2780_v62  ;;  %v2184_v41 = vadd.f32 %v10385_v44, %v2134_v6  ;;  %v10682_v38 = vld [vmem:[#allocation2 + $0x85] sm:$0xff]  ;;  %v13109_v29 = vld [vmem:[#allocation215_spill] sm:$0xff]  ;;  %v13110_v60 = vld [vmem:[#allocation224_spill] sm:$0xff] }
 0x5d2   : > { %v2583_v59 = vadd.f32 %v10387_v22, %v2533_v7  ;;  %v3460_v1 = vsel %vm845_vm0, %v3450_v20, 0.0  ;;  %v2178_v10 = vadd.f32 %v13107_v52, %v2128_v32  ;;  %v2581_v17 = vadd.f32 %v13108_v2, %v2531_v27  ;;  %v13111_v18 = vld [vmem:[#allocation225_spill] sm:$0xff]  ;;  %3217 = vadd.xlane.f32.xlu2 %v3216_v23  ;;  %v13113_v32 = vld [vmem:[#allocation194_spill] sm:$0xff]  ;;  %v13115_v28 = vld [vmem:[#allocation111_spill] sm:$0xff] }
 0x5d3   : > { %v2183_v13 = vadd.f32 %v13109_v29, %v2133_v56  ;;  %v2632_v45 = vadd.f32 %v13110_v60, %v2582_v47  ;;  %v2881_v12 = vadd.f32 %v13111_v18, %v2831_v33  ;;  %v2234_v44 = vadd.f32 %v10525_v5, %v2184_v41  ;;  %3461 = vadd.xlane.f32.xlu1 %v3460_v1  ;;  %v10692_v20 = vld [vmem:[#allocation2 + $0xa4] sm:$0xff] }
 0x5d4   : > { %v2633_v62 = vadd.f32 %v10516_v46, %v2583_v59  ;;  %v2821_v22 = vsel %vm845_vm0, %v2803_v11, 0.0  ;;  %v13112_v6 = vld [vmem:[#allocation109_spill] sm:$0xff]  ;;  %v2631_v25 = vadd.f32 %v13113_v32, %v2581_v17  ;;  %v13114_v27 = vld [vmem:[#allocation226_spill] sm:$0xff]  ;;  %v3401_v56 = vmul.f32 %v10289_v40, %v10682_v38 }
 0x5d5   : > { %v2228_v7 = vadd.f32 %v13112_v6, %v2178_v10  ;;  %v2233_v57 = vadd.f32 %v13114_v27, %v2183_v13  ;;  %2822 = vadd.xlane.f32.xlu0 %v2821_v22  ;;  %v2931_v46 = vadd.f32 %v10294_v42, %v2881_v12  ;;  %v2682_v5 = vadd.f32 %v10308_v48, %v2632_v45  ;;  %v13116_v53 = vld [vmem:[#allocation206_spill] sm:$0xff]  ;;  %v2324_v59 = vpop.xlane.xlu2 %2323  ;;  %v13117_v10 = vld [vmem:[#allocation17_spill] sm:$0xff]  ;;  %v13119_v13 = vld [vmem:[#allocation19_spill] sm:$0xff] }
 0x5d6   : > { %v2284_v23 = vadd.f32 %v10559_v21, %v2234_v44  ;;  %v2683_v11 = vadd.f32 %v2669_v24, %v2633_v62  ;;  %v2681_v33 = vadd.f32 %v13116_v53, %v2631_v25  ;;  %v2719_v1 = vpop.xlane.xlu1 %2718  ;;  %v2653_v52 = vmul.f32 %v10400_v37, %v10692_v20  ;;  %v13118_v24 = vld [vmem:[#allocation208_spill] sm:$0xff]  ;;  %v13120_v45 = vld [vmem:[#allocation119_spill] sm:$0xff]  ;;  %v13121_v37 = vld [vmem:[#allocation218_spill] sm:$0xff] }
 0x5d7   : > { %v2278_v47 = vadd.f32 %v13115_v28, %v2228_v7  ;;  %v2283_v41 = vadd.f32 %v10255_v51, %v2233_v57  ;;  %v2732_v2 = vadd.f32 %v13117_v10, %v2682_v5  ;;  %v2981_v42 = vadd.f32 %v10395_v3, %v2931_v46  ;;  %v3111_v48 = vpop.xlane.xlu0 %3110  ;;  %v13122_v6 = vld [vmem:[#allocation130_spill] sm:$0xff]  ;;  %v13127_v53 = vld [vmem:[#allocation203_spill] sm:$0xff] }
 0x5d8   : > { %v10709_v17 = vadd.f32 %v2324_v59, %v2284_v23  ;;  %v10711_v21 = vadd.f32 %v2719_v1, %v2683_v11  ;;  %v2731_v29 = vadd.f32 %v13118_v24, %v2681_v33  ;;  %v1073_v3 = vsel %vm845_vm0, %v1051_v4, 0.0  ;;  %v13125_v23 = vld [vmem:[#allocation230_spill] sm:$0xff]  ;;  %v13129_v59 = vld [vmem:[#allocation140_spill] sm:$0xff] }
 0x5d9   : > { %v2333_v60 = vadd.f32 %v13119_v13, %v2283_v41  ;;  %v2328_v51 = vadd.f32 %v13120_v45, %v2278_v47  ;;  %v2782_v18 = vadd.f32 %v10424_v43, %v2732_v2  ;;  %v3031_v12 = vadd.f32 %v10426_v36, %v2981_v42  ;;  %v13123_v43 = vld [vmem:[#allocation229_spill] sm:$0xff]  ;;  %v13126_v47 = vld [vmem:[#allocation54_spill] sm:$0xff]  ;;  %v7556_v2 = vld [vmem:[#allocation2 + $0x71] sm:$0xff] }
 0x5da   : > { %v2781_v62 = vadd.f32 %v13121_v37, %v2731_v29  ;;  %v2673_v22 = vsel %vm845_vm0, %v2653_v52, 0.0  ;;  %1074 = vadd.xlane.f32.xlu2 %v1073_v3  ;;  %v3413_v27 = vsel %vm845_vm0, %v3401_v56, 0.0  ;;  %v10735_v56 = vld [vmem:[%s12659_s4 + $0x24] ss:$0 sm:$0xff]  ;;  %v13128_v33 = vld [vmem:[#allocation210_spill] sm:$0xff]  ;;  %v13131_v13 = vld [vmem:[#allocation151_spill] sm:$0xff] }
 0x5db   : > { %v2383_v44 = vadd.f32 %v10434_v35, %v2333_v60  ;;  %v2378_v7 = vadd.f32 %v13122_v6, %v2328_v51  ;;  %v3081_v32 = vadd.f32 %v10557_v8, %v3031_v12  ;;  %v2833_v25 = vadd.f32 %v10566_v31, %v2782_v18  ;;  %2674 = vadd.xlane.f32.xlu1 %v2673_v22  ;;  %v13124_v35 = vld [vmem:[#allocation132_spill] sm:$0xff]  ;;  %v13132_v12 = vld [vmem:[#allocation153_spill] sm:$0xff] }
 0x5dc   : > { %v2832_v36 = vadd.f32 %v13123_v43, %v2781_v62  ;;  %v3252_v41 = vmul.f32 %v13128_v33, %v13127_v53  ;;  %v10758_v3 = vld [vmem:[#allocation2 + $0xa5] sm:$0xff] }
 0x5dd   : > { %v2433_v57 = vadd.f32 %v10468_v49, %v2383_v44  ;;  %3414 = vadd.xlane.f32.xlu0 %v3413_v27  ;;  %v2428_v46 = vadd.f32 %v13124_v35, %v2378_v7  ;;  %v2883_v4 = vadd.f32 %v10616_v55, %v2833_v25  ;;  %v3131_v5 = vadd.f32 %v3111_v48, %v3081_v32  ;;  %v2917_v28 = vpop.xlane.xlu2 %2916  ;;  %v13130_v48 = vld [vmem:[#allocation18_spill] sm:$0xff]  ;;  %v13133_v6 = vld [vmem:[#allocation161_spill] sm:$0xff] }
 0x5de   : > { %v2882_v11 = vadd.f32 %v13125_v23, %v2832_v36  ;;  %v3162_v31 = vpop.xlane.xlu1 %3161  ;;  %v2853_v49 = vmul.f32 %v10735_v56, %v13126_v47  ;;  %v3266_v18 = vsel %vm845_vm0, %v3252_v41, 0.0  ;;  %v10756_v44 = vld [vmem:[#allocation2 + $0x86] sm:$0xff]  ;;  %v2703_v43 = vmul.f32 %v10480_v14, %v10758_v3  ;;  %v13134_v36 = vld [vmem:[#allocation172_spill] sm:$0xff] }
 0x5df   : > { %v2484_v8 = vadd.f32 %v10614_v34, %v2433_v57  ;;  %v2479_v55 = vadd.f32 %v13129_v59, %v2428_v46  ;;  %v10742_v1 = vadd.f32 %v2917_v28, %v2883_v4  ;;  %v2522_v52 = vpop.xlane.xlu0 %2521  ;;  %v10744_v10 = vadd.f32 %v3162_v31, %v3131_v5  ;;  %v7555_v34 = vld [vmem:[%s12659_s4 + $0x1] ss:$0 sm:$0xff]  ;;  %v13136_v23 = vld [vmem:[#allocation174_spill] sm:$0xff] }
 0x5e0   : > { %v1101_v42 = vmul.f32 %v7556_v2, %v7555_v34  ;;  %v2932_v24 = vadd.f32 %v13130_v48, %v2882_v11  ;;  %v2871_v51 = vsel %vm845_vm0, %v2853_v49, 0.0  ;;  %v3451_v27 = vmul.f32 %v10319_v58, %v10756_v44  ;;  %v13137_v28 = vld [vmem:[#allocation182_spill] sm:$0xff]  ;;  %v13138_v53 = vld [vmem:[#allocation193_spill] sm:$0xff]  ;;  %v7559_v34 = vld [vmem:[#allocation2 + $0x93] sm:$0xff] }
 0x5e1   : > { %v2534_v29 = vadd.f32 %v2522_v52, %v2484_v8  ;;  %v2529_v60 = vadd.f32 %v13131_v13, %v2479_v55  ;;  %v2723_v14 = vsel %vm845_vm0, %v2703_v43, 0.0  ;;  %v10788_v55 = vld [vmem:[%s12659_s4 + $0x25] ss:$0 sm:$0xff]  ;;  %v13139_v2 = vld [vmem:[#allocation214_spill] sm:$0xff]  ;;  %v13140_v48 = vld [vmem:[#allocation195_spill] sm:$0xff] }
 0x5e2   : > { %v2982_v45 = vadd.f32 %v10475_v63, %v2932_v24  ;;  %2872 = vadd.xlane.f32.xlu2 %v2871_v51  ;;  %v1123_v62 = vsel %vm845_vm0, %v1101_v42, 0.0  ;;  %v3463_v8 = vsel %vm845_vm0, %v3451_v27, 0.0  ;;  %v2903_v52 = vmul.f32 %v10788_v55, %v10500_v61  ;;  %v7561_v51 = vld [vmem:[#allocation2 + $0x72] sm:$0xff] }
 0x5e3   : > { %v2579_v37 = vadd.f32 %v13132_v12, %v2529_v60  ;;  %3267 = vadd.xlane.f32.xlu1 %v3266_v18  ;;  %v3302_v42 = vmul.f32 %v7559_v34, %v13139_v2  ;;  %v10838_v2 = vld [vmem:[#allocation2 + $0xa6] sm:$0xff] }
 0x5e4   : > { %v3032_v22 = vadd.f32 %v10518_v15, %v2982_v45  ;;  %v10775_v15 = vld [vmem:[%s12659_s4 + $0x28] ss:$0 sm:$0xff]  ;;  %v7560_v45 = vld [vmem:[%s12659_s4 + $0x2] ss:$0 sm:$0xff] }
 0x5e5   : > { %1124 = vadd.xlane.f32.xlu0 %v1123_v62  ;;  %v2629_v7 = vadd.f32 %v13133_v6, %v2579_v37  ;;  %v10763_v32 = vpop.xlane.xlu2 %3358  ;;  %v1151_v18 = vmul.f32 %v7561_v51, %v7560_v45  ;;  %v13141_v37 = vld [vmem:[#allocation204_spill] sm:$0xff]  ;;  %v3316_v6 = vsel %vm845_vm0, %v3302_v42, 0.0  ;;  %v13147_v42 = vld [vmem:[#allocation37_spill] sm:$0xff] }
 0x5e6   : > { %v3082_v63 = vadd.f32 %v10658_v54, %v3032_v22  ;;  %v2572_v25 = vpop.xlane.xlu1 %2571  ;;  %v13135_v54 = vld [vmem:[#allocation227_spill] sm:$0xff]  ;;  %v2921_v22 = vsel %vm845_vm0, %v2903_v52, 0.0  ;;  %v7567_v45 = vld [vmem:[%s12659_s4 + $0x4] ss:$0 sm:$0xff] }
 0x5e7   : > { %v2679_v57 = vadd.f32 %v13134_v36, %v2629_v7  ;;  %v3114_v35 = vpop.xlane.xlu0 %3113  ;;  %v10770_v46 = vadd.f32 %v2572_v25, %v2534_v29  ;;  %v3052_v4 = vmul.f32 %v10775_v15, %v13135_v54  ;;  %v13142_v7 = vld [vmem:[#allocation217_spill] sm:$0xff]  ;;  %v13143_v25 = vld [vmem:[#allocation219_spill] sm:$0xff] }
 0x5e8   : > { %v3132_v5 = vadd.f32 %v3114_v35, %v3082_v63  ;;  %v1173_v63 = vsel %vm845_vm0, %v1151_v18, 0.0  ;;  %v10815_v54 = vld [vmem:[%s12659_s4 + $0x26] ss:$0 sm:$0xff]  ;;  %v7568_v51 = vld [vmem:[#allocation2 + $0x74] sm:$0xff] }
 0x5e9   : > { %v2729_v11 = vadd.f32 %v13136_v23, %v2679_v57  ;;  %v3068_v49 = vsel %vm845_vm0, %v3052_v4, 0.0  ;;  %v7563_v57 = vld [vmem:[#allocation2 + $0x73] sm:$0xff]  ;;  %v2953_v4 = vmul.f32 %v10815_v54, %v10591_v9  ;;  %v1251_v18 = vmul.f32 %v7568_v51, %v7567_v45 }
 0x5ea   : > { %3464 = vadd.xlane.f32.xlu2 %v3463_v8  ;;  %v3003_v45 = vmul.f32 %v10607_v39, %v10692_v20 }
 0x5eb   : > { %v2779_v31 = vadd.f32 %v13137_v28, %v2729_v11  ;;  %2724 = vadd.xlane.f32.xlu1 %v2723_v14  ;;  %v10828_v28 = vld [vmem:[%s12659_s4 + $0x29] ss:$0 sm:$0xff] }
 0x5ed   : > { %3069 = vadd.xlane.f32.xlu0 %v3068_v49  ;;  %v2830_v33 = vadd.f32 %v13138_v53, %v2779_v31  ;;  %v2769_v41 = vpop.xlane.xlu2 %2768  ;;  %v3102_v31 = vmul.f32 %v10828_v28, %v10267_v0  ;;  %v13145_v53 = vld [vmem:[#allocation231_spill] sm:$0xff] }
 0x5ee   : > { %v3165_v59 = vpop.xlane.xlu1 %3164  ;;  %v10795_v29 = vadd.f32 %v2769_v41, %v10711_v21 }
 0x5ef   : > { %v2880_v24 = vadd.f32 %v13140_v48, %v2830_v33  ;;  %v2374_v13 = vpop.xlane.xlu0 %2373  ;;  %v10797_v60 = vadd.f32 %v3165_v59, %v3132_v5  ;;  %v13144_v5 = vld [vmem:[#allocation228_spill] sm:$0xff]  ;;  %v13146_v59 = vld [vmem:[#allocation55_spill] sm:$0xff]  ;;  %v3118_v34 = vsel %vm845_vm0, %v3102_v31, 0.0 }
 0x5f0   : > { %v2384_v12 = vadd.f32 %v2374_v13, %v10709_v17  ;;  %v7562_v17 = vld [vmem:[%s12659_s4 + $0x3] ss:$0 sm:$0xff]  ;;  %v7570_v31 = vld [vmem:[#allocation2 + $0x94] sm:$0xff] }
 0x5f1   : > { %v2930_v62 = vadd.f32 %v13141_v37, %v2880_v24  ;;  %v1201_v35 = vmul.f32 %v7563_v57, %v7562_v17  ;;  %v3649_v57 = vld [vmem:[%s12660_s5] sm:$0xff] }
 0x5f2   : > { %2922 = vadd.xlane.f32.xlu2 %v2921_v22 }
 0x5f3   : > { %v2980_v21 = vadd.f32 %v13142_v7, %v2930_v62  ;;  %3317 = vadd.xlane.f32.xlu1 %v3316_v6  ;;  %v1223_v41 = vsel %vm845_vm0, %v1201_v35, 0.0  ;;  %v13148_v6 = vld [vmem:[#allocation30_spill] sm:$0xff] }
 0x5f4   : > { %v2753_v7 = vmul.f32 %v13148_v6, %v10838_v2  ;;  %v3053_v6 = vmul.f32 %v10775_v15, %v10758_v3 }
 0x5f5   : > { %1174 = vadd.xlane.f32.xlu0 %v1173_v63  ;;  %v3030_v27 = vadd.f32 %v13143_v25, %v2980_v21  ;;  %v3212_v43 = vpop.xlane.xlu2 %3211  ;;  %v10863_v63 = vld [vmem:[#allocation2 + $0xb0] sm:$0xff]  ;;  %v1273_v25 = vsel %vm845_vm0, %v1251_v18, 0.0 }
 0x5f6   : > { %v2424_v36 = vpop.xlane.xlu1 %2423  ;;  %v10821_v11 = vadd.f32 %v3212_v43, %v10744_v10  ;;  %v2971_v10 = vsel %vm845_vm0, %v2953_v4, 0.0  ;;  %v2773_v43 = vsel %vm845_vm0, %v2753_v7, 0.0  ;;  %v10883_v4 = vld [vmem:[%s12659_s4 + $0x2b] ss:$0 sm:$0xff]  ;;  %v7573_v7 = vld [vmem:[#allocation2 + $0x96] sm:$0xff] }
 0x5f7   : > { %v3080_v23 = vadd.f32 %v13144_v5, %v3030_v27  ;;  %v2967_v8 = vpop.xlane.xlu0 %2966  ;;  %v10823_v14 = vadd.f32 %v2424_v36, %v2384_v12  ;;  %v3650_v36 = vld [vmem:[%s12660_s5 + $0x8] sm:$0xff] }
 0x5f8   : > { %v2983_v49 = vadd.f32 %v2967_v8, %v10742_v1  ;;  %v10844_v1 = vld [vmem:[%s12659_s4 + $0x2a] ss:$0 sm:$0xff] }
 0x5f9   : > { %v3130_v33 = vadd.f32 %v13145_v53, %v3080_v23  ;;  %v3153_v13 = vmul.f32 %v10844_v1, %v10347_v16  ;;  %v3652_v16 = vld [vmem:[%s12660_s5 + $0x18] sm:$0xff] }
 0x5fa   : > { %1224 = vadd.xlane.f32.xlu2 %v1223_v41  ;;  %3689 = vmatpush.msrb.mxu0 %v3652_v16 }
 0x5fb   : > { %v3181_v52 = vadd.f32 %v13146_v59, %v3130_v33  ;;  %2972 = vadd.xlane.f32.xlu1 %v2971_v10  ;;  %7342 = vmatpush.msra.mxu2 %v3652_v16 }
 0x5fc   : > { %7343 = vmatpush.msra.mxu3 %v3652_v16  ;;  %v3452_v16 = vmul.f32 %v7573_v7, %v10319_v58  ;;  %v10957_v7 = vld [vmem:[%s12659_s4 + $0x2d] ss:$0 sm:$0xff] }
 0x5fd   : > { %3119 = vadd.xlane.f32.xlu0 %v3118_v34  ;;  %v3231_v48 = vadd.f32 %v13147_v42, %v3181_v52  ;;  %v2622_v0 = vpop.xlane.xlu2 %2621  ;;  %v7572_v42 = vld [vmem:[#allocation2 + $0x95] sm:$0xff] }
 0x5fe   : > { %v3017_v24 = vpop.xlane.xlu1 %3016  ;;  %v10853_v37 = vadd.f32 %v2622_v0, %v10770_v46  ;;  %v3169_v46 = vsel %vm845_vm0, %v3153_v13, 0.0 }
 0x5ff   : > { %v3281_v12 = vadd.f32 %v10623_v19, %v3231_v48  ;;  %v3409_v62 = vpop.xlane.xlu0 %3408  ;;  %v10855_v22 = vadd.f32 %v3017_v24, %v2983_v49  ;;  %v3651_v19 = vld [vmem:[%s12660_s5 + $0x10] sm:$0xff]  ;;  %v10893_v49 = vld [vmem:[%s12659_s4 + $0x2e] ss:$0 sm:$0xff]  ;;  %v3402_v48 = vmul.f32 %v7572_v42, %v10289_v40 }
 0x600   : > { %3690 = vmatpush.msrb.mxu0 %v3651_v19  ;;  %7344 = vmatpush.msra.mxu2 %v3651_v19  ;;  %v3352_v53 = vmul.f32 %v10893_v49, %v7570_v31 }
 0x601   : > { %v3331_v21 = vadd.f32 %v10660_v30, %v3281_v12  ;;  %v2804_v30 = vmul.f32 %v10669_v50, %v10863_v63  ;;  %7345 = vmatpush.msra.mxu3 %v3651_v19  ;;  %v3203_v50 = vmul.f32 %v10883_v4, %v13126_v47 }
 0x602   : > { %3170 = vadd.xlane.f32.xlu2 %v3169_v46  ;;  %3691 = vmatpush.msrb.mxu0 %v3650_v36  ;;  %v3366_v59 = vsel %vm845_vm0, %v3352_v53, 0.0  ;;  %v7574_v46 = vld [vmem:[%s12659_s4 + $0x5] ss:$0 sm:$0xff]  ;;  %v3103_v53 = vmul.f32 %v10828_v28, %v10838_v2 }
 0x603   : > { %v3381_v27 = vadd.f32 %v10763_v32, %v3331_v21  ;;  %1274 = vadd.xlane.f32.xlu1 %v1273_v25  ;;  %7346 = vmatpush.msra.mxu2 %v3650_v36  ;;  %v2824_v47 = vsel %vm845_vm0, %v2804_v30, 0.0  ;;  %v3219_v10 = vsel %vm845_vm0, %v3203_v50, 0.0  ;;  %v7575_v25 = vld [vmem:[#allocation2 + $0x75] sm:$0xff] }
 0x604   : > { %7347 = vmatpush.msra.mxu3 %v3650_v36  ;;  %3692 = vmatpush.msrb.mxu0 %v3649_v57  ;;  %v3071_v36 = vsel %vm845_vm0, %v3053_v6, 0.0 }
 0x605   : > { %2774 = vadd.xlane.f32.xlu0 %v2773_v43  ;;  %v3431_v17 = vadd.f32 %v3409_v62, %v3381_v27  ;;  %v3215_v32 = vpop.xlane.xlu2 %3214  ;;  %7348 = vmatpush.msra.mxu2 %v3649_v57  ;;  %v3416_v62 = vsel %vm845_vm0, %v3402_v48, 0.0  ;;  %v1301_v27 = vmul.f32 %v7575_v25, %v7574_v46  ;;  %v3121_v48 = vsel %vm845_vm0, %v3103_v53, 0.0 }
 0x606   : > { %v3459_v35 = vpop.xlane.xlu1 %3458  ;;  %v10888_v5 = vadd.f32 %v3215_v32, %v10797_v60  ;;  %v10898_v60 = vld [vmem:[#allocation2 + $0xb1] sm:$0xff]  ;;  %7349 = vmatpush.msra.mxu3 %v3649_v57  ;;  %v7576_v32 = vld [vmem:[%s12659_s4 + $0x6] ss:$0 sm:$0xff] }
 0x607   : > { %v2820_v23 = vpop.xlane.xlu0 %2819  ;;  %v3481_v8 = vadd.f32 %v3459_v35, %v3431_v17  ;;  %v2854_v52 = vmul.f32 %v10735_v56, %v10898_v60  ;;  %v3021_v56 = vsel %vm845_vm0, %v3003_v45, 0.0  ;;  %v3466_v17 = vsel %vm845_vm0, %v3452_v16, 0.0  ;;  %v7577_v35 = vld [vmem:[#allocation2 + $0x76] sm:$0xff] }
 0x608   : > { %v2834_v33 = vadd.f32 %v2820_v23, %v10795_v29  ;;  %v1323_v58 = vsel %vm845_vm0, %v1301_v27, 0.0  ;;  %v1351_v50 = vmul.f32 %v7577_v35, %v7576_v32  ;;  %v10944_v45 = vld [vmem:[#allocation2 + $0xb2] sm:$0xff]  ;;  %v3303_v16 = vmul.f32 %v10957_v7, %v10591_v9  ;;  %v7580_v9 = vld [vmem:[%s12659_s4 + $0x8] ss:$0 sm:$0xff]  ;;  %v7582_v35 = vld [vmem:[%s12659_s4 + $0x7] ss:$0 sm:$0xff] }
 0x609   : > { %v7031_v41 = vmul.f32 -1.442695, %v3481_v8  ;;  %v2874_v51 = vsel %vm845_vm0, %v2854_v52, 0.0  ;;  %v10932_v8 = vld [vmem:[%s12659_s4 + $0x2c] ss:$0 sm:$0xff] }
 0x60a   : > { %2825 = vadd.xlane.f32.xlu2 %v2824_v47  ;;  %v3253_v31 = vmul.f32 %v10932_v8, %v10500_v61  ;;  %v1373_v42 = vsel %vm845_vm0, %v1351_v50, 0.0  ;;  %v7583_v50 = vld [vmem:[#allocation2 + $0x80] sm:$0xff] }
 0x60b   : > { %7483 = vpow2.f32 %v7031_v41  ;;  %3220 = vadd.xlane.f32.xlu1 %v3219_v10 }
 0x60d   : > { %3367 = vadd.xlane.f32.xlu0 %v3366_v59  ;;  %v2475_v29 = vpop.xlane.xlu2 %2474 }
 0x60e   : > { %v2870_v34 = vpop.xlane.xlu1 %2869  ;;  %v2485_v0 = vadd.f32 %v2475_v29, %v10823_v14 }
 0x60f   : > { %v10906_v24 = vpop.xlane.xlu0 %3261  ;;  %v2884_v13 = vadd.f32 %v2870_v34, %v2834_v33  ;;  %v10940_v34 = vld [vmem:[#allocation2 + $0xb3] sm:$0xff] }
 0x611   : > { %v7484_v18 = vpop.eup %7483 }
 0x612   : > { %v3513_v12 = vadd.f32 1.0, %v7484_v18  ;;  %3417 = vadd.xlane.f32.xlu2 %v3416_v62  ;;  %v2954_v18 = vmul.f32 %v10815_v54, %v10940_v34 }
 0x613   : > { %2875 = vadd.xlane.f32.xlu1 %v2874_v51 }
 0x614   : > { %7485 = vrcp.f32 %v3513_v12  ;;  %v3530_v33 = vand.u32 2147483647, %v3513_v12  ;;  %v3532_v47 = vand.u32 2147483648, %v3513_v12  ;;  %vm3526_vm13 = vweird.f32 %v3513_v12 }
 0x615   : > { %3022 = vadd.xlane.f32.xlu0 %v3021_v56  ;;  %v3067_v40 = vpop.xlane.xlu2 %3066  ;;  %v2904_v56 = vmul.f32 %v10788_v55, %v10944_v45  ;;  %v2974_v27 = vsel %vm845_vm0, %v2954_v18, 0.0  ;;  %v3254_v18 = vmul.f32 %v10932_v8, %v10944_v45 }
 0x616   : > { %v10913_v14 = vpop.xlane.xlu1 %3311  ;;  %v3083_v21 = vadd.f32 %v3067_v40, %v10855_v22  ;;  %v3533_v61 = vor.u32 1.1754944e-38, %v3532_v47  ;;  %vm3531_vm15 = vcmp.eq.f32.partialorder %v3530_v33, 8.507059e+37 }
 0x617   : > { %v2672_v19 = vpop.xlane.xlu0 %2671  ;;  %v2924_v55 = vsel %vm845_vm0, %v2904_v56, 0.0 }
 0x618   : > { %v2684_v43 = vadd.f32 %v2672_v19, %v10853_v37 }
 0x61a   : > { %v7486_v30 = vpop.eup %7485  ;;  %3072 = vadd.xlane.f32.xlu2 %v3071_v36  ;;  %v3154_v36 = vmul.f32 %v10844_v1, %v10863_v63 }
 0x61b   : > { %v3522_v57 = vmul.f32 %v7486_v30, %v3513_v12  ;;  %3467 = vadd.xlane.f32.xlu1 %v3466_v17  ;;  %vm3527_vm12 = vweird.f32 %v7486_v30  ;;  %v13149_v12 = vld [vmem:[#allocation21_spill] sm:$0xff] }
 0x61c   : > { %vm3528_vm14 = vmor %vm3526_vm13, %vm3527_vm12 }
 0x61d   : > { %1324 = vadd.xlane.f32.xlu0 %v1323_v58  ;;  %v3523_v22 = vsub.f32 1.0, %v3522_v57  ;;  %v2525_v23 = vpop.xlane.xlu2 %2524 }
 0x61e   : > { %v2920_v37 = vpop.xlane.xlu1 %2919  ;;  %v2535_v41 = vadd.f32 %v2525_v23, %v2485_v0  ;;  %v3269_v0 = vsel %vm845_vm0, %v3253_v31, 0.0  ;;  %v1402_v23 = vmul.f32 %v7583_v50, %v7582_v35  ;;  %v10976_v31 = vld [vmem:[#allocation2 + $0xb4] sm:$0xff] }
 0x61f   : > { %v10938_v10 = vpop.xlane.xlu0 %3264  ;;  %v2934_v59 = vadd.f32 %v2920_v37, %v2884_v13  ;;  %v3524_v52 = vmul.f32 %v7486_v30, %v3523_v22  ;;  %v3172_v37 = vsel %vm845_vm0, %v3154_v36, 0.0  ;;  %v3004_v47 = vmul.f32 %v10607_v39, %v10976_v31 }
 0x620   : > { %v1424_v33 = vsel %vm845_vm0, %v1402_v23, 0.0 }
 0x621   : > { %v3525_v29 = vadd.f32 %v7486_v30, %v3524_v52  ;;  %v10985_v52 = vld [vmem:[%s12659_s4 + $0x2f] ss:$0 sm:$0xff] }
 0x622   : > { %1374 = vadd.xlane.f32.xlu2 %v1373_v42 }
 0x623   : > { %3122 = vadd.xlane.f32.xlu1 %v3121_v48  ;;  %v3529_v51 = vsel %vm3528_vm14, %v7486_v30, %v3525_v29  ;;  %v3319_v30 = vsel %vm845_vm0, %v3303_v16, 0.0  ;;  %v3403_v29 = vmul.f32 %v10985_v52, %v10758_v3 }
 0x624   : > { %v3534_v13 = vsel %vm3531_vm15, %v3533_v61, %v3529_v51  ;;  %v3353_v61 = vmul.f32 %v10893_v49, %v10692_v20  ;;  %v3024_v51 = vsel %vm845_vm0, %v3004_v47, 0.0  ;;  %v7585_v20 = vld [vmem:[%s12659_s4 + $0x9] ss:$0 sm:$0xff] }
 0x625   : > { %3270 = vadd.xlane.f32.xlu0 %v3269_v0  ;;  %v3641_v62 = vmul.f32 %v3534_v13, %v13149_v12  ;;  %v3117_v40 = vpop.xlane.xlu2 %3116  ;;  %v3419_v39 = vsel %vm845_vm0, %v3403_v29, 0.0  ;;  %v3204_v12 = vmul.f32 %v10883_v4, %v10898_v60 }
 0x626   : > { %v10952_v6 = vpop.xlane.xlu1 %3361  ;;  %v3133_v19 = vadd.f32 %v3117_v40, %v3083_v21  ;;  %v7581_v21 = vld [vmem:[#allocation2 + $0x81] sm:$0xff]  ;;  %v3369_v13 = vsel %vm845_vm0, %v3353_v61, 0.0 }
 0x627   : > { %v2722_v46 = vpop.xlane.xlu0 %2721  ;;  %7039 = vmatmul.msk.f32.vlgmr.msrb.gmra.mxu0 %vm738_vm3, %v3641_v62  ;;  %v7586_v40 = vld [vmem:[#allocation2 + $0x82] sm:$0xff]  ;;  %v3222_v36 = vsel %vm845_vm0, %v3204_v12, 0.0 }
 0x628   : > { %v2734_v25 = vadd.f32 %v2722_v46, %v2684_v43  ;;  %v1452_v43 = vmul.f32 %v7581_v21, %v7580_v9  ;;  %v1502_v16 = vmul.f32 %v7586_v40, %v7585_v20  ;;  %v11015_v9 = vld [vmem:[#allocation2 + $0xb5] sm:$0xff] }
 0x62a   : > { %3320 = vadd.xlane.f32.xlu2 %v3319_v30  ;;  %v1474_v53 = vsel %vm845_vm0, %v1452_v43, 0.0 }
 0x62b   : > { %2975 = vadd.xlane.f32.xlu1 %v2974_v27 }
 0x62d   : > { %2925 = vadd.xlane.f32.xlu0 %v2924_v55  ;;  %v2575_v17 = vpop.xlane.xlu2 %2574  ;;  %v3272_v55 = vsel %vm845_vm0, %v3254_v18, 0.0 }
 0x62e   : > { %v2970_v57 = vpop.xlane.xlu1 %2969  ;;  %v2585_v58 = vadd.f32 %v2575_v17, %v2535_v41  ;;  %v11012_v17 = vld [vmem:[#allocation2 + $0xb6] sm:$0xff] }
 0x62f   : > { %v10970_v22 = vpop.xlane.xlu0 %3314  ;;  %v2984_v32 = vadd.f32 %v2970_v57, %v2934_v59  ;;  %v1524_v57 = vsel %vm845_vm0, %v1502_v16, 0.0  ;;  %v3354_v16 = vmul.f32 %v10893_v49, %v10976_v31 }
 0x632   : > { %3173 = vadd.xlane.f32.xlu2 %v3172_v37 }
 0x633   : > { %1475 = vadd.xlane.f32.xlu1 %v1474_v53 }
 0x635   : > { %1425 = vadd.xlane.f32.xlu0 %v1424_v33  ;;  %v3168_v41 = vpop.xlane.xlu2 %3167 }
 0x636   : > { %v3412_v59 = vpop.xlane.xlu1 %3411  ;;  %v10989_v42 = vadd.f32 %v3168_v41, %v3133_v19  ;;  %v3282_v19 = vadd.f32 %v10906_v24, %v10821_v11  ;;  %v3104_v11 = vmul.f32 %v10828_v28, %v11012_v17  ;;  %v3304_v41 = vmul.f32 %v10957_v7, %v10940_v34 }
 0x637   : > { %v2772_v48 = vpop.xlane.xlu0 %2771 }
 0x638   : > { %v2784_v0 = vadd.f32 %v2772_v48, %v2734_v25  ;;  %v3332_v30 = vadd.f32 %v10913_v14, %v3282_v19  ;;  %v3054_v14 = vmul.f32 %v10775_v15, %v11015_v9  ;;  %v3124_v37 = vsel %vm845_vm0, %v3104_v11, 0.0  ;;  %v11033_v15 = vld [vmem:[#allocation2 + $0xc0] sm:$0xff] }
 0x639   : > { %v3322_v18 = vsel %vm845_vm0, %v3304_v41, 0.0 }
 0x63a   : > { %3025 = vadd.xlane.f32.xlu2 %v3024_v51  ;;  %v3382_v21 = vadd.f32 %v10952_v6, %v3332_v30  ;;  %v3074_v33 = vsel %vm845_vm0, %v3054_v14, 0.0  ;;  %v7588_v51 = vld [vmem:[%s12659_s4 + $0xa] ss:$0 sm:$0xff]  ;;  %v3283_v30 = vadd.f32 %v10938_v10, %v10888_v5  ;;  %v3372_v14 = vsel %vm845_vm0, %v3354_v16, 0.0 }
 0x63b   : > { %3420 = vadd.xlane.f32.xlu1 %v3419_v39  ;;  %v13150_v39 = vld [vmem:[#allocation25_spill] sm:$0xff] }
 0x63c   : > { %v3432_v24 = vadd.f32 %v3412_v59, %v3382_v21  ;;  %v3155_v59 = vmul.f32 %v10844_v1, %v11033_v15  ;;  %v7589_v21 = vld [vmem:[%s12659_s4 + $0xb] ss:$0 sm:$0xff]  ;;  %v11081_v16 = vld [vmem:[#allocation2 + $0xc3] sm:$0xff] }
 0x63d   : > { %3370 = vadd.xlane.f32.xlu0 %v3369_v13  ;;  %v2625_v62 = vpop.xlane.xlu2 %2624  ;;  %v1552_v13 = vmul.f32 %v7588_v51, %v13150_v39  ;;  %v1602_v11 = vmul.f32 %v7589_v21, %v10599_v26  ;;  %v3404_v26 = vmul.f32 %v10985_v52, %v11015_v9 }
 0x63e   : > { %v3020_v56 = vpop.xlane.xlu1 %3019  ;;  %v2635_v46 = vadd.f32 %v2625_v62, %v2585_v58  ;;  %v3175_v12 = vsel %vm845_vm0, %v3155_v59, 0.0 }
 0x63f   : > { %v11005_v25 = vpop.xlane.xlu0 %3364  ;;  %v11007_v27 = vadd.f32 %v3020_v56, %v2984_v32  ;;  %v11027_v32 = vld [vmem:[%s12659_s4 + $0x30] ss:$0 sm:$0xff]  ;;  %v11046_v56 = vld [vmem:[#allocation2 + $0xc1] sm:$0xff]  ;;  %v1574_v40 = vsel %vm845_vm0, %v1552_v13, 0.0 }
 0x640   : > { %v3453_v6 = vmul.f32 %v11027_v32, %v10838_v2  ;;  %v3205_v19 = vmul.f32 %v10883_v4, %v11046_v56 }
 0x642   : > { %1525 = vadd.xlane.f32.xlu2 %v1524_v57  ;;  %v3469_v47 = vsel %vm845_vm0, %v3453_v6, 0.0  ;;  %v3333_v6 = vadd.f32 %v10970_v22, %v3283_v30  ;;  %v3305_v30 = vmul.f32 %v10957_v7, %v11081_v16 }
 0x643   : > { %3273 = vadd.xlane.f32.xlu1 %v3272_v55 }
 0x644   : > { %v3383_v5 = vadd.f32 %v11005_v25, %v3333_v6  ;;  %v7590_v25 = vld [vmem:[%s12659_s4 + $0xc] ss:$0 sm:$0xff]  ;;  %v7591_v6 = vld [vmem:[%s12659_s4 + $0xd] ss:$0 sm:$0xff] }
 0x645   : > { %3223 = vadd.xlane.f32.xlu0 %v3222_v36  ;;  %v11022_v43 = vpop.xlane.xlu2 %3217  ;;  %v1652_v41 = vmul.f32 %v7590_v25, %v10682_v38 }
 0x646   : > { %v3462_v58 = vpop.xlane.xlu1 %3461 }
 0x647   : > { %v3482_v50 = vadd.f32 %v3462_v58, %v3432_v24  ;;  %v3225_v58 = vsel %vm845_vm0, %v3205_v19, 0.0 }
 0x648   : > { %v2823_v35 = vpop.xlane.xlu0 %2822 }
 0x649   : > { %v2835_v23 = vadd.f32 %v2823_v35, %v2784_v0  ;;  %v7032_v53 = vmul.f32 -1.442695, %v3482_v50  ;;  %v11064_v35 = vld [vmem:[#allocation2 + $0xc2] sm:$0xff] }
 0x64a   : > { %3470 = vadd.xlane.f32.xlu2 %v3469_v47 }
 0x64b   : > { %7487 = vpow2.f32 %v7032_v53  ;;  %3125 = vadd.xlane.f32.xlu1 %v3124_v37  ;;  %v3255_v37 = vmul.f32 %v10932_v8, %v11064_v35 }
 0x64d   : > { %3075 = vadd.xlane.f32.xlu0 %v3074_v33  ;;  %v1075_v29 = vpop.xlane.xlu2 %1074 }
 0x64e   : > { %v2675_v48 = vpop.xlane.xlu1 %2674 }
 0x64f   : > { %v2685_v0 = vadd.f32 %v2675_v48, %v2635_v46 }
 0x650   : > { %v3415_v61 = vpop.xlane.xlu0 %3414 }
 0x651   : > { %v7488_v62 = vpop.eup %7487  ;;  %v3433_v53 = vadd.f32 %v3415_v61, %v3383_v5  ;;  %v3422_v61 = vsel %vm845_vm0, %v3404_v26, 0.0 }
 0x652   : > { %v3514_v20 = vadd.f32 1.0, %v7488_v62  ;;  %3323 = vadd.xlane.f32.xlu2 %v3322_v18 }
 0x653   : > { %3176 = vadd.xlane.f32.xlu1 %v3175_v12  ;;  %v3275_v12 = vsel %vm845_vm0, %v3255_v37, 0.0 }
 0x654   : > { %7489 = vrcp.f32 %v3514_v20  ;;  %v3545_v59 = vand.u32 2147483647, %v3514_v20  ;;  %vm3541_vm4 = vweird.f32 %v3514_v20 }
 0x655   : > { %1575 = vadd.xlane.f32.xlu0 %v1574_v40  ;;  %v2873_v46 = vpop.xlane.xlu2 %2872 }
 0x656   : > { %v11053_v55 = vpop.xlane.xlu1 %3267  ;;  %v2885_v36 = vadd.f32 %v2873_v46, %v2835_v23  ;;  %v1624_v23 = vsel %vm845_vm0, %v1602_v11, 0.0  ;;  %vm3546_vm6 = vcmp.eq.f32.partialorder %v3545_v59, 8.507059e+37  ;;  %v3454_v46 = vmul.f32 %v11027_v32, %v11012_v17 }
 0x658   : > { %v1125_v57 = vpop.xlane.xlu0 %1124 }
 0x659   : > { %v1133_v24 = vadd.f32 %v1125_v57, %v1075_v29  ;;  %v3547_v29 = vand.u32 2147483648, %v3514_v20 }
 0x65a   : > { %v7490_v50 = vpop.eup %7489  ;;  %3373 = vadd.xlane.f32.xlu2 %v3372_v14 }
 0x65b   : > { %v3537_v10 = vmul.f32 %v7490_v50, %v3514_v20  ;;  %3226 = vadd.xlane.f32.xlu1 %v3225_v58  ;;  %vm3542_vm1 = vweird.f32 %v7490_v50  ;;  %v3548_v38 = vor.u32 1.1754944e-38, %v3547_v29  ;;  %v13151_v20 = vld [vmem:[#allocation20_spill] sm:$0xff] }
 0x65c   : > { %vm3543_vm5 = vmor %vm3541_vm4, %vm3542_vm1 }
 0x65d   : > { %1625 = vadd.xlane.f32.xlu0 %v1624_v23  ;;  %v3538_v33 = vsub.f32 1.0, %v3537_v10  ;;  %v3465_v22 = vpop.xlane.xlu2 %3464  ;;  %v3472_v10 = vsel %vm845_vm0, %v3454_v46, 0.0  ;;  %v3325_v23 = vsel %vm845_vm0, %v3305_v30, 0.0 }
 0x65e   : > { %v2725_v47 = vpop.xlane.xlu1 %2724  ;;  %v3483_v48 = vadd.f32 %v3465_v22, %v3433_v53  ;;  %v1743_v22 = vld [vmem:[#allocation2 + $0x90] sm:$0xff] }
 0x65f   : > { %v11076_v39 = vadd.f32 %v2725_v47, %v2685_v0  ;;  %v3539_v13 = vmul.f32 %v7490_v50, %v3538_v33  ;;  %v1674_v0 = vsel %vm845_vm0, %v1652_v41, 0.0  ;;  %v1843_v33 = vld [vmem:[#allocation2 + $0x92] sm:$0xff]  ;;  %v7593_v41 = vld [vmem:[%s12659_s4 + $0x10] ss:$0 sm:$0xff] }
 0x660   : > { %v3070_v51 = vpop.xlane.xlu0 %3069  ;;  %v7033_v62 = vmul.f32 -1.442695, %v3483_v48  ;;  %v1853_v59 = vmul.f32 %v7593_v41, %v1843_v33 }
 0x661   : > { %v3084_v18 = vadd.f32 %v3070_v51, %v11007_v27  ;;  %v3540_v40 = vadd.f32 %v7490_v50, %v3539_v13  ;;  %v7594_v13 = vld [vmem:[%s12659_s4 + $0xe] ss:$0 sm:$0xff] }
 0x662   : > { %7491 = vpow2.f32 %v7033_v62  ;;  %3423 = vadd.xlane.f32.xlu2 %v3422_v61  ;;  %v1753_v61 = vmul.f32 %v7594_v13, %v1743_v22  ;;  %v11112_v62 = vld [vmem:[#allocation2 + $0xc5] sm:$0xff] }
 0x663   : > { %3276 = vadd.xlane.f32.xlu1 %v3275_v12  ;;  %v3544_v19 = vsel %vm3543_vm5, %v7490_v50, %v3540_v40  ;;  %v1702_v50 = vmul.f32 %v7591_v6, %v10756_v44  ;;  %v7592_v44 = vld [vmem:[%s12659_s4 + $0xf] ss:$0 sm:$0xff]  ;;  %v11114_v40 = vld [vmem:[#allocation2 + $0xc6] sm:$0xff] }
 0x664   : > { %v3549_v27 = vsel %vm3546_vm6, %v3548_v38, %v3544_v19  ;;  %v1875_v19 = vsel %vm845_vm0, %v1853_v59, 0.0  ;;  %v1775_v30 = vsel %vm845_vm0, %v1753_v61, 0.0  ;;  %v1893_v59 = vld [vmem:[#allocation2 + $0x93] sm:$0xff] }
 0x665   : > { %1675 = vadd.xlane.f32.xlu0 %v1674_v0  ;;  %v3642_v57 = vmul.f32 %v3549_v27, %v13151_v20  ;;  %v2923_v21 = vpop.xlane.xlu2 %2922  ;;  %v1724_v53 = vsel %vm845_vm0, %v1702_v50, 0.0  ;;  %v11118_v27 = vld [vmem:[#allocation2 + $0xc4] sm:$0xff]  ;;  %v3455_v20 = vmul.f32 %v11027_v32, %v11114_v40 }
 0x666   : > { %v11089_v11 = vpop.xlane.xlu1 %3317  ;;  %v2935_v14 = vadd.f32 %v2923_v21, %v2885_v36  ;;  %v1793_v36 = vld [vmem:[#allocation2 + $0x91] sm:$0xff] }
 0x667   : > { %7040 = vmatmul.msk.f32.gmra.mxu0 %vm738_vm3, %v3642_v57  ;;  %v3355_v57 = vmul.f32 %v10893_v49, %v11118_v27 }
 0x668   : > { %v1175_v58 = vpop.xlane.xlu0 %1174  ;;  %v7492_v26 = vpop.eup %7491 }
 0x669   : > { %v1183_v5 = vadd.f32 %v1175_v58, %v1133_v24  ;;  %v3515_v37 = vadd.f32 1.0, %v7492_v26  ;;  %v1803_v24 = vmul.f32 %v7592_v44, %v1793_v36  ;;  %v3475_v36 = vsel %vm845_vm0, %v3455_v20, 0.0  ;;  %v1943_v44 = vld [vmem:[#allocation2 + $0x94] sm:$0xff] }
 0x66a   : > { %3473 = vadd.xlane.f32.xlu2 %v3472_v10  ;;  %v3375_v33 = vsel %vm845_vm0, %v3355_v57, 0.0 }
 0x66b   : > { %3326 = vadd.xlane.f32.xlu1 %v3325_v23  ;;  %7493 = vrcp.f32 %v3515_v37  ;;  %v1825_v0 = vsel %vm845_vm0, %v1803_v24, 0.0  ;;  %v3562_v6 = vand.u32 2147483648, %v3515_v37  ;;  %v3560_v23 = vand.u32 2147483647, %v3515_v37  ;;  %v2043_v24 = vld [vmem:[#allocation2 + $0x96] sm:$0xff] }
 0x66c   : > { %vm3556_vm8 = vweird.f32 %v3515_v37 }
 0x66d   : > { %1725 = vadd.xlane.f32.xlu0 %v1724_v53  ;;  %v1225_v47 = vpop.xlane.xlu2 %1224  ;;  %vm3561_vm10 = vcmp.eq.f32.partialorder %v3560_v23, 8.507059e+37  ;;  %v1993_v23 = vld [vmem:[#allocation2 + $0x95] sm:$0xff] }
 0x66e   : > { %v2973_v25 = vpop.xlane.xlu1 %2972  ;;  %v1233_v29 = vadd.f32 %v1225_v47, %v1183_v5  ;;  %v3563_v47 = vor.u32 1.1754944e-38, %v3562_v6  ;;  %v2193_v6 = vld [vmem:[#allocation2 + $0xa2] sm:$0xff] }
 0x66f   : > { %v11105_v51 = vadd.f32 %v2973_v25, %v2935_v14 }
 0x670   : > { %v3120_v48 = vpop.xlane.xlu0 %3119 }
 0x671   : > { %v11110_v12 = vadd.f32 %v3120_v48, %v3084_v18  ;;  %v7494_v38 = vpop.eup %7493  ;;  %v3405_v18 = vmul.f32 %v10985_v52, %v11112_v62 }
 0x672   : > { %v3552_v46 = vmul.f32 %v7494_v38, %v3515_v37  ;;  %1826 = vadd.xlane.f32.xlu2 %v1825_v0  ;;  %vm3557_vm7 = vweird.f32 %v7494_v38  ;;  %v7595_v37 = vld [vmem:[%s12659_s4 + $0x12] ss:$0 sm:$0xff] }
 0x673   : > { %1876 = vadd.xlane.f32.xlu1 %v1875_v19  ;;  %v3425_v53 = vsel %vm845_vm0, %v3405_v18, 0.0  ;;  %vm3558_vm9 = vmor %vm3556_vm8, %vm3557_vm7  ;;  %v1953_v61 = vmul.f32 %v7595_v37, %v1943_v44  ;;  %v7598_v44 = vld [vmem:[%s12659_s4 + $0x15] ss:$0 sm:$0xff] }
 0x674   : > { %v3553_v21 = vsub.f32 1.0, %v3552_v46 }
 0x675   : > { %1776 = vadd.xlane.f32.xlu0 %v1775_v30  ;;  %v11127_v14 = vpop.xlane.xlu2 %3170  ;;  %v7597_v30 = vld [vmem:[%s12659_s4 + $0x11] ss:$0 sm:$0xff]  ;;  %v1975_v20 = vsel %vm845_vm0, %v1953_v61, 0.0 }
 0x676   : > { %v1275_v58 = vpop.xlane.xlu1 %1274  ;;  %v3554_v10 = vmul.f32 %v7494_v38, %v3553_v21  ;;  %v1903_v18 = vmul.f32 %v7597_v30, %v1893_v59  ;;  %v2093_v21 = vld [vmem:[#allocation2 + $0xa0] sm:$0xff] }
 0x677   : > { %v11129_v5 = vadd.f32 %v1275_v58, %v1233_v29 }
 0x678   : > { %v2775_v50 = vpop.xlane.xlu0 %2774  ;;  %v3555_v22 = vadd.f32 %v7494_v38, %v3554_v10  ;;  %v1925_v58 = vsel %vm845_vm0, %v1903_v18, 0.0  ;;  %v3909_v10 = vld [vmem:[#allocation8 + $0x28] sm:$0xff] }
 0x679   : > { %v2785_v26 = vadd.f32 %v2775_v50, %v11076_v39  ;;  %v13152_v39 = vld [vmem:[#allocation23_spill] sm:$0xff]  ;;  %v3757_v50 = vld [vmem:[#allocation8 + $0x8] sm:$0xff]  ;;  %3948 = vmatpush.msrb.mxu1 %v3909_v10 }
 0x67a   : > { %3426 = vadd.xlane.f32.xlu2 %v3425_v53  ;;  %v3559_v25 = vsel %vm3558_vm9, %v7494_v38, %v3555_v22  ;;  %v7596_v38 = vld [vmem:[%s12659_s4 + $0x14] ss:$0 sm:$0xff]  ;;  %3872 = vmatpush.msra.mxu0 %v3757_v50  ;;  %v13153_v53 = vmov 0.0   ;;  %v3748_v22 = vld [vmem:[#allocation3] sm:$0xff] }
 0x67b   : > { %3476 = vadd.xlane.f32.xlu1 %v3475_v36  ;;  %v3564_v41 = vsel %vm3561_vm10, %v3563_v47, %v3559_v25  ;;  %v2053_v0 = vmul.f32 %v7596_v38, %v2043_v24  ;;  %3722 = vst.msk [vmem:[#allocation3 + $0x18] sm:$0x3] %vm3719_vm11, %v13153_v53  ;;  %v3756_v36 = vld [vmem:[#allocation8] sm:$0xff]  ;;  %v2103_v24 = vmul.f32 %v7598_v44, %v2093_v21  ;;  %v7604_v44 = vld [vmem:[%s12659_s4 + $0x1d] ss:$0 sm:$0xff] }
 0x67c   : > { %v3643_v29 = vmul.f32 %v3564_v41, %v13152_v39  ;;  %v7599_v41 = vld [vmem:[%s12659_s4 + $0x17] ss:$0 sm:$0xff]  ;;  %3720 = vst.msk [vmem:[#allocation3 + $0x8] sm:$0x3] %vm3719_vm11, %v13153_v53  ;;  %3873 = vmatpush.msra.mxu0 %v3756_v36 }
 0x67d   : > { %3376 = vadd.xlane.f32.xlu0 %v3375_v33  ;;  %v2826_v48 = vpop.xlane.xlu2 %2825  ;;  %v2075_v57 = vsel %vm845_vm0, %v2053_v0, 0.0  ;;  %v3908_v33 = vld [vmem:[#allocation8 + $0x20] sm:$0xff]  ;;  %v2203_v59 = vmul.f32 %v7599_v41, %v2193_v6  ;;  %3724 = vst.msk [vmem:[#allocation3 + $0x28] sm:$0x3] %vm3719_vm11, %v13153_v53  ;;  %7055 = vmatmul.msk.f32.vlgmr.msra.gmra.mxu0 %vm553_vm2, %v3748_v22  ;;  %v2125_v61 = vsel %vm845_vm0, %v2103_v24, 0.0  ;;  %v2504_v24 = vmul.f32 %v7604_v44, %v10898_v60 }
 0x67e   : > { %v11136_v13 = vpop.xlane.xlu1 %3220  ;;  %v2836_v19 = vadd.f32 %v2826_v48, %v2785_v26  ;;  %7041 = vmatmul.msk.f32.vlgmr.msra.gmra.mxu2 %vm738_vm3, %v3643_v29  ;;  %v3234_v26 = vadd.f32 %v11022_v43, %v10989_v42  ;;  %v7600_v29 = vld [vmem:[%s12659_s4 + $0x13] ss:$0 sm:$0xff]  ;;  %3949 = vmatpush.msrb.mxu1 %v3908_v33  ;;  %3726 = vst.msk [vmem:[#allocation3 + $0x38] sm:$0x3] %vm3719_vm11, %v13153_v53 }
 0x67f   : > { %v2003_v48 = vmul.f32 %v7600_v29, %v1993_v23  ;;  %3728 = vst.msk [vmem:[#allocation3 + $0x48] sm:$0x3] %vm3719_vm11, %v13153_v53  ;;  %v2225_v38 = vsel %vm845_vm0, %v2203_v59, 0.0  ;;  %v2526_v60 = vsel %vm845_vm0, %v2504_v24, 0.0 }
 0x680   : > { %v3368_v46 = vpop.xlane.xlu0 %3367  ;;  %v3284_v42 = vadd.f32 %v11053_v55, %v3234_v26  ;;  %3730 = vst.msk [vmem:[#allocation3 + $0x58] sm:$0x3] %vm3719_vm11, %v13153_v53  ;;  %v7603_v26 = vld [vmem:[%s12659_s4 + $0x16] ss:$0 sm:$0xff] }
 0x681   : > { %3732 = vst.msk [vmem:[#allocation3 + $0x68] sm:$0x3] %vm3719_vm11, %v13153_v53 }
 0x682   : > { %1976 = vadd.xlane.f32.xlu2 %v1975_v20  ;;  %v3334_v55 = vadd.f32 %v11089_v11, %v3284_v42  ;;  %v2143_v11 = vld [vmem:[#allocation2 + $0xa1] sm:$0xff]  ;;  %3734 = vst.msk [vmem:[#allocation3 + $0x78] sm:$0x3] %vm3719_vm11, %v13153_v53 }
 0x683   : > { %2076 = vadd.xlane.f32.xlu1 %v2075_v57  ;;  %3736 = vst.msk [vmem:[#allocation3 + $0x88] sm:$0x3] %vm3719_vm11, %v13153_v53  ;;  %v3899_v18 = vld [vmem:[#allocation3 + $0x2] sm:$0xff]  ;;  %v7601_v57 = vld [vmem:[%s12659_s4 + $0x18] ss:$0 sm:$0xff]  ;;  %v2153_v36 = vmul.f32 %v7603_v26, %v2143_v11 }
 0x684   : > { %v3384_v0 = vadd.f32 %v3368_v46, %v3334_v55  ;;  %3738 = vst.msk [vmem:[#allocation3 + $0x98] sm:$0x3] %vm3719_vm11, %v13153_v53  ;;  %7063 = vmatmul.msk.f32.vlgmr.msrb.gmra.mxu1 %vm553_vm2, %v3899_v18  ;;  %v7609_v11 = vld [vmem:[%s12659_s4 + $0x20] ss:$0 sm:$0xff]  ;;  %v7610_v18 = vld [vmem:[%s12659_s4 + $0x1c] ss:$0 sm:$0xff] }
 0x685   : > { %1926 = vadd.xlane.f32.xlu0 %v1925_v58  ;;  %v3418_v47 = vpop.xlane.xlu2 %3417  ;;  %v7602_v58 = vld [vmem:[%s12659_s4 + $0x1a] ss:$0 sm:$0xff] }
 0x686   : > { %v2876_v25 = vpop.xlane.xlu1 %2875  ;;  %v3434_v30 = vadd.f32 %v3418_v47, %v3384_v0  ;;  %v2353_v6 = vmul.f32 %v7602_v58, %v10758_v3 }
 0x687   : > { %v11164_v39 = vadd.f32 %v2876_v25, %v2836_v19  ;;  %v2025_v19 = vsel %vm845_vm0, %v2003_v48, 0.0  ;;  %v2175_v25 = vsel %vm845_vm0, %v2153_v36, 0.0  ;;  %v7606_v48 = vld [vmem:[%s12659_s4 + $0x19] ss:$0 sm:$0xff]  ;;  %v7612_v36 = vld [vmem:[%s12659_s4 + $0x23] ss:$0 sm:$0xff] }
 0x688   : > { %v3023_v43 = vpop.xlane.xlu0 %3022  ;;  %v2375_v3 = vsel %vm845_vm0, %v2353_v6, 0.0 }
 0x689   : > { %v3035_v37 = vadd.f32 %v3023_v43, %v11105_v51  ;;  %v2243_v51 = vld [vmem:[#allocation2 + $0xa3] sm:$0xff] }
 0x68a   : > { %2126 = vadd.xlane.f32.xlu2 %v2125_v61  ;;  %v2253_v21 = vmul.f32 %v7601_v57, %v2243_v51 }
 0x68b   : > { %2226 = vadd.xlane.f32.xlu1 %v2225_v38 }
 0x68c   : > { %v2275_v47 = vsel %vm845_vm0, %v2253_v21, 0.0 }
 0x68d   : > { %2026 = vadd.xlane.f32.xlu0 %v2025_v19  ;;  %v3073_v20 = vpop.xlane.xlu2 %3072 }
 0x68e   : > { %v3468_v46 = vpop.xlane.xlu1 %3467  ;;  %v11199_v50 = vadd.f32 %v3073_v20, %v3035_v37  ;;  %v7607_v37 = vld [vmem:[#allocation2 + $0xa4] sm:$0xff]  ;;  %v2454_v20 = vmul.f32 %v7610_v18, %v10863_v63  ;;  %v7611_v63 = vld [vmem:[%s12659_s4 + $0x21] ss:$0 sm:$0xff]  ;;  %v7615_v18 = vld [vmem:[%s12659_s4 + $0x22] ss:$0 sm:$0xff] }
 0x68f   : > { %v3484_v23 = vadd.f32 %v3468_v46, %v3434_v30  ;;  %v2303_v55 = vmul.f32 %v7607_v37, %v7606_v48  ;;  %v2654_v30 = vmul.f32 %v7609_v11, %v10976_v31  ;;  %v2704_v26 = vmul.f32 %v7611_v63, %v11015_v9  ;;  %v13154_v11 = vld [vmem:[#allocation22_spill] sm:$0xff] }
 0x690   : > { %v1325_v10 = vpop.xlane.xlu0 %1324  ;;  %v2476_v6 = vsel %vm845_vm0, %v2454_v20, 0.0  ;;  %v2754_v20 = vmul.f32 %v7615_v18, %v11012_v17  ;;  %v7616_v17 = vld [vmem:[%s12659_s4 + $0x27] ss:$0 sm:$0xff] }
 0x691   : > { %v1333_v33 = vadd.f32 %v1325_v10, %v11129_v5  ;;  %v7034_v22 = vmul.f32 -1.442695, %v3484_v23  ;;  %v7605_v5 = vld [vmem:[%s12659_s4 + $0x1b] ss:$0 sm:$0xff]  ;;  %v2325_v19 = vsel %vm845_vm0, %v2303_v55, 0.0  ;;  %v2676_v58 = vsel %vm845_vm0, %v2654_v30, 0.0 }
 0x692   : > { %2276 = vadd.xlane.f32.xlu2 %v2275_v47  ;;  %v2403_v42 = vmul.f32 %v7605_v5, %v10838_v2  ;;  %v7608_v2 = vld [vmem:[%s12659_s4 + $0x1e] ss:$0 sm:$0xff]  ;;  %v3005_v63 = vmul.f32 %v7616_v17, %v11118_v27 }
 0x693   : > { %7495 = vpow2.f32 %v7034_v22  ;;  %2376 = vadd.xlane.f32.xlu1 %v2375_v3  ;;  %v2554_v51 = vmul.f32 %v7608_v2, %v10944_v45  ;;  %v7613_v22 = vld [vmem:[%s12659_s4 + $0x1f] ss:$0 sm:$0xff]  ;;  %v7614_v2 = vld [vmem:[%s12659_s4 + $0x24] ss:$0 sm:$0xff] }
 0x694   : > { %v2425_v0 = vsel %vm845_vm0, %v2403_v42, 0.0  ;;  %v2604_v47 = vmul.f32 %v7613_v22, %v10940_v34  ;;  %v3027_v27 = vsel %vm845_vm0, %v3005_v63, 0.0 }
 0x695   : > { %2176 = vadd.xlane.f32.xlu0 %v2175_v25  ;;  %v1375_v41 = vpop.xlane.xlu2 %1374  ;;  %v2576_v45 = vsel %vm845_vm0, %v2554_v51, 0.0  ;;  %v2855_v51 = vmul.f32 %v7614_v2, %v11046_v56 }
 0x696   : > { %v11212_v59 = vpop.xlane.xlu1 %3122  ;;  %v1383_v43 = vadd.f32 %v1375_v41, %v1333_v33  ;;  %v2805_v33 = vmul.f32 %v7612_v36, %v11033_v15  ;;  %v2726_v15 = vsel %vm845_vm0, %v2704_v26, 0.0  ;;  %v2626_v37 = vsel %vm845_vm0, %v2604_v47, 0.0 }
 0x697   : > { %v3105_v26 = vmul.f32 %v10828_v28, %v11114_v40 }
 0x698   : > { %v11218_v29 = vpop.xlane.xlu0 %3270  ;;  %v2827_v48 = vsel %vm845_vm0, %v2805_v33, 0.0 }
 0x699   : > { %v7496_v61 = vpop.eup %7495  ;;  %v3127_v28 = vsel %vm845_vm0, %v3105_v26, 0.0 }
 0x69a   : > { %v3516_v38 = vadd.f32 1.0, %v7496_v61  ;;  %2426 = vadd.xlane.f32.xlu2 %v2425_v0 }
 0x69b   : > { %2527 = vadd.xlane.f32.xlu1 %v2526_v60 }
 0x69c   : > { %7497 = vrcp.f32 %v3516_v38  ;;  %v3577_v9 = vand.u32 2147483648, %v3516_v38  ;;  %v3575_v5 = vand.u32 2147483647, %v3516_v38  ;;  %vm3571_vm13 = vweird.f32 %v3516_v38 }
 0x69d   : > { %2326 = vadd.xlane.f32.xlu0 %v2325_v19  ;;  %v11238_v46 = vpop.xlane.xlu2 %3320 }
 0x69e   : > { %v11240_v57 = vpop.xlane.xlu1 %2975  ;;  %v3578_v34 = vor.u32 1.1754944e-38, %v3577_v9  ;;  %vm3576_vm15 = vcmp.eq.f32.partialorder %v3575_v5, 8.507059e+37  ;;  %v3246_v9 = vld [vmem:[#allocation2 + $0xd2] sm:$0xff] }
 0x6a0   : > { %v11242_v21 = vpop.xlane.xlu0 %2925 }
 0x6a2   : > { %v7498_v10 = vpop.eup %7497  ;;  %2577 = vadd.xlane.f32.xlu2 %v2576_v45 }
 0x6a3   : > { %v3567_v31 = vmul.f32 %v7498_v10, %v3516_v38  ;;  %2677 = vadd.xlane.f32.xlu1 %v2676_v58  ;;  %vm3572_vm12 = vweird.f32 %v7498_v10  ;;  %v2955_v38 = vmul.f32 %v10815_v54, %v11081_v16  ;;  %v2877_v54 = vsel %vm845_vm0, %v2855_v51, 0.0 }
 0x6a4   : > { %v11247_v23 = vpop.f32.mrf.mxu0  ;;  %vm3573_vm14 = vmor %vm3571_vm13, %vm3572_vm12 }
 0x6a5   : > { %2477 = vadd.xlane.f32.xlu0 %v2476_v6  ;;  %3740 = vst.msk [vmem:[#allocation3 + $0x11] sm:$0xff] %vm553_vm2, %v11247_v23  ;;  %v3568_v3 = vsub.f32 1.0, %v3567_v31  ;;  %v11263_v25 = vpop.xlane.xlu2 %3173  ;;  %v2977_v16 = vsel %vm845_vm0, %v2955_v38, 0.0  ;;  %v3185_v6 = vadd.f32 %v11127_v14, %v11110_v12  ;;  %v7617_v12 = vld [vmem:[%s12659_s4 + $0x25] ss:$0 sm:$0xff] }
 0x6a6   : > { %v1476_v44 = vpop.xlane.xlu1 %1475  ;;  %v2905_v14 = vmul.f32 %v7617_v12, %v11064_v35 }
 0x6a7   : > { %v3569_v41 = vmul.f32 %v7498_v10, %v3568_v3  ;;  %v3235_v31 = vadd.f32 %v11136_v13, %v3185_v6  ;;  %v3346_v6 = vld [vmem:[#allocation2 + $0xd4] sm:$0xff] }
 0x6a8   : > { %v1426_v24 = vpop.xlane.xlu0 %1425 }
 0x6a9   : > { %v1434_v42 = vadd.f32 %v1426_v24, %v1383_v43  ;;  %v3570_v55 = vadd.f32 %v7498_v10, %v3569_v41  ;;  %v3285_v36 = vadd.f32 %v11218_v29, %v3235_v31  ;;  %v2927_v29 = vsel %vm845_vm0, %v2905_v14, 0.0  ;;  %v7618_v41 = vld [vmem:[%s12659_s4 + $0x28] ss:$0 sm:$0xff] }
 0x6aa   : > { %2727 = vadd.xlane.f32.xlu2 %v2726_v15  ;;  %v3256_v24 = vmul.f32 %v10932_v8, %v3246_v9  ;;  %v3055_v5 = vmul.f32 %v7618_v41, %v11112_v62  ;;  %v3135_v31 = vadd.f32 %v11212_v59, %v11199_v50 }
 0x6ab   : > { %v1484_v60 = vadd.f32 %v1476_v44, %v1434_v42  ;;  %v3574_v61 = vsel %vm3573_vm14, %v7498_v10, %v3570_v55  ;;  %2828 = vadd.xlane.f32.xlu1 %v2827_v48  ;;  %v2776_v10 = vsel %vm845_vm0, %v2754_v20, 0.0  ;;  %v3335_v22 = vadd.f32 %v11238_v46, %v3285_v36  ;;  %v3146_v44 = vld [vmem:[#allocation2 + $0xd0] sm:$0xff] }
 0x6ac   : > { %v11268_v0 = vld [vmem:[#allocation3 + $0x10] sm:$0xff]  ;;  %v3579_v43 = vsel %vm3576_vm15, %v3578_v34, %v3574_v61  ;;  %v3156_v35 = vmul.f32 %v10844_v1, %v3146_v44  ;;  %v3077_v8 = vsel %vm845_vm0, %v3055_v5, 0.0  ;;  %v3186_v26 = vadd.f32 %v11263_v25, %v3135_v31 }
 0x6ad   : > { %2627 = vadd.xlane.f32.xlu0 %v2626_v37  ;;  %v11270_v19 = vld [vmem:[#allocation3 + $0x12] sm:$0xff]  ;;  %7056 = vmatmul.msk.f32.gmra.mxu0 %vm553_vm2, %v11268_v0  ;;  %v3644_v30 = vmul.f32 %v3579_v43, %v13154_v11  ;;  %v11287_v45 = vpop.xlane.xlu2 %3025 }
 0x6ae   : > { %7064 = vmatmul.msk.f32.gmra.mxu1 %vm553_vm2, %v11270_v19  ;;  %v3421_v56 = vpop.xlane.xlu1 %3420  ;;  %v3178_v55 = vsel %vm845_vm0, %v3156_v35, 0.0  ;;  %v3296_v34 = vld [vmem:[#allocation2 + $0xd3] sm:$0xff] }
 0x6af   : > { %7042 = vmatmul.msk.f32.gmra.mxu2 %vm738_vm3, %v3644_v30  ;;  %v3396_v61 = vld [vmem:[#allocation2 + $0xd5] sm:$0xff]  ;;  %v3306_v62 = vmul.f32 %v10957_v7, %v3296_v34  ;;  %v3356_v7 = vmul.f32 %v10893_v49, %v3346_v6 }
 0x6b0   : > { %v3371_v58 = vpop.xlane.xlu0 %3370  ;;  %v3196_v43 = vld [vmem:[#allocation2 + $0xd1] sm:$0xff]  ;;  %v3406_v2 = vmul.f32 %v10985_v52, %v3396_v61 }
 0x6b1   : > { %v3385_v40 = vadd.f32 %v3371_v58, %v3335_v22  ;;  %v3206_v51 = vmul.f32 %v10883_v4, %v3196_v43  ;;  %v3328_v18 = vsel %vm845_vm0, %v3306_v62, 0.0  ;;  %v3378_v36 = vsel %vm845_vm0, %v3356_v7, 0.0  ;;  %v3993_v22 = vld [vmem:[#allocation8 + $0x38] sm:$0xff] }
 0x6b2   : > { %2878 = vadd.xlane.f32.xlu2 %v2877_v54  ;;  %v3428_v20 = vsel %vm845_vm0, %v3406_v2, 0.0  ;;  %v3446_v54 = vld [vmem:[#allocation2 + $0xd6] sm:$0xff]  ;;  %4032 = vmatpush.msrb.mxu2 %v3993_v22 }
 0x6b3   : > { %2978 = vadd.xlane.f32.xlu1 %v2977_v16  ;;  %v3435_v46 = vadd.f32 %v3421_v56, %v3385_v40  ;;  %v3228_v58 = vsel %vm845_vm0, %v3206_v51, 0.0  ;;  %v3456_v4 = vmul.f32 %v11027_v32, %v3446_v54  ;;  %v3992_v32 = vld [vmem:[#allocation8 + $0x30] sm:$0xff] }
 0x6b4   : > { %4033 = vmatpush.msrb.mxu2 %v3992_v32 }
 0x6b5   : > { %2777 = vadd.xlane.f32.xlu0 %v2776_v10  ;;  %v1526_v13 = vpop.xlane.xlu2 %1525  ;;  %v3478_v63 = vsel %vm845_vm0, %v3456_v4, 0.0 }
 0x6b6   : > { %v11307_v33 = vpop.xlane.xlu1 %3273  ;;  %v11310_v47 = vadd.f32 %v1526_v13, %v1484_v60  ;;  %v3278_v60 = vsel %vm845_vm0, %v3256_v24, 0.0 }
 0x6b8   : > { %v3224_v3 = vpop.xlane.xlu0 %3223 }
 0x6b9   : > { %v3236_v14 = vadd.f32 %v3224_v3, %v3186_v26  ;;  %v2936_v3 = vadd.f32 %v11242_v21, %v11164_v39 }
 0x6ba   : > { %3028 = vadd.xlane.f32.xlu2 %v3027_v27 }
 0x6bb   : > { %3128 = vadd.xlane.f32.xlu1 %v3127_v28  ;;  %v3286_v50 = vadd.f32 %v11307_v33, %v3236_v14  ;;  %v2986_v33 = vadd.f32 %v11240_v57, %v2936_v3 }
 0x6bd   : > { %2928 = vadd.xlane.f32.xlu0 %v2927_v29  ;;  %v3471_v42 = vpop.xlane.xlu2 %3470  ;;  %v3036_v34 = vadd.f32 %v11287_v45, %v2986_v33 }
 0x6be   : > { %v11321_v15 = vpop.xlane.xlu1 %3125  ;;  %v3485_v48 = vadd.f32 %v3471_v42, %v3435_v46  ;;  %v13155_v42 = vld [vmem:[#allocation26_spill] sm:$0xff] }
 0x6c0   : > { %v11323_v37 = vpop.xlane.xlu0 %3075  ;;  %v7035_v1 = vmul.f32 -1.442695, %v3485_v48 }
 0x6c1   : > { %v3086_v21 = vadd.f32 %v11323_v37, %v3036_v34 }
 0x6c2   : > { %7499 = vpow2.f32 %v7035_v1  ;;  %3179 = vadd.xlane.f32.xlu2 %v3178_v55 }
 0x6c3   : > { %3279 = vadd.xlane.f32.xlu1 %v3278_v60  ;;  %v3136_v43 = vadd.f32 %v11321_v15, %v3086_v21 }
 0x6c5   : > { %3078 = vadd.xlane.f32.xlu0 %v3077_v8  ;;  %v3324_v38 = vpop.xlane.xlu2 %3323 }
 0x6c6   : > { %v11331_v11 = vpop.xlane.xlu1 %3176  ;;  %v3336_v44 = vadd.f32 %v3324_v38, %v3286_v50 }
 0x6c7   : > { %v3187_v51 = vadd.f32 %v11331_v11, %v3136_v43 }
 0x6c8   : > { %v11333_v30 = vpop.xlane.xlu0 %1575  ;;  %v7500_v56 = vpop.eup %7499 }
 0x6c9   : > { %v3517_v16 = vadd.f32 1.0, %v7500_v56  ;;  %v1584_v45 = vadd.f32 %v11333_v30, %v11310_v47 }
 0x6ca   : > { %3329 = vadd.xlane.f32.xlu2 %v3328_v18 }
 0x6cb   : > { %3429 = vadd.xlane.f32.xlu1 %v3428_v20  ;;  %7501 = vrcp.f32 %v3517_v16  ;;  %v3592_v40 = vand.u32 2147483648, %v3517_v16  ;;  %v3590_v25 = vand.u32 2147483647, %v3517_v16  ;;  %vm3586_vm0 = vweird.f32 %v3517_v16 }
 0x6cd   : > { %3229 = vadd.xlane.f32.xlu0 %v3228_v58  ;;  %v3374_v52 = vpop.xlane.xlu2 %3373  ;;  %v3593_v35 = vor.u32 1.1754944e-38, %v3592_v40  ;;  %vm3591_vm5 = vcmp.eq.f32.partialorder %v3590_v25, 8.507059e+37 }
 0x6ce   : > { %v3227_v10 = vpop.xlane.xlu1 %3226  ;;  %v3386_v24 = vadd.f32 %v3374_v52, %v3336_v44 }
 0x6cf   : > { %v3237_v18 = vadd.f32 %v3227_v10, %v3187_v51 }
 0x6d0   : > { %v1626_v17 = vpop.xlane.xlu0 %1625 }
 0x6d1   : > { %v7502_v12 = vpop.eup %7501  ;;  %v1634_v38 = vadd.f32 %v1626_v17, %v1584_v45 }
 0x6d2   : > { %v3582_v13 = vmul.f32 %v7502_v12, %v3517_v16  ;;  %3479 = vadd.xlane.f32.xlu2 %v3478_v63  ;;  %vm3587_vm1 = vweird.f32 %v7502_v12 }
 0x6d3   : > { %vm3588_vm4 = vmor %vm3586_vm0, %vm3587_vm1 }
 0x6d4   : > { %v3583_v49 = vsub.f32 1.0, %v3582_v13 }
 0x6d5   : > { %3379 = vadd.xlane.f32.xlu0 %v3378_v36  ;;  %v3424_v27 = vpop.xlane.xlu2 %3423 }
 0x6d6   : > { %v3277_v28 = vpop.xlane.xlu1 %3276  ;;  %v3584_v29 = vmul.f32 %v7502_v12, %v3583_v49  ;;  %v3436_v5 = vadd.f32 %v3424_v27, %v3386_v24 }
 0x6d7   : > { %v3287_v58 = vadd.f32 %v3277_v28, %v3237_v18 }
 0x6d8   : > { %v1676_v59 = vpop.xlane.xlu0 %1675  ;;  %v3585_v9 = vadd.f32 %v7502_v12, %v3584_v29  ;;  %v13156_v29 = vld [vmem:[#allocation27_spill] sm:$0xff] }
 0x6d9   : > { %v1684_v56 = vadd.f32 %v1676_v59, %v1634_v38 }
 0x6da   : > { %v3589_v46 = vsel %vm3588_vm4, %v7502_v12, %v3585_v9 }
 0x6db   : > { %v3594_v41 = vsel %vm3591_vm5, %v3593_v35, %v3589_v46 }
 0x6dc   : > { %v3645_v48 = vmul.f32 %v3594_v41, %v13155_v42  ;;  %v11375_v41 = vld [vmem:[#allocation3 + $0x11] sm:$0xff] }
 0x6dd   : > { %v3474_v55 = vpop.xlane.xlu2 %3473  ;;  %4510 = vst.msk [vmem:[#allocation3 + $0x10] sm:$0xff] %vm553_vm2, %v13153_v53 }
 0x6de   : > { %v3327_v60 = vpop.xlane.xlu1 %3326  ;;  %v3486_v1 = vadd.f32 %v3474_v55, %v3436_v5  ;;  %7043 = vmatmul.msk.f32.gmra.mxu2 %vm738_vm3, %v3645_v48  ;;  %4511 = vst.msk [vmem:[#allocation3 + $0x18] sm:$0x3] %vm3719_vm11, %v13153_v53 }
 0x6df   : > { %v3337_v47 = vadd.f32 %v3327_v60, %v3287_v58 }
 0x6e0   : > { %v1726_v8 = vpop.xlane.xlu0 %1725  ;;  %v7036_v39 = vmul.f32 -1.442695, %v3486_v1 }
 0x6e2   : > { %7503 = vpow2.f32 %v7036_v39 }
 0x6e4   : > { %v11353_v61 = vpop.f32.mrf.mxu0 }
 0x6e5   : > { %3741 = vst.msk [vmem:[#allocation3 + $0x21] sm:$0xff] %vm553_vm2, %v11353_v61  ;;  %v1827_v57 = vpop.xlane.xlu2 %1826 }
 0x6e6   : > { %v1877_v62 = vpop.xlane.xlu1 %1876  ;;  %7071 = vmatmul.msk.f32.vlgmr.msrb.gmra.mxu2 %vm553_vm2, %v11268_v0  ;;  %v1734_v0 = vadd.f32 %v1726_v8, %v1684_v56 }
 0x6e8   : > { %v1777_v2 = vpop.xlane.xlu0 %1776  ;;  %v7504_v37 = vpop.eup %7503 }
 0x6e9   : > { %v3518_v20 = vadd.f32 1.0, %v7504_v37  ;;  %v1785_v6 = vadd.f32 %v1777_v2, %v1734_v0 }
 0x6eb   : > { %7505 = vrcp.f32 %v3518_v20  ;;  %v1835_v31 = vadd.f32 %v1827_v57, %v1785_v6  ;;  %v3607_v14 = vand.u32 2147483648, %v3518_v20  ;;  %v3605_v32 = vand.u32 2147483647, %v3518_v20 }
 0x6ec   : > { %v11363_v54 = vld [vmem:[#allocation3 + $0x20] sm:$0xff]  ;;  %vm3601_vm7 = vweird.f32 %v3518_v20 }
 0x6ed   : > { %v11365_v15 = vld [vmem:[#allocation3 + $0x22] sm:$0xff]  ;;  %7057 = vmatmul.msk.f32.gmra.mxu0 %vm553_vm2, %v11363_v54  ;;  %v3427_v11 = vpop.xlane.xlu2 %3426  ;;  %v1885_v49 = vadd.f32 %v1877_v62, %v1835_v31  ;;  %v3608_v40 = vor.u32 1.1754944e-38, %v3607_v14  ;;  %vm3606_vm9 = vcmp.eq.f32.partialorder %v3605_v32, 8.507059e+37 }
 0x6ee   : > { %7065 = vmatmul.msk.f32.gmra.mxu1 %vm553_vm2, %v11365_v15  ;;  %v3477_v30 = vpop.xlane.xlu1 %3476  ;;  %7072 = vmatmul.msk.f32.gmra.mxu2 %vm553_vm2, %v11363_v54 }
 0x6f0   : > { %v3377_v16 = vpop.xlane.xlu0 %3376 }
 0x6f1   : > { %v3387_v4 = vadd.f32 %v3377_v16, %v3337_v47  ;;  %v7506_v7 = vpop.eup %7505  ;;  %v13157_v16 = vld [vmem:[#allocation31_spill] sm:$0xff] }
 0x6f2   : > { %v3597_v10 = vmul.f32 %v7506_v7, %v3518_v20  ;;  %vm3602_vm6 = vweird.f32 %v7506_v7 }
 0x6f3   : > { %v3437_v52 = vadd.f32 %v3427_v11, %v3387_v4  ;;  %vm3603_vm8 = vmor %vm3601_vm7, %vm3602_vm6 }
 0x6f4   : > { %v3598_v63 = vsub.f32 1.0, %v3597_v10 }
 0x6f5   : > { %v3487_v17 = vadd.f32 %v3477_v30, %v3437_v52  ;;  %v1977_v36 = vpop.xlane.xlu2 %1976 }
 0x6f6   : > { %v2077_v12 = vpop.xlane.xlu1 %2076  ;;  %v3599_v22 = vmul.f32 %v7506_v7, %v3598_v63 }
 0x6f7   : > { %v7037_v26 = vmul.f32 -1.442695, %v3487_v17 }
 0x6f8   : > { %v1927_v13 = vpop.xlane.xlu0 %1926  ;;  %v3600_v27 = vadd.f32 %v7506_v7, %v3599_v22 }
 0x6f9   : > { %7507 = vpow2.f32 %v7037_v26  ;;  %v1935_v28 = vadd.f32 %v1927_v13, %v1885_v49 }
 0x6fa   : > { %v3604_v50 = vsel %vm3603_vm8, %v7506_v7, %v3600_v27 }
 0x6fb   : > { %v3609_v59 = vsel %vm3606_vm9, %v3608_v40, %v3604_v50  ;;  %v1985_v3 = vadd.f32 %v1977_v36, %v1935_v28 }
 0x6fc   : > { %v3646_v25 = vmul.f32 %v3609_v59, %v13156_v29 }
 0x6fd   : > { %v2127_v9 = vpop.xlane.xlu2 %2126 }
 0x6fe   : > { %v2227_v35 = vpop.xlane.xlu1 %2226  ;;  %7044 = vmatmul.msk.f32.vlgmr.msra.gmra.mxu3 %vm738_vm3, %v3646_v25 }
 0x6ff   : > { %v7508_v44 = vpop.eup %7507 }
 0x700   : > { %v3519_v24 = vadd.f32 1.0, %v7508_v44  ;;  %v2027_v46 = vpop.xlane.xlu0 %2026 }
 0x701   : > { %v2035_v5 = vadd.f32 %v2027_v46, %v1985_v3  ;;  %v11381_v48 = vpop.f32.mrf.mxu2 }
 0x702   : > { %7509 = vrcp.f32 %v3519_v24  ;;  %3742 = vst.msk [vmem:[#allocation3 + $0x31] sm:$0xff] %vm553_vm2, %v11381_v48  ;;  %v3622_v2 = vand.u32 2147483648, %v3519_v24  ;;  %v3620_v51 = vand.u32 2147483647, %v3519_v24  ;;  %vm3616_vm12 = vweird.f32 %v3519_v24 }
 0x703   : > { %v2085_v42 = vadd.f32 %v2077_v12, %v2035_v5 }
 0x704   : > { %v3623_v58 = vor.u32 1.1754944e-38, %v3622_v2  ;;  %vm3621_vm14 = vcmp.eq.f32.partialorder %v3620_v51, 8.507059e+37  ;;  %v3768_v2 = vld [vmem:[#allocation8 + $0x18] sm:$0xff] }
 0x705   : > { %v2277_v33 = vpop.xlane.xlu2 %2276  ;;  %v2135_v55 = vadd.f32 %v2127_v9, %v2085_v42  ;;  %3807 = vmatpush.msrb.mxu3 %v3768_v2 }
 0x706   : > { %v2377_v60 = vpop.xlane.xlu1 %2376 }
 0x708   : > { %v7510_v1 = vpop.eup %7509  ;;  %v2177_v8 = vpop.xlane.xlu0 %2176 }
 0x709   : > { %v3612_v34 = vmul.f32 %v7510_v1, %v3519_v24  ;;  %v2185_v39 = vadd.f32 %v2177_v8, %v2135_v55  ;;  %v11385_v43 = vld [vmem:[#allocation3 + $0x30] sm:$0xff]  ;;  %vm3617_vm10 = vweird.f32 %v7510_v1 }
 0x70a   : > { %v11387_v57 = vld [vmem:[#allocation3 + $0x32] sm:$0xff]  ;;  %7058 = vmatmul.msk.f32.gmra.mxu0 %vm553_vm2, %v11385_v43  ;;  %7073 = vmatmul.msk.f32.gmra.mxu2 %vm553_vm2, %v11385_v43  ;;  %vm3618_vm13 = vmor %vm3616_vm12, %vm3617_vm10 }
 0x70b   : > { %v2235_v21 = vadd.f32 %v2227_v35, %v2185_v39  ;;  %v3613_v62 = vsub.f32 1.0, %v3612_v34  ;;  %7066 = vmatmul.msk.f32.gmra.mxu1 %vm553_vm2, %v11387_v57  ;;  %v11411_v39 = vld [vmem:[#allocation3 + $0x21] sm:$0xff] }
 0x70c   : > { %4513 = vst.msk [vmem:[#allocation3 + $0x28] sm:$0x3] %vm3719_vm11, %v13153_v53 }
 0x70d   : > { %v3614_v45 = vmul.f32 %v7510_v1, %v3613_v62  ;;  %v2427_v37 = vpop.xlane.xlu2 %2426  ;;  %v2285_v38 = vadd.f32 %v2277_v33, %v2235_v21  ;;  %4512 = vst.msk [vmem:[#allocation3 + $0x20] sm:$0xff] %vm553_vm2, %v13153_v53 }
 0x70e   : > { %v2528_v20 = vpop.xlane.xlu1 %2527 }
 0x70f   : > { %v3615_v18 = vadd.f32 %v7510_v1, %v3614_v45 }
 0x710   : > { %v2327_v56 = vpop.xlane.xlu0 %2326 }
 0x711   : > { %v2335_v0 = vadd.f32 %v2327_v56, %v2285_v38  ;;  %v3619_v47 = vsel %vm3618_vm13, %v7510_v1, %v3615_v18 }
 0x712   : > { %v3624_v11 = vsel %vm3621_vm14, %v3623_v58, %v3619_v47  ;;  %v3767_v58 = vld [vmem:[#allocation8 + $0x10] sm:$0xff]  ;;  %v3758_v47 = vld [vmem:[#allocation3 + $0x1] sm:$0xff] }
 0x713   : > { %v2385_v30 = vadd.f32 %v2377_v60, %v2335_v0  ;;  %v3647_v6 = vmul.f32 %v3624_v11, %v13157_v16  ;;  %3808 = vmatpush.msrb.mxu3 %v3767_v58  ;;  %4508 = vst.msk [vmem:[#allocation3] sm:$0xff] %vm553_vm2, %v13153_v53  ;;  %v4077_v16 = vld [vmem:[#allocation8 + $0x48] sm:$0xff] }
 0x714   : > { %4509 = vst.msk [vmem:[#allocation3 + $0x8] sm:$0x3] %vm3719_vm11, %v13153_v53 }
 0x715   : > { %7045 = vmatmul.msk.f32.gmra.mxu3 %vm738_vm3, %v3647_v6  ;;  %v2435_v4 = vadd.f32 %v2427_v37, %v2385_v30  ;;  %v2578_v7 = vpop.xlane.xlu2 %2577  ;;  %v11421_v6 = vld [vmem:[#allocation3 + $0x31] sm:$0xff] }
 0x716   : > { %v2678_v52 = vpop.xlane.xlu1 %2677  ;;  %4116 = vmatpush.msra.mxu3 %v4077_v16  ;;  %4515 = vst.msk [vmem:[#allocation3 + $0x38] sm:$0x3] %vm3719_vm11, %v13153_v53 }
 0x717   : > { %4514 = vst.msk [vmem:[#allocation3 + $0x30] sm:$0xff] %vm553_vm2, %v13153_v53 }
 0x718   : > { %v2478_v10 = vpop.xlane.xlu0 %2477 }
 0x719   : > { %v2486_v31 = vadd.f32 %v2478_v10, %v2435_v4 }
 0x71b   : > { %v2536_v17 = vadd.f32 %v2528_v20, %v2486_v31 }
 0x71d   : > { %v2586_v63 = vadd.f32 %v2578_v7, %v2536_v17  ;;  %v2728_v26 = vpop.xlane.xlu2 %2727 }
 0x71e   : > { %v2829_v12 = vpop.xlane.xlu1 %2828 }
 0x720   : > { %v2628_v36 = vpop.xlane.xlu0 %2627 }
 0x721   : > { %v2636_v14 = vadd.f32 %v2628_v36, %v2586_v63 }
 0x723   : > { %v2686_v13 = vadd.f32 %v2678_v52, %v2636_v14 }
 0x725   : > { %v2736_v22 = vadd.f32 %v2728_v26, %v2686_v13  ;;  %v2879_v32 = vpop.xlane.xlu2 %2878  ;;  %v13158_v13 = vld [vmem:[#allocation34_spill] sm:$0xff] }
 0x726   : > { %v2979_v28 = vpop.xlane.xlu1 %2978 }
 0x728   : > { %v2778_v49 = vpop.xlane.xlu0 %2777 }
 0x729   : > { %v2786_v27 = vadd.f32 %v2778_v49, %v2736_v22 }
 0x72b   : > { %v2837_v40 = vadd.f32 %v2829_v12, %v2786_v27 }
 0x72d   : > { %v2887_v50 = vadd.f32 %v2879_v32, %v2837_v40  ;;  %v3029_v59 = vpop.xlane.xlu2 %3028  ;;  %v4076_v40 = vld [vmem:[#allocation8 + $0x40] sm:$0xff] }
 0x72e   : > { %v3129_v3 = vpop.xlane.xlu1 %3128  ;;  %4117 = vmatpush.msra.mxu3 %v4076_v40 }
 0x730   : > { %v2929_v29 = vpop.xlane.xlu0 %2928 }
 0x731   : > { %v2937_v25 = vadd.f32 %v2929_v29, %v2887_v50  ;;  %v4246_v29 = vld [vmem:[#allocation8 + $0x68] sm:$0xff] }
 0x732   : > { %v11397_v9 = vpop.f32.mrf.mxu2  ;;  %4285 = vmatpush.msra.mxu1 %v4246_v29 }
 0x733   : > { %v2987_v44 = vadd.f32 %v2979_v28, %v2937_v25  ;;  %3743 = vst.msk [vmem:[#allocation3 + $0x41] sm:$0xff] %vm553_vm2, %v11397_v9  ;;  %v4160_v25 = vld [vmem:[#allocation8 + $0x50] sm:$0xff] }
 0x735   : > { %v3037_v35 = vadd.f32 %v3029_v59, %v2987_v44  ;;  %v3180_v24 = vpop.xlane.xlu2 %3179  ;;  %v4161_v59 = vld [vmem:[#allocation8 + $0x58] sm:$0xff]  ;;  %v4245_v44 = vld [vmem:[#allocation8 + $0x60] sm:$0xff] }
 0x736   : > { %v3280_v60 = vpop.xlane.xlu1 %3279  ;;  %4200 = vmatpush.msrb.mxu0 %v4161_v59  ;;  %4286 = vmatpush.msra.mxu1 %v4245_v44 }
 0x738   : > { %v3079_v46 = vpop.xlane.xlu0 %3078  ;;  %4201 = vmatpush.msrb.mxu0 %v4160_v25 }
 0x739   : > { %v3087_v5 = vadd.f32 %v3079_v46, %v3037_v35 }
 0x73a   : > { %v11401_v33 = vld [vmem:[#allocation3 + $0x40] sm:$0xff] }
 0x73b   : > { %v3137_v42 = vadd.f32 %v3129_v3, %v3087_v5  ;;  %v11403_v55 = vld [vmem:[#allocation3 + $0x42] sm:$0xff]  ;;  %7059 = vmatmul.msk.f32.gmra.mxu0 %vm553_vm2, %v11401_v33  ;;  %7074 = vmatmul.msk.f32.gmra.mxu2 %vm553_vm2, %v11401_v33 }
 0x73c   : > { %7067 = vmatmul.msk.f32.gmra.mxu1 %vm553_vm2, %v11403_v55  ;;  %v11443_v27 = vld [vmem:[#allocation3 + $0x41] sm:$0xff] }
 0x73d   : > { %v3188_v1 = vadd.f32 %v3180_v24, %v3137_v42  ;;  %v3330_v34 = vpop.xlane.xlu2 %3329  ;;  %4517 = vst.msk [vmem:[#allocation3 + $0x48] sm:$0x3] %vm3719_vm11, %v13153_v53 }
 0x73e   : > { %v3430_v37 = vpop.xlane.xlu1 %3429  ;;  %4516 = vst.msk [vmem:[#allocation3 + $0x40] sm:$0xff] %vm553_vm2, %v13153_v53 }
 0x740   : > { %v3230_v8 = vpop.xlane.xlu0 %3229 }
 0x741   : > { %v3238_v21 = vadd.f32 %v3230_v8, %v3188_v1  ;;  %v4330_v1 = vld [vmem:[#allocation8 + $0x78] sm:$0xff]  ;;  %v4414_v8 = vld [vmem:[#allocation8 + $0x88] sm:$0xff] }
 0x742   : > { %4369 = vmatpush.msra.mxu2 %v4330_v1 }
 0x743   : > { %v3288_v62 = vadd.f32 %v3280_v60, %v3238_v21 }
 0x745   : > { %v3338_v45 = vadd.f32 %v3330_v34, %v3288_v62  ;;  %v3480_v18 = vpop.xlane.xlu2 %3479  ;;  %v4243_v62 = vld [vmem:[#allocation3 + $0x90] sm:$0xff] }
 0x748   : > { %v3380_v51 = vpop.xlane.xlu0 %3379 }
 0x749   : > { %v3388_v38 = vadd.f32 %v3380_v51, %v3338_v45 }
 0x74b   : > { %v3438_v20 = vadd.f32 %v3430_v37, %v3388_v38  ;;  %v4411_v37 = vld [vmem:[#allocation3 + $0x92] sm:$0xff] }
 0x74c   : > { %v4556_v38 = vld [vmem:[#allocation9 + $0x18] sm:$0xff] }
 0x74d   : > { %v3488_v56 = vadd.f32 %v3480_v18, %v3438_v20  ;;  %4595 = vmatpush.msra.mxu0 %v4556_v38  ;;  %v3875_v18 = vpop.f32.mrf.mxu0 }
 0x74f   : > { %v7038_v0 = vmul.f32 -1.442695, %v3488_v56  ;;  %v3951_v56 = vpop.f32.mrf.mxu1 }
 0x751   : > { %7511 = vpow2.f32 %v7038_v0 }
 0x755   : > { %v3878_v58 = vpop.f32.mrf.mxu0 }
 0x757   : > { %v7512_v11 = vpop.eup %7511 }
 0x758   : > { %v3520_v30 = vadd.f32 1.0, %v7512_v11 }
 0x75a   : > { %7513 = vrcp.f32 %v3520_v30  ;;  %v3637_v31 = vand.u32 2147483648, %v3520_v30  ;;  %v3635_v63 = vand.u32 2147483647, %v3520_v30  ;;  %vm3631_vm1 = vweird.f32 %v3520_v30 }
 0x75c   : > { %v3638_v36 = vor.u32 1.1754944e-38, %v3637_v31  ;;  %vm3636_vm4 = vcmp.eq.f32.partialorder %v3635_v63, 8.507059e+37 }
 0x760   : > { %v7514_v4 = vpop.eup %7513 }
 0x761   : > { %v3627_v7 = vmul.f32 %v7514_v4, %v3520_v30  ;;  %v11427_v52 = vpop.f32.mrf.mxu2  ;;  %vm3632_vm15 = vweird.f32 %v7514_v4 }
 0x762   : > { %3744 = vst.msk [vmem:[#allocation3 + $0x51] sm:$0xff] %vm553_vm2, %v11427_v52  ;;  %vm3633_vm0 = vmor %vm3631_vm1, %vm3632_vm15 }
 0x763   : > { %v3628_v10 = vsub.f32 1.0, %v3627_v7  ;;  %v4555_v7 = vld [vmem:[#allocation9 + $0x10] sm:$0xff] }
 0x764   : > { %4596 = vmatpush.msra.mxu0 %v4555_v7 }
 0x765   : > { %v3629_v17 = vmul.f32 %v7514_v4, %v3628_v10 }
 0x767   : > { %v3630_v26 = vadd.f32 %v7514_v4, %v3629_v17 }
 0x769   : > { %v3634_v12 = vsel %vm3633_vm0, %v7514_v4, %v3630_v26  ;;  %v11432_v32 = vld [vmem:[#allocation3 + $0x50] sm:$0xff]  ;;  %v4035_v30 = vpop.f32.mrf.mxu2 }
 0x76a   : > { %v3639_v14 = vsel %vm3636_vm4, %v3638_v36, %v3634_v12  ;;  %v11434_v49 = vld [vmem:[#allocation3 + $0x52] sm:$0xff]  ;;  %7060 = vmatmul.msk.f32.gmra.mxu0 %vm553_vm2, %v11432_v32  ;;  %7075 = vmatmul.msk.f32.gmra.mxu2 %vm553_vm2, %v11432_v32  ;;  %v3881_v11 = vpop.f32.mrf.mxu0 }
 0x76b   : > { %v3648_v22 = vmul.f32 %v3639_v14, %v13158_v13  ;;  %7068 = vmatmul.msk.f32.gmra.mxu1 %vm553_vm2, %v11434_v49  ;;  %v11450_v28 = vld [vmem:[#allocation3 + $0x51] sm:$0xff] }
 0x76c   : > { %4519 = vst.msk [vmem:[#allocation3 + $0x58] sm:$0x3] %vm3719_vm11, %v13153_v53 }
 0x76d   : > { %7046 = vmatmul.msk.f32.gmra.mxu3 %vm738_vm3, %v3648_v22  ;;  %4518 = vst.msk [vmem:[#allocation3 + $0x50] sm:$0xff] %vm553_vm2, %v13153_v53 }
 0x771   : > { %v4038_v31 = vpop.f32.mrf.mxu2 }
 0x775   : > { %7047 = vmatmul.msk.f32.vlgmr.msrb.gmra.mxu3 %vm553_vm2, %v3758_v47  ;;  %v3954_v47 = vpop.f32.mrf.mxu1 }
 0x776   : > { %4453 = vmatpush.msrb.mxu3 %v4414_v8 }
 0x77d   : > { %7048 = vmatmul.msk.f32.gmra.mxu3 %vm553_vm2, %v11375_v41 }
 0x781   : > { %v11458_v50 = vpop.f32.mrf.mxu3 }
 0x782   : > { %3745 = vst.msk [vmem:[#allocation3 + $0x61] sm:$0xff] %vm553_vm2, %v11458_v50 }
 0x785   : > { %7049 = vmatmul.msk.f32.gmra.mxu3 %vm553_vm2, %v11411_v39 }
 0x787   : > { %v11603_v4 = vpop.f32.mrf.mxu0 }
 0x789   : > { %v3754_v3 = vld [vmem:[#allocation3 + $0x60] sm:$0xff] }
 0x78a   : > { %v11464_v35 = vld [vmem:[#allocation3 + $0x62] sm:$0xff]  ;;  %7061 = vmatmul.msk.f32.gmra.mxu0 %vm553_vm2, %v3754_v3  ;;  %7076 = vmatmul.msk.f32.gmra.mxu2 %vm553_vm2, %v3754_v3 }
 0x78b   : > { %v11466_v24 = vld [vmem:[#allocation3 + $0x61] sm:$0xff]  ;;  %7069 = vmatmul.msk.f32.gmra.mxu1 %vm553_vm2, %v11464_v35 }
 0x78c   : > { %4521 = vst.msk [vmem:[#allocation3 + $0x68] sm:$0x3] %vm3719_vm11, %v13153_v53 }
 0x78d   : > { %7050 = vmatmul.msk.f32.gmra.mxu3 %vm553_vm2, %v11421_v6  ;;  %4520 = vst.msk [vmem:[#allocation3 + $0x60] sm:$0xff] %vm553_vm2, %v13153_v53  ;;  %v11613_v36 = vpop.f32.mrf.mxu2 }
 0x795   : > { %7051 = vmatmul.msk.f32.gmra.mxu3 %vm553_vm2, %v11443_v27 }
 0x798   : > { %v11480_v46 = vpop.f32.mrf.mxu3 }
 0x799   : > { %3746 = vst.msk [vmem:[#allocation3 + $0x71] sm:$0xff] %vm553_vm2, %v11480_v46 }
 0x79d   : > { %7052 = vmatmul.msk.f32.gmra.mxu3 %vm553_vm2, %v11450_v28 }
 0x7a0   : > { %v3755_v5 = vld [vmem:[#allocation3 + $0x70] sm:$0xff] }
 0x7a1   : > { %v11486_v42 = vld [vmem:[#allocation3 + $0x72] sm:$0xff]  ;;  %7062 = vmatmul.msk.f32.gmra.mxu0 %vm553_vm2, %v3755_v5  ;;  %7077 = vmatmul.msk.f32.gmra.mxu2 %vm553_vm2, %v3755_v5 }
 0x7a2   : > { %v11488_v60 = vld [vmem:[#allocation3 + $0x71] sm:$0xff]  ;;  %7070 = vmatmul.msk.f32.gmra.mxu1 %vm553_vm2, %v11486_v42 }
 0x7a3   : > { %4523 = vst.msk [vmem:[#allocation3 + $0x78] sm:$0x3] %vm3719_vm11, %v13153_v53 }
 0x7a4   : > { %4522 = vst.msk [vmem:[#allocation3 + $0x70] sm:$0xff] %vm553_vm2, %v13153_v53 }
 0x7a5   : > { %7053 = vmatmul.msk.f32.gmra.mxu3 %vm553_vm2, %v11466_v24 }
 0x7a9   : > { %7087 = vmatmul.msk.f32.vlgmr.msrb.gmra.mxu0 %vm553_vm2, %v11270_v19  ;;  %v4329_v19 = vld [vmem:[#allocation8 + $0x70] sm:$0xff] }
 0x7aa   : > { %7095 = vmatmul.msk.f32.vlgmr.msra.gmra.mxu1 %vm553_vm2, %v11363_v54  ;;  %v4413_v54 = vld [vmem:[#allocation8 + $0x80] sm:$0xff]  ;;  %4370 = vmatpush.msra.mxu2 %v4329_v19 }
 0x7ab   : > { %4454 = vmatpush.msrb.mxu3 %v4413_v54 }
 0x7ad   : > { %7054 = vmatmul.msk.f32.gmra.mxu3 %vm553_vm2, %v11488_v60 }
 0x7b1   : > { %7088 = vmatmul.msk.f32.gmra.mxu0 %vm553_vm2, %v11365_v15 }
 0x7b2   : > { %7096 = vmatmul.msk.f32.gmra.mxu1 %vm553_vm2, %v11385_v43 }
 0x7b5   : > { %7079 = vmatmul.msk.f32.vlgmr.msra.gmra.mxu3 %vm553_vm2, %v11375_v41 }
 0x7b8   : > { %v11609_v63 = vpop.f32.mrf.mxu0 }
 0x7b9   : > { %7089 = vmatmul.msk.f32.gmra.mxu0 %vm553_vm2, %v11387_v57 }
 0x7ba   : > { %7097 = vmatmul.msk.f32.gmra.mxu1 %vm553_vm2, %v11401_v33 }
 0x7bd   : > { %7080 = vmatmul.msk.f32.gmra.mxu3 %vm553_vm2, %v11411_v39 }
 0x7be   : > { %v11621_v22 = vpop.f32.mrf.mxu2 }
 0x7c1   : > { %7090 = vmatmul.msk.f32.gmra.mxu0 %vm553_vm2, %v11403_v55 }
 0x7c2   : > { %7098 = vmatmul.msk.f32.gmra.mxu1 %vm553_vm2, %v11432_v32 }
 0x7c5   : > { %7081 = vmatmul.msk.f32.gmra.mxu3 %vm553_vm2, %v11421_v6 }
 0x7c9   : > { %7091 = vmatmul.msk.f32.gmra.mxu0 %vm553_vm2, %v11434_v49 }
 0x7ca   : > { %7099 = vmatmul.msk.f32.gmra.mxu1 %vm553_vm2, %v3754_v3  ;;  %v4781_v3 = vld [vmem:[#allocation9 + $0x38] sm:$0xff] }
 0x7cb   : > { %4820 = vmatpush.msra.mxu3 %v4781_v3 }
 0x7cd   : > { %7082 = vmatmul.msk.f32.gmra.mxu3 %vm553_vm2, %v11443_v27 }
 0x7d1   : > { %7092 = vmatmul.msk.f32.gmra.mxu0 %vm553_vm2, %v11464_v35 }
 0x7d2   : > { %7100 = vmatmul.msk.f32.gmra.mxu1 %vm553_vm2, %v3755_v5  ;;  %v4687_v5 = vld [vmem:[#allocation3 + $0x2] sm:$0xff] }
 0x7d5   : > { %7083 = vmatmul.msk.f32.gmra.mxu3 %vm553_vm2, %v11450_v28 }
 0x7d9   : > { %7093 = vmatmul.msk.f32.gmra.mxu0 %vm553_vm2, %v11486_v42 }
 0x7dd   : > { %7084 = vmatmul.msk.f32.gmra.mxu3 %vm553_vm2, %v11466_v24 }
 0x7e5   : > { %7085 = vmatmul.msk.f32.gmra.mxu3 %vm553_vm2, %v11488_v60 }
 0x7e7   : > { %v11617_v14 = vpop.f32.mrf.mxu0 }
 0x7ed   : > { %v11629_v40 = vpop.f32.mrf.mxu2 }
 0x7f0   : > { %v11540_v41 = vpop.f32.mrf.mxu3 }
 0x7f1   : > { %3747 = vst.msk [vmem:[#allocation3 + $0x81] sm:$0xff] %vm553_vm2, %v11540_v41 }
 0x7f8   : > { %v4410_v43 = vld [vmem:[#allocation3 + $0x82] sm:$0xff]  ;;  %v11544_v33 = vpop.f32.mrf.mxu3 }
 0x7f9   : > { %v3990_v34 = vld [vmem:[#allocation3 + $0x80] sm:$0xff]  ;;  %7094 = vmatmul.msk.f32.gmra.mxu0 %vm553_vm2, %v4410_v43 }
 0x7fa   : > { %v4074_v21 = vld [vmem:[#allocation3 + $0x81] sm:$0xff]  ;;  %7078 = vmatmul.msk.f32.gmra.mxu2 %vm553_vm2, %v3990_v34  ;;  %7101 = vmatmul.msk.f32.gmra.mxu1 %vm553_vm2, %v3990_v34 }
 0x7fb   : > { %7086 = vmatmul.msk.f32.gmra.mxu3 %vm553_vm2, %v4074_v21  ;;  %4524 = vst.msk [vmem:[#allocation3 + $0x80] sm:$0xff] %vm553_vm2, %v13153_v53  ;;  %v4546_v34 = vld [vmem:[#allocation3 + $0x1] sm:$0xff] }
 0x7fc   : > { %4525 = vst.msk [vmem:[#allocation3 + $0x88] sm:$0x3] %vm3719_vm11, %v13153_v53 }
 0x7fd   : > { %5304 = vst.msk [vmem:[#allocation3 + $0x8] sm:$0x3] %vm3719_vm11, %v13153_v53 }
 0x800   : > { %v11554_v2 = vpop.f32.mrf.mxu3 }
 0x801   : > { %7119 = vmatmul.msk.f32.vlgmr.msra.gmra.mxu0 %vm553_vm2, %v4546_v34 }
 0x802   : > { %7103 = vmatmul.msk.f32.vlgmr.msra.gmra.mxu2 %vm553_vm2, %v11411_v39  ;;  %7102 = vmatmul.msk.f32.gmra.mxu1 %vm553_vm2, %v4243_v62  ;;  %v4865_v62 = vld [vmem:[#allocation9 + $0x48] sm:$0xff] }
 0x803   : > { %7111 = vmatmul.msk.f32.vlgmr.msrb.gmra.mxu3 %vm553_vm2, %v11365_v15  ;;  %v4327_v15 = vld [vmem:[#allocation3 + $0x91] sm:$0xff]  ;;  %4904 = vmatpush.msrb.mxu0 %v4865_v62 }
 0x804   : > { %4526 = vst.msk [vmem:[#allocation3 + $0x90] sm:$0xff] %vm553_vm2, %v13153_v53 }
 0x805   : > { %4527 = vst.msk [vmem:[#allocation3 + $0x98] sm:$0x3] %vm3719_vm11, %v13153_v53 }
 0x807   : > { %v11623_v32 = vpop.f32.mrf.mxu0 }
 0x808   : > { %v11561_v45 = vpop.f32.mrf.mxu3 }
 0x80a   : > { %7104 = vmatmul.msk.f32.gmra.mxu2 %vm553_vm2, %v11421_v6  ;;  %v11601_v6 = vpop.f32.mrf.mxu1 }
 0x80b   : > { %7112 = vmatmul.msk.f32.gmra.mxu3 %vm553_vm2, %v11387_v57 }
 0x80d   : > { %v11637_v44 = vpop.f32.mrf.mxu2 }
 0x810   : > { %v11567_v51 = vpop.f32.mrf.mxu3 }
 0x812   : > { %7105 = vmatmul.msk.f32.gmra.mxu2 %vm553_vm2, %v11443_v27  ;;  %v11605_v10 = vpop.f32.mrf.mxu1 }
 0x813   : > { %7113 = vmatmul.msk.f32.gmra.mxu3 %vm553_vm2, %v11403_v55 }
 0x818   : > { %v11573_v39 = vpop.f32.mrf.mxu3 }
 0x81a   : > { %7106 = vmatmul.msk.f32.gmra.mxu2 %vm553_vm2, %v11450_v28  ;;  %v11611_v26 = vpop.f32.mrf.mxu1  ;;  %v4697_v28 = vld [vmem:[#allocation9 + $0x28] sm:$0xff] }
 0x81b   : > { %7114 = vmatmul.msk.f32.gmra.mxu3 %vm553_vm2, %v11434_v49  ;;  %4736 = vmatpush.msrb.mxu2 %v4697_v28  ;;  %v4780_v28 = vld [vmem:[#allocation9 + $0x30] sm:$0xff] }
 0x81c   : > { %4821 = vmatpush.msra.mxu3 %v4780_v28 }
 0x81e   : > { %v11631_v59 = vpop.f32.mrf.mxu0 }
 0x820   : > { %v11583_v57 = vpop.f32.mrf.mxu3 }
 0x822   : > { %7107 = vmatmul.msk.f32.gmra.mxu2 %vm553_vm2, %v11466_v24  ;;  %v11619_v13 = vpop.f32.mrf.mxu1  ;;  %v4696_v24 = vld [vmem:[#allocation9 + $0x20] sm:$0xff] }
 0x823   : > { %7115 = vmatmul.msk.f32.gmra.mxu3 %vm553_vm2, %v11464_v35  ;;  %v4545_v35 = vld [vmem:[#allocation9 + $0x8] sm:$0xff]  ;;  %4737 = vmatpush.msrb.mxu2 %v4696_v24  ;;  %v3882_v24 = vadd.f32 %v3881_v11, %v11561_v45 }
 0x824   : > { %4660 = vmatpush.msrb.mxu1 %v4545_v35  ;;  %v11641_v1 = vpop.f32.mrf.mxu2 }
 0x828   : > { %v11589_v55 = vpop.f32.mrf.mxu3 }
 0x82a   : > { %7108 = vmatmul.msk.f32.gmra.mxu2 %vm553_vm2, %v11488_v60  ;;  %v11627_v27 = vpop.f32.mrf.mxu1  ;;  %v4203_v60 = vpop.f32.mrf.mxu0 }
 0x82b   : > { %7116 = vmatmul.msk.f32.gmra.mxu3 %vm553_vm2, %v11486_v42  ;;  %v3876_v42 = vadd.f32 %v3875_v18, %v11544_v33  ;;  %v3879_v33 = vadd.f32 %v3878_v58, %v11554_v2  ;;  %v3977_v2 = vadd.f32 %v11601_v6, %v3882_v24 }
 0x82d   : > { %v3975_v19 = vadd.f32 %v3951_v56, %v3876_v42  ;;  %v3976_v7 = vadd.f32 %v3954_v47, %v3879_v33  ;;  %v4061_v11 = vadd.f32 %v11613_v36, %v3977_v2 }
 0x830   : > { %v11595_v20 = vpop.f32.mrf.mxu3 }
 0x832   : > { %7109 = vmatmul.msk.f32.gmra.mxu2 %vm553_vm2, %v4074_v21  ;;  %v11635_v25 = vpop.f32.mrf.mxu1  ;;  %v4536_v21 = vld [vmem:[#allocation3] sm:$0xff] }
 0x833   : > { %7117 = vmatmul.msk.f32.gmra.mxu3 %vm553_vm2, %v4410_v43  ;;  %v4544_v43 = vld [vmem:[#allocation9] sm:$0xff]  ;;  %5303 = vst.msk [vmem:[#allocation3] sm:$0xff] %vm553_vm2, %v13153_v53 }
 0x834   : > { %4661 = vmatpush.msrb.mxu1 %v4544_v43 }
 0x835   : > { %7127 = vmatmul.msk.f32.vlgmr.msrb.gmra.mxu1 %vm553_vm2, %v4536_v21 }
 0x838   : > { %v4119_v0 = vpop.f32.mrf.mxu3 }
 0x83a   : > { %7110 = vmatmul.msk.f32.gmra.mxu2 %vm553_vm2, %v4327_v15  ;;  %v4288_v54 = vpop.f32.mrf.mxu1  ;;  %v4059_v15 = vadd.f32 %v4035_v30, %v3975_v19  ;;  %v11661_v30 = vld [vmem:[%s12662_s7] ss:$0 sm:$0xff] }
 0x83b   : > { %7118 = vmatmul.msk.f32.gmra.mxu3 %vm553_vm2, %v4411_v37  ;;  %v4206_v37 = vpop.f32.mrf.mxu0 }
 0x83c   : > { %v4143_v38 = vadd.f32 %v4119_v0, %v4059_v15 }
 0x83e   : > { %v4227_v35 = vadd.f32 %v4203_v60, %v4143_v38  ;;  %v3885_v60 = vadd.f32 %v11603_v4, %v11567_v51  ;;  %v3888_v51 = vadd.f32 %v11609_v63, %v11573_v39  ;;  %v4864_v63 = vld [vmem:[#allocation9 + $0x40] sm:$0xff] }
 0x83f   : > { %4905 = vmatpush.msrb.mxu0 %v4864_v63 }
 0x840   : > { %v4122_v16 = vpop.f32.mrf.mxu3  ;;  %v4312_v43 = vadd.f32 %v4288_v54, %v4227_v35  ;;  %v3978_v15 = vadd.f32 %v11605_v10, %v3885_v60 }
 0x842   : > { %7135 = vmatmul.msk.f32.vlgmr.msrb.gmra.mxu2 %vm553_vm2, %v4687_v5  ;;  %v4291_v3 = vpop.f32.mrf.mxu1  ;;  %v4060_v5 = vadd.f32 %v4038_v31, %v3976_v7  ;;  %v4062_v4 = vadd.f32 %v11621_v22, %v3978_v15 }
 0x843   : > { %v4209_v58 = vpop.f32.mrf.mxu0 }
 0x844   : > { %v4144_v42 = vadd.f32 %v4122_v16, %v4060_v5 }
 0x846   : > { %v4228_v47 = vadd.f32 %v4206_v37, %v4144_v42 }
 0x848   : > { %v11607_v17 = vpop.f32.mrf.mxu3  ;;  %v4313_v54 = vadd.f32 %v4291_v3, %v4228_v47 }
 0x849   : > { %v4145_v31 = vadd.f32 %v11607_v17, %v4061_v11 }
 0x84a   : > { %v4294_v45 = vpop.f32.mrf.mxu1 }
 0x84b   : > { %v4212_v38 = vpop.f32.mrf.mxu0  ;;  %v4229_v7 = vadd.f32 %v4209_v58, %v4145_v31 }
 0x84d   : > { %v4314_v24 = vadd.f32 %v4294_v45, %v4229_v7 }
 0x850   : > { %v11615_v12 = vpop.f32.mrf.mxu3 }
 0x851   : > { %v4146_v3 = vadd.f32 %v11615_v12, %v4062_v4 }
 0x852   : > { %v4297_v17 = vpop.f32.mrf.mxu1 }
 0x853   : > { %v4230_v12 = vadd.f32 %v4212_v38, %v4146_v3  ;;  %v4215_v2 = vpop.f32.mrf.mxu0 }
 0x855   : > { %v4315_v60 = vadd.f32 %v4297_v17, %v4230_v12 }
 0x858   : > { %v11625_v49 = vpop.f32.mrf.mxu3 }
 0x85b   : > { %v4218_v15 = vpop.f32.mrf.mxu0 }
 0x860   : > { %v11633_v29 = vpop.f32.mrf.mxu3 }
 0x868   : > { %v11643_v8 = vpop.f32.mrf.mxu3 }
 0x87d   : > { %v11652_v18 = vpop.f32.mrf.mxu2 }
 0x87e   : > { %v11654_v56 = vpop.f32.mrf.mxu3 }
 0x885   : > { %v4372_v34 = vpop.f32.mrf.mxu2 }
 0x886   : > { %v4456_v21 = vpop.f32.mrf.mxu3  ;;  %v4396_v0 = vadd.f32 %v4372_v34, %v4312_v43 }
 0x888   : > { %v4480_v19 = vadd.f32 %v4456_v21, %v4396_v0  ;;  %v3979_v21 = vadd.f32 %v11611_v26, %v3888_v51  ;;  %v3891_v26 = vadd.f32 %v11617_v14, %v11583_v57  ;;  %v4300_v14 = vpop.f32.mrf.mxu1 }
 0x88a   : > { %v4492_v16 = vadd.f32 %v11661_v30, %v4480_v19  ;;  %v4063_v58 = vadd.f32 %v11629_v40, %v3979_v21  ;;  %v3897_v21 = vadd.f32 %v11631_v59, %v11595_v20 }
 0x88c   : > { %v4500_v6 = vmax.f32 %v4492_v16, 0.0  ;;  %v4147_v47 = vadd.f32 %v11625_v49, %v4063_v58  ;;  %v3982_v20 = vadd.f32 %v11635_v25, %v3897_v21 }
 0x88d   : > { %v4375_v62 = vpop.f32.mrf.mxu2 }
 0x88e   : > { %v4459_v33 = vpop.f32.mrf.mxu3  ;;  %4528 = vst.msk [vmem:[#allocation3 + $0x11] sm:$0xff] %vm553_vm2, %v4500_v6  ;;  %v4397_v37 = vadd.f32 %v4375_v62, %v4313_v54  ;;  %v3980_v54 = vadd.f32 %v11619_v13, %v3891_v26  ;;  %v4231_v13 = vadd.f32 %v4215_v2, %v4147_v47  ;;  %v4066_v25 = vadd.f32 %v11652_v18, %v3982_v20 }
 0x890   : > { %v4481_v28 = vadd.f32 %v4459_v33, %v4397_v37  ;;  %v4064_v40 = vadd.f32 %v11637_v44, %v3980_v54  ;;  %v3894_v33 = vadd.f32 %v11623_v32, %v11589_v55  ;;  %v4316_v7 = vadd.f32 %v4300_v14, %v4231_v13  ;;  %v5033_v55 = vld [vmem:[#allocation9 + $0x68] sm:$0xff]  ;;  %v5117_v32 = vld [vmem:[#allocation9 + $0x78] sm:$0xff] }
 0x891   : > { %5072 = vmatpush.msra.mxu2 %v5033_v55  ;;  %5156 = vmatpush.msrb.mxu3 %v5117_v32  ;;  %v4150_v14 = vadd.f32 %v11654_v56, %v4066_v25 }
 0x892   : > { %v4493_v36 = vadd.f32 %v11661_v30, %v4481_v28  ;;  %v4148_v37 = vadd.f32 %v11633_v29, %v4064_v40  ;;  %v4949_v29 = vld [vmem:[#allocation9 + $0x58] sm:$0xff]  ;;  %v3981_v3 = vadd.f32 %v11627_v27, %v3894_v33 }
 0x893   : > { %4988 = vmatpush.msra.mxu1 %v4949_v29 }
 0x894   : > { %v4501_v35 = vmax.f32 %v4493_v36, 0.0  ;;  %v4065_v27 = vadd.f32 %v11641_v1, %v3981_v3  ;;  %v4221_v1 = vpop.f32.mrf.mxu0 }
 0x895   : > { %v4378_v5 = vpop.f32.mrf.mxu2  ;;  %v11675_v42 = vld [vmem:[#allocation3 + $0x11] sm:$0xff] }
 0x896   : > { %v4462_v10 = vpop.f32.mrf.mxu3  ;;  %v4537_v43 = vld [vmem:[#allocation3 + $0x10] sm:$0xff]  ;;  %4529 = vst.msk [vmem:[#allocation3 + $0x21] sm:$0xff] %vm553_vm2, %v4501_v35  ;;  %v4398_v39 = vadd.f32 %v4378_v5, %v4314_v24  ;;  %7120 = vmatmul.msk.f32.gmra.mxu0 %vm553_vm2, %v11675_v42  ;;  %v4232_v35 = vadd.f32 %v4218_v15, %v4148_v37  ;;  %v4149_v47 = vadd.f32 %v11643_v8, %v4065_v27 }
 0x897   : > { %v11677_v34 = vld [vmem:[#allocation3 + $0x12] sm:$0xff]  ;;  %7128 = vmatmul.msk.f32.gmra.mxu1 %vm553_vm2, %v4537_v43  ;;  %7143 = vmatmul.msk.f32.vlgmr.msra.gmra.mxu3 %vm553_vm2, %v4537_v43  ;;  %v4303_v43 = vpop.f32.mrf.mxu1 }
 0x898   : > { %7136 = vmatmul.msk.f32.gmra.mxu2 %vm553_vm2, %v11677_v34  ;;  %5305 = vst.msk [vmem:[#allocation3 + $0x10] sm:$0xff] %vm553_vm2, %v13153_v53  ;;  %v4482_v22 = vadd.f32 %v4462_v10, %v4398_v39  ;;  %v4948_v5 = vld [vmem:[#allocation9 + $0x50] sm:$0xff]  ;;  %v5032_v10 = vld [vmem:[#allocation9 + $0x60] sm:$0xff]  ;;  %v4317_v12 = vadd.f32 %v4303_v43, %v4232_v35 }
 0x899   : > { %5306 = vst.msk [vmem:[#allocation3 + $0x18] sm:$0x3] %vm3719_vm11, %v13153_v53  ;;  %5073 = vmatpush.msra.mxu2 %v5032_v10  ;;  %4989 = vmatpush.msra.mxu1 %v4948_v5  ;;  %v5116_v8 = vld [vmem:[#allocation9 + $0x70] sm:$0xff] }
 0x89a   : > { %v4494_v0 = vadd.f32 %v11661_v30, %v4482_v22  ;;  %5157 = vmatpush.msrb.mxu3 %v5116_v8 }
 0x89c   : > { %v4502_v19 = vmax.f32 %v4494_v0, 0.0  ;;  %v4224_v37 = vpop.f32.mrf.mxu0 }
 0x89d   : > { %v4381_v45 = vpop.f32.mrf.mxu2  ;;  %v11696_v16 = vld [vmem:[#allocation3 + $0x21] sm:$0xff]  ;;  %v4234_v56 = vadd.f32 %v4224_v37, %v4150_v14 }
 0x89e   : > { %v4465_v11 = vpop.f32.mrf.mxu3  ;;  %v11698_v31 = vld [vmem:[#allocation3 + $0x20] sm:$0xff]  ;;  %4530 = vst.msk [vmem:[#allocation3 + $0x31] sm:$0xff] %vm553_vm2, %v4502_v19  ;;  %v4399_v57 = vadd.f32 %v4381_v45, %v4315_v60  ;;  %7121 = vmatmul.msk.f32.gmra.mxu0 %vm553_vm2, %v11696_v16  ;;  %v5201_v19 = vld [vmem:[#allocation9 + $0x88] sm:$0xff] }
 0x89f   : > { %v11700_v6 = vld [vmem:[#allocation3 + $0x22] sm:$0xff]  ;;  %7129 = vmatmul.msk.f32.gmra.mxu1 %vm553_vm2, %v11698_v31  ;;  %7144 = vmatmul.msk.f32.gmra.mxu3 %vm553_vm2, %v11698_v31  ;;  %v4306_v45 = vpop.f32.mrf.mxu1 }
 0x8a0   : > { %7137 = vmatmul.msk.f32.gmra.mxu2 %vm553_vm2, %v11700_v6  ;;  %5307 = vst.msk [vmem:[#allocation3 + $0x20] sm:$0xff] %vm553_vm2, %v13153_v53  ;;  %v4483_v49 = vadd.f32 %v4465_v11, %v4399_v57  ;;  %5240 = vmatpush.msra.mxu0 %v5201_v19  ;;  %v4233_v11 = vadd.f32 %v4221_v1, %v4149_v47  ;;  %v5352_v1 = vld [vmem:[#allocation8 + $0xa8] sm:$0xff] }
 0x8a1   : > { %5308 = vst.msk [vmem:[#allocation3 + $0x28] sm:$0x3] %vm3719_vm11, %v13153_v53  ;;  %5391 = vmatpush.msrb.mxu1 %v5352_v1 }
 0x8a2   : > { %v4495_v62 = vadd.f32 %v11661_v30, %v4483_v49  ;;  %v4318_v57 = vadd.f32 %v4306_v45, %v4233_v11 }
 0x8a4   : > { %v4503_v38 = vmax.f32 %v4495_v62, 0.0 }
 0x8a5   : > { %v4384_v28 = vpop.f32.mrf.mxu2  ;;  %v11721_v4 = vld [vmem:[#allocation3 + $0x31] sm:$0xff] }
 0x8a6   : > { %v4468_v51 = vpop.f32.mrf.mxu3  ;;  %v11723_v36 = vld [vmem:[#allocation3 + $0x30] sm:$0xff]  ;;  %4531 = vst.msk [vmem:[#allocation3 + $0x41] sm:$0xff] %vm553_vm2, %v4503_v38  ;;  %v4400_v44 = vadd.f32 %v4384_v28, %v4316_v7  ;;  %7122 = vmatmul.msk.f32.gmra.mxu0 %vm553_vm2, %v11721_v4 }
 0x8a7   : > { %v11725_v17 = vld [vmem:[#allocation3 + $0x32] sm:$0xff]  ;;  %7130 = vmatmul.msk.f32.gmra.mxu1 %vm553_vm2, %v11723_v36  ;;  %7145 = vmatmul.msk.f32.gmra.mxu3 %vm553_vm2, %v11723_v36  ;;  %v4309_v7 = vpop.f32.mrf.mxu1 }
 0x8a8   : > { %7138 = vmatmul.msk.f32.gmra.mxu2 %vm553_vm2, %v11725_v17  ;;  %5309 = vst.msk [vmem:[#allocation3 + $0x30] sm:$0xff] %vm553_vm2, %v13153_v53  ;;  %v4484_v24 = vadd.f32 %v4468_v51, %v4400_v44  ;;  %v4319_v51 = vadd.f32 %v4309_v7, %v4234_v56 }
 0x8a9   : > { %5310 = vst.msk [vmem:[#allocation3 + $0x38] sm:$0x3] %vm3719_vm11, %v13153_v53 }
 0x8aa   : > { %v4496_v39 = vadd.f32 %v11661_v30, %v4484_v24 }
 0x8ac   : > { %v4504_v63 = vmax.f32 %v4496_v39, 0.0 }
 0x8ad   : > { %v4387_v22 = vpop.f32.mrf.mxu2  ;;  %v11745_v2 = vld [vmem:[#allocation3 + $0x41] sm:$0xff] }
 0x8ae   : > { %v4471_v26 = vpop.f32.mrf.mxu3  ;;  %v11747_v58 = vld [vmem:[#allocation3 + $0x40] sm:$0xff]  ;;  %4532 = vst.msk [vmem:[#allocation3 + $0x51] sm:$0xff] %vm553_vm2, %v4504_v63  ;;  %v4401_v59 = vadd.f32 %v4387_v22, %v4317_v12  ;;  %7123 = vmatmul.msk.f32.gmra.mxu0 %vm553_vm2, %v11745_v2 }
 0x8af   : > { %v11749_v0 = vld [vmem:[#allocation3 + $0x42] sm:$0xff]  ;;  %7131 = vmatmul.msk.f32.gmra.mxu1 %vm553_vm2, %v11747_v58  ;;  %7146 = vmatmul.msk.f32.gmra.mxu3 %vm553_vm2, %v11747_v58 }
 0x8b0   : > { %7139 = vmatmul.msk.f32.gmra.mxu2 %vm553_vm2, %v11749_v0  ;;  %5311 = vst.msk [vmem:[#allocation3 + $0x40] sm:$0xff] %vm553_vm2, %v13153_v53  ;;  %v4485_v60 = vadd.f32 %v4471_v26, %v4401_v59  ;;  %v5200_v63 = vld [vmem:[#allocation9 + $0x80] sm:$0xff]  ;;  %v5198_v26 = vld [vmem:[#allocation3 + $0x92] sm:$0xff] }
 0x8b1   : > { %5312 = vst.msk [vmem:[#allocation3 + $0x48] sm:$0x3] %vm3719_vm11, %v13153_v53  ;;  %5241 = vmatpush.msra.mxu0 %v5200_v63 }
 0x8b2   : > { %v4497_v54 = vadd.f32 %v11661_v30, %v4485_v60 }
 0x8b4   : > { %v4505_v13 = vmax.f32 %v4497_v54, 0.0 }
 0x8b5   : > { %v4390_v49 = vpop.f32.mrf.mxu2  ;;  %v11769_v62 = vld [vmem:[#allocation3 + $0x51] sm:$0xff] }
 0x8b6   : > { %v4474_v40 = vpop.f32.mrf.mxu3  ;;  %v4541_v33 = vld [vmem:[#allocation3 + $0x50] sm:$0xff]  ;;  %4533 = vst.msk [vmem:[#allocation3 + $0x61] sm:$0xff] %vm553_vm2, %v4505_v13  ;;  %v4402_v15 = vadd.f32 %v4390_v49, %v4318_v57  ;;  %7124 = vmatmul.msk.f32.gmra.mxu0 %vm553_vm2, %v11769_v62 }
 0x8b7   : > { %v11771_v18 = vld [vmem:[#allocation3 + $0x52] sm:$0xff]  ;;  %7132 = vmatmul.msk.f32.gmra.mxu1 %vm553_vm2, %v4541_v33  ;;  %7147 = vmatmul.msk.f32.gmra.mxu3 %vm553_vm2, %v4541_v33 }
 0x8b8   : > { %7140 = vmatmul.msk.f32.gmra.mxu2 %vm553_vm2, %v11771_v18  ;;  %5313 = vst.msk [vmem:[#allocation3 + $0x50] sm:$0xff] %vm553_vm2, %v13153_v53  ;;  %v4486_v38 = vadd.f32 %v4474_v40, %v4402_v15 }
 0x8b9   : > { %5314 = vst.msk [vmem:[#allocation3 + $0x58] sm:$0x3] %vm3719_vm11, %v13153_v53 }
 0x8ba   : > { %v4498_v28 = vadd.f32 %v11661_v30, %v4486_v38 }
 0x8bc   : > { %v4506_v44 = vmax.f32 %v4498_v28, 0.0 }
 0x8bd   : > { %v4393_v55 = vpop.f32.mrf.mxu2  ;;  %v4552_v32 = vld [vmem:[#allocation3 + $0x61] sm:$0xff] }
 0x8be   : > { %v4542_v29 = vld [vmem:[#allocation3 + $0x60] sm:$0xff]  ;;  %v4477_v35 = vpop.f32.mrf.mxu3  ;;  %4534 = vst.msk [vmem:[#allocation3 + $0x71] sm:$0xff] %vm553_vm2, %v4506_v44  ;;  %v4403_v24 = vadd.f32 %v4393_v55, %v4319_v51  ;;  %7125 = vmatmul.msk.f32.gmra.mxu0 %vm553_vm2, %v4552_v32  ;;  %v5341_v44 = vld [vmem:[#allocation8 + $0x98] sm:$0xff] }
 0x8bf   : > { %v11785_v3 = vld [vmem:[#allocation3 + $0x62] sm:$0xff]  ;;  %7133 = vmatmul.msk.f32.gmra.mxu1 %vm553_vm2, %v4542_v29  ;;  %7148 = vmatmul.msk.f32.gmra.mxu3 %vm553_vm2, %v4542_v29 }
 0x8c0   : > { %7141 = vmatmul.msk.f32.gmra.mxu2 %vm553_vm2, %v11785_v3  ;;  %5315 = vst.msk [vmem:[#allocation3 + $0x60] sm:$0xff] %vm553_vm2, %v13153_v53  ;;  %v4487_v5 = vadd.f32 %v4477_v35, %v4403_v24 }
 0x8c1   : > { %5316 = vst.msk [vmem:[#allocation3 + $0x68] sm:$0x3] %vm3719_vm11, %v13153_v53  ;;  %5456 = vmatpush.msrb.mxu2 %v5341_v44 }
 0x8c2   : > { %v4499_v10 = vadd.f32 %v11661_v30, %v4487_v5  ;;  %v5340_v5 = vld [vmem:[#allocation8 + $0x90] sm:$0xff] }
 0x8c3   : > { %5457 = vmatpush.msrb.mxu2 %v5340_v5 }
 0x8c4   : > { %v4507_v43 = vmax.f32 %v4499_v10, 0.0  ;;  %v5331_v10 = vld [vmem:[#allocation3] sm:$0xff] }
 0x8c5   : > { %v4553_v21 = vld [vmem:[#allocation3 + $0x71] sm:$0xff] }
 0x8c6   : > { %v4543_v39 = vld [vmem:[#allocation3 + $0x70] sm:$0xff]  ;;  %4535 = vst.msk [vmem:[#allocation3 + $0x81] sm:$0xff] %vm553_vm2, %v4507_v43  ;;  %7126 = vmatmul.msk.f32.gmra.mxu0 %vm553_vm2, %v4553_v21 }
 0x8c7   : > { %v11798_v27 = vld [vmem:[#allocation3 + $0x72] sm:$0xff]  ;;  %7134 = vmatmul.msk.f32.gmra.mxu1 %vm553_vm2, %v4543_v39  ;;  %7149 = vmatmul.msk.f32.gmra.mxu3 %vm553_vm2, %v4543_v39 }
 0x8c8   : > { %7142 = vmatmul.msk.f32.gmra.mxu2 %vm553_vm2, %v11798_v27  ;;  %5317 = vst.msk [vmem:[#allocation3 + $0x70] sm:$0xff] %vm553_vm2, %v13153_v53  ;;  %v5492_v43 = vld [vmem:[#allocation8 + $0xb0] sm:$0xff] }
 0x8c9   : > { %5318 = vst.msk [vmem:[#allocation3 + $0x78] sm:$0x3] %vm3719_vm11, %v13153_v53 }
 0x8cd   : > { %v4778_v30 = vld [vmem:[#allocation3 + $0x80] sm:$0xff] }
 0x8ce   : > { %7151 = vmatmul.msk.f32.vlgmr.msrb.gmra.mxu0 %vm553_vm2, %v11675_v42  ;;  %v4862_v42 = vld [vmem:[#allocation3 + $0x81] sm:$0xff] }
 0x8cf   : > { %7159 = vmatmul.msk.f32.vlgmr.msra.gmra.mxu1 %vm553_vm2, %v11677_v34  ;;  %7150 = vmatmul.msk.f32.gmra.mxu3 %vm553_vm2, %v4778_v30  ;;  %v4946_v34 = vld [vmem:[#allocation3 + $0x82] sm:$0xff] }
 0x8d0   : > { %7167 = vmatmul.msk.f32.vlgmr.msra.gmra.mxu2 %vm553_vm2, %v11698_v31  ;;  %5320 = vst.msk [vmem:[#allocation3 + $0x88] sm:$0x3] %vm3719_vm11, %v13153_v53  ;;  %v11865_v31 = vpop.f32.mrf.mxu0 }
 0x8d1   : > { %5319 = vst.msk [vmem:[#allocation3 + $0x80] sm:$0xff] %vm553_vm2, %v13153_v53 }
 0x8d6   : > { %7152 = vmatmul.msk.f32.gmra.mxu0 %vm553_vm2, %v11696_v16 }
 0x8d7   : > { %7160 = vmatmul.msk.f32.gmra.mxu1 %vm553_vm2, %v11700_v6  ;;  %7175 = vmatmul.msk.f32.vlgmr.msrb.gmra.mxu3 %vm553_vm2, %v11696_v16  ;;  %v5030_v16 = vld [vmem:[#allocation3 + $0x90] sm:$0xff] }
 0x8d8   : > { %7168 = vmatmul.msk.f32.gmra.mxu2 %vm553_vm2, %v11723_v36 }
 0x8de   : > { %7153 = vmatmul.msk.f32.gmra.mxu0 %vm553_vm2, %v11721_v4 }
 0x8df   : > { %7161 = vmatmul.msk.f32.gmra.mxu1 %vm553_vm2, %v11725_v17  ;;  %7176 = vmatmul.msk.f32.gmra.mxu3 %vm553_vm2, %v11721_v4  ;;  %v5114_v4 = vld [vmem:[#allocation3 + $0x91] sm:$0xff] }
 0x8e0   : > { %7169 = vmatmul.msk.f32.gmra.mxu2 %vm553_vm2, %v11747_v58  ;;  %5321 = vst.msk [vmem:[#allocation3 + $0x90] sm:$0xff] %vm553_vm2, %v13153_v53 }
 0x8e1   : > { %5322 = vst.msk [vmem:[#allocation3 + $0x98] sm:$0x3] %vm3719_vm11, %v13153_v53 }
 0x8e6   : > { %7154 = vmatmul.msk.f32.gmra.mxu0 %vm553_vm2, %v11745_v2 }
 0x8e7   : > { %7162 = vmatmul.msk.f32.gmra.mxu1 %vm553_vm2, %v11749_v0  ;;  %7177 = vmatmul.msk.f32.gmra.mxu3 %vm553_vm2, %v11745_v2  ;;  %v4663_v2 = vpop.f32.mrf.mxu1 }
 0x8e8   : > { %7170 = vmatmul.msk.f32.gmra.mxu2 %vm553_vm2, %v4541_v33  ;;  %v5351_v33 = vld [vmem:[#allocation8 + $0xa0] sm:$0xff] }
 0x8e9   : > { %5392 = vmatpush.msrb.mxu1 %v5351_v33 }
 0x8ee   : > { %7155 = vmatmul.msk.f32.gmra.mxu0 %vm553_vm2, %v11769_v62 }
 0x8ef   : > { %7163 = vmatmul.msk.f32.gmra.mxu1 %vm553_vm2, %v11771_v18  ;;  %7178 = vmatmul.msk.f32.gmra.mxu3 %vm553_vm2, %v11769_v62 }
 0x8f0   : > { %7171 = vmatmul.msk.f32.gmra.mxu2 %vm553_vm2, %v4542_v29 }
 0x8f6   : > { %7156 = vmatmul.msk.f32.gmra.mxu0 %vm553_vm2, %v4552_v32 }
 0x8f7   : > { %7164 = vmatmul.msk.f32.gmra.mxu1 %vm553_vm2, %v11785_v3  ;;  %7179 = vmatmul.msk.f32.gmra.mxu3 %vm553_vm2, %v4552_v32  ;;  %v5493_v32 = vld [vmem:[#allocation8 + $0xb8] sm:$0xff] }
 0x8f8   : > { %7172 = vmatmul.msk.f32.gmra.mxu2 %vm553_vm2, %v4543_v39  ;;  %5532 = vmatpush.msra.mxu3 %v5493_v32  ;;  %v5577_v39 = vld [vmem:[#allocation8 + $0xc8] sm:$0xff] }
 0x8f9   : > { %5616 = vmatpush.msrb.mxu0 %v5577_v39 }
 0x8fa   : > { %5533 = vmatpush.msra.mxu3 %v5492_v43 }
 0x8fe   : > { %7157 = vmatmul.msk.f32.gmra.mxu0 %vm553_vm2, %v4553_v21 }
 0x8ff   : > { %7165 = vmatmul.msk.f32.gmra.mxu1 %vm553_vm2, %v11798_v27  ;;  %7180 = vmatmul.msk.f32.gmra.mxu3 %vm553_vm2, %v4553_v21  ;;  %v5483_v21 = vld [vmem:[#allocation3 + $0x2] sm:$0xff] }
 0x900   : > { %7173 = vmatmul.msk.f32.gmra.mxu2 %vm553_vm2, %v4778_v30 }
 0x906   : > { %7158 = vmatmul.msk.f32.gmra.mxu0 %vm553_vm2, %v4862_v42 }
 0x907   : > { %7166 = vmatmul.msk.f32.gmra.mxu1 %vm553_vm2, %v4946_v34  ;;  %7181 = vmatmul.msk.f32.gmra.mxu3 %vm553_vm2, %v4862_v42  ;;  %v4664_v42 = vadd.f32 %v4663_v2, %v11865_v31 }
 0x908   : > { %7174 = vmatmul.msk.f32.gmra.mxu2 %vm553_vm2, %v5030_v16  ;;  %v5342_v16 = vld [vmem:[#allocation3 + $0x1] sm:$0xff] }
 0x909   : > { %6092 = vst.msk [vmem:[#allocation3] sm:$0xff] %vm553_vm2, %v13153_v53 }
 0x90a   : > { %6093 = vst.msk [vmem:[#allocation3 + $0x8] sm:$0x3] %vm3719_vm11, %v13153_v53 }
 0x90e   : > { %7183 = vmatmul.msk.f32.vlgmr.msra.gmra.mxu0 %vm553_vm2, %v11700_v6  ;;  %v11886_v6 = vpop.f32.mrf.mxu2 }
 0x90f   : > { %7182 = vmatmul.msk.f32.gmra.mxu3 %vm553_vm2, %v5114_v4  ;;  %v5661_v4 = vld [vmem:[#allocation8 + $0xd8] sm:$0xff]  ;;  %7191 = vmatmul.msk.f32.vlgmr.msrb.gmra.mxu1 %vm553_vm2, %v5342_v16 }
 0x910   : > { %7199 = vmatmul.msk.f32.vlgmr.msrb.gmra.mxu2 %vm553_vm2, %v5331_v10  ;;  %5700 = vmatpush.msra.mxu1 %v5661_v4  ;;  %v5576_v10 = vld [vmem:[#allocation8 + $0xc0] sm:$0xff] }
 0x911   : > { %5617 = vmatpush.msrb.mxu0 %v5576_v10 }
 0x913   : > { %v11870_v36 = vpop.f32.mrf.mxu0 }
 0x916   : > { %7184 = vmatmul.msk.f32.gmra.mxu0 %vm553_vm2, %v11725_v17 }
 0x917   : > { %7207 = vmatmul.msk.f32.vlgmr.msra.gmra.mxu3 %vm553_vm2, %v5483_v21 }
 0x91a   : > { %v11888_v17 = vpop.f32.mrf.mxu3 }
 0x91b   : > { %v11874_v12 = vpop.f32.mrf.mxu0  ;;  %v11896_v47 = vpop.f32.mrf.mxu2 }
 0x91e   : > { %7185 = vmatmul.msk.f32.gmra.mxu0 %vm553_vm2, %v11749_v0  ;;  %v11894_v0 = vpop.f32.mrf.mxu1 }
 0x91f   : > { %v4667_v5 = vadd.f32 %v11894_v0, %v11870_v36 }
 0x921   : > { %v4764_v43 = vadd.f32 %v11896_v47, %v4667_v5 }
 0x922   : > { %v11898_v20 = vpop.f32.mrf.mxu3 }
 0x923   : > { %v11878_v22 = vpop.f32.mrf.mxu0  ;;  %v11906_v8 = vpop.f32.mrf.mxu2  ;;  %v4848_v21 = vadd.f32 %v11898_v20, %v4764_v43 }
 0x926   : > { %7186 = vmatmul.msk.f32.gmra.mxu0 %vm553_vm2, %v11771_v18  ;;  %v11904_v19 = vpop.f32.mrf.mxu1 }
 0x927   : > { %v4670_v36 = vadd.f32 %v11904_v19, %v11874_v12 }
 0x929   : > { %v4765_v47 = vadd.f32 %v11906_v8, %v4670_v36 }
 0x92a   : > { %v11910_v60 = vpop.f32.mrf.mxu3 }
 0x92b   : > { %v11890_v58 = vpop.f32.mrf.mxu0  ;;  %v11917_v54 = vpop.f32.mrf.mxu2 }
 0x92e   : > { %7187 = vmatmul.msk.f32.gmra.mxu0 %vm553_vm2, %v11785_v3  ;;  %v11915_v11 = vpop.f32.mrf.mxu1 }
 0x92f   : > { %v4673_v12 = vadd.f32 %v11915_v11, %v11878_v22 }
 0x932   : > { %v11920_v57 = vpop.f32.mrf.mxu3 }
 0x933   : > { %v11900_v59 = vpop.f32.mrf.mxu0  ;;  %v11924_v49 = vpop.f32.mrf.mxu2 }
 0x936   : > { %7188 = vmatmul.msk.f32.gmra.mxu0 %vm553_vm2, %v11798_v27  ;;  %v11922_v13 = vpop.f32.mrf.mxu1 }
 0x93a   : > { %v11926_v40 = vpop.f32.mrf.mxu3 }
 0x93b   : > { %v11908_v25 = vpop.f32.mrf.mxu0  ;;  %v11930_v15 = vpop.f32.mrf.mxu2 }
 0x93e   : > { %7189 = vmatmul.msk.f32.gmra.mxu0 %vm553_vm2, %v4946_v34  ;;  %v11928_v18 = vpop.f32.mrf.mxu1 }
 0x942   : > { %v11932_v37 = vpop.f32.mrf.mxu3 }
 0x943   : > { %v11913_v45 = vpop.f32.mrf.mxu0  ;;  %v11938_v7 = vpop.f32.mrf.mxu2 }
 0x946   : > { %7190 = vmatmul.msk.f32.gmra.mxu0 %vm553_vm2, %v5198_v26  ;;  %v11936_v38 = vpop.f32.mrf.mxu1  ;;  %v4763_v26 = vadd.f32 %v11886_v6, %v4664_v42 }
 0x948   : > { %v4847_v1 = vadd.f32 %v11888_v17, %v4763_v26 }
 0x94a   : > { %v11942_v51 = vpop.f32.mrf.mxu3 }
 0x94b   : > { %v4907_v14 = vpop.f32.mrf.mxu0  ;;  %v11948_v3 = vpop.f32.mrf.mxu2 }
 0x94c   : > { %v4931_v31 = vadd.f32 %v4907_v14, %v4847_v1  ;;  %v11975_v14 = vld [vmem:[%s12664_s9] ss:$0 sm:$0xff] }
 0x94e   : > { %v11946_v29 = vpop.f32.mrf.mxu1 }
 0x952   : > { %v11950_v35 = vpop.f32.mrf.mxu3 }
 0x953   : > { %v4910_v62 = vpop.f32.mrf.mxu0  ;;  %v5075_v30 = vpop.f32.mrf.mxu2 }
 0x954   : > { %v4932_v42 = vadd.f32 %v4910_v62, %v4848_v21  ;;  %v4849_v62 = vadd.f32 %v11910_v60, %v4765_v47 }
 0x956   : > { %v4991_v27 = vpop.f32.mrf.mxu1 }
 0x957   : > { %v5015_v6 = vadd.f32 %v4991_v27, %v4931_v31 }
 0x959   : > { %v5099_v39 = vadd.f32 %v5075_v30, %v5015_v6 }
 0x95a   : > { %v5159_v63 = vpop.f32.mrf.mxu3 }
 0x95b   : > { %v11934_v56 = vpop.f32.mrf.mxu0  ;;  %v5078_v44 = vpop.f32.mrf.mxu2  ;;  %v5183_v16 = vadd.f32 %v5159_v63, %v5099_v39 }
 0x95c   : > { %v4933_v31 = vadd.f32 %v11934_v56, %v4849_v62 }
 0x95e   : > { %v4994_v33 = vpop.f32.mrf.mxu1 }
 0x95f   : > { %v5016_v27 = vadd.f32 %v4994_v33, %v4932_v42  ;;  %v4766_v33 = vadd.f32 %v11917_v54, %v4673_v12 }
 0x961   : > { %v5100_v30 = vadd.f32 %v5078_v44, %v5016_v27 }
 0x962   : > { %v5162_v2 = vpop.f32.mrf.mxu3 }
 0x963   : > { %v11940_v28 = vpop.f32.mrf.mxu0  ;;  %v5081_v4 = vpop.f32.mrf.mxu2  ;;  %v5184_v5 = vadd.f32 %v5162_v2, %v5100_v30  ;;  %v4850_v2 = vadd.f32 %v11920_v57, %v4766_v33  ;;  %v5660_v57 = vld [vmem:[#allocation8 + $0xd0] sm:$0xff] }
 0x964   : > { %5701 = vmatpush.msra.mxu1 %v5660_v57 }
 0x965   : > { %v4934_v22 = vadd.f32 %v11940_v28, %v4850_v2 }
 0x966   : > { %v4997_v17 = vpop.f32.mrf.mxu1 }
 0x96a   : > { %v5165_v1 = vpop.f32.mrf.mxu3 }
 0x96b   : > { %v11944_v55 = vpop.f32.mrf.mxu0  ;;  %v5084_v60 = vpop.f32.mrf.mxu2 }
 0x96e   : > { %v5000_v19 = vpop.f32.mrf.mxu1 }
 0x972   : > { %v5168_v56 = vpop.f32.mrf.mxu3 }
 0x973   : > { %v11952_v24 = vpop.f32.mrf.mxu0  ;;  %v5087_v36 = vpop.f32.mrf.mxu2 }
 0x976   : > { %v5003_v28 = vpop.f32.mrf.mxu1 }
 0x97a   : > { %v5171_v27 = vpop.f32.mrf.mxu3 }
 0x97b   : > { %v11957_v34 = vpop.f32.mrf.mxu0  ;;  %v5090_v33 = vpop.f32.mrf.mxu2 }
 0x983   : > { %v11966_v32 = vpop.f32.mrf.mxu0 }
 0x98b   : > { %v5243_v26 = vpop.f32.mrf.mxu0 }
 0x98c   : > { %v5267_v0 = vadd.f32 %v5243_v26, %v5183_v16 }
 0x98e   : > { %v5279_v20 = vadd.f32 %v11975_v14, %v5267_v0 }
 0x990   : > { %v11983_v63 = vadd.f32 %v5279_v20, %v11247_v23  ;;  %v5017_v23 = vadd.f32 %v4997_v17, %v4933_v31  ;;  %v4676_v17 = vadd.f32 %v11922_v13, %v11890_v58  ;;  %v5018_v13 = vadd.f32 %v5000_v19, %v4934_v22 }
 0x992   : > { %v12697_v10 = vmax.f32 %v11983_v63, 0.0  ;;  %v5101_v6 = vadd.f32 %v5081_v4, %v5017_v23  ;;  %v4767_v58 = vadd.f32 %v11924_v49, %v4676_v17 }
 0x993   : > { %v5246_v43 = vpop.f32.mrf.mxu0 }
 0x994   : > { %5323 = vst.msk [vmem:[#allocation3 + $0x11] sm:$0xff] %vm553_vm2, %v12697_v10  ;;  %v5268_v8 = vadd.f32 %v5246_v43, %v5184_v5  ;;  %v5185_v11 = vadd.f32 %v5165_v1, %v5101_v6  ;;  %v4851_v0 = vadd.f32 %v11926_v40, %v4767_v58  ;;  %v5102_v1 = vadd.f32 %v5084_v60, %v5018_v13 }
 0x995   : > { %v4679_v40 = vadd.f32 %v11928_v18, %v11900_v59 }
 0x996   : > { %v5280_v44 = vadd.f32 %v11975_v14, %v5268_v8  ;;  %v4935_v20 = vadd.f32 %v11944_v55, %v4851_v0  ;;  %v5186_v62 = vadd.f32 %v5168_v56, %v5102_v1  ;;  %v5006_v8 = vpop.f32.mrf.mxu1  ;;  %v5093_v1 = vpop.f32.mrf.mxu2 }
 0x997   : > { %v4768_v59 = vadd.f32 %v11930_v15, %v4679_v40  ;;  %v5174_v15 = vpop.f32.mrf.mxu3  ;;  %v5997_v40 = vld [vmem:[#allocation8 + $0x118] sm:$0xff] }
 0x998   : > { %v11996_v21 = vadd.f32 %v5280_v44, %v11353_v61  ;;  %v5019_v18 = vadd.f32 %v5003_v28, %v4935_v20  ;;  %6036 = vmatpush.msrb.mxu1 %v5997_v40 }
 0x999   : > { %v4852_v12 = vadd.f32 %v11932_v37, %v4768_v59  ;;  %v4682_v37 = vadd.f32 %v11936_v38, %v11908_v25  ;;  %v5913_v25 = vld [vmem:[#allocation8 + $0x108] sm:$0xff]  ;;  %v5744_v38 = vld [vmem:[#allocation8 + $0xe0] sm:$0xff] }
 0x99a   : > { %v12696_v39 = vmax.f32 %v11996_v21, 0.0  ;;  %v5103_v19 = vadd.f32 %v5087_v36, %v5019_v18  ;;  %5952 = vmatpush.msra.mxu0 %v5913_v25 }
 0x99b   : > { %v5249_v42 = vpop.f32.mrf.mxu0  ;;  %v12000_v16 = vld [vmem:[#allocation3 + $0x11] sm:$0xff]  ;;  %v4936_v23 = vadd.f32 %v11952_v24, %v4852_v12  ;;  %v5745_v24 = vld [vmem:[#allocation8 + $0xe8] sm:$0xff]  ;;  %v4769_v17 = vadd.f32 %v11938_v7, %v4682_v37 }
 0x99c   : > { %v5332_v26 = vld [vmem:[#allocation3 + $0x10] sm:$0xff]  ;;  %5324 = vst.msk [vmem:[#allocation3 + $0x21] sm:$0xff] %vm553_vm2, %v12696_v39  ;;  %v5269_v61 = vadd.f32 %v5249_v42, %v5185_v11  ;;  %7192 = vmatmul.msk.f32.gmra.mxu1 %vm553_vm2, %v12000_v16  ;;  %v5187_v44 = vadd.f32 %v5171_v27, %v5103_v19  ;;  %v5829_v42 = vld [vmem:[#allocation8 + $0xf8] sm:$0xff]  ;;  %5784 = vmatpush.msra.mxu2 %v5745_v24 }
 0x99d   : > { %v12002_v54 = vld [vmem:[#allocation3 + $0x12] sm:$0xff]  ;;  %7200 = vmatmul.msk.f32.gmra.mxu2 %vm553_vm2, %v5332_v26  ;;  %7215 = vmatmul.msk.f32.vlgmr.msrb.gmra.mxu0 %vm553_vm2, %v5332_v26  ;;  %v4853_v58 = vadd.f32 %v11942_v51, %v4769_v17 }
 0x99e   : > { %7208 = vmatmul.msk.f32.gmra.mxu3 %vm553_vm2, %v12002_v54  ;;  %6094 = vst.msk [vmem:[#allocation3 + $0x10] sm:$0xff] %vm553_vm2, %v13153_v53  ;;  %v5281_v4 = vadd.f32 %v11975_v14, %v5269_v61  ;;  %v5828_v26 = vld [vmem:[#allocation8 + $0xf0] sm:$0xff]  ;;  %v5020_v61 = vadd.f32 %v5006_v8, %v4936_v23  ;;  %5785 = vmatpush.msra.mxu2 %v5744_v38  ;;  %v5009_v7 = vpop.f32.mrf.mxu1 }
 0x99f   : > { %6095 = vst.msk [vmem:[#allocation3 + $0x18] sm:$0x3] %vm3719_vm11, %v13153_v53  ;;  %5868 = vmatpush.msrb.mxu3 %v5829_v42 }
 0x9a0   : > { %v12023_v47 = vadd.f32 %v5281_v4, %v11381_v48  ;;  %v5104_v13 = vadd.f32 %v5090_v33, %v5020_v61  ;;  %v4937_v4 = vadd.f32 %v11957_v34, %v4853_v58  ;;  %v5177_v34 = vpop.f32.mrf.mxu3 }
 0x9a1   : > { %5869 = vmatpush.msrb.mxu3 %v5828_v26 }
 0x9a2   : > { %v12695_v49 = vmax.f32 %v12023_v47, 0.0  ;;  %v5188_v36 = vadd.f32 %v5174_v15, %v5104_v13 }
 0x9a3   : > { %v5252_v30 = vpop.f32.mrf.mxu0  ;;  %v12027_v31 = vld [vmem:[#allocation3 + $0x21] sm:$0xff] }
 0x9a4   : > { %v12029_v5 = vld [vmem:[#allocation3 + $0x20] sm:$0xff]  ;;  %5325 = vst.msk [vmem:[#allocation3 + $0x31] sm:$0xff] %vm553_vm2, %v12695_v49  ;;  %v5270_v48 = vadd.f32 %v5252_v30, %v5186_v62  ;;  %7193 = vmatmul.msk.f32.gmra.mxu1 %vm553_vm2, %v12027_v31 }
 0x9a5   : > { %v12031_v43 = vld [vmem:[#allocation3 + $0x22] sm:$0xff]  ;;  %7201 = vmatmul.msk.f32.gmra.mxu2 %vm553_vm2, %v12029_v5  ;;  %7216 = vmatmul.msk.f32.gmra.mxu0 %vm553_vm2, %v12029_v5 }
 0x9a6   : > { %7209 = vmatmul.msk.f32.gmra.mxu3 %vm553_vm2, %v12031_v43  ;;  %6097 = vst.msk [vmem:[#allocation3 + $0x28] sm:$0x3] %vm3719_vm11, %v13153_v53  ;;  %v5282_v55 = vadd.f32 %v11975_v14, %v5270_v48  ;;  %v5021_v48 = vadd.f32 %v5009_v7, %v4937_v4 }
 0x9a7   : > { %6096 = vst.msk [vmem:[#allocation3 + $0x20] sm:$0xff] %vm553_vm2, %v13153_v53 }
 0x9a8   : > { %v12054_v60 = vadd.f32 %v5282_v55, %v11397_v9  ;;  %v5105_v55 = vadd.f32 %v5093_v1, %v5021_v48 }
 0x9aa   : > { %v12694_v56 = vmax.f32 %v12054_v60, 0.0  ;;  %v5189_v8 = vadd.f32 %v5177_v34, %v5105_v55 }
 0x9ab   : > { %v5255_v2 = vpop.f32.mrf.mxu0  ;;  %v12058_v6 = vld [vmem:[#allocation3 + $0x31] sm:$0xff] }
 0x9ac   : > { %v12060_v22 = vld [vmem:[#allocation3 + $0x30] sm:$0xff]  ;;  %5326 = vst.msk [vmem:[#allocation3 + $0x41] sm:$0xff] %vm553_vm2, %v12694_v56  ;;  %v5271_v9 = vadd.f32 %v5255_v2, %v5187_v44  ;;  %7194 = vmatmul.msk.f32.gmra.mxu1 %vm553_vm2, %v12058_v6 }
 0x9ad   : > { %v12062_v11 = vld [vmem:[#allocation3 + $0x32] sm:$0xff]  ;;  %7202 = vmatmul.msk.f32.gmra.mxu2 %vm553_vm2, %v12060_v22  ;;  %7217 = vmatmul.msk.f32.gmra.mxu0 %vm553_vm2, %v12060_v22 }
 0x9ae   : > { %7210 = vmatmul.msk.f32.gmra.mxu3 %vm553_vm2, %v12062_v11  ;;  %6098 = vst.msk [vmem:[#allocation3 + $0x30] sm:$0xff] %vm553_vm2, %v13153_v53  ;;  %v5283_v57 = vadd.f32 %v11975_v14, %v5271_v9  ;;  %v5180_v9 = vpop.f32.mrf.mxu3 }
 0x9af   : > { %6099 = vst.msk [vmem:[#allocation3 + $0x38] sm:$0x3] %vm3719_vm11, %v13153_v53 }
 0x9b0   : > { %v12085_v28 = vadd.f32 %v5283_v57, %v11427_v52  ;;  %v4685_v52 = vadd.f32 %v11946_v29, %v11913_v45  ;;  %v5912_v45 = vld [vmem:[#allocation8 + $0x100] sm:$0xff] }
 0x9b1   : > { %5953 = vmatpush.msra.mxu0 %v5912_v45 }
 0x9b2   : > { %v12693_v0 = vmax.f32 %v12085_v28, 0.0  ;;  %v4770_v29 = vadd.f32 %v11948_v3, %v4685_v52 }
 0x9b3   : > { %v5258_v27 = vpop.f32.mrf.mxu0  ;;  %v12089_v20 = vld [vmem:[#allocation3 + $0x41] sm:$0xff] }
 0x9b4   : > { %v12091_v62 = vld [vmem:[#allocation3 + $0x40] sm:$0xff]  ;;  %5327 = vst.msk [vmem:[#allocation3 + $0x51] sm:$0xff] %vm553_vm2, %v12693_v0  ;;  %v5272_v51 = vadd.f32 %v5258_v27, %v5188_v36  ;;  %7195 = vmatmul.msk.f32.gmra.mxu1 %vm553_vm2, %v12089_v20  ;;  %v4854_v18 = vadd.f32 %v11950_v35, %v4770_v29  ;;  %v6141_v29 = vld [vmem:[#allocation9 + $0xa8] sm:$0xff] }
 0x9b5   : > { %v12093_v30 = vld [vmem:[#allocation3 + $0x42] sm:$0xff]  ;;  %7203 = vmatmul.msk.f32.gmra.mxu2 %vm553_vm2, %v12091_v62  ;;  %7218 = vmatmul.msk.f32.gmra.mxu0 %vm553_vm2, %v12091_v62 }
 0x9b6   : > { %7211 = vmatmul.msk.f32.gmra.mxu3 %vm553_vm2, %v12093_v30  ;;  %6100 = vst.msk [vmem:[#allocation3 + $0x40] sm:$0xff] %vm553_vm2, %v13153_v53  ;;  %v5284_v59 = vadd.f32 %v11975_v14, %v5272_v51  ;;  %v4938_v19 = vadd.f32 %v11966_v32, %v4854_v18  ;;  %v5096_v32 = vpop.f32.mrf.mxu2  ;;  %6180 = vmatpush.msrb.mxu2 %v6141_v29  ;;  %v6450_v29 = vld [vmem:[#allocation9 + $0xd8] sm:$0xff] }
 0x9b7   : > { %6101 = vst.msk [vmem:[#allocation3 + $0x48] sm:$0x3] %vm3719_vm11, %v13153_v53 }
 0x9b8   : > { %v12116_v12 = vadd.f32 %v5284_v59, %v11458_v50  ;;  %v5012_v50 = vpop.f32.mrf.mxu1 }
 0x9b9   : > { %v5022_v2 = vadd.f32 %v5012_v50, %v4938_v19 }
 0x9ba   : > { %v12692_v33 = vmax.f32 %v12116_v12, 0.0 }
 0x9bb   : > { %v5261_v3 = vpop.f32.mrf.mxu0  ;;  %v12120_v23 = vld [vmem:[#allocation3 + $0x51] sm:$0xff]  ;;  %v5106_v24 = vadd.f32 %v5096_v32, %v5022_v2  ;;  %v6140_v2 = vld [vmem:[#allocation9 + $0xa0] sm:$0xff] }
 0x9bc   : > { %v12122_v44 = vld [vmem:[#allocation3 + $0x50] sm:$0xff]  ;;  %5328 = vst.msk [vmem:[#allocation3 + $0x61] sm:$0xff] %vm553_vm2, %v12692_v33  ;;  %v5273_v35 = vadd.f32 %v5261_v3, %v5189_v8  ;;  %7196 = vmatmul.msk.f32.gmra.mxu1 %vm553_vm2, %v12120_v23  ;;  %6181 = vmatpush.msrb.mxu2 %v6140_v2 }
 0x9bd   : > { %v12124_v15 = vld [vmem:[#allocation3 + $0x52] sm:$0xff]  ;;  %7204 = vmatmul.msk.f32.gmra.mxu2 %vm553_vm2, %v12122_v44  ;;  %7219 = vmatmul.msk.f32.gmra.mxu0 %vm553_vm2, %v12122_v44  ;;  %v5190_v25 = vadd.f32 %v5180_v9, %v5106_v24 }
 0x9be   : > { %7212 = vmatmul.msk.f32.gmra.mxu3 %vm553_vm2, %v12124_v15  ;;  %6102 = vst.msk [vmem:[#allocation3 + $0x50] sm:$0xff] %vm553_vm2, %v13153_v53  ;;  %v5285_v37 = vadd.f32 %v11975_v14, %v5273_v35 }
 0x9bf   : > { %6103 = vst.msk [vmem:[#allocation3 + $0x58] sm:$0x3] %vm3719_vm11, %v13153_v53 }
 0x9c0   : > { %v12143_v42 = vadd.f32 %v5285_v37, %v11480_v46 }
 0x9c2   : > { %v12691_v38 = vmax.f32 %v12143_v42, 0.0 }
 0x9c3   : > { %v5264_v26 = vpop.f32.mrf.mxu0  ;;  %v5348_v17 = vld [vmem:[#allocation3 + $0x61] sm:$0xff] }
 0x9c4   : > { %v5337_v61 = vld [vmem:[#allocation3 + $0x60] sm:$0xff]  ;;  %5329 = vst.msk [vmem:[#allocation3 + $0x71] sm:$0xff] %vm553_vm2, %v12691_v38  ;;  %v5274_v58 = vadd.f32 %v5264_v26, %v5190_v25  ;;  %7197 = vmatmul.msk.f32.gmra.mxu1 %vm553_vm2, %v5348_v17 }
 0x9c5   : > { %v12146_v57 = vld [vmem:[#allocation3 + $0x62] sm:$0xff]  ;;  %7205 = vmatmul.msk.f32.gmra.mxu2 %vm553_vm2, %v5337_v61  ;;  %7220 = vmatmul.msk.f32.gmra.mxu0 %vm553_vm2, %v5337_v61 }
 0x9c6   : > { %7213 = vmatmul.msk.f32.gmra.mxu3 %vm553_vm2, %v12146_v57  ;;  %6104 = vst.msk [vmem:[#allocation3 + $0x60] sm:$0xff] %vm553_vm2, %v13153_v53  ;;  %v5286_v46 = vadd.f32 %v11975_v14, %v5274_v58  ;;  %v5996_v14 = vld [vmem:[#allocation8 + $0x110] sm:$0xff]  ;;  %v6365_v38 = vld [vmem:[#allocation9 + $0xc0] sm:$0xff] }
 0x9c7   : > { %6105 = vst.msk [vmem:[#allocation3 + $0x68] sm:$0x3] %vm3719_vm11, %v13153_v53  ;;  %6037 = vmatpush.msrb.mxu1 %v5996_v14  ;;  %v6282_v14 = vld [vmem:[#allocation9 + $0xb8] sm:$0xff] }
 0x9c8   : > { %v12162_v13 = vadd.f32 %v5286_v46, %v11540_v41  ;;  %6321 = vmatpush.msrb.mxu0 %v6282_v14  ;;  %v6366_v14 = vld [vmem:[#allocation9 + $0xc8] sm:$0xff] }
 0x9ca   : > { %13159 = vst [vmem:[#allocation59_spill] sm:$0xff] %v12162_v13  ;;  %v12690_v4 = vmax.f32 %v12162_v13, 0.0 }
 0x9cb   : > { %v5349_v7 = vld [vmem:[#allocation3 + $0x71] sm:$0xff] }
 0x9cc   : > { %v5338_v36 = vld [vmem:[#allocation3 + $0x70] sm:$0xff]  ;;  %5330 = vst.msk [vmem:[#allocation3 + $0x81] sm:$0xff] %vm553_vm2, %v12690_v4  ;;  %7198 = vmatmul.msk.f32.gmra.mxu1 %vm553_vm2, %v5349_v7 }
 0x9cd   : > { %v12165_v1 = vld [vmem:[#allocation3 + $0x72] sm:$0xff]  ;;  %7206 = vmatmul.msk.f32.gmra.mxu2 %vm553_vm2, %v5338_v36  ;;  %7221 = vmatmul.msk.f32.gmra.mxu0 %vm553_vm2, %v5338_v36 }
 0x9ce   : > { %7214 = vmatmul.msk.f32.gmra.mxu3 %vm553_vm2, %v12165_v1  ;;  %6106 = vst.msk [vmem:[#allocation3 + $0x70] sm:$0xff] %vm553_vm2, %v13153_v53 }
 0x9cf   : > { %6107 = vst.msk [vmem:[#allocation3 + $0x78] sm:$0x3] %vm3719_vm11, %v13153_v53 }
 0x9d3   : > { %v5574_v41 = vld [vmem:[#allocation3 + $0x80] sm:$0xff] }
 0x9d4   : > { %7223 = vmatmul.msk.f32.vlgmr.msra.gmra.mxu1 %vm553_vm2, %v12000_v16  ;;  %v5658_v16 = vld [vmem:[#allocation3 + $0x81] sm:$0xff] }
 0x9d5   : > { %7231 = vmatmul.msk.f32.vlgmr.msra.gmra.mxu2 %vm553_vm2, %v12002_v54  ;;  %7222 = vmatmul.msk.f32.gmra.mxu0 %vm553_vm2, %v5574_v41  ;;  %v5742_v54 = vld [vmem:[#allocation3 + $0x82] sm:$0xff] }
 0x9d6   : > { %7239 = vmatmul.msk.f32.vlgmr.msrb.gmra.mxu3 %vm553_vm2, %v12029_v5  ;;  %6109 = vst.msk [vmem:[#allocation3 + $0x88] sm:$0x3] %vm3719_vm11, %v13153_v53  ;;  %v12235_v5 = vpop.f32.mrf.mxu1  ;;  %6489 = vmatpush.msra.mxu2 %v6450_v29 }
 0x9d7   : > { %6108 = vst.msk [vmem:[#allocation3 + $0x80] sm:$0xff] %vm553_vm2, %v13153_v53  ;;  %6405 = vmatpush.msra.mxu1 %v6366_v14 }
 0x9d9   : > { %6406 = vmatpush.msra.mxu1 %v6365_v38 }
 0x9dc   : > { %7224 = vmatmul.msk.f32.gmra.mxu1 %vm553_vm2, %v12027_v31 }
 0x9dd   : > { %7232 = vmatmul.msk.f32.gmra.mxu2 %vm553_vm2, %v12031_v43  ;;  %7247 = vmatmul.msk.f32.vlgmr.msra.gmra.mxu0 %vm553_vm2, %v12027_v31  ;;  %v5826_v31 = vld [vmem:[#allocation3 + $0x90] sm:$0xff] }
 0x9de   : > { %7240 = vmatmul.msk.f32.gmra.mxu3 %vm553_vm2, %v12060_v22 }
 0x9e4   : > { %7225 = vmatmul.msk.f32.gmra.mxu1 %vm553_vm2, %v12058_v6 }
 0x9e5   : > { %7233 = vmatmul.msk.f32.gmra.mxu2 %vm553_vm2, %v12062_v11  ;;  %7248 = vmatmul.msk.f32.gmra.mxu0 %vm553_vm2, %v12058_v6  ;;  %v5910_v6 = vld [vmem:[#allocation3 + $0x91] sm:$0xff] }
 0x9e6   : > { %7241 = vmatmul.msk.f32.gmra.mxu3 %vm553_vm2, %v12091_v62 }
 0x9ec   : > { %7226 = vmatmul.msk.f32.gmra.mxu1 %vm553_vm2, %v12089_v20 }
 0x9ed   : > { %7234 = vmatmul.msk.f32.gmra.mxu2 %vm553_vm2, %v12093_v30  ;;  %7249 = vmatmul.msk.f32.gmra.mxu0 %vm553_vm2, %v12089_v20  ;;  %v12248_v20 = vpop.f32.mrf.mxu2 }
 0x9ee   : > { %7242 = vmatmul.msk.f32.gmra.mxu3 %vm553_vm2, %v12122_v44  ;;  %v5460_v4 = vadd.f32 %v12248_v20, %v12235_v5 }
 0x9f4   : > { %7227 = vmatmul.msk.f32.gmra.mxu1 %vm553_vm2, %v12120_v23 }
 0x9f5   : > { %7235 = vmatmul.msk.f32.gmra.mxu2 %vm553_vm2, %v12124_v15  ;;  %7250 = vmatmul.msk.f32.gmra.mxu0 %vm553_vm2, %v12120_v23 }
 0x9f6   : > { %7243 = vmatmul.msk.f32.gmra.mxu3 %vm553_vm2, %v5337_v61 }
 0x9fc   : > { %7228 = vmatmul.msk.f32.gmra.mxu1 %vm553_vm2, %v5348_v17 }
 0x9fd   : > { %7236 = vmatmul.msk.f32.gmra.mxu2 %vm553_vm2, %v12146_v57  ;;  %7251 = vmatmul.msk.f32.gmra.mxu0 %vm553_vm2, %v5348_v17 }
 0x9fe   : > { %7244 = vmatmul.msk.f32.gmra.mxu3 %vm553_vm2, %v5338_v36 }
 0xa04   : > { %7229 = vmatmul.msk.f32.gmra.mxu1 %vm553_vm2, %v5349_v7 }
 0xa05   : > { %7237 = vmatmul.msk.f32.gmra.mxu2 %vm553_vm2, %v12165_v1  ;;  %7252 = vmatmul.msk.f32.gmra.mxu0 %vm553_vm2, %v5349_v7 }
 0xa06   : > { %7245 = vmatmul.msk.f32.gmra.mxu3 %vm553_vm2, %v5574_v41  ;;  %v6129_v41 = vld [vmem:[#allocation9 + $0x90] sm:$0xff] }
 0xa0c   : > { %7230 = vmatmul.msk.f32.gmra.mxu1 %vm553_vm2, %v5658_v16 }
 0xa0d   : > { %7238 = vmatmul.msk.f32.gmra.mxu2 %vm553_vm2, %v5742_v54  ;;  %7253 = vmatmul.msk.f32.gmra.mxu0 %vm553_vm2, %v5658_v16 }
 0xa0e   : > { %7246 = vmatmul.msk.f32.gmra.mxu3 %vm553_vm2, %v5826_v31  ;;  %v6120_v31 = vld [vmem:[#allocation3] sm:$0xff] }
 0xa14   : > { %7255 = vmatmul.msk.f32.vlgmr.msrb.gmra.mxu1 %vm553_vm2, %v12031_v43  ;;  %v5994_v43 = vld [vmem:[#allocation3 + $0x92] sm:$0xff] }
 0xa15   : > { %7254 = vmatmul.msk.f32.gmra.mxu0 %vm553_vm2, %v5910_v6  ;;  %6110 = vst.msk [vmem:[#allocation3 + $0x90] sm:$0xff] %vm553_vm2, %v13153_v53  ;;  %v6281_v6 = vld [vmem:[#allocation9 + $0xb0] sm:$0xff] }
 0xa16   : > { %6111 = vst.msk [vmem:[#allocation3 + $0x98] sm:$0x3] %vm3719_vm11, %v13153_v53  ;;  %6322 = vmatpush.msrb.mxu0 %v6281_v6 }
 0xa19   : > { %v12240_v22 = vpop.f32.mrf.mxu1 }
 0xa1a   : > { %v12260_v52 = vpop.f32.mrf.mxu0 }
 0xa1c   : > { %7256 = vmatmul.msk.f32.gmra.mxu1 %vm553_vm2, %v12062_v11  ;;  %v12258_v11 = vpop.f32.mrf.mxu3 }
 0xa20   : > { %v12262_v51 = vpop.f32.mrf.mxu2 }
 0xa21   : > { %v12244_v27 = vpop.f32.mrf.mxu1 }
 0xa22   : > { %v12272_v45 = vpop.f32.mrf.mxu0 }
 0xa24   : > { %7257 = vmatmul.msk.f32.gmra.mxu1 %vm553_vm2, %v12093_v30  ;;  %v12268_v34 = vpop.f32.mrf.mxu3 }
 0xa28   : > { %v12274_v48 = vpop.f32.mrf.mxu2 }
 0xa29   : > { %v12250_v62 = vpop.f32.mrf.mxu1 }
 0xa2a   : > { %v12282_v18 = vpop.f32.mrf.mxu0 }
 0xa2c   : > { %7258 = vmatmul.msk.f32.gmra.mxu1 %vm553_vm2, %v12124_v15  ;;  %v12278_v53 = vpop.f32.mrf.mxu3 }
 0xa30   : > { %v12285_v55 = vpop.f32.mrf.mxu2 }
 0xa31   : > { %v12264_v30 = vpop.f32.mrf.mxu1 }
 0xa32   : > { %v12292_v3 = vpop.f32.mrf.mxu0 }
 0xa34   : > { %7259 = vmatmul.msk.f32.gmra.mxu1 %vm553_vm2, %v12146_v57  ;;  %v12289_v8 = vpop.f32.mrf.mxu3 }
 0xa38   : > { %v12294_v23 = vpop.f32.mrf.mxu2 }
 0xa39   : > { %v12270_v40 = vpop.f32.mrf.mxu1 }
 0xa3a   : > { %v12298_v35 = vpop.f32.mrf.mxu0 }
 0xa3c   : > { %7260 = vmatmul.msk.f32.gmra.mxu1 %vm553_vm2, %v12165_v1  ;;  %v12296_v15 = vpop.f32.mrf.mxu3  ;;  %v6130_v1 = vld [vmem:[#allocation9 + $0x98] sm:$0xff] }
 0xa3d   : > { %6245 = vmatpush.msra.mxu3 %v6130_v1 }
 0xa3f   : > { %6246 = vmatpush.msra.mxu3 %v6129_v41 }
 0xa40   : > { %v12300_v50 = vpop.f32.mrf.mxu2  ;;  %7272 = vmatmul.msk.f32.vlgmr.msra.gmra.mxu3 %vm553_vm2, %v6120_v31  ;;  %v5463_v31 = vadd.f32 %v12262_v51, %v12240_v22  ;;  %v12347_v51 = vld [vmem:[%s12662_s7 + $0x1] ss:$0 sm:$0xff] }
 0xa41   : > { %v12280_v59 = vpop.f32.mrf.mxu1 }
 0xa42   : > { %v12306_v24 = vpop.f32.mrf.mxu0  ;;  %v5560_v29 = vadd.f32 %v12268_v34, %v5463_v31 }
 0xa44   : > { %7261 = vmatmul.msk.f32.gmra.mxu1 %vm553_vm2, %v5742_v54  ;;  %v12302_v37 = vpop.f32.mrf.mxu3  ;;  %v6131_v54 = vld [vmem:[#allocation3 + $0x1] sm:$0xff]  ;;  %v5644_v39 = vadd.f32 %v12272_v45, %v5560_v29  ;;  %v5469_v45 = vadd.f32 %v12285_v55, %v12250_v62  ;;  %v5472_v55 = vadd.f32 %v12294_v23, %v12264_v30 }
 0xa45   : > { %7264 = vmatmul.msk.f32.vlgmr.msrb.gmra.mxu2 %vm553_vm2, %v6131_v54  ;;  %v5559_v54 = vadd.f32 %v12258_v11, %v5460_v4  ;;  %v5466_v4 = vadd.f32 %v12274_v48, %v12244_v27 }
 0xa47   : > { %v5643_v41 = vadd.f32 %v12260_v52, %v5559_v54  ;;  %v5561_v52 = vadd.f32 %v12278_v53, %v5466_v4 }
 0xa48   : > { %v12308_v25 = vpop.f32.mrf.mxu2 }
 0xa49   : > { %v12287_v19 = vpop.f32.mrf.mxu1  ;;  %v5645_v54 = vadd.f32 %v12282_v18, %v5561_v52  ;;  %v5563_v52 = vadd.f32 %v12296_v15, %v5472_v55  ;;  %v5475_v15 = vadd.f32 %v12300_v50, %v12270_v40 }
 0xa4a   : > { %v12314_v61 = vpop.f32.mrf.mxu0 }
 0xa4c   : > { %7262 = vmatmul.msk.f32.gmra.mxu1 %vm553_vm2, %v5994_v43  ;;  %v12310_v26 = vpop.f32.mrf.mxu3  ;;  %v6272_v43 = vld [vmem:[#allocation3 + $0x2] sm:$0xff] }
 0xa4d   : > { %7280 = vmatmul.msk.f32.vlgmr.msrb.gmra.mxu0 %vm553_vm2, %v6272_v43 }
 0xa50   : > { %v12316_v57 = vpop.f32.mrf.mxu2 }
 0xa51   : > { %v5703_v44 = vpop.f32.mrf.mxu1 }
 0xa52   : > { %v12322_v7 = vpop.f32.mrf.mxu0  ;;  %v5727_v6 = vadd.f32 %v5703_v44, %v5643_v41 }
 0xa54   : > { %v12320_v46 = vpop.f32.mrf.mxu3 }
 0xa58   : > { %v5787_v36 = vpop.f32.mrf.mxu2 }
 0xa59   : > { %v5706_v32 = vpop.f32.mrf.mxu1  ;;  %v5811_v5 = vadd.f32 %v5787_v36, %v5727_v6  ;;  %v6449_v6 = vld [vmem:[#allocation9 + $0xd0] sm:$0xff] }
 0xa5a   : > { %v5955_v1 = vpop.f32.mrf.mxu0  ;;  %v5728_v11 = vadd.f32 %v5706_v32, %v5644_v39  ;;  %6490 = vmatpush.msra.mxu2 %v6449_v6 }
 0xa5c   : > { %v5871_v2 = vpop.f32.mrf.mxu3 }
 0xa5d   : > { %v5895_v38 = vadd.f32 %v5871_v2, %v5811_v5  ;;  %v5562_v2 = vadd.f32 %v12289_v8, %v5469_v45 }
 0xa5f   : > { %v5979_v14 = vadd.f32 %v5955_v1, %v5895_v38  ;;  %v5646_v62 = vadd.f32 %v12292_v3, %v5562_v2 }
 0xa60   : > { %v5790_v33 = vpop.f32.mrf.mxu2 }
 0xa61   : > { %v12304_v9 = vpop.f32.mrf.mxu1  ;;  %v5812_v22 = vadd.f32 %v5790_v33, %v5728_v11 }
 0xa62   : > { %v5958_v56 = vpop.f32.mrf.mxu0  ;;  %v5729_v33 = vadd.f32 %v12304_v9, %v5645_v54 }
 0xa64   : > { %v5874_v43 = vpop.f32.mrf.mxu3 }
 0xa65   : > { %v5896_v27 = vadd.f32 %v5874_v43, %v5812_v22 }
 0xa67   : > { %v5980_v1 = vadd.f32 %v5958_v56, %v5896_v27 }
 0xa68   : > { %v5793_v49 = vpop.f32.mrf.mxu2 }
 0xa69   : > { %v12312_v17 = vpop.f32.mrf.mxu1  ;;  %v5813_v41 = vadd.f32 %v5793_v49, %v5729_v33 }
 0xa6a   : > { %v5961_v48 = vpop.f32.mrf.mxu0  ;;  %v5730_v5 = vadd.f32 %v12312_v17, %v5646_v62  ;;  %v5647_v17 = vadd.f32 %v12298_v35, %v5563_v52 }
 0xa6c   : > { %v5877_v34 = vpop.f32.mrf.mxu3 }
 0xa6d   : > { %v5897_v43 = vadd.f32 %v5877_v34, %v5813_v41 }
 0xa70   : > { %v5796_v53 = vpop.f32.mrf.mxu2 }
 0xa71   : > { %v12318_v58 = vpop.f32.mrf.mxu1  ;;  %v5814_v3 = vadd.f32 %v5796_v53, %v5730_v5  ;;  %v6617_v5 = vld [vmem:[#allocation9 + $0xf0] sm:$0xff] }
 0xa72   : > { %v5964_v8 = vpop.f32.mrf.mxu0 }
 0xa74   : > { %v5880_v29 = vpop.f32.mrf.mxu3 }
 0xa75   : > { %v5898_v22 = vadd.f32 %v5880_v29, %v5814_v3 }
 0xa77   : > { %v5982_v53 = vadd.f32 %v5964_v8, %v5898_v22 }
 0xa78   : > { %v5799_v49 = vpop.f32.mrf.mxu2 }
 0xa79   : > { %v12324_v16 = vpop.f32.mrf.mxu1 }
 0xa7a   : > { %v5967_v33 = vpop.f32.mrf.mxu0 }
 0xa80   : > { %v5802_v40 = vpop.f32.mrf.mxu2 }
 0xa81   : > { %v12331_v0 = vpop.f32.mrf.mxu1 }
 0xa89   : > { %v12338_v20 = vpop.f32.mrf.mxu1 }
 0xa91   : > { %v6039_v44 = vpop.f32.mrf.mxu1 }
 0xa92   : > { %v6063_v36 = vadd.f32 %v6039_v44, %v5979_v14  ;;  %v5981_v14 = vadd.f32 %v5961_v48, %v5897_v43  ;;  %v5883_v44 = vpop.f32.mrf.mxu3 }
 0xa94   : > { %v6076_v39 = vadd.f32 %v12347_v51, %v6063_v36  ;;  %v5731_v36 = vadd.f32 %v12318_v58, %v5647_v17  ;;  %v5478_v58 = vadd.f32 %v12308_v25, %v12280_v59  ;;  %v6618_v25 = vld [vmem:[#allocation9 + $0xf8] sm:$0xff] }
 0xa95   : > { %6657 = vmatpush.msra.mxu0 %v6618_v25 }
 0xa96   : > { %v6084_v32 = vmax.f32 %v6076_v39, 0.0  ;;  %v5564_v39 = vadd.f32 %v12302_v37, %v5475_v15  ;;  %v5815_v35 = vadd.f32 %v5799_v49, %v5731_v36  ;;  %v5565_v6 = vadd.f32 %v12310_v26, %v5478_v58  ;;  %v6533_v26 = vld [vmem:[#allocation9 + $0xe0] sm:$0xff]  ;;  %v5805_v49 = vpop.f32.mrf.mxu2 }
 0xa97   : > { %6658 = vmatpush.msra.mxu0 %v6617_v5 }
 0xa98   : > { %6112 = vst.msk [vmem:[#allocation3 + $0x11] sm:$0xff] %vm553_vm2, %v6084_v32  ;;  %v5648_v32 = vadd.f32 %v12306_v24, %v5564_v39  ;;  %v5899_v2 = vadd.f32 %v5883_v44, %v5815_v35  ;;  %v6534_v24 = vld [vmem:[#allocation9 + $0xe8] sm:$0xff]  ;;  %v5649_v8 = vadd.f32 %v12314_v61, %v5565_v6  ;;  %v6701_v44 = vld [vmem:[#allocation9 + $0x100] sm:$0xff] }
 0xa99   : > { %v6042_v31 = vpop.f32.mrf.mxu1  ;;  %6573 = vmatpush.msrb.mxu3 %v6534_v24 }
 0xa9a   : > { %v6064_v18 = vadd.f32 %v6042_v31, %v5980_v1  ;;  %v5732_v41 = vadd.f32 %v12324_v16, %v5648_v32  ;;  %v5983_v43 = vadd.f32 %v5967_v33, %v5899_v2  ;;  %v5733_v3 = vadd.f32 %v12331_v0, %v5649_v8 }
 0xa9b   : > { %6574 = vmatpush.msrb.mxu3 %v6533_v26 }
 0xa9c   : > { %v6077_v9 = vadd.f32 %v12347_v51, %v6064_v18  ;;  %v5886_v18 = vpop.f32.mrf.mxu3 }
 0xa9e   : > { %v6085_v56 = vmax.f32 %v6077_v9, 0.0  ;;  %v5816_v9 = vadd.f32 %v5802_v40, %v5732_v41  ;;  %v5808_v33 = vpop.f32.mrf.mxu2 }
 0xa9f   : > { %v12361_v4 = vld [vmem:[#allocation3 + $0x11] sm:$0xff] }
 0xaa0   : > { %v6121_v38 = vld [vmem:[#allocation3 + $0x10] sm:$0xff]  ;;  %6113 = vst.msk [vmem:[#allocation3 + $0x21] sm:$0xff] %vm553_vm2, %v6085_v56  ;;  %7265 = vmatmul.msk.f32.gmra.mxu2 %vm553_vm2, %v12361_v4  ;;  %v5970_v56 = vpop.f32.mrf.mxu0  ;;  %v5900_v52 = vadd.f32 %v5886_v18, %v5816_v9 }
 0xaa1   : > { %v12363_v11 = vld [vmem:[#allocation3 + $0x12] sm:$0xff]  ;;  %7273 = vmatmul.msk.f32.gmra.mxu3 %vm553_vm2, %v6121_v38  ;;  %7288 = vmatmul.msk.f32.vlgmr.msra.gmra.mxu1 %vm553_vm2, %v6121_v38  ;;  %v6045_v30 = vpop.f32.mrf.mxu1  ;;  %v5481_v38 = vadd.f32 %v12316_v57, %v12287_v19 }
 0xaa2   : > { %7281 = vmatmul.msk.f32.gmra.mxu0 %vm553_vm2, %v12363_v11  ;;  %v6065_v23 = vadd.f32 %v6045_v30, %v5981_v14  ;;  %v5984_v22 = vadd.f32 %v5970_v56, %v5900_v52  ;;  %v6786_v57 = vld [vmem:[#allocation9 + $0x118] sm:$0xff] }
 0xaa3   : > { %v5566_v61 = vadd.f32 %v12320_v46, %v5481_v38  ;;  %v6702_v46 = vld [vmem:[#allocation9 + $0x108] sm:$0xff]  ;;  %6825 = vmatpush.msrb.mxu2 %v6786_v57  ;;  %v6783_v57 = vld [vmem:[#allocation3 + $0x92] sm:$0xff] }
 0xaa4   : > { %v6078_v34 = vadd.f32 %v12347_v51, %v6065_v23  ;;  %v5889_v0 = vpop.f32.mrf.mxu3  ;;  %6741 = vmatpush.msrb.mxu1 %v6702_v46 }
 0xaa6   : > { %v6086_v54 = vmax.f32 %v6078_v34, 0.0  ;;  %v5817_v34 = vadd.f32 %v5805_v49, %v5733_v3  ;;  %6742 = vmatpush.msrb.mxu1 %v6701_v44 }
 0xaa7   : > { %v12378_v45 = vld [vmem:[#allocation3 + $0x21] sm:$0xff] }
 0xaa8   : > { %v12380_v27 = vld [vmem:[#allocation3 + $0x20] sm:$0xff]  ;;  %6114 = vst.msk [vmem:[#allocation3 + $0x31] sm:$0xff] %vm553_vm2, %v6086_v54  ;;  %7266 = vmatmul.msk.f32.gmra.mxu2 %vm553_vm2, %v12378_v45  ;;  %v5650_v54 = vadd.f32 %v12322_v7, %v5566_v61  ;;  %v5901_v39 = vadd.f32 %v5889_v0, %v5817_v34  ;;  %v5973_v35 = vpop.f32.mrf.mxu0 }
 0xaa9   : > { %v12382_v48 = vld [vmem:[#allocation3 + $0x22] sm:$0xff]  ;;  %7274 = vmatmul.msk.f32.gmra.mxu3 %vm553_vm2, %v12380_v27  ;;  %7289 = vmatmul.msk.f32.gmra.mxu1 %vm553_vm2, %v12380_v27  ;;  %v6048_v50 = vpop.f32.mrf.mxu1 }
 0xaaa   : > { %7282 = vmatmul.msk.f32.gmra.mxu0 %vm553_vm2, %v12382_v48  ;;  %v6066_v37 = vadd.f32 %v6048_v50, %v5982_v53  ;;  %v5734_v40 = vadd.f32 %v12338_v20, %v5650_v54  ;;  %v5985_v2 = vadd.f32 %v5973_v35, %v5901_v39 }
 0xaac   : > { %v6079_v1 = vadd.f32 %v12347_v51, %v6066_v37  ;;  %v5892_v7 = vpop.f32.mrf.mxu3 }
 0xaae   : > { %v6087_v31 = vmax.f32 %v6079_v1, 0.0  ;;  %v5818_v1 = vadd.f32 %v5808_v33, %v5734_v40 }
 0xaaf   : > { %v12400_v29 = vld [vmem:[#allocation3 + $0x31] sm:$0xff] }
 0xab0   : > { %v12402_v62 = vld [vmem:[#allocation3 + $0x30] sm:$0xff]  ;;  %6115 = vst.msk [vmem:[#allocation3 + $0x41] sm:$0xff] %vm553_vm2, %v6087_v31  ;;  %7267 = vmatmul.msk.f32.gmra.mxu2 %vm553_vm2, %v12400_v29  ;;  %v5902_v31 = vadd.f32 %v5892_v7, %v5818_v1  ;;  %v5976_v18 = vpop.f32.mrf.mxu0 }
 0xab1   : > { %v12404_v55 = vld [vmem:[#allocation3 + $0x32] sm:$0xff]  ;;  %7275 = vmatmul.msk.f32.gmra.mxu3 %vm553_vm2, %v12402_v62  ;;  %7290 = vmatmul.msk.f32.gmra.mxu1 %vm553_vm2, %v12402_v62  ;;  %v6051_v59 = vpop.f32.mrf.mxu1 }
 0xab2   : > { %7283 = vmatmul.msk.f32.gmra.mxu0 %vm553_vm2, %v12404_v55  ;;  %v6067_v16 = vadd.f32 %v6051_v59, %v5983_v43  ;;  %v5986_v25 = vadd.f32 %v5976_v18, %v5902_v31 }
 0xab4   : > { %v6080_v14 = vadd.f32 %v12347_v51, %v6067_v16 }
 0xab6   : > { %v6088_v30 = vmax.f32 %v6080_v14, 0.0 }
 0xab7   : > { %v12420_v23 = vld [vmem:[#allocation3 + $0x41] sm:$0xff] }
 0xab8   : > { %v12422_v17 = vld [vmem:[#allocation3 + $0x40] sm:$0xff]  ;;  %6116 = vst.msk [vmem:[#allocation3 + $0x51] sm:$0xff] %vm553_vm2, %v6088_v30  ;;  %7268 = vmatmul.msk.f32.gmra.mxu2 %vm553_vm2, %v12420_v23 }
 0xab9   : > { %v12424_v15 = vld [vmem:[#allocation3 + $0x42] sm:$0xff]  ;;  %7276 = vmatmul.msk.f32.gmra.mxu3 %vm553_vm2, %v12422_v17  ;;  %7291 = vmatmul.msk.f32.gmra.mxu1 %vm553_vm2, %v12422_v17  ;;  %v6054_v19 = vpop.f32.mrf.mxu1 }
 0xaba   : > { %7284 = vmatmul.msk.f32.gmra.mxu0 %vm553_vm2, %v12424_v15  ;;  %v6068_v36 = vadd.f32 %v6054_v19, %v5984_v22 }
 0xabc   : > { %v6081_v53 = vadd.f32 %v12347_v51, %v6068_v36 }
 0xabe   : > { %v6089_v50 = vmax.f32 %v6081_v53, 0.0 }
 0xabf   : > { %v6136_v37 = vld [vmem:[#allocation3 + $0x51] sm:$0xff] }
 0xac0   : > { %v6125_v58 = vld [vmem:[#allocation3 + $0x50] sm:$0xff]  ;;  %6117 = vst.msk [vmem:[#allocation3 + $0x61] sm:$0xff] %vm553_vm2, %v6089_v50  ;;  %7269 = vmatmul.msk.f32.gmra.mxu2 %vm553_vm2, %v6136_v37 }
 0xac1   : > { %v12439_v32 = vld [vmem:[#allocation3 + $0x52] sm:$0xff]  ;;  %7277 = vmatmul.msk.f32.gmra.mxu3 %vm553_vm2, %v6125_v58  ;;  %7292 = vmatmul.msk.f32.gmra.mxu1 %vm553_vm2, %v6125_v58  ;;  %v6057_v20 = vpop.f32.mrf.mxu1 }
 0xac2   : > { %7285 = vmatmul.msk.f32.gmra.mxu0 %vm553_vm2, %v12439_v32  ;;  %v6069_v41 = vadd.f32 %v6057_v20, %v5985_v2 }
 0xac3   : > { %v6248_v30 = vpop.f32.mrf.mxu3 }
 0xac4   : > { %v6082_v6 = vadd.f32 %v12347_v51, %v6069_v41 }
 0xac6   : > { %v6090_v43 = vmax.f32 %v6082_v6, 0.0 }
 0xac7   : > { %v6137_v9 = vld [vmem:[#allocation3 + $0x61] sm:$0xff] }
 0xac8   : > { %v6126_v59 = vld [vmem:[#allocation3 + $0x60] sm:$0xff]  ;;  %6118 = vst.msk [vmem:[#allocation3 + $0x71] sm:$0xff] %vm553_vm2, %v6090_v43  ;;  %7270 = vmatmul.msk.f32.gmra.mxu2 %vm553_vm2, %v6137_v9 }
 0xac9   : > { %v12448_v24 = vld [vmem:[#allocation3 + $0x62] sm:$0xff]  ;;  %7278 = vmatmul.msk.f32.gmra.mxu3 %vm553_vm2, %v6126_v59  ;;  %7293 = vmatmul.msk.f32.gmra.mxu1 %vm553_vm2, %v6126_v59  ;;  %v6060_v26 = vpop.f32.mrf.mxu1 }
 0xaca   : > { %7286 = vmatmul.msk.f32.gmra.mxu0 %vm553_vm2, %v12448_v24  ;;  %v6070_v16 = vadd.f32 %v6060_v26, %v5986_v25 }
 0xacc   : > { %v6083_v5 = vadd.f32 %v12347_v51, %v6070_v16  ;;  %v6785_v51 = vld [vmem:[#allocation9 + $0x110] sm:$0xff] }
 0xacd   : > { %6826 = vmatpush.msrb.mxu2 %v6785_v51 }
 0xace   : > { %v6091_v8 = vmax.f32 %v6083_v5, 0.0 }
 0xacf   : > { %v6138_v56 = vld [vmem:[#allocation3 + $0x71] sm:$0xff] }
 0xad0   : > { %v6127_v49 = vld [vmem:[#allocation3 + $0x70] sm:$0xff]  ;;  %6119 = vst.msk [vmem:[#allocation3 + $0x81] sm:$0xff] %vm553_vm2, %v6091_v8  ;;  %7271 = vmatmul.msk.f32.gmra.mxu2 %vm553_vm2, %v6138_v56 }
 0xad1   : > { %v6279_v38 = vld [vmem:[#allocation3 + $0x72] sm:$0xff]  ;;  %7279 = vmatmul.msk.f32.gmra.mxu3 %vm553_vm2, %v6127_v49  ;;  %7294 = vmatmul.msk.f32.gmra.mxu1 %vm553_vm2, %v6127_v49 }
 0xad2   : > { %7287 = vmatmul.msk.f32.gmra.mxu0 %vm553_vm2, %v6279_v38 }
 0xad7   : > { %v6363_v52 = vld [vmem:[#allocation3 + $0x80] sm:$0xff] }
 0xad8   : > { %7296 = vmatmul.msk.f32.vlgmr.msra.gmra.mxu2 %vm553_vm2, %v12361_v4  ;;  %v6615_v4 = vld [vmem:[#allocation3 + $0x90] sm:$0xff] }
 0xad9   : > { %7304 = vmatmul.msk.f32.vlgmr.msrb.gmra.mxu3 %vm553_vm2, %v12363_v11  ;;  %7295 = vmatmul.msk.f32.gmra.mxu1 %vm553_vm2, %v6363_v52  ;;  %v6447_v11 = vld [vmem:[#allocation3 + $0x81] sm:$0xff] }
 0xada   : > { %7312 = vmatmul.msk.f32.vlgmr.msra.gmra.mxu0 %vm553_vm2, %v12380_v27  ;;  %v6699_v27 = vld [vmem:[#allocation3 + $0x91] sm:$0xff] }
 0xae0   : > { %7297 = vmatmul.msk.f32.gmra.mxu2 %vm553_vm2, %v12378_v45 }
 0xae1   : > { %7305 = vmatmul.msk.f32.gmra.mxu3 %vm553_vm2, %v12382_v48  ;;  %7320 = vmatmul.msk.f32.vlgmr.msrb.gmra.mxu1 %vm553_vm2, %v12378_v45  ;;  %v6531_v45 = vld [vmem:[#allocation3 + $0x82] sm:$0xff] }
 0xae2   : > { %7313 = vmatmul.msk.f32.gmra.mxu0 %vm553_vm2, %v12402_v62 }
 0xae8   : > { %7298 = vmatmul.msk.f32.gmra.mxu2 %vm553_vm2, %v12400_v29 }
 0xae9   : > { %7306 = vmatmul.msk.f32.gmra.mxu3 %vm553_vm2, %v12404_v55  ;;  %7321 = vmatmul.msk.f32.gmra.mxu1 %vm553_vm2, %v12400_v29  ;;  %v6183_v29 = vpop.f32.mrf.mxu2 }
 0xaea   : > { %7314 = vmatmul.msk.f32.gmra.mxu0 %vm553_vm2, %v12422_v17 }
 0xaf0   : > { %7299 = vmatmul.msk.f32.gmra.mxu2 %vm553_vm2, %v12420_v23 }
 0xaf1   : > { %7307 = vmatmul.msk.f32.gmra.mxu3 %vm553_vm2, %v12424_v15  ;;  %7322 = vmatmul.msk.f32.gmra.mxu1 %vm553_vm2, %v12420_v23  ;;  %v6324_v23 = vpop.f32.mrf.mxu0 }
 0xaf2   : > { %7315 = vmatmul.msk.f32.gmra.mxu0 %vm553_vm2, %v6125_v58 }
 0xaf8   : > { %7300 = vmatmul.msk.f32.gmra.mxu2 %vm553_vm2, %v6136_v37 }
 0xaf9   : > { %7308 = vmatmul.msk.f32.gmra.mxu3 %vm553_vm2, %v12439_v32  ;;  %7323 = vmatmul.msk.f32.gmra.mxu1 %vm553_vm2, %v6136_v37 }
 0xafa   : > { %7316 = vmatmul.msk.f32.gmra.mxu0 %vm553_vm2, %v6126_v59 }
 0xb00   : > { %7301 = vmatmul.msk.f32.gmra.mxu2 %vm553_vm2, %v6137_v9 }
 0xb01   : > { %7309 = vmatmul.msk.f32.gmra.mxu3 %vm553_vm2, %v12448_v24  ;;  %7324 = vmatmul.msk.f32.gmra.mxu1 %vm553_vm2, %v6137_v9 }
 0xb02   : > { %7317 = vmatmul.msk.f32.gmra.mxu0 %vm553_vm2, %v6127_v49 }
 0xb08   : > { %7302 = vmatmul.msk.f32.gmra.mxu2 %vm553_vm2, %v6138_v56 }
 0xb09   : > { %7310 = vmatmul.msk.f32.gmra.mxu3 %vm553_vm2, %v6279_v38  ;;  %7325 = vmatmul.msk.f32.gmra.mxu1 %vm553_vm2, %v6138_v56 }
 0xb0a   : > { %7318 = vmatmul.msk.f32.gmra.mxu0 %vm553_vm2, %v6363_v52 }
 0xb10   : > { %7303 = vmatmul.msk.f32.gmra.mxu2 %vm553_vm2, %v6447_v11 }
 0xb11   : > { %7311 = vmatmul.msk.f32.gmra.mxu3 %vm553_vm2, %v6531_v45  ;;  %7326 = vmatmul.msk.f32.gmra.mxu1 %vm553_vm2, %v6447_v11 }
 0xb12   : > { %7319 = vmatmul.msk.f32.gmra.mxu0 %vm553_vm2, %v6615_v4 }
 0xb18   : > { %7328 = vmatmul.msk.f32.vlgmr.msrb.gmra.mxu2 %vm553_vm2, %v12382_v48 }
 0xb19   : > { %7327 = vmatmul.msk.f32.gmra.mxu1 %vm553_vm2, %v6699_v27 }
 0xb1e   : > { %v6408_v48 = vpop.f32.mrf.mxu1 }
 0xb20   : > { %7329 = vmatmul.msk.f32.gmra.mxu2 %vm553_vm2, %v12404_v55  ;;  %v6327_v55 = vpop.f32.mrf.mxu0 }
 0xb23   : > { %v6186_v62 = vpop.f32.mrf.mxu2 }
 0xb24   : > { %v6251_v61 = vpop.f32.mrf.mxu3 }
 0xb25   : > { %v6252_v56 = vadd.f32 %v6251_v61, %v6186_v62  ;;  %v12573_v62 = vld [vmem:[%s12664_s9 + $0x1] ss:$0 sm:$0xff] }
 0xb27   : > { %v6349_v52 = vadd.f32 %v6327_v55, %v6252_v56 }
 0xb28   : > { %7330 = vmatmul.msk.f32.gmra.mxu2 %vm553_vm2, %v12424_v15  ;;  %v6411_v15 = vpop.f32.mrf.mxu1  ;;  %v6330_v0 = vpop.f32.mrf.mxu0 }
 0xb2b   : > { %v6189_v14 = vpop.f32.mrf.mxu2 }
 0xb2c   : > { %v6254_v34 = vpop.f32.mrf.mxu3 }
 0xb2d   : > { %v6255_v27 = vadd.f32 %v6254_v34, %v6189_v14 }
 0xb30   : > { %7331 = vmatmul.msk.f32.gmra.mxu2 %vm553_vm2, %v12439_v32  ;;  %v6414_v46 = vpop.f32.mrf.mxu1  ;;  %v6333_v54 = vpop.f32.mrf.mxu0 }
 0xb33   : > { %v12519_v3 = vpop.f32.mrf.mxu2 }
 0xb34   : > { %v6257_v44 = vpop.f32.mrf.mxu3 }
 0xb38   : > { %7332 = vmatmul.msk.f32.gmra.mxu2 %vm553_vm2, %v12448_v24  ;;  %v12534_v39 = vpop.f32.mrf.mxu1  ;;  %v12538_v33 = vpop.f32.mrf.mxu0  ;;  %v6249_v24 = vadd.f32 %v6248_v30, %v6183_v29 }
 0xb3a   : > { %v6348_v26 = vadd.f32 %v6324_v23, %v6249_v24  ;;  %v6350_v24 = vadd.f32 %v6330_v0, %v6255_v27 }
 0xb3b   : > { %v12523_v17 = vpop.f32.mrf.mxu2 }
 0xb3c   : > { %v12536_v53 = vpop.f32.mrf.mxu3  ;;  %v6432_v8 = vadd.f32 %v6408_v48, %v6348_v26  ;;  %v6434_v55 = vadd.f32 %v6414_v46, %v6350_v24 }
 0xb40   : > { %7333 = vmatmul.msk.f32.gmra.mxu2 %vm553_vm2, %v6279_v38  ;;  %v12540_v40 = vpop.f32.mrf.mxu1  ;;  %v12544_v58 = vpop.f32.mrf.mxu0 }
 0xb43   : > { %v12526_v22 = vpop.f32.mrf.mxu2 }
 0xb44   : > { %v12542_v37 = vpop.f32.mrf.mxu3 }
 0xb48   : > { %7334 = vmatmul.msk.f32.gmra.mxu2 %vm553_vm2, %v6531_v45  ;;  %v12546_v2 = vpop.f32.mrf.mxu1  ;;  %v12550_v7 = vpop.f32.mrf.mxu0  ;;  %v6433_v45 = vadd.f32 %v6411_v15, %v6349_v52  ;;  %v6258_v15 = vadd.f32 %v6257_v44, %v12519_v3  ;;  %v13161_v52 = vmax.f32 %v11996_v21, 0.0 }
 0xb4b   : > { %v12529_v19 = vpop.f32.mrf.mxu2 }
 0xb4c   : > { %v12548_v1 = vpop.f32.mrf.mxu3 }
 0xb50   : > { %7335 = vmatmul.msk.f32.gmra.mxu2 %vm553_vm2, %v6783_v57  ;;  %v12552_v41 = vpop.f32.mrf.mxu1  ;;  %v12558_v18 = vpop.f32.mrf.mxu0 }
 0xb53   : > { %v12532_v36 = vpop.f32.mrf.mxu2 }
 0xb54   : > { %v12554_v31 = vpop.f32.mrf.mxu3 }
 0xb58   : > { %v12560_v43 = vpop.f32.mrf.mxu1  ;;  %v6660_v25 = vpop.f32.mrf.mxu0 }
 0xb5b   : > { %v6492_v35 = vpop.f32.mrf.mxu2 }
 0xb5c   : > { %v6576_v9 = vpop.f32.mrf.mxu3  ;;  %v6516_v38 = vadd.f32 %v6492_v35, %v6432_v8 }
 0xb5e   : > { %v6600_v4 = vadd.f32 %v6576_v9, %v6516_v38  ;;  %v6351_v9 = vadd.f32 %v6333_v54, %v6258_v15 }
 0xb60   : > { %v6744_v16 = vpop.f32.mrf.mxu1  ;;  %v6663_v51 = vpop.f32.mrf.mxu0  ;;  %v6684_v29 = vadd.f32 %v6660_v25, %v6600_v4  ;;  %v13160_v25 = vmax.f32 %v11983_v63, 0.0  ;;  %v6435_v44 = vadd.f32 %v12534_v39, %v6351_v9  ;;  %v13163_v9 = vmax.f32 %v12054_v60, 0.0 }
 0xb62   : > { %v6768_v10 = vadd.f32 %v6744_v16, %v6684_v29  ;;  %v6264_v29 = vadd.f32 %v12542_v37, %v12526_v22 }
 0xb63   : > { %v6495_v50 = vpop.f32.mrf.mxu2 }
 0xb64   : > { %v6579_v49 = vpop.f32.mrf.mxu3  ;;  %v6517_v30 = vadd.f32 %v6495_v50, %v6433_v45  ;;  %v6353_v24 = vadd.f32 %v12544_v58, %v6264_v29 }
 0xb66   : > { %v6601_v13 = vadd.f32 %v6579_v49, %v6517_v30  ;;  %v6437_v37 = vadd.f32 %v12546_v2, %v6353_v24 }
 0xb68   : > { %v6747_v57 = vpop.f32.mrf.mxu1  ;;  %v6666_v48 = vpop.f32.mrf.mxu0  ;;  %v6685_v34 = vadd.f32 %v6663_v51, %v6601_v13 }
 0xb6a   : > { %v6769_v46 = vadd.f32 %v6747_v57, %v6685_v34  ;;  %v6267_v34 = vadd.f32 %v12548_v1, %v12529_v19 }
 0xb6b   : > { %v6498_v32 = vpop.f32.mrf.mxu2 }
 0xb6c   : > { %v6582_v23 = vpop.f32.mrf.mxu3  ;;  %v6518_v35 = vadd.f32 %v6498_v32, %v6434_v55  ;;  %v6261_v32 = vadd.f32 %v12536_v53, %v12523_v17 }
 0xb6e   : > { %v6602_v3 = vadd.f32 %v6582_v23, %v6518_v35  ;;  %v6352_v38 = vadd.f32 %v12538_v33, %v6261_v32 }
 0xb70   : > { %v6750_v0 = vpop.f32.mrf.mxu1  ;;  %v6669_v54 = vpop.f32.mrf.mxu0  ;;  %v6686_v8 = vadd.f32 %v6666_v48, %v6602_v3  ;;  %v6436_v53 = vadd.f32 %v12540_v40, %v6352_v38  ;;  %v13162_v48 = vmax.f32 %v12023_v47, 0.0  ;;  %v6270_v3 = vadd.f32 %v12554_v31, %v12532_v36 }
 0xb72   : > { %v6770_v45 = vadd.f32 %v6750_v0, %v6686_v8  ;;  %v6354_v0 = vadd.f32 %v12550_v7, %v6267_v34  ;;  %v6355_v32 = vadd.f32 %v12558_v18, %v6270_v3 }
 0xb73   : > { %v6501_v20 = vpop.f32.mrf.mxu2 }
 0xb74   : > { %v6585_v16 = vpop.f32.mrf.mxu3  ;;  %v6519_v56 = vadd.f32 %v6501_v20, %v6435_v44  ;;  %v6438_v1 = vadd.f32 %v12552_v41, %v6354_v0 }
 0xb76   : > { %v6603_v39 = vadd.f32 %v6585_v16, %v6519_v56 }
 0xb78   : > { %v6753_v4 = vpop.f32.mrf.mxu1  ;;  %v6687_v30 = vadd.f32 %v6669_v54, %v6603_v39  ;;  %v6672_v23 = vpop.f32.mrf.mxu0 }
 0xb7a   : > { %v6771_v55 = vadd.f32 %v6753_v4, %v6687_v30  ;;  %v13166_v30 = vmax.f32 %v12143_v42, 0.0 }
 0xb7b   : > { %v12556_v6 = vpop.f32.mrf.mxu2 }
 0xb7c   : > { %v6588_v57 = vpop.f32.mrf.mxu3  ;;  %v6520_v33 = vadd.f32 %v12556_v6, %v6436_v53 }
 0xb7e   : > { %v6604_v40 = vadd.f32 %v6588_v57, %v6520_v33 }
 0xb83   : > { %v12562_v59 = vpop.f32.mrf.mxu2 }
 0xb84   : > { %v6591_v35 = vpop.f32.mrf.mxu3  ;;  %v6521_v58 = vadd.f32 %v12562_v59, %v6437_v37 }
 0xb86   : > { %v6605_v16 = vadd.f32 %v6591_v35, %v6521_v58 }
 0xb8b   : > { %v12564_v5 = vpop.f32.mrf.mxu2 }
 0xb8c   : > { %v6522_v7 = vadd.f32 %v12564_v5, %v6438_v1  ;;  %v6594_v44 = vpop.f32.mrf.mxu3 }
 0xb8e   : > { %v6606_v8 = vadd.f32 %v6594_v44, %v6522_v7 }
 0xb93   : > { %v12566_v11 = vpop.f32.mrf.mxu2 }
 0xb9b   : > { %v6828_v61 = vpop.f32.mrf.mxu2 }
 0xb9c   : > { %v6852_v14 = vadd.f32 %v6828_v61, %v6768_v10 }
 0xb9e   : > { %v6865_v50 = vadd.f32 %v12573_v62, %v6852_v14  ;;  %v6756_v14 = vpop.f32.mrf.mxu1 }
 0xba0   : > { %v6873_v26 = vadd.f32 %v6865_v50, %v13160_v25  ;;  %v6688_v50 = vadd.f32 %v6672_v23, %v6604_v40 }
 0xba2   : > { %v6881_v10 = vmax.f32 %v6873_v26, 0.0  ;;  %v6675_v26 = vpop.f32.mrf.mxu0  ;;  %v6772_v2 = vadd.f32 %v6756_v14, %v6688_v50 }
 0xba3   : > { %v6831_v13 = vpop.f32.mrf.mxu2 }
 0xba4   : > { %6889 = vst.msk [vmem:[%s12582_s6] sm:$0xff] %vm553_vm2, %v6881_v10  ;;  %v6853_v63 = vadd.f32 %v6831_v13, %v6769_v46  ;;  %v6689_v13 = vadd.f32 %v6675_v26, %v6605_v16 }
 0xba6   : > { %v6866_v49 = vadd.f32 %v12573_v62, %v6853_v63  ;;  %v6759_v10 = vpop.f32.mrf.mxu1  ;;  %v13164_v63 = vmax.f32 %v12085_v28, 0.0  ;;  %v13165_v28 = vmax.f32 %v12116_v12, 0.0 }
 0xba7   : > { %v6773_v41 = vadd.f32 %v6759_v10, %v6689_v13 }
 0xba8   : > { %v6874_v51 = vadd.f32 %v6866_v49, %v13161_v52  ;;  %v6439_v49 = vadd.f32 %v12560_v43, %v6355_v32 }
 0xbaa   : > { %v6882_v27 = vmax.f32 %v6874_v51, 0.0  ;;  %v6678_v36 = vpop.f32.mrf.mxu0  ;;  %v6523_v52 = vadd.f32 %v12566_v11, %v6439_v49 }
 0xbab   : > { %v6834_v17 = vpop.f32.mrf.mxu2  ;;  %v6690_v5 = vadd.f32 %v6678_v36, %v6606_v8 }
 0xbac   : > { %6890 = vst.msk [vmem:[%s12582_s6 + $0x8] sm:$0xff] %vm553_vm2, %v6882_v27  ;;  %v6854_v20 = vadd.f32 %v6834_v17, %v6770_v45  ;;  %v6597_v45 = vpop.f32.mrf.mxu3 }
 0xbad   : > { %v6607_v27 = vadd.f32 %v6597_v45, %v6523_v52 }
 0xbae   : > { %v6867_v21 = vadd.f32 %v12573_v62, %v6854_v20  ;;  %v6762_v18 = vpop.f32.mrf.mxu1 }
 0xbaf   : > { %v6774_v39 = vadd.f32 %v6762_v18, %v6690_v5 }
 0xbb0   : > { %v6875_v61 = vadd.f32 %v6867_v21, %v13162_v48 }
 0xbb2   : > { %v6883_v15 = vmax.f32 %v6875_v61, 0.0  ;;  %v6681_v17 = vpop.f32.mrf.mxu0  ;;  %v13167_v61 = vld [vmem:[#allocation59_spill] sm:$0xff] }
 0xbb3   : > { %v6837_v22 = vpop.f32.mrf.mxu2  ;;  %v6691_v29 = vadd.f32 %v6681_v17, %v6607_v27 }
 0xbb4   : > { %6891 = vst.msk [vmem:[%s12582_s6 + $0x10] sm:$0xff] %vm553_vm2, %v6883_v15  ;;  %v6855_v6 = vadd.f32 %v6837_v22, %v6771_v55  ;;  %v13168_v55 = vmax.f32 %v13167_v61, 0.0 }
 0xbb6   : > { %v6868_v47 = vadd.f32 %v12573_v62, %v6855_v6  ;;  %v6765_v20 = vpop.f32.mrf.mxu1 }
 0xbb7   : > { %v6775_v12 = vadd.f32 %v6765_v20, %v6691_v29 }
 0xbb8   : > { %v6876_v25 = vadd.f32 %v6868_v47, %v13163_v9 }
 0xbba   : > { %v6884_v46 = vmax.f32 %v6876_v25, 0.0 }
 0xbbb   : > { %v6840_v19 = vpop.f32.mrf.mxu2 }
 0xbbc   : > { %6892 = vst.msk [vmem:[%s12582_s6 + $0x18] sm:$0xff] %vm553_vm2, %v6884_v46  ;;  %v6856_v59 = vadd.f32 %v6840_v19, %v6772_v2 }
 0xbbe   : > { %v6869_v60 = vadd.f32 %v12573_v62, %v6856_v59 }
 0xbc0   : > { %v6877_v54 = vadd.f32 %v6869_v60, %v13164_v63 }
 0xbc2   : > { %v6885_v56 = vmax.f32 %v6877_v54, 0.0 }
 0xbc3   : > { %v6843_v31 = vpop.f32.mrf.mxu2 }
 0xbc4   : > { %6893 = vst.msk [vmem:[%s12582_s6 + $0x20] sm:$0xff] %vm553_vm2, %v6885_v56  ;;  %v6857_v38 = vadd.f32 %v6843_v31, %v6773_v41 }
 0xbc6   : > { %v6870_v51 = vadd.f32 %v12573_v62, %v6857_v38 }
 0xbc8   : > { %v6878_v4 = vadd.f32 %v6870_v51, %v13165_v28 }
 0xbca   : > { %v6886_v57 = vmax.f32 %v6878_v4, 0.0 }
 0xbcb   : > { %v6846_v43 = vpop.f32.mrf.mxu2 }
 0xbcc   : > { %6894 = vst.msk [vmem:[%s12582_s6 + $0x28] sm:$0xff] %vm553_vm2, %v6886_v57  ;;  %v6858_v53 = vadd.f32 %v6846_v43, %v6774_v39 }
 0xbce   : > { %v6871_v11 = vadd.f32 %v12573_v62, %v6858_v53 }
 0xbd0   : > { %v6879_v33 = vadd.f32 %v6871_v11, %v13166_v30 }
 0xbd2   : > { %v6887_v21 = vmax.f32 %v6879_v33, 0.0 }
 0xbd3   : > { %v6849_v23 = vpop.f32.mrf.mxu2 }
 0xbd4   : > { %6895 = vst.msk [vmem:[%s12582_s6 + $0x30] sm:$0xff] %vm553_vm2, %v6887_v21  ;;  %v6859_v24 = vadd.f32 %v6849_v23, %v6775_v12 }
 0xbd6   : > { %v6872_v48 = vadd.f32 %v12573_v62, %v6859_v24 }
 0xbd8   : > { %v6880_v40 = vadd.f32 %v6872_v48, %v13168_v55 }
 0xbda   : > { %v6888_v15 = vmax.f32 %v6880_v40, 0.0 }
 0xbdc   : > { %6896 = vst.msk [vmem:[%s12582_s6 + $0x38] sm:$0xff] %vm553_vm2, %v6888_v15 }
 0xbdd PF: > { %s13169_s17 = sld [smem:[#allocation15_spill]]  ;;  %p24_p4 = scmp.ge.s32.totalorder %s7903_s12, 4  }
 0xbde   : > { %s13170_s15 = sld [smem:[#allocation16_spill]]  ;;  %s13171_s13 = smov %s7777_s14 }
 0xbdf   : > { %s13173_s16 = smov %s7903_s12  ;;  %26 = sbr.rel (!%p24_p4) target bundleno = 10 (0xa), region = 165 }
 0xbe3   : > { %s13172_s14 = smov %s13169_s17 }
 0xbe4   :  { %6918 = vsyncpa [#allocation5], 1 }
 0xbe5   :  { %6920 = vsyncpa [#allocation5 + $0x1], 1 }
 0xbe6   :  { %6921 = vsyncpa [#allocation7], 1 }
 0xbe7   :  { %6923 = vsyncpa [#allocation7 + $0x1], 1 }
 0xbe8   :  { %6924 = vsyncpa [#allocation10], 1 }

</bundles_post_ra>
